<compile_context>
chip_gen: v7x
topology: tpu7x:2x2x1
jax: 0.10.0
libtpu: 0.0.40
codegen_flags: <defaults>
</compile_context>

<pallas_src>
import jax
import jax.numpy as jnp
from jax import lax
from jax.experimental import pallas as pl
from jax.experimental.pallas import tpu as pltpu

# ---------------- static geometry for the 50x50x1 input of Deep_model -----------------
H0, W0S = 50, 50                                  # conv1 input: 50 rows, stored width 50
C0, C1, C2, C3 = 1, 16, 32, 64
K1, K2, K3 = 3, 3, 5

X0_ROWS = 2504                                    # 50*50 flattened + 4 zero slack rows

H1, V1 = H0 - K1 + 1, W0S - K1 + 1                # 48, 48   conv1 valid output
H1P, W1PS, V1P = H1 // 2, W0S // 2, V1 // 2       # 24, 25, 24  after 2x2 pool

H2IN = H1P + 2                                    # 26  conv2 input height (padding=1)
W2S = V1P + 2                                     # 26  stored width of conv2 rows
X2_ROWS = 680                                     # 26*26=676 + slack (taps read <=678)
H2, V2 = H2IN - K2 + 1, W2S - K2 + 1              # 24, 24
H2P, W2PS, V2P = H2 // 2, W2S // 2, V2 // 2       # 12, 13, 12

W3S = W2PS + 1                                    # 14  (even stored width for pooling)
H3IN = H2P                                        # 12
X3_ROWS = 176                                     # 12*14=168 + slack (taps read <=172)
H3, V3 = H3IN - K3 + 1, V2P - K3 + 1              # 8, 8
H3P, W3PS, V3P = H3 // 2, W3S // 2, V3 // 2       # 4, 7, 4

# conv1 is evaluated in CH1-output-row chunks inside a fori_loop (keeps emitted code
# small); chunk bases stay 8-row aligned because 4*50 = 200 is a multiple of 8.
CH1 = 4
NCH1 = H1 // CH1                                  # 12
CH1_ROWS = CH1 * W0S                              # 200
CH1_IN = CH1_ROWS + (K1 - 1) * W0S + (K1 - 1) + 2  # 304 input rows per chunk


def deep_model_kernel(x_ref, w1_ref, b1_ref, w2_ref, b2_ref, w3_ref, b3_ref,
                      wo_ref, bo_ref, o_ref, s1, x2buf, s2, x3buf, s3):
    f32 = jnp.float32

    # Zero the padded activation buffers (conv2's zero border / slack rows must be 0).
    x2buf[...] = jnp.zeros_like(x2buf)
    x3buf[...] = jnp.zeros_like(x3buf)

    # ------------------ conv1: 1 -> 16, 3x3, pad 0  (VPU broadcast FMA) ----------------
    w1 = w1_ref[...]                               # (9, 16)   rows = dh*3 + dw
    b1 = b1_ref[...]                               # (1, 16)

    def conv1_chunk(c, carry):
        cb = pl.multiple_of(c * CH1_ROWS, 8)       # aligned chunk base row
        xc = x_ref[pl.ds(cb, CH1_IN), :]           # (304, 1)
        acc = jnp.zeros((CH1_ROWS, C1), f32)
        for dh in range(K1):
            for dw in range(K1):
                t = dh * K1 + dw
                xs = xc[dh * W0S + dw: dh * W0S + dw + CH1_ROWS, :]   # (200, 1)
                acc = acc + xs * w1[t:t + 1, :]                       # VPU bcast mult
        s1[pl.ds(cb, CH1_ROWS), :] = jnp.maximum(acc + b1, 0.0)
        return carry

    _ = lax.fori_loop(0, NCH1, conv1_chunk, 0)

    # ------------- 2x2 max-pool of conv1 -> zero-padded conv2 input buffer -------------
    h1 = jnp.maximum(s1[pl.ds(0, (H1 * W0S) // 2, stride=2), :],
                     s1[pl.ds(1, (H1 * W0S) // 2, stride=2), :])      # (1200, 16)
    for i in range(H1P):                           # 24 pooled rows
        blk = jnp.maximum(h1[(2 * i) * W1PS:(2 * i + 1) * W1PS, :],
                          h1[(2 * i + 1) * W1PS:(2 * i + 2) * W1PS, :])
        # drop the garbage column and place inside the +1 zero border (padding=1)
        x2buf[(i + 1) * W2S + 1:(i + 1) * W2S + 1 + V1P, :] = blk[0:V1P, :]

    # ------------------ conv2: 16 -> 32, 3x3, pad 1  (MXU) -----------------------------
    w2 = w2_ref[...]                               # (144, 32)
    acc2 = jnp.zeros((H2 * W2S, C2), f32)
    for dh in range(K2):
        for dw in range(K2):
            t = dh * K2 + dw
            xs = x2buf[dh * W2S + dw: dh * W2S + dw + H2 * W2S, :]    # (624, 16)
            acc2 = acc2 + jnp.dot(xs, w2[t * C1:(t + 1) * C1, :],
                                  preferred_element_type=f32)
    s2[...] = jnp.maximum(acc2 + b2_ref[...], 0.0)

    # ------------- 2x2 max-pool of conv2 -> conv3 input buffer (stored width 14) -------
    h2 = jnp.maximum(s2[pl.ds(0, (H2 * W2S) // 2, stride=2), :],
                     s2[pl.ds(1, (H2 * W2S) // 2, stride=2), :])      # (312, 32)
    for i in range(H2P):                           # 12 pooled rows
        blk = jnp.maximum(h2[(2 * i) * W2PS:(2 * i + 1) * W2PS, :],
                          h2[(2 * i + 1) * W2PS:(2 * i + 2) * W2PS, :])
        x3buf[i * W3S: i * W3S + W2PS, :] = blk    # (13, 32); column 13 stays zero

    # ------------------ conv3: 32 -> 64, 5x5, pad 0  (MXU) -----------------------------
    w3 = w3_ref[...]                               # (800, 64)
    acc3 = jnp.zeros((H3 * W3S, C3), f32)
    for dh in range(K3):
        for dw in range(K3):
            t = dh * K3 + dw
            xs = x3buf[dh * W3S + dw: dh * W3S + dw + H3 * W3S, :]    # (112, 32)
            acc3 = acc3 + jnp.dot(xs, w3[t * C2:(t + 1) * C2, :],
                                  preferred_element_type=f32)
    s3[...] = jnp.maximum(acc3 + b3_ref[...], 0.0)

    # --------- 2x2 max-pool of conv3 fused with Linear(1024->1) + sigmoid (VPU) --------
    h3 = jnp.maximum(s3[pl.ds(0, (H3 * W3S) // 2, stride=2), :],
                     s3[pl.ds(1, (H3 * W3S) // 2, stride=2), :])      # (56, 64)
    wo = wo_ref[...]                               # (16, 64)   rows = h*4 + w
    lin = jnp.zeros((V3P, C3), f32)
    for i in range(H3P):                           # 4 pooled rows
        blk = jnp.maximum(h3[(2 * i) * W3PS:(2 * i + 1) * W3PS, :],
                          h3[(2 * i + 1) * W3PS:(2 * i + 2) * W3PS, :])
        lin = lin + blk[0:V3P, :] * wo[i * V3P:(i + 1) * V3P, :]
    z = bo_ref[...] + jnp.sum(jnp.sum(lin, axis=1, keepdims=True),
                              axis=0, keepdims=True)                  # (1, 1)
    o_ref[...] = (1.0 / (1.0 + jnp.exp(-z))).reshape(1, 1, 1)


def deep_model_forward(x_nchw, params):
    """x_nchw: (N, 1, 50, 50) -> (N, 1), same semantics as the PyTorch module."""
    n = x_nchw.shape[0]
    # Flatten each 50x50 image row-major, append 4 zero slack rows, stack images along
    # the row axis so each grid step gets one (2504, 1) block.
    x = x_nchw.astype(jnp.float32).reshape(n, H0 * W0S, 1)
    x = jnp.pad(x, ((0, 0), (0, X0_ROWS - H0 * W0S), (0, 0)))
    x = x.reshape(n * X0_ROWS, 1)

    # Conv weights in (kh, kw, cin) x cout layout; the Linear weight is permuted from
    # PyTorch's (c, h, w) flatten order to this kernel's (h, w, c) order.
    w1m = jnp.transpose(params["w1"], (2, 3, 1, 0)).reshape(K1 * K1 * C0, C1)
    b1m = params["b1"].reshape(1, C1)
    w2m = jnp.transpose(params["w2"], (2, 3, 1, 0)).reshape(K2 * K2 * C1, C2)
    b2m = params["b2"].reshape(1, C2)
    w3m = jnp.transpose(params["w3"], (2, 3, 1, 0)).reshape(K3 * K3 * C2, C3)
    b3m = params["b3"].reshape(1, C3)
    wom = jnp.transpose(params["w_out"].reshape(C3, H3P, V3P),
                        (1, 2, 0)).reshape(H3P * V3P, C3)
    bom = params["b_out"].reshape(1, 1)

    out = pl.pallas_call(
        deep_model_kernel,
        grid=(n,),
        in_specs=[
            pl.BlockSpec((X0_ROWS, 1), lambda i: (i, 0)),   # one image per grid step
            pl.BlockSpec(w1m.shape, lambda i: (0, 0)),      # weights stay resident
            pl.BlockSpec(b1m.shape, lambda i: (0, 0)),
            pl.BlockSpec(w2m.shape, lambda i: (0, 0)),
            pl.BlockSpec(b2m.shape, lambda i: (0, 0)),
            pl.BlockSpec(w3m.shape, lambda i: (0, 0)),
            pl.BlockSpec(b3m.shape, lambda i: (0, 0)),
            pl.BlockSpec(wom.shape, lambda i: (0, 0)),
            pl.BlockSpec(bom.shape, lambda i: (0, 0)),
        ],
        out_specs=pl.BlockSpec((1, 1, 1), lambda i: (i, 0, 0)),
        out_shape=jax.ShapeDtypeStruct((n, 1, 1), jnp.float32),
        scratch_shapes=[
            pltpu.VMEM((H1 * W0S, C1), jnp.float32),   # s1: conv1 output      (2400, 16)
            pltpu.VMEM((X2_ROWS, C1), jnp.float32),    # x2buf: padded conv2 in (680, 16)
            pltpu.VMEM((H2 * W2S, C2), jnp.float32),   # s2: conv2 output       (624, 32)
            pltpu.VMEM((X3_ROWS, C2), jnp.float32),    # x3buf: conv3 input     (176, 32)
            pltpu.VMEM((H3 * W3S, C3), jnp.float32),   # s3: conv3 output       (112, 64)
        ],
        compiler_params=pltpu.CompilerParams(
            dimension_semantics=("parallel",),
            vmem_limit_bytes=32 * 1024 * 1024,
        ),
    )(x, w1m, b1m, w2m, b2m, w3m, b3m, wom, bom)
    return out.reshape(n, 1)


# ------------------------- pure-JAX reference (correctness) -------------------------- #

def deep_model_reference(x, params):
    dn = ("NCHW", "OIHW", "NCHW")
    hi = lax.Precision.HIGHEST

    def pool2(y):
        return lax.reduce_window(y, -jnp.inf, lax.max,
                                 (1, 1, 2, 2), (1, 1, 2, 2), "VALID")

    y = lax.conv_general_dilated(x, params["w1"], (1, 1), "VALID",
                                 dimension_numbers=dn, precision=hi)
    y = pool2(jnp.maximum(y + params["b1"].reshape(1, -1, 1, 1), 0.0))
    y = lax.conv_general_dilated(y, params["w2"], (1, 1), ((1, 1), (1, 1)),
                                 dimension_numbers=dn, precision=hi)
    y = pool2(jnp.maximum(y + params["b2"].reshape(1, -1, 1, 1), 0.0))
    y = lax.conv_general_dilated(y, params["w3"], (1, 1), "VALID",
                                 dimension_numbers=dn, precision=hi)
    y = pool2(jnp.maximum(y + params["b3"].reshape(1, -1, 1, 1), 0.0))
    y = y.reshape(y.shape[0], -1)                          # (N, 64*4*4), (c, h, w) order
    z = jnp.dot(y, params["w_out"].T, precision=hi) + params["b_out"]
    return jax.nn.sigmoid(z)


# --------------------------------- main ------------------------------------ #

if __name__ == "__main__":
    key = jax.random.PRNGKey(0)
    ks = jax.random.split(key, 9)
    params = {
        "w1": 0.30 * jax.random.normal(ks[0], (16, 1, 3, 3), jnp.float32),
        "b1": 0.05 * jax.random.normal(ks[1], (16,), jnp.float32),
        "w2": 0.08 * jax.random.normal(ks[2], (32, 16, 3, 3), jnp.float32),
        "b2": 0.05 * jax.random.normal(ks[3], (32,), jnp.float32),
        "w3": 0.03 * jax.random.normal(ks[4], (64, 32, 5, 5), jnp.float32),
        "b3": 0.05 * jax.random.normal(ks[5], (64,), jnp.float32),
        "w_out": 0.03 * jax.random.normal(ks[6], (1, 64 * 4 * 4), jnp.float32),
        "b_out": 0.05 * jax.random.normal(ks[7], (1,), jnp.float32),
    }
    # Linear layer hard-codes 64*4*4 features => spatial input must be 50x50, 1 channel.
    x = jax.random.normal(ks[8], (2, 1, 50, 50), jnp.float32)

    out = jax.jit(deep_model_forward)(x, params)
    out = jax.block_until_ready(out)
    assert out.shape == (2, 1)
    assert bool(jnp.all(jnp.isfinite(out))) and bool(jnp.all((out > 0) & (out < 1)))

    ref = jax.block_until_ready(jax.jit(deep_model_reference)(x, params))
    max_err = float(jnp.max(jnp.abs(out - ref)))
    assert max_err < 5e-3, f"mismatch vs reference: max_err={max_err}"

    print("KERNEL_OK")
</pallas_src>

<mosaic_0001>
module attributes {stable_mosaic.version = 11 : i64} {
  func.func @deep_model_kernel(%arg0: i32, %arg1: memref<2504x1xf32, #tpu.memory_space<vmem>>, %arg2: memref<9x16xf32, #tpu.memory_space<vmem>>, %arg3: memref<1x16xf32, #tpu.memory_space<vmem>>, %arg4: memref<144x32xf32, #tpu.memory_space<vmem>>, %arg5: memref<1x32xf32, #tpu.memory_space<vmem>>, %arg6: memref<800x64xf32, #tpu.memory_space<vmem>>, %arg7: memref<1x64xf32, #tpu.memory_space<vmem>>, %arg8: memref<16x64xf32, #tpu.memory_space<vmem>>, %arg9: memref<1x1xf32, #tpu.memory_space<vmem>>, %arg10: memref<1x1x1xf32, #tpu.memory_space<vmem>>, %arg11: memref<2400x16xf32, #tpu.memory_space<vmem>>, %arg12: memref<680x16xf32, #tpu.memory_space<vmem>>, %arg13: memref<624x32xf32, #tpu.memory_space<vmem>>, %arg14: memref<176x32xf32, #tpu.memory_space<vmem>>, %arg15: memref<112x64xf32, #tpu.memory_space<vmem>>) attributes {dimension_semantics = [#tpu.dimension_semantics<parallel>], iteration_bounds = array<i64: 2>, scalar_prefetch = 0 : i64, scratch_operands = 5 : i64, tpu.core_type = #tpu.core_type<tc>, window_params = [{transform_indices = @transform_0, window_bounds = array<i64: 2504, 1>}, {pipeline_mode = #tpu.pipeline_mode<synchronous>, transform_indices = @transform_1, window_bounds = array<i64: 9, 16>}, {pipeline_mode = #tpu.pipeline_mode<synchronous>, transform_indices = @transform_2, window_bounds = array<i64: 1, 16>}, {pipeline_mode = #tpu.pipeline_mode<synchronous>, transform_indices = @transform_3, window_bounds = array<i64: 144, 32>}, {pipeline_mode = #tpu.pipeline_mode<synchronous>, transform_indices = @transform_4, window_bounds = array<i64: 1, 32>}, {pipeline_mode = #tpu.pipeline_mode<synchronous>, transform_indices = @transform_5, window_bounds = array<i64: 800, 64>}, {pipeline_mode = #tpu.pipeline_mode<synchronous>, transform_indices = @transform_6, window_bounds = array<i64: 1, 64>}, {pipeline_mode = #tpu.pipeline_mode<synchronous>, transform_indices = @transform_7, window_bounds = array<i64: 16, 64>}, {pipeline_mode = #tpu.pipeline_mode<synchronous>, transform_indices = @transform_8, window_bounds = array<i64: 1, 1>}, {transform_indices = @transform_9, window_bounds = array<i64: 1, 1, 1>}]} {
    %cst = arith.constant 0.000000e+00 : f32
    %0 = vector.broadcast %cst : f32 to vector<680x16xf32>
    %c0 = arith.constant 0 : index
    %c0_0 = arith.constant 0 : index
    %1 = vector.load %arg12[%c0, %c0_0] : memref<680x16xf32, #tpu.memory_space<vmem>>, vector<680x16xf32>
    tpu.vector_store %arg12[%c0, %c0_0], %0 {strides = array<i32>} : memref<680x16xf32, #tpu.memory_space<vmem>>, vector<680x16xf32>,
    %cst_1 = arith.constant 0.000000e+00 : f32
    %2 = vector.broadcast %cst_1 : f32 to vector<176x32xf32>
    %c0_2 = arith.constant 0 : index
    %c0_3 = arith.constant 0 : index
    %3 = vector.load %arg14[%c0_2, %c0_3] : memref<176x32xf32, #tpu.memory_space<vmem>>, vector<176x32xf32>
    tpu.vector_store %arg14[%c0_2, %c0_3], %2 {strides = array<i32>} : memref<176x32xf32, #tpu.memory_space<vmem>>, vector<176x32xf32>,
    %c0_4 = arith.constant 0 : index
    %c0_5 = arith.constant 0 : index
    %4 = vector.load %arg2[%c0_4, %c0_5] : memref<9x16xf32, #tpu.memory_space<vmem>>, vector<9x16xf32>
    %c0_6 = arith.constant 0 : index
    %c0_7 = arith.constant 0 : index
    %5 = vector.load %arg3[%c0_6, %c0_7] : memref<1x16xf32, #tpu.memory_space<vmem>>, vector<1x16xf32>
    %c0_i32 = arith.constant 0 : i32
    %c12_i32 = arith.constant 12 : i32
    %6 = arith.addi %c0_i32, %c12_i32 : i32
    %c1_i32 = arith.constant 1 : i32
    scf.for %arg16 = %c0_i32 to %6 step %c1_i32  : i32 {
      %c200_i32 = arith.constant 200 : i32
      %381 = arith.muli %arg16, %c200_i32 : i32
      %382 = tpu.assume_multiple %381, 8 : i32
      %383 = arith.index_cast %382 : i32 to index
      %c0_166 = arith.constant 0 : index
      %384 = vector.load %arg1[%383, %c0_166] : memref<2504x1xf32, #tpu.memory_space<vmem>>, vector<304x1xf32>
      %cst_167 = arith.constant 0.000000e+00 : f32
      %385 = vector.broadcast %cst_167 : f32 to vector<200x16xf32>
      %386 = vector.extract_strided_slice %384 {offsets = [0, 0], sizes = [200, 1], strides = [1, 1]} : vector<304x1xf32> to vector<200x1xf32>
      %387 = vector.extract_strided_slice %4 {offsets = [0, 0], sizes = [1, 16], strides = [1, 1]} : vector<9x16xf32> to vector<1x16xf32>
      %388 = vector.broadcast %386 : vector<200x1xf32> to vector<200x16xf32>
      %389 = vector.broadcast %387 : vector<1x16xf32> to vector<200x16xf32>
      %390 = arith.mulf %388, %389 : vector<200x16xf32>
      %391 = arith.addf %385, %390 : vector<200x16xf32>
      %392 = vector.extract_strided_slice %384 {offsets = [1, 0], sizes = [200, 1], strides = [1, 1]} : vector<304x1xf32> to vector<200x1xf32>
      %393 = vector.extract_strided_slice %4 {offsets = [1, 0], sizes = [1, 16], strides = [1, 1]} : vector<9x16xf32> to vector<1x16xf32>
      %394 = vector.broadcast %392 : vector<200x1xf32> to vector<200x16xf32>
      %395 = vector.broadcast %393 : vector<1x16xf32> to vector<200x16xf32>
      %396 = arith.mulf %394, %395 : vector<200x16xf32>
      %397 = arith.addf %391, %396 : vector<200x16xf32>
      %398 = vector.extract_strided_slice %384 {offsets = [2, 0], sizes = [200, 1], strides = [1, 1]} : vector<304x1xf32> to vector<200x1xf32>
      %399 = vector.extract_strided_slice %4 {offsets = [2, 0], sizes = [1, 16], strides = [1, 1]} : vector<9x16xf32> to vector<1x16xf32>
      %400 = vector.broadcast %398 : vector<200x1xf32> to vector<200x16xf32>
      %401 = vector.broadcast %399 : vector<1x16xf32> to vector<200x16xf32>
      %402 = arith.mulf %400, %401 : vector<200x16xf32>
      %403 = arith.addf %397, %402 : vector<200x16xf32>
      %404 = vector.extract_strided_slice %384 {offsets = [50, 0], sizes = [200, 1], strides = [1, 1]} : vector<304x1xf32> to vector<200x1xf32>
      %405 = vector.extract_strided_slice %4 {offsets = [3, 0], sizes = [1, 16], strides = [1, 1]} : vector<9x16xf32> to vector<1x16xf32>
      %406 = vector.broadcast %404 : vector<200x1xf32> to vector<200x16xf32>
      %407 = vector.broadcast %405 : vector<1x16xf32> to vector<200x16xf32>
      %408 = arith.mulf %406, %407 : vector<200x16xf32>
      %409 = arith.addf %403, %408 : vector<200x16xf32>
      %410 = vector.extract_strided_slice %384 {offsets = [51, 0], sizes = [200, 1], strides = [1, 1]} : vector<304x1xf32> to vector<200x1xf32>
      %411 = vector.extract_strided_slice %4 {offsets = [4, 0], sizes = [1, 16], strides = [1, 1]} : vector<9x16xf32> to vector<1x16xf32>
      %412 = vector.broadcast %410 : vector<200x1xf32> to vector<200x16xf32>
      %413 = vector.broadcast %411 : vector<1x16xf32> to vector<200x16xf32>
      %414 = arith.mulf %412, %413 : vector<200x16xf32>
      %415 = arith.addf %409, %414 : vector<200x16xf32>
      %416 = vector.extract_strided_slice %384 {offsets = [52, 0], sizes = [200, 1], strides = [1, 1]} : vector<304x1xf32> to vector<200x1xf32>
      %417 = vector.extract_strided_slice %4 {offsets = [5, 0], sizes = [1, 16], strides = [1, 1]} : vector<9x16xf32> to vector<1x16xf32>
      %418 = vector.broadcast %416 : vector<200x1xf32> to vector<200x16xf32>
      %419 = vector.broadcast %417 : vector<1x16xf32> to vector<200x16xf32>
      %420 = arith.mulf %418, %419 : vector<200x16xf32>
      %421 = arith.addf %415, %420 : vector<200x16xf32>
      %422 = vector.extract_strided_slice %384 {offsets = [100, 0], sizes = [200, 1], strides = [1, 1]} : vector<304x1xf32> to vector<200x1xf32>
      %423 = vector.extract_strided_slice %4 {offsets = [6, 0], sizes = [1, 16], strides = [1, 1]} : vector<9x16xf32> to vector<1x16xf32>
      %424 = vector.broadcast %422 : vector<200x1xf32> to vector<200x16xf32>
      %425 = vector.broadcast %423 : vector<1x16xf32> to vector<200x16xf32>
      %426 = arith.mulf %424, %425 : vector<200x16xf32>
      %427 = arith.addf %421, %426 : vector<200x16xf32>
      %428 = vector.extract_strided_slice %384 {offsets = [101, 0], sizes = [200, 1], strides = [1, 1]} : vector<304x1xf32> to vector<200x1xf32>
      %429 = vector.extract_strided_slice %4 {offsets = [7, 0], sizes = [1, 16], strides = [1, 1]} : vector<9x16xf32> to vector<1x16xf32>
      %430 = vector.broadcast %428 : vector<200x1xf32> to vector<200x16xf32>
      %431 = vector.broadcast %429 : vector<1x16xf32> to vector<200x16xf32>
      %432 = arith.mulf %430, %431 : vector<200x16xf32>
      %433 = arith.addf %427, %432 : vector<200x16xf32>
      %434 = vector.extract_strided_slice %384 {offsets = [102, 0], sizes = [200, 1], strides = [1, 1]} : vector<304x1xf32> to vector<200x1xf32>
      %435 = vector.extract_strided_slice %4 {offsets = [8, 0], sizes = [1, 16], strides = [1, 1]} : vector<9x16xf32> to vector<1x16xf32>
      %436 = vector.broadcast %434 : vector<200x1xf32> to vector<200x16xf32>
      %437 = vector.broadcast %435 : vector<1x16xf32> to vector<200x16xf32>
      %438 = arith.mulf %436, %437 : vector<200x16xf32>
      %439 = arith.addf %433, %438 : vector<200x16xf32>
      %440 = vector.broadcast %5 : vector<1x16xf32> to vector<200x16xf32>
      %441 = arith.addf %439, %440 : vector<200x16xf32>
      %cst_168 = arith.constant 0.000000e+00 : f32
      %442 = vector.broadcast %cst_168 : f32 to vector<200x16xf32>
      %443 = arith.maximumf %441, %442 : vector<200x16xf32>
      %444 = arith.index_cast %382 : i32 to index
      %c0_169 = arith.constant 0 : index
      %445 = vector.load %arg11[%444, %c0_169] : memref<2400x16xf32, #tpu.memory_space<vmem>>, vector<200x16xf32>
      tpu.vector_store %arg11[%444, %c0_169], %443 {strides = array<i32>} : memref<2400x16xf32, #tpu.memory_space<vmem>>, vector<200x16xf32>,
    }
    %c12_i32_8 = arith.constant 12 : i32
    %c0_9 = arith.constant 0 : index
    %c0_10 = arith.constant 0 : index
    %7 = tpu.strided_load %arg11[%c0_9, %c0_10] {strides = array<i32: 2, 1>} : memref<2400x16xf32, #tpu.memory_space<vmem>>, vector<1200x16xf32>
    %c1 = arith.constant 1 : index
    %c0_11 = arith.constant 0 : index
    %8 = tpu.strided_load %arg11[%c1, %c0_11] {strides = array<i32: 2, 1>} : memref<2400x16xf32, #tpu.memory_space<vmem>>, vector<1200x16xf32>
    %9 = arith.maximumf %7, %8 : vector<1200x16xf32>
    %10 = vector.extract_strided_slice %9 {offsets = [0, 0], sizes = [25, 16], strides = [1, 1]} : vector<1200x16xf32> to vector<25x16xf32>
    %11 = vector.extract_strided_slice %9 {offsets = [25, 0], sizes = [25, 16], strides = [1, 1]} : vector<1200x16xf32> to vector<25x16xf32>
    %12 = arith.maximumf %10, %11 : vector<25x16xf32>
    %13 = vector.extract_strided_slice %12 {offsets = [0, 0], sizes = [24, 16], strides = [1, 1]} : vector<25x16xf32> to vector<24x16xf32>
    %c27 = arith.constant 27 : index
    %c0_12 = arith.constant 0 : index
    %14 = vector.load %arg12[%c27, %c0_12] : memref<680x16xf32, #tpu.memory_space<vmem>>, vector<24x16xf32>
    tpu.vector_store %arg12[%c27, %c0_12], %13 {strides = array<i32>} : memref<680x16xf32, #tpu.memory_space<vmem>>, vector<24x16xf32>,
    %15 = vector.extract_strided_slice %9 {offsets = [50, 0], sizes = [25, 16], strides = [1, 1]} : vector<1200x16xf32> to vector<25x16xf32>
    %16 = vector.extract_strided_slice %9 {offsets = [75, 0], sizes = [25, 16], strides = [1, 1]} : vector<1200x16xf32> to vector<25x16xf32>
    %17 = arith.maximumf %15, %16 : vector<25x16xf32>
    %18 = vector.extract_strided_slice %17 {offsets = [0, 0], sizes = [24, 16], strides = [1, 1]} : vector<25x16xf32> to vector<24x16xf32>
    %c53 = arith.constant 53 : index
    %c0_13 = arith.constant 0 : index
    %19 = vector.load %arg12[%c53, %c0_13] : memref<680x16xf32, #tpu.memory_space<vmem>>, vector<24x16xf32>
    tpu.vector_store %arg12[%c53, %c0_13], %18 {strides = array<i32>} : memref<680x16xf32, #tpu.memory_space<vmem>>, vector<24x16xf32>,
    %20 = vector.extract_strided_slice %9 {offsets = [100, 0], sizes = [25, 16], strides = [1, 1]} : vector<1200x16xf32> to vector<25x16xf32>
    %21 = vector.extract_strided_slice %9 {offsets = [125, 0], sizes = [25, 16], strides = [1, 1]} : vector<1200x16xf32> to vector<25x16xf32>
    %22 = arith.maximumf %20, %21 : vector<25x16xf32>
    %23 = vector.extract_strided_slice %22 {offsets = [0, 0], sizes = [24, 16], strides = [1, 1]} : vector<25x16xf32> to vector<24x16xf32>
    %c79 = arith.constant 79 : index
    %c0_14 = arith.constant 0 : index
    %24 = vector.load %arg12[%c79, %c0_14] : memref<680x16xf32, #tpu.memory_space<vmem>>, vector<24x16xf32>
    tpu.vector_store %arg12[%c79, %c0_14], %23 {strides = array<i32>} : memref<680x16xf32, #tpu.memory_space<vmem>>, vector<24x16xf32>,
    %25 = vector.extract_strided_slice %9 {offsets = [150, 0], sizes = [25, 16], strides = [1, 1]} : vector<1200x16xf32> to vector<25x16xf32>
    %26 = vector.extract_strided_slice %9 {offsets = [175, 0], sizes = [25, 16], strides = [1, 1]} : vector<1200x16xf32> to vector<25x16xf32>
    %27 = arith.maximumf %25, %26 : vector<25x16xf32>
    %28 = vector.extract_strided_slice %27 {offsets = [0, 0], sizes = [24, 16], strides = [1, 1]} : vector<25x16xf32> to vector<24x16xf32>
    %c105 = arith.constant 105 : index
    %c0_15 = arith.constant 0 : index
    %29 = vector.load %arg12[%c105, %c0_15] : memref<680x16xf32, #tpu.memory_space<vmem>>, vector<24x16xf32>
    tpu.vector_store %arg12[%c105, %c0_15], %28 {strides = array<i32>} : memref<680x16xf32, #tpu.memory_space<vmem>>, vector<24x16xf32>,
    %30 = vector.extract_strided_slice %9 {offsets = [200, 0], sizes = [25, 16], strides = [1, 1]} : vector<1200x16xf32> to vector<25x16xf32>
    %31 = vector.extract_strided_slice %9 {offsets = [225, 0], sizes = [25, 16], strides = [1, 1]} : vector<1200x16xf32> to vector<25x16xf32>
    %32 = arith.maximumf %30, %31 : vector<25x16xf32>
    %33 = vector.extract_strided_slice %32 {offsets = [0, 0], sizes = [24, 16], strides = [1, 1]} : vector<25x16xf32> to vector<24x16xf32>
    %c131 = arith.constant 131 : index
    %c0_16 = arith.constant 0 : index
    %34 = vector.load %arg12[%c131, %c0_16] : memref<680x16xf32, #tpu.memory_space<vmem>>, vector<24x16xf32>
    tpu.vector_store %arg12[%c131, %c0_16], %33 {strides = array<i32>} : memref<680x16xf32, #tpu.memory_space<vmem>>, vector<24x16xf32>,
    %35 = vector.extract_strided_slice %9 {offsets = [250, 0], sizes = [25, 16], strides = [1, 1]} : vector<1200x16xf32> to vector<25x16xf32>
    %36 = vector.extract_strided_slice %9 {offsets = [275, 0], sizes = [25, 16], strides = [1, 1]} : vector<1200x16xf32> to vector<25x16xf32>
    %37 = arith.maximumf %35, %36 : vector<25x16xf32>
    %38 = vector.extract_strided_slice %37 {offsets = [0, 0], sizes = [24, 16], strides = [1, 1]} : vector<25x16xf32> to vector<24x16xf32>
    %c157 = arith.constant 157 : index
    %c0_17 = arith.constant 0 : index
    %39 = vector.load %arg12[%c157, %c0_17] : memref<680x16xf32, #tpu.memory_space<vmem>>, vector<24x16xf32>
    tpu.vector_store %arg12[%c157, %c0_17], %38 {strides = array<i32>} : memref<680x16xf32, #tpu.memory_space<vmem>>, vector<24x16xf32>,
    %40 = vector.extract_strided_slice %9 {offsets = [300, 0], sizes = [25, 16], strides = [1, 1]} : vector<1200x16xf32> to vector<25x16xf32>
    %41 = vector.extract_strided_slice %9 {offsets = [325, 0], sizes = [25, 16], strides = [1, 1]} : vector<1200x16xf32> to vector<25x16xf32>
    %42 = arith.maximumf %40, %41 : vector<25x16xf32>
    %43 = vector.extract_strided_slice %42 {offsets = [0, 0], sizes = [24, 16], strides = [1, 1]} : vector<25x16xf32> to vector<24x16xf32>
    %c183 = arith.constant 183 : index
    %c0_18 = arith.constant 0 : index
    %44 = vector.load %arg12[%c183, %c0_18] : memref<680x16xf32, #tpu.memory_space<vmem>>, vector<24x16xf32>
    tpu.vector_store %arg12[%c183, %c0_18], %43 {strides = array<i32>} : memref<680x16xf32, #tpu.memory_space<vmem>>, vector<24x16xf32>,
    %45 = vector.extract_strided_slice %9 {offsets = [350, 0], sizes = [25, 16], strides = [1, 1]} : vector<1200x16xf32> to vector<25x16xf32>
    %46 = vector.extract_strided_slice %9 {offsets = [375, 0], sizes = [25, 16], strides = [1, 1]} : vector<1200x16xf32> to vector<25x16xf32>
    %47 = arith.maximumf %45, %46 : vector<25x16xf32>
    %48 = vector.extract_strided_slice %47 {offsets = [0, 0], sizes = [24, 16], strides = [1, 1]} : vector<25x16xf32> to vector<24x16xf32>
    %c209 = arith.constant 209 : index
    %c0_19 = arith.constant 0 : index
    %49 = vector.load %arg12[%c209, %c0_19] : memref<680x16xf32, #tpu.memory_space<vmem>>, vector<24x16xf32>
    tpu.vector_store %arg12[%c209, %c0_19], %48 {strides = array<i32>} : memref<680x16xf32, #tpu.memory_space<vmem>>, vector<24x16xf32>,
    %50 = vector.extract_strided_slice %9 {offsets = [400, 0], sizes = [25, 16], strides = [1, 1]} : vector<1200x16xf32> to vector<25x16xf32>
    %51 = vector.extract_strided_slice %9 {offsets = [425, 0], sizes = [25, 16], strides = [1, 1]} : vector<1200x16xf32> to vector<25x16xf32>
    %52 = arith.maximumf %50, %51 : vector<25x16xf32>
    %53 = vector.extract_strided_slice %52 {offsets = [0, 0], sizes = [24, 16], strides = [1, 1]} : vector<25x16xf32> to vector<24x16xf32>
    %c235 = arith.constant 235 : index
    %c0_20 = arith.constant 0 : index
    %54 = vector.load %arg12[%c235, %c0_20] : memref<680x16xf32, #tpu.memory_space<vmem>>, vector<24x16xf32>
    tpu.vector_store %arg12[%c235, %c0_20], %53 {strides = array<i32>} : memref<680x16xf32, #tpu.memory_space<vmem>>, vector<24x16xf32>,
    %55 = vector.extract_strided_slice %9 {offsets = [450, 0], sizes = [25, 16], strides = [1, 1]} : vector<1200x16xf32> to vector<25x16xf32>
    %56 = vector.extract_strided_slice %9 {offsets = [475, 0], sizes = [25, 16], strides = [1, 1]} : vector<1200x16xf32> to vector<25x16xf32>
    %57 = arith.maximumf %55, %56 : vector<25x16xf32>
    %58 = vector.extract_strided_slice %57 {offsets = [0, 0], sizes = [24, 16], strides = [1, 1]} : vector<25x16xf32> to vector<24x16xf32>
    %c261 = arith.constant 261 : index
    %c0_21 = arith.constant 0 : index
    %59 = vector.load %arg12[%c261, %c0_21] : memref<680x16xf32, #tpu.memory_space<vmem>>, vector<24x16xf32>
    tpu.vector_store %arg12[%c261, %c0_21], %58 {strides = array<i32>} : memref<680x16xf32, #tpu.memory_space<vmem>>, vector<24x16xf32>,
    %60 = vector.extract_strided_slice %9 {offsets = [500, 0], sizes = [25, 16], strides = [1, 1]} : vector<1200x16xf32> to vector<25x16xf32>
    %61 = vector.extract_strided_slice %9 {offsets = [525, 0], sizes = [25, 16], strides = [1, 1]} : vector<1200x16xf32> to vector<25x16xf32>
    %62 = arith.maximumf %60, %61 : vector<25x16xf32>
    %63 = vector.extract_strided_slice %62 {offsets = [0, 0], sizes = [24, 16], strides = [1, 1]} : vector<25x16xf32> to vector<24x16xf32>
    %c287 = arith.constant 287 : index
    %c0_22 = arith.constant 0 : index
    %64 = vector.load %arg12[%c287, %c0_22] : memref<680x16xf32, #tpu.memory_space<vmem>>, vector<24x16xf32>
    tpu.vector_store %arg12[%c287, %c0_22], %63 {strides = array<i32>} : memref<680x16xf32, #tpu.memory_space<vmem>>, vector<24x16xf32>,
    %65 = vector.extract_strided_slice %9 {offsets = [550, 0], sizes = [25, 16], strides = [1, 1]} : vector<1200x16xf32> to vector<25x16xf32>
    %66 = vector.extract_strided_slice %9 {offsets = [575, 0], sizes = [25, 16], strides = [1, 1]} : vector<1200x16xf32> to vector<25x16xf32>
    %67 = arith.maximumf %65, %66 : vector<25x16xf32>
    %68 = vector.extract_strided_slice %67 {offsets = [0, 0], sizes = [24, 16], strides = [1, 1]} : vector<25x16xf32> to vector<24x16xf32>
    %c313 = arith.constant 313 : index
    %c0_23 = arith.constant 0 : index
    %69 = vector.load %arg12[%c313, %c0_23] : memref<680x16xf32, #tpu.memory_space<vmem>>, vector<24x16xf32>
    tpu.vector_store %arg12[%c313, %c0_23], %68 {strides = array<i32>} : memref<680x16xf32, #tpu.memory_space<vmem>>, vector<24x16xf32>,
    %70 = vector.extract_strided_slice %9 {offsets = [600, 0], sizes = [25, 16], strides = [1, 1]} : vector<1200x16xf32> to vector<25x16xf32>
    %71 = vector.extract_strided_slice %9 {offsets = [625, 0], sizes = [25, 16], strides = [1, 1]} : vector<1200x16xf32> to vector<25x16xf32>
    %72 = arith.maximumf %70, %71 : vector<25x16xf32>
    %73 = vector.extract_strided_slice %72 {offsets = [0, 0], sizes = [24, 16], strides = [1, 1]} : vector<25x16xf32> to vector<24x16xf32>
    %c339 = arith.constant 339 : index
    %c0_24 = arith.constant 0 : index
    %74 = vector.load %arg12[%c339, %c0_24] : memref<680x16xf32, #tpu.memory_space<vmem>>, vector<24x16xf32>
    tpu.vector_store %arg12[%c339, %c0_24], %73 {strides = array<i32>} : memref<680x16xf32, #tpu.memory_space<vmem>>, vector<24x16xf32>,
    %75 = vector.extract_strided_slice %9 {offsets = [650, 0], sizes = [25, 16], strides = [1, 1]} : vector<1200x16xf32> to vector<25x16xf32>
    %76 = vector.extract_strided_slice %9 {offsets = [675, 0], sizes = [25, 16], strides = [1, 1]} : vector<1200x16xf32> to vector<25x16xf32>
    %77 = arith.maximumf %75, %76 : vector<25x16xf32>
    %78 = vector.extract_strided_slice %77 {offsets = [0, 0], sizes = [24, 16], strides = [1, 1]} : vector<25x16xf32> to vector<24x16xf32>
    %c365 = arith.constant 365 : index
    %c0_25 = arith.constant 0 : index
    %79 = vector.load %arg12[%c365, %c0_25] : memref<680x16xf32, #tpu.memory_space<vmem>>, vector<24x16xf32>
    tpu.vector_store %arg12[%c365, %c0_25], %78 {strides = array<i32>} : memref<680x16xf32, #tpu.memory_space<vmem>>, vector<24x16xf32>,
    %80 = vector.extract_strided_slice %9 {offsets = [700, 0], sizes = [25, 16], strides = [1, 1]} : vector<1200x16xf32> to vector<25x16xf32>
    %81 = vector.extract_strided_slice %9 {offsets = [725, 0], sizes = [25, 16], strides = [1, 1]} : vector<1200x16xf32> to vector<25x16xf32>
    %82 = arith.maximumf %80, %81 : vector<25x16xf32>
    %83 = vector.extract_strided_slice %82 {offsets = [0, 0], sizes = [24, 16], strides = [1, 1]} : vector<25x16xf32> to vector<24x16xf32>
    %c391 = arith.constant 391 : index
    %c0_26 = arith.constant 0 : index
    %84 = vector.load %arg12[%c391, %c0_26] : memref<680x16xf32, #tpu.memory_space<vmem>>, vector<24x16xf32>
    tpu.vector_store %arg12[%c391, %c0_26], %83 {strides = array<i32>} : memref<680x16xf32, #tpu.memory_space<vmem>>, vector<24x16xf32>,
    %85 = vector.extract_strided_slice %9 {offsets = [750, 0], sizes = [25, 16], strides = [1, 1]} : vector<1200x16xf32> to vector<25x16xf32>
    %86 = vector.extract_strided_slice %9 {offsets = [775, 0], sizes = [25, 16], strides = [1, 1]} : vector<1200x16xf32> to vector<25x16xf32>
    %87 = arith.maximumf %85, %86 : vector<25x16xf32>
    %88 = vector.extract_strided_slice %87 {offsets = [0, 0], sizes = [24, 16], strides = [1, 1]} : vector<25x16xf32> to vector<24x16xf32>
    %c417 = arith.constant 417 : index
    %c0_27 = arith.constant 0 : index
    %89 = vector.load %arg12[%c417, %c0_27] : memref<680x16xf32, #tpu.memory_space<vmem>>, vector<24x16xf32>
    tpu.vector_store %arg12[%c417, %c0_27], %88 {strides = array<i32>} : memref<680x16xf32, #tpu.memory_space<vmem>>, vector<24x16xf32>,
    %90 = vector.extract_strided_slice %9 {offsets = [800, 0], sizes = [25, 16], strides = [1, 1]} : vector<1200x16xf32> to vector<25x16xf32>
    %91 = vector.extract_strided_slice %9 {offsets = [825, 0], sizes = [25, 16], strides = [1, 1]} : vector<1200x16xf32> to vector<25x16xf32>
    %92 = arith.maximumf %90, %91 : vector<25x16xf32>
    %93 = vector.extract_strided_slice %92 {offsets = [0, 0], sizes = [24, 16], strides = [1, 1]} : vector<25x16xf32> to vector<24x16xf32>
    %c443 = arith.constant 443 : index
    %c0_28 = arith.constant 0 : index
    %94 = vector.load %arg12[%c443, %c0_28] : memref<680x16xf32, #tpu.memory_space<vmem>>, vector<24x16xf32>
    tpu.vector_store %arg12[%c443, %c0_28], %93 {strides = array<i32>} : memref<680x16xf32, #tpu.memory_space<vmem>>, vector<24x16xf32>,
    %95 = vector.extract_strided_slice %9 {offsets = [850, 0], sizes = [25, 16], strides = [1, 1]} : vector<1200x16xf32> to vector<25x16xf32>
    %96 = vector.extract_strided_slice %9 {offsets = [875, 0], sizes = [25, 16], strides = [1, 1]} : vector<1200x16xf32> to vector<25x16xf32>
    %97 = arith.maximumf %95, %96 : vector<25x16xf32>
    %98 = vector.extract_strided_slice %97 {offsets = [0, 0], sizes = [24, 16], strides = [1, 1]} : vector<25x16xf32> to vector<24x16xf32>
    %c469 = arith.constant 469 : index
    %c0_29 = arith.constant 0 : index
    %99 = vector.load %arg12[%c469, %c0_29] : memref<680x16xf32, #tpu.memory_space<vmem>>, vector<24x16xf32>
    tpu.vector_store %arg12[%c469, %c0_29], %98 {strides = array<i32>} : memref<680x16xf32, #tpu.memory_space<vmem>>, vector<24x16xf32>,
    %100 = vector.extract_strided_slice %9 {offsets = [900, 0], sizes = [25, 16], strides = [1, 1]} : vector<1200x16xf32> to vector<25x16xf32>
    %101 = vector.extract_strided_slice %9 {offsets = [925, 0], sizes = [25, 16], strides = [1, 1]} : vector<1200x16xf32> to vector<25x16xf32>
    %102 = arith.maximumf %100, %101 : vector<25x16xf32>
    %103 = vector.extract_strided_slice %102 {offsets = [0, 0], sizes = [24, 16], strides = [1, 1]} : vector<25x16xf32> to vector<24x16xf32>
    %c495 = arith.constant 495 : index
    %c0_30 = arith.constant 0 : index
    %104 = vector.load %arg12[%c495, %c0_30] : memref<680x16xf32, #tpu.memory_space<vmem>>, vector<24x16xf32>
    tpu.vector_store %arg12[%c495, %c0_30], %103 {strides = array<i32>} : memref<680x16xf32, #tpu.memory_space<vmem>>, vector<24x16xf32>,
    %105 = vector.extract_strided_slice %9 {offsets = [950, 0], sizes = [25, 16], strides = [1, 1]} : vector<1200x16xf32> to vector<25x16xf32>
    %106 = vector.extract_strided_slice %9 {offsets = [975, 0], sizes = [25, 16], strides = [1, 1]} : vector<1200x16xf32> to vector<25x16xf32>
    %107 = arith.maximumf %105, %106 : vector<25x16xf32>
    %108 = vector.extract_strided_slice %107 {offsets = [0, 0], sizes = [24, 16], strides = [1, 1]} : vector<25x16xf32> to vector<24x16xf32>
    %c521 = arith.constant 521 : index
    %c0_31 = arith.constant 0 : index
    %109 = vector.load %arg12[%c521, %c0_31] : memref<680x16xf32, #tpu.memory_space<vmem>>, vector<24x16xf32>
    tpu.vector_store %arg12[%c521, %c0_31], %108 {strides = array<i32>} : memref<680x16xf32, #tpu.memory_space<vmem>>, vector<24x16xf32>,
    %110 = vector.extract_strided_slice %9 {offsets = [1000, 0], sizes = [25, 16], strides = [1, 1]} : vector<1200x16xf32> to vector<25x16xf32>
    %111 = vector.extract_strided_slice %9 {offsets = [1025, 0], sizes = [25, 16], strides = [1, 1]} : vector<1200x16xf32> to vector<25x16xf32>
    %112 = arith.maximumf %110, %111 : vector<25x16xf32>
    %113 = vector.extract_strided_slice %112 {offsets = [0, 0], sizes = [24, 16], strides = [1, 1]} : vector<25x16xf32> to vector<24x16xf32>
    %c547 = arith.constant 547 : index
    %c0_32 = arith.constant 0 : index
    %114 = vector.load %arg12[%c547, %c0_32] : memref<680x16xf32, #tpu.memory_space<vmem>>, vector<24x16xf32>
    tpu.vector_store %arg12[%c547, %c0_32], %113 {strides = array<i32>} : memref<680x16xf32, #tpu.memory_space<vmem>>, vector<24x16xf32>,
    %115 = vector.extract_strided_slice %9 {offsets = [1050, 0], sizes = [25, 16], strides = [1, 1]} : vector<1200x16xf32> to vector<25x16xf32>
    %116 = vector.extract_strided_slice %9 {offsets = [1075, 0], sizes = [25, 16], strides = [1, 1]} : vector<1200x16xf32> to vector<25x16xf32>
    %117 = arith.maximumf %115, %116 : vector<25x16xf32>
    %118 = vector.extract_strided_slice %117 {offsets = [0, 0], sizes = [24, 16], strides = [1, 1]} : vector<25x16xf32> to vector<24x16xf32>
    %c573 = arith.constant 573 : index
    %c0_33 = arith.constant 0 : index
    %119 = vector.load %arg12[%c573, %c0_33] : memref<680x16xf32, #tpu.memory_space<vmem>>, vector<24x16xf32>
    tpu.vector_store %arg12[%c573, %c0_33], %118 {strides = array<i32>} : memref<680x16xf32, #tpu.memory_space<vmem>>, vector<24x16xf32>,
    %120 = vector.extract_strided_slice %9 {offsets = [1100, 0], sizes = [25, 16], strides = [1, 1]} : vector<1200x16xf32> to vector<25x16xf32>
    %121 = vector.extract_strided_slice %9 {offsets = [1125, 0], sizes = [25, 16], strides = [1, 1]} : vector<1200x16xf32> to vector<25x16xf32>
    %122 = arith.maximumf %120, %121 : vector<25x16xf32>
    %123 = vector.extract_strided_slice %122 {offsets = [0, 0], sizes = [24, 16], strides = [1, 1]} : vector<25x16xf32> to vector<24x16xf32>
    %c599 = arith.constant 599 : index
    %c0_34 = arith.constant 0 : index
    %124 = vector.load %arg12[%c599, %c0_34] : memref<680x16xf32, #tpu.memory_space<vmem>>, vector<24x16xf32>
    tpu.vector_store %arg12[%c599, %c0_34], %123 {strides = array<i32>} : memref<680x16xf32, #tpu.memory_space<vmem>>, vector<24x16xf32>,
    %125 = vector.extract_strided_slice %9 {offsets = [1150, 0], sizes = [25, 16], strides = [1, 1]} : vector<1200x16xf32> to vector<25x16xf32>
    %126 = vector.extract_strided_slice %9 {offsets = [1175, 0], sizes = [25, 16], strides = [1, 1]} : vector<1200x16xf32> to vector<25x16xf32>
    %127 = arith.maximumf %125, %126 : vector<25x16xf32>
    %128 = vector.extract_strided_slice %127 {offsets = [0, 0], sizes = [24, 16], strides = [1, 1]} : vector<25x16xf32> to vector<24x16xf32>
    %c625 = arith.constant 625 : index
    %c0_35 = arith.constant 0 : index
    %129 = vector.load %arg12[%c625, %c0_35] : memref<680x16xf32, #tpu.memory_space<vmem>>, vector<24x16xf32>
    tpu.vector_store %arg12[%c625, %c0_35], %128 {strides = array<i32>} : memref<680x16xf32, #tpu.memory_space<vmem>>, vector<24x16xf32>,
    %c0_36 = arith.constant 0 : index
    %c0_37 = arith.constant 0 : index
    %130 = vector.load %arg4[%c0_36, %c0_37] : memref<144x32xf32, #tpu.memory_space<vmem>>, vector<144x32xf32>
    %cst_38 = arith.constant 0.000000e+00 : f32
    %131 = vector.broadcast %cst_38 : f32 to vector<624x32xf32>
    %c0_39 = arith.constant 0 : index
    %c0_40 = arith.constant 0 : index
    %132 = vector.load %arg12[%c0_39, %c0_40] : memref<680x16xf32, #tpu.memory_space<vmem>>, vector<624x16xf32>
    %133 = vector.extract_strided_slice %130 {offsets = [0, 0], sizes = [16, 32], strides = [1, 1]} : vector<144x32xf32> to vector<16x32xf32>
    %cst_41 = arith.constant dense<0.000000e+00> : vector<624x32xf32>
    %134 = tpu.matmul %132, %133, %cst_41 {dimension_numbers = #tpu.dot_dimension_numbers<[1], [0], [0], [1], [0, 0, 1, 1], [], []>} : vector<624x16xf32>, vector<16x32xf32>, vector<624x32xf32> -> vector<624x32xf32>
    %135 = arith.addf %131, %134 : vector<624x32xf32>
    %c1_42 = arith.constant 1 : index
    %c0_43 = arith.constant 0 : index
    %136 = vector.load %arg12[%c1_42, %c0_43] : memref<680x16xf32, #tpu.memory_space<vmem>>, vector<624x16xf32>
    %137 = vector.extract_strided_slice %130 {offsets = [16, 0], sizes = [16, 32], strides = [1, 1]} : vector<144x32xf32> to vector<16x32xf32>
    %cst_44 = arith.constant dense<0.000000e+00> : vector<624x32xf32>
    %138 = tpu.matmul %136, %137, %cst_44 {dimension_numbers = #tpu.dot_dimension_numbers<[1], [0], [0], [1], [0, 0, 1, 1], [], []>} : vector<624x16xf32>, vector<16x32xf32>, vector<624x32xf32> -> vector<624x32xf32>
    %139 = arith.addf %135, %138 : vector<624x32xf32>
    %c2 = arith.constant 2 : index
    %c0_45 = arith.constant 0 : index
    %140 = vector.load %arg12[%c2, %c0_45] : memref<680x16xf32, #tpu.memory_space<vmem>>, vector<624x16xf32>
    %141 = vector.extract_strided_slice %130 {offsets = [32, 0], sizes = [16, 32], strides = [1, 1]} : vector<144x32xf32> to vector<16x32xf32>
    %cst_46 = arith.constant dense<0.000000e+00> : vector<624x32xf32>
    %142 = tpu.matmul %140, %141, %cst_46 {dimension_numbers = #tpu.dot_dimension_numbers<[1], [0], [0], [1], [0, 0, 1, 1], [], []>} : vector<624x16xf32>, vector<16x32xf32>, vector<624x32xf32> -> vector<624x32xf32>
    %143 = arith.addf %139, %142 : vector<624x32xf32>
    %c26 = arith.constant 26 : index
    %c0_47 = arith.constant 0 : index
    %144 = vector.load %arg12[%c26, %c0_47] : memref<680x16xf32, #tpu.memory_space<vmem>>, vector<624x16xf32>
    %145 = vector.extract_strided_slice %130 {offsets = [48, 0], sizes = [16, 32], strides = [1, 1]} : vector<144x32xf32> to vector<16x32xf32>
    %cst_48 = arith.constant dense<0.000000e+00> : vector<624x32xf32>
    %146 = tpu.matmul %144, %145, %cst_48 {dimension_numbers = #tpu.dot_dimension_numbers<[1], [0], [0], [1], [0, 0, 1, 1], [], []>} : vector<624x16xf32>, vector<16x32xf32>, vector<624x32xf32> -> vector<624x32xf32>
    %147 = arith.addf %143, %146 : vector<624x32xf32>
    %c27_49 = arith.constant 27 : index
    %c0_50 = arith.constant 0 : index
    %148 = vector.load %arg12[%c27_49, %c0_50] : memref<680x16xf32, #tpu.memory_space<vmem>>, vector<624x16xf32>
    %149 = vector.extract_strided_slice %130 {offsets = [64, 0], sizes = [16, 32], strides = [1, 1]} : vector<144x32xf32> to vector<16x32xf32>
    %cst_51 = arith.constant dense<0.000000e+00> : vector<624x32xf32>
    %150 = tpu.matmul %148, %149, %cst_51 {dimension_numbers = #tpu.dot_dimension_numbers<[1], [0], [0], [1], [0, 0, 1, 1], [], []>} : vector<624x16xf32>, vector<16x32xf32>, vector<624x32xf32> -> vector<624x32xf32>
    %151 = arith.addf %147, %150 : vector<624x32xf32>
    %c28 = arith.constant 28 : index
    %c0_52 = arith.constant 0 : index
    %152 = vector.load %arg12[%c28, %c0_52] : memref<680x16xf32, #tpu.memory_space<vmem>>, vector<624x16xf32>
    %153 = vector.extract_strided_slice %130 {offsets = [80, 0], sizes = [16, 32], strides = [1, 1]} : vector<144x32xf32> to vector<16x32xf32>
    %cst_53 = arith.constant dense<0.000000e+00> : vector<624x32xf32>
    %154 = tpu.matmul %152, %153, %cst_53 {dimension_numbers = #tpu.dot_dimension_numbers<[1], [0], [0], [1], [0, 0, 1, 1], [], []>} : vector<624x16xf32>, vector<16x32xf32>, vector<624x32xf32> -> vector<624x32xf32>
    %155 = arith.addf %151, %154 : vector<624x32xf32>
    %c52 = arith.constant 52 : index
    %c0_54 = arith.constant 0 : index
    %156 = vector.load %arg12[%c52, %c0_54] : memref<680x16xf32, #tpu.memory_space<vmem>>, vector<624x16xf32>
    %157 = vector.extract_strided_slice %130 {offsets = [96, 0], sizes = [16, 32], strides = [1, 1]} : vector<144x32xf32> to vector<16x32xf32>
    %cst_55 = arith.constant dense<0.000000e+00> : vector<624x32xf32>
    %158 = tpu.matmul %156, %157, %cst_55 {dimension_numbers = #tpu.dot_dimension_numbers<[1], [0], [0], [1], [0, 0, 1, 1], [], []>} : vector<624x16xf32>, vector<16x32xf32>, vector<624x32xf32> -> vector<624x32xf32>
    %159 = arith.addf %155, %158 : vector<624x32xf32>
    %c53_56 = arith.constant 53 : index
    %c0_57 = arith.constant 0 : index
    %160 = vector.load %arg12[%c53_56, %c0_57] : memref<680x16xf32, #tpu.memory_space<vmem>>, vector<624x16xf32>
    %161 = vector.extract_strided_slice %130 {offsets = [112, 0], sizes = [16, 32], strides = [1, 1]} : vector<144x32xf32> to vector<16x32xf32>
    %cst_58 = arith.constant dense<0.000000e+00> : vector<624x32xf32>
    %162 = tpu.matmul %160, %161, %cst_58 {dimension_numbers = #tpu.dot_dimension_numbers<[1], [0], [0], [1], [0, 0, 1, 1], [], []>} : vector<624x16xf32>, vector<16x32xf32>, vector<624x32xf32> -> vector<624x32xf32>
    %163 = arith.addf %159, %162 : vector<624x32xf32>
    %c54 = arith.constant 54 : index
    %c0_59 = arith.constant 0 : index
    %164 = vector.load %arg12[%c54, %c0_59] : memref<680x16xf32, #tpu.memory_space<vmem>>, vector<624x16xf32>
    %165 = vector.extract_strided_slice %130 {offsets = [128, 0], sizes = [16, 32], strides = [1, 1]} : vector<144x32xf32> to vector<16x32xf32>
    %cst_60 = arith.constant dense<0.000000e+00> : vector<624x32xf32>
    %166 = tpu.matmul %164, %165, %cst_60 {dimension_numbers = #tpu.dot_dimension_numbers<[1], [0], [0], [1], [0, 0, 1, 1], [], []>} : vector<624x16xf32>, vector<16x32xf32>, vector<624x32xf32> -> vector<624x32xf32>
    %167 = arith.addf %163, %166 : vector<624x32xf32>
    %c0_61 = arith.constant 0 : index
    %c0_62 = arith.constant 0 : index
    %168 = vector.load %arg5[%c0_61, %c0_62] : memref<1x32xf32, #tpu.memory_space<vmem>>, vector<1x32xf32>
    %169 = vector.broadcast %168 : vector<1x32xf32> to vector<624x32xf32>
    %170 = arith.addf %167, %169 : vector<624x32xf32>
    %cst_63 = arith.constant 0.000000e+00 : f32
    %171 = vector.broadcast %cst_63 : f32 to vector<624x32xf32>
    %172 = arith.maximumf %170, %171 : vector<624x32xf32>
    %c0_64 = arith.constant 0 : index
    %c0_65 = arith.constant 0 : index
    %173 = vector.load %arg13[%c0_64, %c0_65] : memref<624x32xf32, #tpu.memory_space<vmem>>, vector<624x32xf32>
    tpu.vector_store %arg13[%c0_64, %c0_65], %172 {strides = array<i32>} : memref<624x32xf32, #tpu.memory_space<vmem>>, vector<624x32xf32>,
    %c0_66 = arith.constant 0 : index
    %c0_67 = arith.constant 0 : index
    %174 = tpu.strided_load %arg13[%c0_66, %c0_67] {strides = array<i32: 2, 1>} : memref<624x32xf32, #tpu.memory_space<vmem>>, vector<312x32xf32>
    %c1_68 = arith.constant 1 : index
    %c0_69 = arith.constant 0 : index
    %175 = tpu.strided_load %arg13[%c1_68, %c0_69] {strides = array<i32: 2, 1>} : memref<624x32xf32, #tpu.memory_space<vmem>>, vector<312x32xf32>
    %176 = arith.maximumf %174, %175 : vector<312x32xf32>
    %177 = vector.extract_strided_slice %176 {offsets = [0, 0], sizes = [13, 32], strides = [1, 1]} : vector<312x32xf32> to vector<13x32xf32>
    %178 = vector.extract_strided_slice %176 {offsets = [13, 0], sizes = [13, 32], strides = [1, 1]} : vector<312x32xf32> to vector<13x32xf32>
    %179 = arith.maximumf %177, %178 : vector<13x32xf32>
    %c0_70 = arith.constant 0 : index
    %c0_71 = arith.constant 0 : index
    %180 = vector.load %arg14[%c0_70, %c0_71] : memref<176x32xf32, #tpu.memory_space<vmem>>, vector<13x32xf32>
    tpu.vector_store %arg14[%c0_70, %c0_71], %179 {strides = array<i32>} : memref<176x32xf32, #tpu.memory_space<vmem>>, vector<13x32xf32>,
    %181 = vector.extract_strided_slice %176 {offsets = [26, 0], sizes = [13, 32], strides = [1, 1]} : vector<312x32xf32> to vector<13x32xf32>
    %182 = vector.extract_strided_slice %176 {offsets = [39, 0], sizes = [13, 32], strides = [1, 1]} : vector<312x32xf32> to vector<13x32xf32>
    %183 = arith.maximumf %181, %182 : vector<13x32xf32>
    %c14 = arith.constant 14 : index
    %c0_72 = arith.constant 0 : index
    %184 = vector.load %arg14[%c14, %c0_72] : memref<176x32xf32, #tpu.memory_space<vmem>>, vector<13x32xf32>
    tpu.vector_store %arg14[%c14, %c0_72], %183 {strides = array<i32>} : memref<176x32xf32, #tpu.memory_space<vmem>>, vector<13x32xf32>,
    %185 = vector.extract_strided_slice %176 {offsets = [52, 0], sizes = [13, 32], strides = [1, 1]} : vector<312x32xf32> to vector<13x32xf32>
    %186 = vector.extract_strided_slice %176 {offsets = [65, 0], sizes = [13, 32], strides = [1, 1]} : vector<312x32xf32> to vector<13x32xf32>
    %187 = arith.maximumf %185, %186 : vector<13x32xf32>
    %c28_73 = arith.constant 28 : index
    %c0_74 = arith.constant 0 : index
    %188 = vector.load %arg14[%c28_73, %c0_74] : memref<176x32xf32, #tpu.memory_space<vmem>>, vector<13x32xf32>
    tpu.vector_store %arg14[%c28_73, %c0_74], %187 {strides = array<i32>} : memref<176x32xf32, #tpu.memory_space<vmem>>, vector<13x32xf32>,
    %189 = vector.extract_strided_slice %176 {offsets = [78, 0], sizes = [13, 32], strides = [1, 1]} : vector<312x32xf32> to vector<13x32xf32>
    %190 = vector.extract_strided_slice %176 {offsets = [91, 0], sizes = [13, 32], strides = [1, 1]} : vector<312x32xf32> to vector<13x32xf32>
    %191 = arith.maximumf %189, %190 : vector<13x32xf32>
    %c42 = arith.constant 42 : index
    %c0_75 = arith.constant 0 : index
    %192 = vector.load %arg14[%c42, %c0_75] : memref<176x32xf32, #tpu.memory_space<vmem>>, vector<13x32xf32>
    tpu.vector_store %arg14[%c42, %c0_75], %191 {strides = array<i32>} : memref<176x32xf32, #tpu.memory_space<vmem>>, vector<13x32xf32>,
    %193 = vector.extract_strided_slice %176 {offsets = [104, 0], sizes = [13, 32], strides = [1, 1]} : vector<312x32xf32> to vector<13x32xf32>
    %194 = vector.extract_strided_slice %176 {offsets = [117, 0], sizes = [13, 32], strides = [1, 1]} : vector<312x32xf32> to vector<13x32xf32>
    %195 = arith.maximumf %193, %194 : vector<13x32xf32>
    %c56 = arith.constant 56 : index
    %c0_76 = arith.constant 0 : index
    %196 = vector.load %arg14[%c56, %c0_76] : memref<176x32xf32, #tpu.memory_space<vmem>>, vector<13x32xf32>
    tpu.vector_store %arg14[%c56, %c0_76], %195 {strides = array<i32>} : memref<176x32xf32, #tpu.memory_space<vmem>>, vector<13x32xf32>,
    %197 = vector.extract_strided_slice %176 {offsets = [130, 0], sizes = [13, 32], strides = [1, 1]} : vector<312x32xf32> to vector<13x32xf32>
    %198 = vector.extract_strided_slice %176 {offsets = [143, 0], sizes = [13, 32], strides = [1, 1]} : vector<312x32xf32> to vector<13x32xf32>
    %199 = arith.maximumf %197, %198 : vector<13x32xf32>
    %c70 = arith.constant 70 : index
    %c0_77 = arith.constant 0 : index
    %200 = vector.load %arg14[%c70, %c0_77] : memref<176x32xf32, #tpu.memory_space<vmem>>, vector<13x32xf32>
    tpu.vector_store %arg14[%c70, %c0_77], %199 {strides = array<i32>} : memref<176x32xf32, #tpu.memory_space<vmem>>, vector<13x32xf32>,
    %201 = vector.extract_strided_slice %176 {offsets = [156, 0], sizes = [13, 32], strides = [1, 1]} : vector<312x32xf32> to vector<13x32xf32>
    %202 = vector.extract_strided_slice %176 {offsets = [169, 0], sizes = [13, 32], strides = [1, 1]} : vector<312x32xf32> to vector<13x32xf32>
    %203 = arith.maximumf %201, %202 : vector<13x32xf32>
    %c84 = arith.constant 84 : index
    %c0_78 = arith.constant 0 : index
    %204 = vector.load %arg14[%c84, %c0_78] : memref<176x32xf32, #tpu.memory_space<vmem>>, vector<13x32xf32>
    tpu.vector_store %arg14[%c84, %c0_78], %203 {strides = array<i32>} : memref<176x32xf32, #tpu.memory_space<vmem>>, vector<13x32xf32>,
    %205 = vector.extract_strided_slice %176 {offsets = [182, 0], sizes = [13, 32], strides = [1, 1]} : vector<312x32xf32> to vector<13x32xf32>
    %206 = vector.extract_strided_slice %176 {offsets = [195, 0], sizes = [13, 32], strides = [1, 1]} : vector<312x32xf32> to vector<13x32xf32>
    %207 = arith.maximumf %205, %206 : vector<13x32xf32>
    %c98 = arith.constant 98 : index
    %c0_79 = arith.constant 0 : index
    %208 = vector.load %arg14[%c98, %c0_79] : memref<176x32xf32, #tpu.memory_space<vmem>>, vector<13x32xf32>
    tpu.vector_store %arg14[%c98, %c0_79], %207 {strides = array<i32>} : memref<176x32xf32, #tpu.memory_space<vmem>>, vector<13x32xf32>,
    %209 = vector.extract_strided_slice %176 {offsets = [208, 0], sizes = [13, 32], strides = [1, 1]} : vector<312x32xf32> to vector<13x32xf32>
    %210 = vector.extract_strided_slice %176 {offsets = [221, 0], sizes = [13, 32], strides = [1, 1]} : vector<312x32xf32> to vector<13x32xf32>
    %211 = arith.maximumf %209, %210 : vector<13x32xf32>
    %c112 = arith.constant 112 : index
    %c0_80 = arith.constant 0 : index
    %212 = vector.load %arg14[%c112, %c0_80] : memref<176x32xf32, #tpu.memory_space<vmem>>, vector<13x32xf32>
    tpu.vector_store %arg14[%c112, %c0_80], %211 {strides = array<i32>} : memref<176x32xf32, #tpu.memory_space<vmem>>, vector<13x32xf32>,
    %213 = vector.extract_strided_slice %176 {offsets = [234, 0], sizes = [13, 32], strides = [1, 1]} : vector<312x32xf32> to vector<13x32xf32>
    %214 = vector.extract_strided_slice %176 {offsets = [247, 0], sizes = [13, 32], strides = [1, 1]} : vector<312x32xf32> to vector<13x32xf32>
    %215 = arith.maximumf %213, %214 : vector<13x32xf32>
    %c126 = arith.constant 126 : index
    %c0_81 = arith.constant 0 : index
    %216 = vector.load %arg14[%c126, %c0_81] : memref<176x32xf32, #tpu.memory_space<vmem>>, vector<13x32xf32>
    tpu.vector_store %arg14[%c126, %c0_81], %215 {strides = array<i32>} : memref<176x32xf32, #tpu.memory_space<vmem>>, vector<13x32xf32>,
    %217 = vector.extract_strided_slice %176 {offsets = [260, 0], sizes = [13, 32], strides = [1, 1]} : vector<312x32xf32> to vector<13x32xf32>
    %218 = vector.extract_strided_slice %176 {offsets = [273, 0], sizes = [13, 32], strides = [1, 1]} : vector<312x32xf32> to vector<13x32xf32>
    %219 = arith.maximumf %217, %218 : vector<13x32xf32>
    %c140 = arith.constant 140 : index
    %c0_82 = arith.constant 0 : index
    %220 = vector.load %arg14[%c140, %c0_82] : memref<176x32xf32, #tpu.memory_space<vmem>>, vector<13x32xf32>
    tpu.vector_store %arg14[%c140, %c0_82], %219 {strides = array<i32>} : memref<176x32xf32, #tpu.memory_space<vmem>>, vector<13x32xf32>,
    %221 = vector.extract_strided_slice %176 {offsets = [286, 0], sizes = [13, 32], strides = [1, 1]} : vector<312x32xf32> to vector<13x32xf32>
    %222 = vector.extract_strided_slice %176 {offsets = [299, 0], sizes = [13, 32], strides = [1, 1]} : vector<312x32xf32> to vector<13x32xf32>
    %223 = arith.maximumf %221, %222 : vector<13x32xf32>
    %c154 = arith.constant 154 : index
    %c0_83 = arith.constant 0 : index
    %224 = vector.load %arg14[%c154, %c0_83] : memref<176x32xf32, #tpu.memory_space<vmem>>, vector<13x32xf32>
    tpu.vector_store %arg14[%c154, %c0_83], %223 {strides = array<i32>} : memref<176x32xf32, #tpu.memory_space<vmem>>, vector<13x32xf32>,
    %c0_84 = arith.constant 0 : index
    %c0_85 = arith.constant 0 : index
    %225 = vector.load %arg6[%c0_84, %c0_85] : memref<800x64xf32, #tpu.memory_space<vmem>>, vector<800x64xf32>
    %cst_86 = arith.constant 0.000000e+00 : f32
    %226 = vector.broadcast %cst_86 : f32 to vector<112x64xf32>
    %c0_87 = arith.constant 0 : index
    %c0_88 = arith.constant 0 : index
    %227 = vector.load %arg14[%c0_87, %c0_88] : memref<176x32xf32, #tpu.memory_space<vmem>>, vector<112x32xf32>
    %228 = vector.extract_strided_slice %225 {offsets = [0, 0], sizes = [32, 64], strides = [1, 1]} : vector<800x64xf32> to vector<32x64xf32>
    %cst_89 = arith.constant dense<0.000000e+00> : vector<112x64xf32>
    %229 = tpu.matmul %227, %228, %cst_89 {dimension_numbers = #tpu.dot_dimension_numbers<[1], [0], [0], [1], [0, 0, 1, 1], [], []>} : vector<112x32xf32>, vector<32x64xf32>, vector<112x64xf32> -> vector<112x64xf32>
    %230 = arith.addf %226, %229 : vector<112x64xf32>
    %c1_90 = arith.constant 1 : index
    %c0_91 = arith.constant 0 : index
    %231 = vector.load %arg14[%c1_90, %c0_91] : memref<176x32xf32, #tpu.memory_space<vmem>>, vector<112x32xf32>
    %232 = vector.extract_strided_slice %225 {offsets = [32, 0], sizes = [32, 64], strides = [1, 1]} : vector<800x64xf32> to vector<32x64xf32>
    %cst_92 = arith.constant dense<0.000000e+00> : vector<112x64xf32>
    %233 = tpu.matmul %231, %232, %cst_92 {dimension_numbers = #tpu.dot_dimension_numbers<[1], [0], [0], [1], [0, 0, 1, 1], [], []>} : vector<112x32xf32>, vector<32x64xf32>, vector<112x64xf32> -> vector<112x64xf32>
    %234 = arith.addf %230, %233 : vector<112x64xf32>
    %c2_93 = arith.constant 2 : index
    %c0_94 = arith.constant 0 : index
    %235 = vector.load %arg14[%c2_93, %c0_94] : memref<176x32xf32, #tpu.memory_space<vmem>>, vector<112x32xf32>
    %236 = vector.extract_strided_slice %225 {offsets = [64, 0], sizes = [32, 64], strides = [1, 1]} : vector<800x64xf32> to vector<32x64xf32>
    %cst_95 = arith.constant dense<0.000000e+00> : vector<112x64xf32>
    %237 = tpu.matmul %235, %236, %cst_95 {dimension_numbers = #tpu.dot_dimension_numbers<[1], [0], [0], [1], [0, 0, 1, 1], [], []>} : vector<112x32xf32>, vector<32x64xf32>, vector<112x64xf32> -> vector<112x64xf32>
    %238 = arith.addf %234, %237 : vector<112x64xf32>
    %c3 = arith.constant 3 : index
    %c0_96 = arith.constant 0 : index
    %239 = vector.load %arg14[%c3, %c0_96] : memref<176x32xf32, #tpu.memory_space<vmem>>, vector<112x32xf32>
    %240 = vector.extract_strided_slice %225 {offsets = [96, 0], sizes = [32, 64], strides = [1, 1]} : vector<800x64xf32> to vector<32x64xf32>
    %cst_97 = arith.constant dense<0.000000e+00> : vector<112x64xf32>
    %241 = tpu.matmul %239, %240, %cst_97 {dimension_numbers = #tpu.dot_dimension_numbers<[1], [0], [0], [1], [0, 0, 1, 1], [], []>} : vector<112x32xf32>, vector<32x64xf32>, vector<112x64xf32> -> vector<112x64xf32>
    %242 = arith.addf %238, %241 : vector<112x64xf32>
    %c4 = arith.constant 4 : index
    %c0_98 = arith.constant 0 : index
    %243 = vector.load %arg14[%c4, %c0_98] : memref<176x32xf32, #tpu.memory_space<vmem>>, vector<112x32xf32>
    %244 = vector.extract_strided_slice %225 {offsets = [128, 0], sizes = [32, 64], strides = [1, 1]} : vector<800x64xf32> to vector<32x64xf32>
    %cst_99 = arith.constant dense<0.000000e+00> : vector<112x64xf32>
    %245 = tpu.matmul %243, %244, %cst_99 {dimension_numbers = #tpu.dot_dimension_numbers<[1], [0], [0], [1], [0, 0, 1, 1], [], []>} : vector<112x32xf32>, vector<32x64xf32>, vector<112x64xf32> -> vector<112x64xf32>
    %246 = arith.addf %242, %245 : vector<112x64xf32>
    %c14_100 = arith.constant 14 : index
    %c0_101 = arith.constant 0 : index
    %247 = vector.load %arg14[%c14_100, %c0_101] : memref<176x32xf32, #tpu.memory_space<vmem>>, vector<112x32xf32>
    %248 = vector.extract_strided_slice %225 {offsets = [160, 0], sizes = [32, 64], strides = [1, 1]} : vector<800x64xf32> to vector<32x64xf32>
    %cst_102 = arith.constant dense<0.000000e+00> : vector<112x64xf32>
    %249 = tpu.matmul %247, %248, %cst_102 {dimension_numbers = #tpu.dot_dimension_numbers<[1], [0], [0], [1], [0, 0, 1, 1], [], []>} : vector<112x32xf32>, vector<32x64xf32>, vector<112x64xf32> -> vector<112x64xf32>
    %250 = arith.addf %246, %249 : vector<112x64xf32>
    %c15 = arith.constant 15 : index
    %c0_103 = arith.constant 0 : index
    %251 = vector.load %arg14[%c15, %c0_103] : memref<176x32xf32, #tpu.memory_space<vmem>>, vector<112x32xf32>
    %252 = vector.extract_strided_slice %225 {offsets = [192, 0], sizes = [32, 64], strides = [1, 1]} : vector<800x64xf32> to vector<32x64xf32>
    %cst_104 = arith.constant dense<0.000000e+00> : vector<112x64xf32>
    %253 = tpu.matmul %251, %252, %cst_104 {dimension_numbers = #tpu.dot_dimension_numbers<[1], [0], [0], [1], [0, 0, 1, 1], [], []>} : vector<112x32xf32>, vector<32x64xf32>, vector<112x64xf32> -> vector<112x64xf32>
    %254 = arith.addf %250, %253 : vector<112x64xf32>
    %c16 = arith.constant 16 : index
    %c0_105 = arith.constant 0 : index
    %255 = vector.load %arg14[%c16, %c0_105] : memref<176x32xf32, #tpu.memory_space<vmem>>, vector<112x32xf32>
    %256 = vector.extract_strided_slice %225 {offsets = [224, 0], sizes = [32, 64], strides = [1, 1]} : vector<800x64xf32> to vector<32x64xf32>
    %cst_106 = arith.constant dense<0.000000e+00> : vector<112x64xf32>
    %257 = tpu.matmul %255, %256, %cst_106 {dimension_numbers = #tpu.dot_dimension_numbers<[1], [0], [0], [1], [0, 0, 1, 1], [], []>} : vector<112x32xf32>, vector<32x64xf32>, vector<112x64xf32> -> vector<112x64xf32>
    %258 = arith.addf %254, %257 : vector<112x64xf32>
    %c17 = arith.constant 17 : index
    %c0_107 = arith.constant 0 : index
    %259 = vector.load %arg14[%c17, %c0_107] : memref<176x32xf32, #tpu.memory_space<vmem>>, vector<112x32xf32>
    %260 = vector.extract_strided_slice %225 {offsets = [256, 0], sizes = [32, 64], strides = [1, 1]} : vector<800x64xf32> to vector<32x64xf32>
    %cst_108 = arith.constant dense<0.000000e+00> : vector<112x64xf32>
    %261 = tpu.matmul %259, %260, %cst_108 {dimension_numbers = #tpu.dot_dimension_numbers<[1], [0], [0], [1], [0, 0, 1, 1], [], []>} : vector<112x32xf32>, vector<32x64xf32>, vector<112x64xf32> -> vector<112x64xf32>
    %262 = arith.addf %258, %261 : vector<112x64xf32>
    %c18 = arith.constant 18 : index
    %c0_109 = arith.constant 0 : index
    %263 = vector.load %arg14[%c18, %c0_109] : memref<176x32xf32, #tpu.memory_space<vmem>>, vector<112x32xf32>
    %264 = vector.extract_strided_slice %225 {offsets = [288, 0], sizes = [32, 64], strides = [1, 1]} : vector<800x64xf32> to vector<32x64xf32>
    %cst_110 = arith.constant dense<0.000000e+00> : vector<112x64xf32>
    %265 = tpu.matmul %263, %264, %cst_110 {dimension_numbers = #tpu.dot_dimension_numbers<[1], [0], [0], [1], [0, 0, 1, 1], [], []>} : vector<112x32xf32>, vector<32x64xf32>, vector<112x64xf32> -> vector<112x64xf32>
    %266 = arith.addf %262, %265 : vector<112x64xf32>
    %c28_111 = arith.constant 28 : index
    %c0_112 = arith.constant 0 : index
    %267 = vector.load %arg14[%c28_111, %c0_112] : memref<176x32xf32, #tpu.memory_space<vmem>>, vector<112x32xf32>
    %268 = vector.extract_strided_slice %225 {offsets = [320, 0], sizes = [32, 64], strides = [1, 1]} : vector<800x64xf32> to vector<32x64xf32>
    %cst_113 = arith.constant dense<0.000000e+00> : vector<112x64xf32>
    %269 = tpu.matmul %267, %268, %cst_113 {dimension_numbers = #tpu.dot_dimension_numbers<[1], [0], [0], [1], [0, 0, 1, 1], [], []>} : vector<112x32xf32>, vector<32x64xf32>, vector<112x64xf32> -> vector<112x64xf32>
    %270 = arith.addf %266, %269 : vector<112x64xf32>
    %c29 = arith.constant 29 : index
    %c0_114 = arith.constant 0 : index
    %271 = vector.load %arg14[%c29, %c0_114] : memref<176x32xf32, #tpu.memory_space<vmem>>, vector<112x32xf32>
    %272 = vector.extract_strided_slice %225 {offsets = [352, 0], sizes = [32, 64], strides = [1, 1]} : vector<800x64xf32> to vector<32x64xf32>
    %cst_115 = arith.constant dense<0.000000e+00> : vector<112x64xf32>
    %273 = tpu.matmul %271, %272, %cst_115 {dimension_numbers = #tpu.dot_dimension_numbers<[1], [0], [0], [1], [0, 0, 1, 1], [], []>} : vector<112x32xf32>, vector<32x64xf32>, vector<112x64xf32> -> vector<112x64xf32>
    %274 = arith.addf %270, %273 : vector<112x64xf32>
    %c30 = arith.constant 30 : index
    %c0_116 = arith.constant 0 : index
    %275 = vector.load %arg14[%c30, %c0_116] : memref<176x32xf32, #tpu.memory_space<vmem>>, vector<112x32xf32>
    %276 = vector.extract_strided_slice %225 {offsets = [384, 0], sizes = [32, 64], strides = [1, 1]} : vector<800x64xf32> to vector<32x64xf32>
    %cst_117 = arith.constant dense<0.000000e+00> : vector<112x64xf32>
    %277 = tpu.matmul %275, %276, %cst_117 {dimension_numbers = #tpu.dot_dimension_numbers<[1], [0], [0], [1], [0, 0, 1, 1], [], []>} : vector<112x32xf32>, vector<32x64xf32>, vector<112x64xf32> -> vector<112x64xf32>
    %278 = arith.addf %274, %277 : vector<112x64xf32>
    %c31 = arith.constant 31 : index
    %c0_118 = arith.constant 0 : index
    %279 = vector.load %arg14[%c31, %c0_118] : memref<176x32xf32, #tpu.memory_space<vmem>>, vector<112x32xf32>
    %280 = vector.extract_strided_slice %225 {offsets = [416, 0], sizes = [32, 64], strides = [1, 1]} : vector<800x64xf32> to vector<32x64xf32>
    %cst_119 = arith.constant dense<0.000000e+00> : vector<112x64xf32>
    %281 = tpu.matmul %279, %280, %cst_119 {dimension_numbers = #tpu.dot_dimension_numbers<[1], [0], [0], [1], [0, 0, 1, 1], [], []>} : vector<112x32xf32>, vector<32x64xf32>, vector<112x64xf32> -> vector<112x64xf32>
    %282 = arith.addf %278, %281 : vector<112x64xf32>
    %c32 = arith.constant 32 : index
    %c0_120 = arith.constant 0 : index
    %283 = vector.load %arg14[%c32, %c0_120] : memref<176x32xf32, #tpu.memory_space<vmem>>, vector<112x32xf32>
    %284 = vector.extract_strided_slice %225 {offsets = [448, 0], sizes = [32, 64], strides = [1, 1]} : vector<800x64xf32> to vector<32x64xf32>
    %cst_121 = arith.constant dense<0.000000e+00> : vector<112x64xf32>
    %285 = tpu.matmul %283, %284, %cst_121 {dimension_numbers = #tpu.dot_dimension_numbers<[1], [0], [0], [1], [0, 0, 1, 1], [], []>} : vector<112x32xf32>, vector<32x64xf32>, vector<112x64xf32> -> vector<112x64xf32>
    %286 = arith.addf %282, %285 : vector<112x64xf32>
    %c42_122 = arith.constant 42 : index
    %c0_123 = arith.constant 0 : index
    %287 = vector.load %arg14[%c42_122, %c0_123] : memref<176x32xf32, #tpu.memory_space<vmem>>, vector<112x32xf32>
    %288 = vector.extract_strided_slice %225 {offsets = [480, 0], sizes = [32, 64], strides = [1, 1]} : vector<800x64xf32> to vector<32x64xf32>
    %cst_124 = arith.constant dense<0.000000e+00> : vector<112x64xf32>
    %289 = tpu.matmul %287, %288, %cst_124 {dimension_numbers = #tpu.dot_dimension_numbers<[1], [0], [0], [1], [0, 0, 1, 1], [], []>} : vector<112x32xf32>, vector<32x64xf32>, vector<112x64xf32> -> vector<112x64xf32>
    %290 = arith.addf %286, %289 : vector<112x64xf32>
    %c43 = arith.constant 43 : index
    %c0_125 = arith.constant 0 : index
    %291 = vector.load %arg14[%c43, %c0_125] : memref<176x32xf32, #tpu.memory_space<vmem>>, vector<112x32xf32>
    %292 = vector.extract_strided_slice %225 {offsets = [512, 0], sizes = [32, 64], strides = [1, 1]} : vector<800x64xf32> to vector<32x64xf32>
    %cst_126 = arith.constant dense<0.000000e+00> : vector<112x64xf32>
    %293 = tpu.matmul %291, %292, %cst_126 {dimension_numbers = #tpu.dot_dimension_numbers<[1], [0], [0], [1], [0, 0, 1, 1], [], []>} : vector<112x32xf32>, vector<32x64xf32>, vector<112x64xf32> -> vector<112x64xf32>
    %294 = arith.addf %290, %293 : vector<112x64xf32>
    %c44 = arith.constant 44 : index
    %c0_127 = arith.constant 0 : index
    %295 = vector.load %arg14[%c44, %c0_127] : memref<176x32xf32, #tpu.memory_space<vmem>>, vector<112x32xf32>
    %296 = vector.extract_strided_slice %225 {offsets = [544, 0], sizes = [32, 64], strides = [1, 1]} : vector<800x64xf32> to vector<32x64xf32>
    %cst_128 = arith.constant dense<0.000000e+00> : vector<112x64xf32>
    %297 = tpu.matmul %295, %296, %cst_128 {dimension_numbers = #tpu.dot_dimension_numbers<[1], [0], [0], [1], [0, 0, 1, 1], [], []>} : vector<112x32xf32>, vector<32x64xf32>, vector<112x64xf32> -> vector<112x64xf32>
    %298 = arith.addf %294, %297 : vector<112x64xf32>
    %c45 = arith.constant 45 : index
    %c0_129 = arith.constant 0 : index
    %299 = vector.load %arg14[%c45, %c0_129] : memref<176x32xf32, #tpu.memory_space<vmem>>, vector<112x32xf32>
    %300 = vector.extract_strided_slice %225 {offsets = [576, 0], sizes = [32, 64], strides = [1, 1]} : vector<800x64xf32> to vector<32x64xf32>
    %cst_130 = arith.constant dense<0.000000e+00> : vector<112x64xf32>
    %301 = tpu.matmul %299, %300, %cst_130 {dimension_numbers = #tpu.dot_dimension_numbers<[1], [0], [0], [1], [0, 0, 1, 1], [], []>} : vector<112x32xf32>, vector<32x64xf32>, vector<112x64xf32> -> vector<112x64xf32>
    %302 = arith.addf %298, %301 : vector<112x64xf32>
    %c46 = arith.constant 46 : index
    %c0_131 = arith.constant 0 : index
    %303 = vector.load %arg14[%c46, %c0_131] : memref<176x32xf32, #tpu.memory_space<vmem>>, vector<112x32xf32>
    %304 = vector.extract_strided_slice %225 {offsets = [608, 0], sizes = [32, 64], strides = [1, 1]} : vector<800x64xf32> to vector<32x64xf32>
    %cst_132 = arith.constant dense<0.000000e+00> : vector<112x64xf32>
    %305 = tpu.matmul %303, %304, %cst_132 {dimension_numbers = #tpu.dot_dimension_numbers<[1], [0], [0], [1], [0, 0, 1, 1], [], []>} : vector<112x32xf32>, vector<32x64xf32>, vector<112x64xf32> -> vector<112x64xf32>
    %306 = arith.addf %302, %305 : vector<112x64xf32>
    %c56_133 = arith.constant 56 : index
    %c0_134 = arith.constant 0 : index
    %307 = vector.load %arg14[%c56_133, %c0_134] : memref<176x32xf32, #tpu.memory_space<vmem>>, vector<112x32xf32>
    %308 = vector.extract_strided_slice %225 {offsets = [640, 0], sizes = [32, 64], strides = [1, 1]} : vector<800x64xf32> to vector<32x64xf32>
    %cst_135 = arith.constant dense<0.000000e+00> : vector<112x64xf32>
    %309 = tpu.matmul %307, %308, %cst_135 {dimension_numbers = #tpu.dot_dimension_numbers<[1], [0], [0], [1], [0, 0, 1, 1], [], []>} : vector<112x32xf32>, vector<32x64xf32>, vector<112x64xf32> -> vector<112x64xf32>
    %310 = arith.addf %306, %309 : vector<112x64xf32>
    %c57 = arith.constant 57 : index
    %c0_136 = arith.constant 0 : index
    %311 = vector.load %arg14[%c57, %c0_136] : memref<176x32xf32, #tpu.memory_space<vmem>>, vector<112x32xf32>
    %312 = vector.extract_strided_slice %225 {offsets = [672, 0], sizes = [32, 64], strides = [1, 1]} : vector<800x64xf32> to vector<32x64xf32>
    %cst_137 = arith.constant dense<0.000000e+00> : vector<112x64xf32>
    %313 = tpu.matmul %311, %312, %cst_137 {dimension_numbers = #tpu.dot_dimension_numbers<[1], [0], [0], [1], [0, 0, 1, 1], [], []>} : vector<112x32xf32>, vector<32x64xf32>, vector<112x64xf32> -> vector<112x64xf32>
    %314 = arith.addf %310, %313 : vector<112x64xf32>
    %c58 = arith.constant 58 : index
    %c0_138 = arith.constant 0 : index
    %315 = vector.load %arg14[%c58, %c0_138] : memref<176x32xf32, #tpu.memory_space<vmem>>, vector<112x32xf32>
    %316 = vector.extract_strided_slice %225 {offsets = [704, 0], sizes = [32, 64], strides = [1, 1]} : vector<800x64xf32> to vector<32x64xf32>
    %cst_139 = arith.constant dense<0.000000e+00> : vector<112x64xf32>
    %317 = tpu.matmul %315, %316, %cst_139 {dimension_numbers = #tpu.dot_dimension_numbers<[1], [0], [0], [1], [0, 0, 1, 1], [], []>} : vector<112x32xf32>, vector<32x64xf32>, vector<112x64xf32> -> vector<112x64xf32>
    %318 = arith.addf %314, %317 : vector<112x64xf32>
    %c59 = arith.constant 59 : index
    %c0_140 = arith.constant 0 : index
    %319 = vector.load %arg14[%c59, %c0_140] : memref<176x32xf32, #tpu.memory_space<vmem>>, vector<112x32xf32>
    %320 = vector.extract_strided_slice %225 {offsets = [736, 0], sizes = [32, 64], strides = [1, 1]} : vector<800x64xf32> to vector<32x64xf32>
    %cst_141 = arith.constant dense<0.000000e+00> : vector<112x64xf32>
    %321 = tpu.matmul %319, %320, %cst_141 {dimension_numbers = #tpu.dot_dimension_numbers<[1], [0], [0], [1], [0, 0, 1, 1], [], []>} : vector<112x32xf32>, vector<32x64xf32>, vector<112x64xf32> -> vector<112x64xf32>
    %322 = arith.addf %318, %321 : vector<112x64xf32>
    %c60 = arith.constant 60 : index
    %c0_142 = arith.constant 0 : index
    %323 = vector.load %arg14[%c60, %c0_142] : memref<176x32xf32, #tpu.memory_space<vmem>>, vector<112x32xf32>
    %324 = vector.extract_strided_slice %225 {offsets = [768, 0], sizes = [32, 64], strides = [1, 1]} : vector<800x64xf32> to vector<32x64xf32>
    %cst_143 = arith.constant dense<0.000000e+00> : vector<112x64xf32>
    %325 = tpu.matmul %323, %324, %cst_143 {dimension_numbers = #tpu.dot_dimension_numbers<[1], [0], [0], [1], [0, 0, 1, 1], [], []>} : vector<112x32xf32>, vector<32x64xf32>, vector<112x64xf32> -> vector<112x64xf32>
    %326 = arith.addf %322, %325 : vector<112x64xf32>
    %c0_144 = arith.constant 0 : index
    %c0_145 = arith.constant 0 : index
    %327 = vector.load %arg7[%c0_144, %c0_145] : memref<1x64xf32, #tpu.memory_space<vmem>>, vector<1x64xf32>
    %328 = vector.broadcast %327 : vector<1x64xf32> to vector<112x64xf32>
    %329 = arith.addf %326, %328 : vector<112x64xf32>
    %cst_146 = arith.constant 0.000000e+00 : f32
    %330 = vector.broadcast %cst_146 : f32 to vector<112x64xf32>
    %331 = arith.maximumf %329, %330 : vector<112x64xf32>
    %c0_147 = arith.constant 0 : index
    %c0_148 = arith.constant 0 : index
    %332 = vector.load %arg15[%c0_147, %c0_148] : memref<112x64xf32, #tpu.memory_space<vmem>>, vector<112x64xf32>
    tpu.vector_store %arg15[%c0_147, %c0_148], %331 {strides = array<i32>} : memref<112x64xf32, #tpu.memory_space<vmem>>, vector<112x64xf32>,
    %c0_149 = arith.constant 0 : index
    %c0_150 = arith.constant 0 : index
    %333 = tpu.strided_load %arg15[%c0_149, %c0_150] {strides = array<i32: 2, 1>} : memref<112x64xf32, #tpu.memory_space<vmem>>, vector<56x64xf32>
    %c1_151 = arith.constant 1 : index
    %c0_152 = arith.constant 0 : index
    %334 = tpu.strided_load %arg15[%c1_151, %c0_152] {strides = array<i32: 2, 1>} : memref<112x64xf32, #tpu.memory_space<vmem>>, vector<56x64xf32>
    %335 = arith.maximumf %333, %334 : vector<56x64xf32>
    %c0_153 = arith.constant 0 : index
    %c0_154 = arith.constant 0 : index
    %336 = vector.load %arg8[%c0_153, %c0_154] : memref<16x64xf32, #tpu.memory_space<vmem>>, vector<16x64xf32>
    %cst_155 = arith.constant 0.000000e+00 : f32
    %337 = vector.broadcast %cst_155 : f32 to vector<4x64xf32>
    %338 = vector.extract_strided_slice %335 {offsets = [0, 0], sizes = [7, 64], strides = [1, 1]} : vector<56x64xf32> to vector<7x64xf32>
    %339 = vector.extract_strided_slice %335 {offsets = [7, 0], sizes = [7, 64], strides = [1, 1]} : vector<56x64xf32> to vector<7x64xf32>
    %340 = arith.maximumf %338, %339 : vector<7x64xf32>
    %341 = vector.extract_strided_slice %340 {offsets = [0, 0], sizes = [4, 64], strides = [1, 1]} : vector<7x64xf32> to vector<4x64xf32>
    %342 = vector.extract_strided_slice %336 {offsets = [0, 0], sizes = [4, 64], strides = [1, 1]} : vector<16x64xf32> to vector<4x64xf32>
    %343 = arith.mulf %341, %342 : vector<4x64xf32>
    %344 = arith.addf %337, %343 : vector<4x64xf32>
    %345 = vector.extract_strided_slice %335 {offsets = [14, 0], sizes = [7, 64], strides = [1, 1]} : vector<56x64xf32> to vector<7x64xf32>
    %346 = vector.extract_strided_slice %335 {offsets = [21, 0], sizes = [7, 64], strides = [1, 1]} : vector<56x64xf32> to vector<7x64xf32>
    %347 = arith.maximumf %345, %346 : vector<7x64xf32>
    %348 = vector.extract_strided_slice %347 {offsets = [0, 0], sizes = [4, 64], strides = [1, 1]} : vector<7x64xf32> to vector<4x64xf32>
    %349 = vector.extract_strided_slice %336 {offsets = [4, 0], sizes = [4, 64], strides = [1, 1]} : vector<16x64xf32> to vector<4x64xf32>
    %350 = arith.mulf %348, %349 : vector<4x64xf32>
    %351 = arith.addf %344, %350 : vector<4x64xf32>
    %352 = vector.extract_strided_slice %335 {offsets = [28, 0], sizes = [7, 64], strides = [1, 1]} : vector<56x64xf32> to vector<7x64xf32>
    %353 = vector.extract_strided_slice %335 {offsets = [35, 0], sizes = [7, 64], strides = [1, 1]} : vector<56x64xf32> to vector<7x64xf32>
    %354 = arith.maximumf %352, %353 : vector<7x64xf32>
    %355 = vector.extract_strided_slice %354 {offsets = [0, 0], sizes = [4, 64], strides = [1, 1]} : vector<7x64xf32> to vector<4x64xf32>
    %356 = vector.extract_strided_slice %336 {offsets = [8, 0], sizes = [4, 64], strides = [1, 1]} : vector<16x64xf32> to vector<4x64xf32>
    %357 = arith.mulf %355, %356 : vector<4x64xf32>
    %358 = arith.addf %351, %357 : vector<4x64xf32>
    %359 = vector.extract_strided_slice %335 {offsets = [42, 0], sizes = [7, 64], strides = [1, 1]} : vector<56x64xf32> to vector<7x64xf32>
    %360 = vector.extract_strided_slice %335 {offsets = [49, 0], sizes = [7, 64], strides = [1, 1]} : vector<56x64xf32> to vector<7x64xf32>
    %361 = arith.maximumf %359, %360 : vector<7x64xf32>
    %362 = vector.extract_strided_slice %361 {offsets = [0, 0], sizes = [4, 64], strides = [1, 1]} : vector<7x64xf32> to vector<4x64xf32>
    %363 = vector.extract_strided_slice %336 {offsets = [12, 0], sizes = [4, 64], strides = [1, 1]} : vector<16x64xf32> to vector<4x64xf32>
    %364 = arith.mulf %362, %363 : vector<4x64xf32>
    %365 = arith.addf %358, %364 : vector<4x64xf32>
    %c0_156 = arith.constant 0 : index
    %c0_157 = arith.constant 0 : index
    %366 = vector.load %arg9[%c0_156, %c0_157] : memref<1x1xf32, #tpu.memory_space<vmem>>, vector<1x1xf32>
    %cst_158 = arith.constant dense<0.000000e+00> : vector<4xf32>
    %367 = vector.multi_reduction <add>, %365, %cst_158 [1] : vector<4x64xf32> to vector<4xf32>
    %368 = vector.shape_cast %367 : vector<4xf32> to vector<4x1xf32>
    %cst_159 = arith.constant dense<0.000000e+00> : vector<1xf32>
    %369 = vector.multi_reduction <add>, %368, %cst_159 [0] : vector<4x1xf32> to vector<1xf32>
    %370 = vector.shape_cast %369 : vector<1xf32> to vector<1x1xf32>
    %371 = arith.addf %366, %370 : vector<1x1xf32>
    %cst_160 = arith.constant 0.000000e+00 : f32
    %372 = vector.broadcast %cst_160 : f32 to vector<1x1xf32>
    %373 = arith.subf %372, %371 : vector<1x1xf32>
    %374 = math.exp %373 : vector<1x1xf32>
    %cst_161 = arith.constant 1.000000e+00 : f32
    %375 = vector.broadcast %cst_161 : f32 to vector<1x1xf32>
    %376 = arith.addf %375, %374 : vector<1x1xf32>
    %cst_162 = arith.constant 1.000000e+00 : f32
    %377 = vector.broadcast %cst_162 : f32 to vector<1x1xf32>
    %378 = arith.divf %377, %376 : vector<1x1xf32>
    %379 = vector.shape_cast %378 : vector<1x1xf32> to vector<1x1x1xf32>
    %c0_163 = arith.constant 0 : index
    %c0_164 = arith.constant 0 : index
    %c0_165 = arith.constant 0 : index
    %380 = vector.load %arg10[%c0_163, %c0_164, %c0_165] : memref<1x1x1xf32, #tpu.memory_space<vmem>>, vector<1x1x1xf32>
    tpu.vector_store %arg10[%c0_163, %c0_164, %c0_165], %379 {strides = array<i32>} : memref<1x1x1xf32, #tpu.memory_space<vmem>>, vector<1x1x1xf32>,
    return
  }
  func.func @transform_0(%arg0: i32) -> (i32, i32) {
    %c0_i32 = arith.constant 0 : i32
    %c0_i32_0 = arith.constant 0 : i32
    return %arg0, %c0_i32 : i32, i32
  }
  func.func @transform_1(%arg0: i32) -> (i32, i32) {
    %c0_i32 = arith.constant 0 : i32
    %c0_i32_0 = arith.constant 0 : i32
    %c0_i32_1 = arith.constant 0 : i32
    return %c0_i32, %c0_i32_0 : i32, i32
  }
  func.func @transform_2(%arg0: i32) -> (i32, i32) {
    %c0_i32 = arith.constant 0 : i32
    %c0_i32_0 = arith.constant 0 : i32
    %c0_i32_1 = arith.constant 0 : i32
    return %c0_i32, %c0_i32_0 : i32, i32
  }
  func.func @transform_3(%arg0: i32) -> (i32, i32) {
    %c0_i32 = arith.constant 0 : i32
    %c0_i32_0 = arith.constant 0 : i32
    %c0_i32_1 = arith.constant 0 : i32
    return %c0_i32, %c0_i32_0 : i32, i32
  }
  func.func @transform_4(%arg0: i32) -> (i32, i32) {
    %c0_i32 = arith.constant 0 : i32
    %c0_i32_0 = arith.constant 0 : i32
    %c0_i32_1 = arith.constant 0 : i32
    return %c0_i32, %c0_i32_0 : i32, i32
  }
  func.func @transform_5(%arg0: i32) -> (i32, i32) {
    %c0_i32 = arith.constant 0 : i32
    %c0_i32_0 = arith.constant 0 : i32
    %c0_i32_1 = arith.constant 0 : i32
    return %c0_i32, %c0_i32_0 : i32, i32
  }
  func.func @transform_6(%arg0: i32) -> (i32, i32) {
    %c0_i32 = arith.constant 0 : i32
    %c0_i32_0 = arith.constant 0 : i32
    %c0_i32_1 = arith.constant 0 : i32
    return %c0_i32, %c0_i32_0 : i32, i32
  }
  func.func @transform_7(%arg0: i32) -> (i32, i32) {
    %c0_i32 = arith.constant 0 : i32
    %c0_i32_0 = arith.constant 0 : i32
    %c0_i32_1 = arith.constant 0 : i32
    return %c0_i32, %c0_i32_0 : i32, i32
  }
  func.func @transform_8(%arg0: i32) -> (i32, i32) {
    %c0_i32 = arith.constant 0 : i32
    %c0_i32_0 = arith.constant 0 : i32
    %c0_i32_1 = arith.constant 0 : i32
    return %c0_i32, %c0_i32_0 : i32, i32
  }
  func.func @transform_9(%arg0: i32) -> (i32, i32, i32) {
    %c0_i32 = arith.constant 0 : i32
    %c0_i32_0 = arith.constant 0 : i32
    %c0_i32_1 = arith.constant 0 : i32
    return %arg0, %c0_i32, %c0_i32_0 : i32, i32, i32
  }
}

</mosaic_0001>

<bundles_post_ra>
// kernel: deep_model_forward.1
= control target key start
LH: loop header
LB: loop body
LE: loop exit
PB: predicated region body
PF: predicated region fallthrough
CT: control target
= control target key end

     0   :  { %s22219_s11 = smov 0   ;;  %s27067_s0 = inlined_call_operand.vmem [shape: f32[5008,1], index: 0, kind: input, shape index: {}]   ;;  %s27068_s1 = inlined_call_operand.vmem [shape: f32[9,16], index: 1, kind: input, shape index: {}]   ;;  %s27069_s2 = inlined_call_operand.vmem [shape: f32[1,16], index: 2, kind: input, shape index: {}]   ;;  %s27070_s3 = inlined_call_operand.vmem [shape: f32[144,32], index: 3, kind: input, shape index: {}]   ;;  %s27071_s4 = inlined_call_operand.vmem [shape: f32[1,32], index: 4, kind: input, shape index: {}]   ;;  %s27072_s5 = inlined_call_operand.vmem [shape: f32[800,64], index: 5, kind: input, shape index: {}]   ;;  %s27073_s6 = inlined_call_operand.vmem [shape: f32[1,64], index: 6, kind: input, shape index: {}]   ;;  %s27074_s7 = inlined_call_operand.vmem [shape: f32[16,64], index: 7, kind: input, shape index: {}]   ;;  %s27075_s8 = inlined_call_operand.<no memory space> [shape: f32[1,1], index: 8, kind: input, shape index: {}]   ;;  %s27076_s9 = inlined_call_operand.vmem [shape: f32[2,1,1], index: 9, kind: output, shape index: {}]  }
   0x1   :  { %v14_v0 = vstv %s27075_s8 }
   0x2   :  { %15 = vst [vmem:[#allocation7] sm:$0x1] %v14_v0 }
   0x3 LB: > { %s22225_s12 = sadd.s32 4294967295, %s22158_s11   ;;  %p16867_p0 = scmp.ge.s32.totalorder %s22158_s11, 1  ;;  %s22158_s11 = sphi %s22219_s11, %s21_s11  }
   0x4   : > { %p290_p1 = scmp.lt.s32.totalorder %s22158_s11, 3 }
   0x6   : > { %p291_p2 = pnand %p16867_p0, %p290_p1 }
   0x8   : > { %294 = sbr.rel (%p291_p2) target bundleno = 2839 (0xb17), region = 56 }
   0xf   : > { %s324_s8 = smul.u32 313, %s22225_s12  ;;  %p330_p3 = scmp.lt.s32.totalorder %s22225_s12, 1  ;;  %vm333_vm0 = vcmask 130048   ;;  %v22234_v1 = vld [vmem:[%s27068_s1] sm:$0xff]  ;;  %vm419_vm1 = vcmask 261120   ;;  %v22164_v2 = vmov 0.0  }
  0x10   : > { %27178 = vst [vmem:[#allocation8_spill] sm:$0xff] %v22234_v1  ;;  %334 = vst.msk [vmem:[#allocation3] sm:$0xff] %vm333_vm0, %v22164_v2  ;;  %v22409_v3 = vld [vmem:[%s27068_s1 + $0x8] ss:$0 sm:$0xff]  ;;  %v22414_v4 = vld [vmem:[%s27069_s2] ss:$0 sm:$0xff] }
  0x11   : > { %335 = vst.msk [vmem:[#allocation3 + $0x8] sm:$0xff] %vm333_vm0, %v22164_v2  ;;  %336 = vst.msk [vmem:[#allocation3 + $0x10] sm:$0xff] %vm333_vm0, %v22164_v2  ;;  %p325_p4 = scmp.lt.s32.totalorder %s324_s8, 625  ;;  %s22478_s27 = smov 0  }
  0x12   : > { %337 = vst.msk [vmem:[#allocation3 + $0x18] sm:$0xff] %vm333_vm0, %v22164_v2  ;;  %338 = vst.msk [vmem:[#allocation3 + $0x20] sm:$0xff] %vm333_vm0, %v22164_v2  ;;  %s22465_s19 = scalar_select %p330_p3, %s22225_s12, 1 }
  0x13   : > { %339 = vst.msk [vmem:[#allocation3 + $0x28] sm:$0xff] %vm333_vm0, %v22164_v2  ;;  %340 = vst.msk [vmem:[#allocation3 + $0x30] sm:$0xff] %vm333_vm0, %v22164_v2  ;;  %s27508_s8 = smov (!%p325_p4, %s324_s8), 625 }
  0x14   : > { %341 = vst.msk [vmem:[#allocation3 + $0x38] sm:$0xff] %vm333_vm0, %v22164_v2  ;;  %342 = vst.msk [vmem:[#allocation3 + $0x40] sm:$0xff] %vm333_vm0, %v22164_v2  ;;  %s332_s22 = scalar_lea.vmem %s27076_s9, %s22465_s19  ;;  %s16868_s23 = sshll.u32 %s27508_s8, 3 }
  0x15   : > { %343 = vst.msk [vmem:[#allocation3 + $0x48] sm:$0xff] %vm333_vm0, %v22164_v2  ;;  %344 = vst.msk [vmem:[#allocation3 + $0x50] sm:$0xff] %vm333_vm0, %v22164_v2  ;;  %s22476_s26 = scalar_lea.vmem %s27067_s0, %s16868_s23 }
  0x16   : > { %345 = vst.msk [vmem:[#allocation3 + $0x58] sm:$0xff] %vm333_vm0, %v22164_v2  ;;  %346 = vst.msk [vmem:[#allocation3 + $0x60] sm:$0xff] %vm333_vm0, %v22164_v2 }
  0x17   : > { %347 = vst.msk [vmem:[#allocation3 + $0x68] sm:$0xff] %vm333_vm0, %v22164_v2  ;;  %348 = vst.msk [vmem:[#allocation3 + $0x70] sm:$0xff] %vm333_vm0, %v22164_v2 }
  0x18   : > { %349 = vst.msk [vmem:[#allocation3 + $0x78] sm:$0xff] %vm333_vm0, %v22164_v2  ;;  %350 = vst.msk [vmem:[#allocation3 + $0x80] sm:$0xff] %vm333_vm0, %v22164_v2 }
  0x19   : > { %351 = vst.msk [vmem:[#allocation3 + $0x88] sm:$0xff] %vm333_vm0, %v22164_v2  ;;  %352 = vst.msk [vmem:[#allocation3 + $0x90] sm:$0xff] %vm333_vm0, %v22164_v2 }
  0x1a   : > { %353 = vst.msk [vmem:[#allocation3 + $0x98] sm:$0xff] %vm333_vm0, %v22164_v2  ;;  %354 = vst.msk [vmem:[#allocation3 + $0xa0] sm:$0xff] %vm333_vm0, %v22164_v2 }
  0x1b   : > { %355 = vst.msk [vmem:[#allocation3 + $0xa8] sm:$0xff] %vm333_vm0, %v22164_v2  ;;  %356 = vst.msk [vmem:[#allocation3 + $0xb0] sm:$0xff] %vm333_vm0, %v22164_v2 }
  0x1c   : > { %357 = vst.msk [vmem:[#allocation3 + $0xb8] sm:$0xff] %vm333_vm0, %v22164_v2  ;;  %358 = vst.msk [vmem:[#allocation3 + $0xc0] sm:$0xff] %vm333_vm0, %v22164_v2 }
  0x1d   : > { %359 = vst.msk [vmem:[#allocation3 + $0xc8] sm:$0xff] %vm333_vm0, %v22164_v2  ;;  %360 = vst.msk [vmem:[#allocation3 + $0xd0] sm:$0xff] %vm333_vm0, %v22164_v2 }
  0x1e   : > { %361 = vst.msk [vmem:[#allocation3 + $0xd8] sm:$0xff] %vm333_vm0, %v22164_v2  ;;  %362 = vst.msk [vmem:[#allocation3 + $0xe0] sm:$0xff] %vm333_vm0, %v22164_v2 }
  0x1f   : > { %363 = vst.msk [vmem:[#allocation3 + $0xe8] sm:$0xff] %vm333_vm0, %v22164_v2  ;;  %364 = vst.msk [vmem:[#allocation3 + $0xf0] sm:$0xff] %vm333_vm0, %v22164_v2 }
  0x20   : > { %365 = vst.msk [vmem:[#allocation3 + $0xf8] sm:$0xff] %vm333_vm0, %v22164_v2  ;;  %366 = vst.msk [vmem:[#allocation3 + $0x100] sm:$0xff] %vm333_vm0, %v22164_v2 }
  0x21   : > { %367 = vst.msk [vmem:[#allocation3 + $0x108] sm:$0xff] %vm333_vm0, %v22164_v2  ;;  %368 = vst.msk [vmem:[#allocation3 + $0x110] sm:$0xff] %vm333_vm0, %v22164_v2 }
  0x22   : > { %369 = vst.msk [vmem:[#allocation3 + $0x118] sm:$0xff] %vm333_vm0, %v22164_v2  ;;  %370 = vst.msk [vmem:[#allocation3 + $0x120] sm:$0xff] %vm333_vm0, %v22164_v2 }
  0x23   : > { %371 = vst.msk [vmem:[#allocation3 + $0x128] sm:$0xff] %vm333_vm0, %v22164_v2  ;;  %372 = vst.msk [vmem:[#allocation3 + $0x130] sm:$0xff] %vm333_vm0, %v22164_v2 }
  0x24   : > { %373 = vst.msk [vmem:[#allocation3 + $0x138] sm:$0xff] %vm333_vm0, %v22164_v2  ;;  %374 = vst.msk [vmem:[#allocation3 + $0x140] sm:$0xff] %vm333_vm0, %v22164_v2 }
  0x25   : > { %375 = vst.msk [vmem:[#allocation3 + $0x148] sm:$0xff] %vm333_vm0, %v22164_v2  ;;  %376 = vst.msk [vmem:[#allocation3 + $0x150] sm:$0xff] %vm333_vm0, %v22164_v2 }
  0x26   : > { %377 = vst.msk [vmem:[#allocation3 + $0x158] sm:$0xff] %vm333_vm0, %v22164_v2  ;;  %378 = vst.msk [vmem:[#allocation3 + $0x160] sm:$0xff] %vm333_vm0, %v22164_v2 }
  0x27   : > { %379 = vst.msk [vmem:[#allocation3 + $0x168] sm:$0xff] %vm333_vm0, %v22164_v2  ;;  %380 = vst.msk [vmem:[#allocation3 + $0x170] sm:$0xff] %vm333_vm0, %v22164_v2 }
  0x28   : > { %381 = vst.msk [vmem:[#allocation3 + $0x178] sm:$0xff] %vm333_vm0, %v22164_v2  ;;  %382 = vst.msk [vmem:[#allocation3 + $0x180] sm:$0xff] %vm333_vm0, %v22164_v2 }
  0x29   : > { %383 = vst.msk [vmem:[#allocation3 + $0x188] sm:$0xff] %vm333_vm0, %v22164_v2  ;;  %384 = vst.msk [vmem:[#allocation3 + $0x190] sm:$0xff] %vm333_vm0, %v22164_v2 }
  0x2a   : > { %385 = vst.msk [vmem:[#allocation3 + $0x198] sm:$0xff] %vm333_vm0, %v22164_v2  ;;  %386 = vst.msk [vmem:[#allocation3 + $0x1a0] sm:$0xff] %vm333_vm0, %v22164_v2 }
  0x2b   : > { %387 = vst.msk [vmem:[#allocation3 + $0x1a8] sm:$0xff] %vm333_vm0, %v22164_v2  ;;  %388 = vst.msk [vmem:[#allocation3 + $0x1b0] sm:$0xff] %vm333_vm0, %v22164_v2 }
  0x2c   : > { %389 = vst.msk [vmem:[#allocation3 + $0x1b8] sm:$0xff] %vm333_vm0, %v22164_v2  ;;  %390 = vst.msk [vmem:[#allocation3 + $0x1c0] sm:$0xff] %vm333_vm0, %v22164_v2 }
  0x2d   : > { %391 = vst.msk [vmem:[#allocation3 + $0x1c8] sm:$0xff] %vm333_vm0, %v22164_v2  ;;  %392 = vst.msk [vmem:[#allocation3 + $0x1d0] sm:$0xff] %vm333_vm0, %v22164_v2 }
  0x2e   : > { %393 = vst.msk [vmem:[#allocation3 + $0x1d8] sm:$0xff] %vm333_vm0, %v22164_v2  ;;  %394 = vst.msk [vmem:[#allocation3 + $0x1e0] sm:$0xff] %vm333_vm0, %v22164_v2 }
  0x2f   : > { %395 = vst.msk [vmem:[#allocation3 + $0x1e8] sm:$0xff] %vm333_vm0, %v22164_v2  ;;  %396 = vst.msk [vmem:[#allocation3 + $0x1f0] sm:$0xff] %vm333_vm0, %v22164_v2 }
  0x30   : > { %397 = vst.msk [vmem:[#allocation3 + $0x1f8] sm:$0xff] %vm333_vm0, %v22164_v2  ;;  %398 = vst.msk [vmem:[#allocation3 + $0x200] sm:$0xff] %vm333_vm0, %v22164_v2 }
  0x31   : > { %399 = vst.msk [vmem:[#allocation3 + $0x208] sm:$0xff] %vm333_vm0, %v22164_v2  ;;  %400 = vst.msk [vmem:[#allocation3 + $0x210] sm:$0xff] %vm333_vm0, %v22164_v2 }
  0x32   : > { %401 = vst.msk [vmem:[#allocation3 + $0x218] sm:$0xff] %vm333_vm0, %v22164_v2  ;;  %402 = vst.msk [vmem:[#allocation3 + $0x220] sm:$0xff] %vm333_vm0, %v22164_v2 }
  0x33   : > { %403 = vst.msk [vmem:[#allocation3 + $0x228] sm:$0xff] %vm333_vm0, %v22164_v2  ;;  %404 = vst.msk [vmem:[#allocation3 + $0x230] sm:$0xff] %vm333_vm0, %v22164_v2 }
  0x34   : > { %405 = vst.msk [vmem:[#allocation3 + $0x238] sm:$0xff] %vm333_vm0, %v22164_v2  ;;  %406 = vst.msk [vmem:[#allocation3 + $0x240] sm:$0xff] %vm333_vm0, %v22164_v2 }
  0x35   : > { %407 = vst.msk [vmem:[#allocation3 + $0x248] sm:$0xff] %vm333_vm0, %v22164_v2  ;;  %408 = vst.msk [vmem:[#allocation3 + $0x250] sm:$0xff] %vm333_vm0, %v22164_v2 }
  0x36   : > { %409 = vst.msk [vmem:[#allocation3 + $0x258] sm:$0xff] %vm333_vm0, %v22164_v2  ;;  %410 = vst.msk [vmem:[#allocation3 + $0x260] sm:$0xff] %vm333_vm0, %v22164_v2 }
  0x37   : > { %411 = vst.msk [vmem:[#allocation3 + $0x268] sm:$0xff] %vm333_vm0, %v22164_v2  ;;  %412 = vst.msk [vmem:[#allocation3 + $0x270] sm:$0xff] %vm333_vm0, %v22164_v2 }
  0x38   : > { %413 = vst.msk [vmem:[#allocation3 + $0x278] sm:$0xff] %vm333_vm0, %v22164_v2  ;;  %414 = vst.msk [vmem:[#allocation3 + $0x280] sm:$0xff] %vm333_vm0, %v22164_v2 }
  0x39   : > { %415 = vst.msk [vmem:[#allocation3 + $0x288] sm:$0xff] %vm333_vm0, %v22164_v2  ;;  %416 = vst.msk [vmem:[#allocation3 + $0x290] sm:$0xff] %vm333_vm0, %v22164_v2 }
  0x3a   : > { %417 = vst.msk [vmem:[#allocation3 + $0x298] sm:$0xff] %vm333_vm0, %v22164_v2  ;;  %418 = vst.msk [vmem:[#allocation3 + $0x2a0] sm:$0xff] %vm333_vm0, %v22164_v2 }
  0x3b   : > { %420 = vst.msk [vmem:[#allocation5] sm:$0xff] %vm419_vm1, %v22164_v2  ;;  %421 = vst.msk [vmem:[#allocation5 + $0x8] sm:$0xff] %vm419_vm1, %v22164_v2 }
  0x3c   : > { %422 = vst.msk [vmem:[#allocation5 + $0x10] sm:$0xff] %vm419_vm1, %v22164_v2  ;;  %423 = vst.msk [vmem:[#allocation5 + $0x18] sm:$0xff] %vm419_vm1, %v22164_v2 }
  0x3d   : > { %424 = vst.msk [vmem:[#allocation5 + $0x20] sm:$0xff] %vm419_vm1, %v22164_v2  ;;  %425 = vst.msk [vmem:[#allocation5 + $0x28] sm:$0xff] %vm419_vm1, %v22164_v2 }
  0x3e   : > { %426 = vst.msk [vmem:[#allocation5 + $0x30] sm:$0xff] %vm419_vm1, %v22164_v2  ;;  %427 = vst.msk [vmem:[#allocation5 + $0x38] sm:$0xff] %vm419_vm1, %v22164_v2 }
  0x3f   : > { %428 = vst.msk [vmem:[#allocation5 + $0x40] sm:$0xff] %vm419_vm1, %v22164_v2  ;;  %429 = vst.msk [vmem:[#allocation5 + $0x48] sm:$0xff] %vm419_vm1, %v22164_v2 }
  0x40   : > { %430 = vst.msk [vmem:[#allocation5 + $0x50] sm:$0xff] %vm419_vm1, %v22164_v2  ;;  %431 = vst.msk [vmem:[#allocation5 + $0x58] sm:$0xff] %vm419_vm1, %v22164_v2 }
  0x41   : > { %432 = vst.msk [vmem:[#allocation5 + $0x60] sm:$0xff] %vm419_vm1, %v22164_v2  ;;  %433 = vst.msk [vmem:[#allocation5 + $0x68] sm:$0xff] %vm419_vm1, %v22164_v2 }
  0x42   : > { %434 = vst.msk [vmem:[#allocation5 + $0x70] sm:$0xff] %vm419_vm1, %v22164_v2  ;;  %435 = vst.msk [vmem:[#allocation5 + $0x78] sm:$0xff] %vm419_vm1, %v22164_v2 }
  0x43   : > { %436 = vst.msk [vmem:[#allocation5 + $0x80] sm:$0xff] %vm419_vm1, %v22164_v2  ;;  %437 = vst.msk [vmem:[#allocation5 + $0x88] sm:$0xff] %vm419_vm1, %v22164_v2 }
  0x44   : > { %438 = vst.msk [vmem:[#allocation5 + $0x90] sm:$0xff] %vm419_vm1, %v22164_v2  ;;  %439 = vst.msk [vmem:[#allocation5 + $0x98] sm:$0xff] %vm419_vm1, %v22164_v2 }
  0x45   : > { %440 = vst.msk [vmem:[#allocation5 + $0xa0] sm:$0xff] %vm419_vm1, %v22164_v2  ;;  %441 = vst.msk [vmem:[#allocation5 + $0xa8] sm:$0xff] %vm419_vm1, %v22164_v2 }
  0x46 LB: >> { %v27179_v1 = vld [vmem:[#allocation8_spill] sm:$0xff]  ;;  %v22165_v5 = vmov 0   ;;  %s451_s28 = smul.u32 200, %s22162_s27  ;;  %v616_v44 = vlaneseq  ;;  %vm731_vm2 = vcmask 1046528   ;;  %vm889_vm3 = vcmask 1045504   ;;  %s450_s27 = sadd.s32 1, %s22162_s27   ;;  %s22162_s27 = sphi %s22478_s27, %s450_s27  }
  0x47   : >> { %22128 = vset.pattern.permute.xlu1 %v22165_v5  ;;  %22127 = vset.pattern.permute.xlu0 %v22165_v5  ;;  %vm1234_vm4 = vcmask 1044480   ;;  %vm1392_vm5 = vcmask 1043456   ;;  %vm1737_vm6 = vcmask 1042432   ;;  %vm1895_vm7 = vcmask 1041408   ;;  %p447_p5 = scmp.ge.s32.totalorder %s450_s27, 12  }
  0x48   : >> { %s22487_s29 = scalar_lea.vmem %s22476_s26, %s451_s28  ;;  %v617_v45 = vshrl.u32 %v616_v44, 7  ;;  %s22903_s30 = scalar_lea.vmem [#allocation2], %s451_s28  ;;  %vm2868_vm8 = vcmask (%p447_p5), 130050   ;;  %vm2872_vm9 = vcmask (%p447_p5), 123904   ;;  %vm2893_vm10 = vcmask (%p447_p5), 130052  }
  0x49   : >> { %v455_v6 = vld [vmem:[%s22487_s29 + $0x10] sm:$0xff]  ;;  %v453_v7 = vld [vmem:[%s22487_s29] sm:$0xff]  ;;  %v456_v8 = vld [vmem:[%s22487_s29 + $0x18] sm:$0xff]  ;;  %vm2897_vm11 = vcmask (%p447_p5), 125952   ;;  %vm2918_vm12 = vcmask (%p447_p5), 130054   ;;  %vm2922_vm13 = vcmask (%p447_p5), 128000  }
  0x4a   : >> { %503 = vperm.xlu1 %22128, %v455_v6   ;;  %493 = vperm.xlu0 %22127, %v453_v7   ;;  %v454_v9 = vld [vmem:[%s22487_s29 + $0x8] sm:$0xff]  ;;  %v457_v11 = vld [vmem:[%s22487_s29 + $0x20] sm:$0xff]  ;;  %v460_v12 = vld [vmem:[%s22487_s29 + $0x38] sm:$0xff]  ;;  %v677_v46 = vsub.s32 1, %v617_v45  ;;  %v618_v48 = vsub.s32 0, %v617_v45  ;;  %v835_v49 = vsub.s32 2, %v617_v45 }
  0x4b   : >> { %v458_v10 = vld [vmem:[%s22487_s29 + $0x28] sm:$0xff]  ;;  %v459_v13 = vld [vmem:[%s22487_s29 + $0x30] sm:$0xff]  ;;  %v461_v15 = vld [vmem:[%s22487_s29 + $0x40] sm:$0xff]  ;;  %v1023_v52 = vsub.s32 3, %v617_v45  ;;  %v1180_v53 = vsub.s32 4, %v617_v45  ;;  %v1338_v60 = vsub.s32 5, %v617_v45 }
  0x4c   : >> { %v462_v14 = vld [vmem:[%s22487_s29 + $0x48] sm:$0xff]  ;;  %v464_v16 = vld [vmem:[%s22487_s29 + $0x58] sm:$0xff]  ;;  %v463_v17 = vld [vmem:[%s22487_s29 + $0x50] sm:$0xff]  ;;  %v22528_v47 = vrot.slane %v27179_v1, %v677_v46  ;;  %v22532_v55 = vrot.slane %v27179_v1, %v618_v48  ;;  %v22535_v56 = vrot.slane %v27179_v1, %v835_v49  ;;  %v1526_v5 = vsub.s32 6, %v617_v45 }
  0x4d   : >> { %v466_v18 = vld [vmem:[%s22487_s29 + $0x68] sm:$0xff]  ;;  %v465_v19 = vld [vmem:[%s22487_s29 + $0x60] sm:$0xff]  ;;  %v468_v20 = vld [vmem:[%s22487_s29 + $0x78] sm:$0xff]  ;;  %v22540_v62 = vrot.slane %v27179_v1, %v1023_v52  ;;  %v22547_v2 = vrot.slane %v27179_v1, %v1180_v53  ;;  %vm11285_vm14 = vcmask (%p447_p5), 258048   ;;  %vm11299_vm15 = vcmask (%p447_p5), 261122  }
  0x4e   : >> { %508 = vperm.xlu1 %22128, %v456_v8   ;;  %498 = vperm.xlu0 %22127, %v454_v9   ;;  %v467_v21 = vld [vmem:[%s22487_s29 + $0x70] sm:$0xff]  ;;  %v470_v22 = vld [vmem:[%s22487_s29 + $0x88] sm:$0xff]  ;;  %v469_v23 = vld [vmem:[%s22487_s29 + $0x80] sm:$0xff]  ;;  %27180 = vst [vmem:[#allocation9_spill] sm:$0xff] %v22528_v47  ;;  %v1683_v9 = vsub.s32 7, %v617_v45 }
  0x4f   : >> { %v472_v24 = vld [vmem:[%s22487_s29 + $0x98] sm:$0xff]  ;;  %v471_v25 = vld [vmem:[%s22487_s29 + $0x90] sm:$0xff]  ;;  %v474_v26 = vld [vmem:[%s22487_s29 + $0xa8] sm:$0xff]  ;;  %27181 = vst [vmem:[#allocation10_spill] sm:$0xff] %v22532_v55 }
  0x50   : >> { %v473_v27 = vld [vmem:[%s22487_s29 + $0xa0] sm:$0xff]  ;;  %v476_v28 = vld [vmem:[%s22487_s29 + $0xb8] sm:$0xff]  ;;  %v475_v29 = vld [vmem:[%s22487_s29 + $0xb0] sm:$0xff]  ;;  %27182 = vst [vmem:[#allocation11_spill] sm:$0xff] %v22535_v56 }
  0x51   : >> { %v478_v30 = vld [vmem:[%s22487_s29 + $0xc8] sm:$0xff]  ;;  %v477_v31 = vld [vmem:[%s22487_s29 + $0xc0] sm:$0xff]  ;;  %v480_v32 = vld [vmem:[%s22487_s29 + $0xd8] sm:$0xff] }
  0x52   : >> { %518 = vperm.xlu1 %22128, %v458_v10   ;;  %513 = vperm.xlu0 %22127, %v457_v11   ;;  %v479_v33 = vld [vmem:[%s22487_s29 + $0xd0] sm:$0xff]  ;;  %v482_v34 = vld [vmem:[%s22487_s29 + $0xe8] sm:$0xff]  ;;  %v481_v35 = vld [vmem:[%s22487_s29 + $0xe0] sm:$0xff] }
  0x53   : >> { %v484_v36 = vld [vmem:[%s22487_s29 + $0xf8] sm:$0xff]  ;;  %v483_v37 = vld [vmem:[%s22487_s29 + $0xf0] sm:$0xff]  ;;  %v486_v38 = vld [vmem:[%s22487_s29 + $0x108] sm:$0xff] }
  0x54   : >> { %v485_v39 = vld [vmem:[%s22487_s29 + $0x100] sm:$0xff]  ;;  %v488_v40 = vld [vmem:[%s22487_s29 + $0x118] sm:$0xff]  ;;  %v487_v41 = vld [vmem:[%s22487_s29 + $0x110] sm:$0xff] }
  0x55   : >> { %v490_v42 = vld [vmem:[%s22487_s29 + $0x128] sm:$0xff]  ;;  %v489_v43 = vld [vmem:[%s22487_s29 + $0x120] sm:$0xff] }
  0x56   : >> { %528 = vperm.xlu1 %22128, %v460_v12   ;;  %523 = vperm.xlu0 %22127, %v459_v13  }
  0x5a   : >> { %538 = vperm.xlu1 %22128, %v462_v14   ;;  %533 = vperm.xlu0 %22127, %v461_v15   ;;  %v22552_v14 = vrot.slane %v27179_v1, %v1338_v60 }
  0x5e   : >> { %548 = vperm.xlu1 %22128, %v464_v16   ;;  %543 = vperm.xlu0 %22127, %v463_v17  }
  0x62   : >> { %558 = vperm.xlu1 %22128, %v466_v18   ;;  %553 = vperm.xlu0 %22127, %v465_v19  }
  0x66   : >> { %568 = vperm.xlu1 %22128, %v468_v20   ;;  %563 = vperm.xlu0 %22127, %v467_v21  }
  0x6a   : >> { %578 = vperm.xlu1 %22128, %v470_v22   ;;  %573 = vperm.xlu0 %22127, %v469_v23  }
  0x6e   : >> { %588 = vperm.xlu1 %22128, %v472_v24   ;;  %583 = vperm.xlu0 %22127, %v471_v25  }
  0x72   : >> { %598 = vperm.xlu1 %22128, %v474_v26   ;;  %593 = vperm.xlu0 %22127, %v473_v27   ;;  %v22566_v26 = vrot.slane %v27179_v1, %v1526_v5  ;;  %v22569_v27 = vrot.slane %v27179_v1, %v1683_v9 }
  0x76   : >> { %608 = vperm.xlu1 %22128, %v476_v28   ;;  %603 = vperm.xlu0 %22127, %v475_v29  }
  0x7a   : >> { %672 = vperm.xlu1 %22128, %v478_v30   ;;  %613 = vperm.xlu0 %22127, %v477_v31  }
  0x7e   : >> { %998 = vperm.xlu1 %22128, %v480_v32   ;;  %993 = vperm.xlu0 %22127, %v479_v33  }
  0x82   : >> { %1008 = vperm.xlu1 %22128, %v482_v34   ;;  %1003 = vperm.xlu0 %22127, %v481_v35  }
  0x86   : >> { %1018 = vperm.xlu1 %22128, %v484_v36   ;;  %1013 = vperm.xlu0 %22127, %v483_v37  }
  0x8a   : >> { %1501 = vperm.xlu1 %22128, %v486_v38   ;;  %1496 = vperm.xlu0 %22127, %v485_v39  }
  0x8e   : >> { %1511 = vperm.xlu1 %22128, %v488_v40   ;;  %1506 = vperm.xlu0 %22127, %v487_v41  }
  0x92   : >> { %1521 = vperm.xlu1 %22128, %v490_v42   ;;  %1516 = vperm.xlu0 %22127, %v489_v43  }
  0xc9   : >> { %v504_v50 = vpop.permute.xlu1 %503  ;;  %v494_v51 = vpop.permute.xlu0 %493 }
  0xca   : >> { %v681_v54 = vmul.f32 %v22528_v47, %v504_v50  ;;  %v679_v57 = vmul.f32 %v22528_v47, %v494_v51  ;;  %v839_v10 = vmul.f32 %v22535_v56, %v504_v50  ;;  %v622_v15 = vmul.f32 %v22532_v55, %v504_v50 }
  0xcb   : >> { %v837_v16 = vmul.f32 %v22535_v56, %v494_v51  ;;  %v620_v20 = vmul.f32 %v22532_v55, %v494_v51 }
  0xcc   : >> { %v735_v6 = vrot.slane %v681_v54, 1  ;;  %v732_v11 = vrot.slane %v679_v57, 1  ;;  %v893_v28 = vrot.slane %v839_v10, 2 }
  0xcd   : >> { %v509_v58 = vpop.permute.xlu1 %508  ;;  %v499_v59 = vpop.permute.xlu0 %498  ;;  %v890_v33 = vrot.slane %v837_v16, 2 }
  0xce   : >> { %v682_v61 = vmul.f32 %v22528_v47, %v509_v58  ;;  %v22543_v63 = vmul.f32 %v22535_v56, %v509_v58  ;;  %v680_v0 = vmul.f32 %v22528_v47, %v499_v59  ;;  %v838_v8 = vmul.f32 %v22535_v56, %v499_v59 }
  0xcf   : >> { %v621_v24 = vmul.f32 %v22532_v55, %v499_v59  ;;  %v623_v34 = vmul.f32 %v22532_v55, %v509_v58 }
  0xd0   : >> { %v737_v7 = vrot.slane %v682_v61, 1  ;;  %v733_v12 = vrot.slane %v680_v0, 1  ;;  %v895_v21 = vrot.slane %v22543_v63, 2  ;;  %v891_v25 = vrot.slane %v838_v8, 2 }
  0xd1   : >> { %v519_v13 = vpop.permute.xlu1 %518  ;;  %v514_v19 = vpop.permute.xlu0 %513 }
  0xd2   : >> { %v738_v17 = vsel %vm731_vm2, %v735_v6, %v737_v7  ;;  %v22558_v18 = vmul.f32 %v22528_v47, %v519_v13  ;;  %v734_v22 = vsel %vm731_vm2, %v732_v11, %v733_v12  ;;  %v736_v23 = vsel %vm731_vm2, %v733_v12, %v735_v6 }
  0xd3   : >> { %v810_v29 = vadd.f32 %v738_v17, %v622_v15  ;;  %v808_v30 = vadd.f32 %v734_v22, %v620_v20  ;;  %v683_v31 = vmul.f32 %v22528_v47, %v514_v19  ;;  %v809_v35 = vadd.f32 %v736_v23, %v621_v24 }
  0xd4   : >> { %v741_v36 = vrot.slane %v22558_v18, 1  ;;  %v896_v37 = vsel %vm889_vm3, %v893_v28, %v895_v21  ;;  %v842_v38 = vmul.f32 %v22535_v56, %v519_v13  ;;  %v841_v40 = vmul.f32 %v22535_v56, %v514_v19 }
  0xd5   : >> { %v529_v32 = vpop.permute.xlu1 %528  ;;  %v739_v39 = vrot.slane %v683_v31, 1  ;;  %v892_v41 = vsel %vm889_vm3, %v890_v33, %v891_v25  ;;  %v894_v42 = vsel %vm889_vm3, %v891_v25, %v893_v28  ;;  %v625_v43 = vmul.f32 %v22532_v55, %v519_v13  ;;  %v524_v50 = vpop.permute.xlu0 %523 }
  0xd6   : >> { %v22581_v44 = vmul.f32 %v22528_v47, %v529_v32  ;;  %v22583_v45 = vadd.f32 %v896_v37, %v810_v29  ;;  %v966_v46 = vadd.f32 %v892_v41, %v808_v30  ;;  %v624_v48 = vmul.f32 %v22532_v55, %v514_v19 }
  0xd7   : >> { %v22587_v49 = vmul.f32 %v22540_v62, %v529_v32  ;;  %v22589_v51 = vadd.f32 %v894_v42, %v809_v35  ;;  %v740_v52 = vsel %vm731_vm2, %v737_v7, %v739_v39  ;;  %v742_v53 = vsel %vm731_vm2, %v739_v39, %v741_v36 }
  0xd8   : >> { %v22594_v54 = vmul.f32 %v22535_v56, %v529_v32  ;;  %v899_v57 = vrot.slane %v842_v38, 2  ;;  %v897_v58 = vrot.slane %v841_v40, 2  ;;  %v22597_v59 = vmul.f32 %v22532_v55, %v529_v32 }
  0xd9   : >> { %v22600_v60 = vmul.f32 %v22547_v2, %v529_v32  ;;  %v745_v61 = vrot.slane %v22581_v44, 1  ;;  %v22604_v63 = vmul.f32 %v22552_v14, %v529_v32  ;;  %v685_v0 = vmul.f32 %v22528_v47, %v524_v50  ;;  %v539_v10 = vpop.permute.xlu1 %538  ;;  %v534_v30 = vpop.permute.xlu0 %533 }
  0xda   : >> { %v843_v5 = vmul.f32 %v22535_v56, %v524_v50  ;;  %v811_v6 = vadd.f32 %v740_v52, %v623_v34  ;;  %v812_v7 = vadd.f32 %v742_v53, %v624_v48  ;;  %v1078_v8 = vrot.slane %v22587_v49, 2 }
  0xdb   : >> { %v1025_v9 = vmul.f32 %v22540_v62, %v524_v50  ;;  %v903_v11 = vrot.slane %v22594_v54, 2  ;;  %v743_v12 = vrot.slane %v685_v0, 1  ;;  %v1182_v13 = vmul.f32 %v22547_v2, %v524_v50 }
  0xdc   : >> { %v1340_v15 = vmul.f32 %v22552_v14, %v524_v50  ;;  %v898_v16 = vsel %vm889_vm3, %v895_v21, %v897_v58  ;;  %v900_v17 = vsel %vm889_vm3, %v897_v58, %v899_v57  ;;  %v901_v18 = vrot.slane %v843_v5, 2 }
  0xdd   : >> { %v1077_v19 = vrot.slane %v1025_v9, 2  ;;  %v1236_v20 = vrot.slane %v22600_v60, 3  ;;  %v1394_v22 = vrot.slane %v22604_v63, 4  ;;  %v626_v23 = vmul.f32 %v22532_v55, %v524_v50 }
  0xde   : >> { %v22619_v24 = vmul.f32 %v22528_v47, %v539_v10  ;;  %v22621_v25 = vadd.f32 %v898_v16, %v811_v6  ;;  %v22623_v28 = vadd.f32 %v900_v17, %v812_v7  ;;  %v744_v29 = vsel %vm731_vm2, %v741_v36, %v743_v12 }
  0xdf   : >> { %v1079_v21 = vsel %vm889_vm3, %v1077_v19, %v1078_v8  ;;  %v746_v31 = vsel %vm731_vm2, %v743_v12, %v745_v61  ;;  %v1235_v32 = vrot.slane %v1182_v13, 3  ;;  %v1393_v33 = vrot.slane %v1340_v15, 4  ;;  %v549_v12 = vpop.permute.xlu1 %548 }
  0xe0   : >> { %v22629_v34 = vmul.f32 %v22532_v55, %v539_v10  ;;  %v902_v35 = vsel %vm889_vm3, %v899_v57, %v901_v18  ;;  %v1153_v37 = vadd.f32 %v1079_v21, %v966_v46  ;;  %v22633_v38 = vmul.f32 %v22535_v56, %v539_v10 }
  0xe1   : >> { %v22636_v39 = vmul.f32 %v22540_v62, %v539_v10  ;;  %v813_v36 = vadd.f32 %v744_v29, %v625_v43  ;;  %v904_v40 = vsel %vm889_vm3, %v901_v18, %v903_v11  ;;  %v749_v41 = vrot.slane %v22619_v24, 1 }
  0xe2   : >> { %v687_v42 = vmul.f32 %v22528_v47, %v534_v30  ;;  %v814_v44 = vadd.f32 %v746_v31, %v626_v23  ;;  %v845_v48 = vmul.f32 %v22535_v56, %v534_v30  ;;  %v1027_v46 = vmul.f32 %v22540_v62, %v534_v30  ;;  %v544_v31 = vpop.permute.xlu0 %543 }
  0xe3   : >> { %v1184_v49 = vmul.f32 %v22547_v2, %v534_v30  ;;  %v1237_v50 = vsel %vm1234_vm4, %v1235_v32, %v1236_v20  ;;  %v1395_v43 = vsel %vm1392_vm5, %v1393_v33, %v1394_v22  ;;  %v22651_v52 = vmul.f32 %v22547_v2, %v539_v10 }
  0xe4   : >> { %v747_v53 = vrot.slane %v687_v42, 1  ;;  %v1311_v57 = vadd.f32 %v1237_v50, %v1153_v37  ;;  %v907_v58 = vrot.slane %v22633_v38, 2  ;;  %v1082_v60 = vrot.slane %v22636_v39, 2 }
  0xe5   : >> { %v1080_v0 = vrot.slane %v1027_v46, 2  ;;  %v22656_v5 = vmul.f32 %v22552_v14, %v539_v10  ;;  %v1342_v9 = vmul.f32 %v22552_v14, %v534_v30  ;;  %v22661_v13 = vadd.f32 %v902_v35, %v813_v36 }
  0xe6   : >> { %v748_v6 = vsel %vm731_vm2, %v745_v61, %v747_v53  ;;  %v750_v7 = vsel %vm731_vm2, %v747_v53, %v749_v41  ;;  %v628_v15 = vmul.f32 %v22532_v55, %v534_v30  ;;  %v905_v16 = vrot.slane %v845_v48, 2 }
  0xe7   : >> { %v1238_v17 = vrot.slane %v1184_v49, 3  ;;  %v22664_v18 = vadd.f32 %v904_v40, %v814_v44  ;;  %v1240_v19 = vrot.slane %v22651_v52, 3  ;;  %v815_v10 = vadd.f32 %v748_v6, %v22597_v59 }
  0xe8   : >> { %v1081_v23 = vsel %vm889_vm3, %v1078_v8, %v1080_v0  ;;  %v816_v61 = vadd.f32 %v750_v7, %v628_v15  ;;  %v1083_v24 = vsel %vm889_vm3, %v1080_v0, %v1082_v60  ;;  %v22672_v21 = vmul.f32 %v22528_v47, %v549_v12 }
  0xe9   : >> { %v1154_v29 = vadd.f32 %v1081_v23, %v22589_v51  ;;  %v22674_v30 = vadd.f32 %v1395_v43, %v1311_v57  ;;  %v1398_v32 = vrot.slane %v22656_v5, 4  ;;  %v1396_v33 = vrot.slane %v1342_v9, 4 }
  0xea   : >> { %v22678_v35 = vmul.f32 %v22532_v55, %v549_v12  ;;  %v906_v59 = vsel %vm889_vm3, %v903_v11, %v905_v16  ;;  %v908_v51 = vsel %vm889_vm3, %v905_v16, %v907_v58  ;;  %v1239_v8 = vsel %vm1234_vm4, %v1236_v20, %v1238_v17  ;;  %v559_v16 = vpop.permute.xlu1 %558 }
  0xeb   : >> { %v22688_v37 = vmul.f32 %v22540_v62, %v549_v12  ;;  %v22690_v39 = vadd.f32 %v906_v59, %v815_v10  ;;  %v1155_v36 = vadd.f32 %v1083_v24, %v22583_v45  ;;  %v1241_v40 = vsel %vm1234_vm4, %v1238_v17, %v1240_v19 }
  0xec   : >> { %v689_v54 = vmul.f32 %v22528_v47, %v544_v31  ;;  %v22697_v11 = vadd.f32 %v908_v51, %v816_v61  ;;  %v1312_v42 = vadd.f32 %v1239_v8, %v1154_v29  ;;  %v753_v44 = vrot.slane %v22672_v21, 1 }
  0xed   : >> { %v22701_v20 = vmul.f32 %v22535_v56, %v549_v12  ;;  %v1086_v48 = vrot.slane %v22688_v37, 2  ;;  %v847_v49 = vmul.f32 %v22535_v56, %v544_v31  ;;  %v1029_v45 = vmul.f32 %v22540_v62, %v544_v31 }
  0xee   : >> { %v751_v46 = vrot.slane %v689_v54, 1  ;;  %v1397_v50 = vsel %vm1392_vm5, %v1394_v22, %v1396_v33  ;;  %v22710_v43 = vmul.f32 %v22547_v2, %v549_v12  ;;  %v1186_v53 = vmul.f32 %v22547_v2, %v544_v31 }
  0xef   : >> { %v22714_v57 = vmul.f32 %v22552_v14, %v544_v31  ;;  %v1313_v0 = vadd.f32 %v1241_v40, %v1155_v36  ;;  %v1399_v5 = vsel %vm1392_vm5, %v1396_v33, %v1398_v32  ;;  %v1084_v7 = vrot.slane %v1029_v45, 2 }
  0xf0   : >> { %v752_v6 = vsel %vm731_vm2, %v749_v41, %v751_v46  ;;  %v22718_v9 = vadd.f32 %v1397_v50, %v1312_v42  ;;  %v911_v63 = vrot.slane %v22701_v20, 2  ;;  %v22722_v22 = vmul.f32 %v22552_v14, %v549_v12  ;;  %v554_v42 = vpop.permute.xlu0 %553 }
  0xf1   : >> { %v630_v15 = vmul.f32 %v22532_v55, %v544_v31  ;;  %v754_v17 = vsel %vm731_vm2, %v751_v46, %v753_v44  ;;  %v909_v10 = vrot.slane %v847_v49, 2  ;;  %v1085_v23 = vsel %vm889_vm3, %v1082_v60, %v1084_v7 }
  0xf2   : >> { %v1087_v41 = vsel %vm889_vm3, %v1084_v7, %v1086_v48  ;;  %v27077_v61 = vrot.slane %v22710_v43, 3  ;;  %v817_v24 = vadd.f32 %v752_v6, %v22629_v34  ;;  %v1242_v12 = vrot.slane %v1186_v53, 3 }
  0xf3   : >> { %v27078_v29 = vrot.slane %v22714_v57, 4  ;;  %v22735_v31 = vadd.f32 %v1399_v5, %v1313_v0  ;;  %v1156_v33 = vadd.f32 %v1085_v23, %v22621_v25  ;;  %v1157_v59 = vadd.f32 %v1087_v41, %v22623_v28 }
  0xf4   : >> { %v22740_v51 = vmul.f32 %v22528_v47, %v559_v16  ;;  %v1402_v60 = vrot.slane %v22722_v22, 4  ;;  %v818_v8 = vadd.f32 %v754_v17, %v630_v15  ;;  %v22744_v36 = vmul.f32 %v22532_v55, %v559_v16 }
  0xf5   : >> { %v22747_v34 = vmul.f32 %v22535_v56, %v559_v16  ;;  %v910_v40 = vsel %vm889_vm3, %v907_v58, %v909_v10  ;;  %v912_v25 = vsel %vm889_vm3, %v909_v10, %v911_v63  ;;  %v22754_v28 = vmul.f32 %v22540_v62, %v559_v16 }
  0xf6   : >> { %v22757_v54 = vmul.f32 %v22566_v26, %v559_v16  ;;  %v22759_v20 = vadd.f32 %v910_v40, %v817_v24  ;;  %v1243_v46 = vsel %vm1234_vm4, %v1240_v19, %v1242_v12  ;;  %v1245_v38 = vsel %vm1234_vm4, %v1242_v12, %v27077_v61 }
  0xf7   : >> { %v1401_v58 = vsel %vm1392_vm5, %v1398_v32, %v27078_v29  ;;  %v1314_v49 = vadd.f32 %v1243_v46, %v1156_v33  ;;  %v1315_v45 = vadd.f32 %v1245_v38, %v1157_v59  ;;  %v27080_v50 = vrot.slane %v22740_v51, 1 }
  0xf8   : >> { %v22772_v53 = vmul.f32 %v22547_v2, %v559_v16  ;;  %v27079_v52 = vrot.slane %v22747_v34, 2  ;;  %v22776_v19 = vmul.f32 %v22552_v14, %v559_v16  ;;  %v22779_v0 = vmul.f32 %v22569_v27, %v559_v16 }
  0xf9   : >> { %v691_v5 = vmul.f32 %v22528_v47, %v554_v42  ;;  %v1090_v32 = vrot.slane %v22754_v28, 2  ;;  %v1581_v6 = vrot.slane %v22757_v54, 4  ;;  %v849_v7 = vmul.f32 %v22535_v56, %v554_v42 }
  0xfa   : >> { %v1031_v15 = vmul.f32 %v22540_v62, %v554_v42  ;;  %v22787_v17 = vmul.f32 %v22409_v3, %v559_v16  ;;  %v1528_v23 = vmul.f32 %v22566_v26, %v554_v42  ;;  %v1685_v41 = vmul.f32 %v22569_v27, %v554_v42 }
  0xfb   : >> { %v755_v10 = vrot.slane %v691_v5, 1  ;;  %v632_v24 = vmul.f32 %v22532_v55, %v554_v42  ;;  %v913_v12 = vrot.slane %v849_v7, 2  ;;  %v1188_v59 = vmul.f32 %v22547_v2, %v554_v42 }
  0xfc   : >> { %v1088_v33 = vrot.slane %v1031_v15, 2  ;;  %v1346_v46 = vmul.f32 %v22552_v14, %v554_v42  ;;  %v1580_v38 = vrot.slane %v1528_v23, 4  ;;  %v27084_v5 = vrot.slane %v22779_v0, 5 }
  0xfd   : >> { %v756_v40 = vsel %vm731_vm2, %v753_v44, %v755_v10  ;;  %v758_v16 = vsel %vm731_vm2, %v755_v10, %v27080_v50  ;;  %v916_v7 = vsel %vm889_vm3, %v913_v12, %v27079_v52  ;;  %v914_v21 = vsel %vm889_vm3, %v911_v63, %v913_v12 }
  0xfe   : >> { %v819_v61 = vadd.f32 %v756_v40, %v22678_v35  ;;  %v820_v29 = vadd.f32 %v758_v16, %v632_v24  ;;  %v1089_v44 = vsel %vm889_vm3, %v1086_v48, %v1088_v33  ;;  %v1091_v15 = vsel %vm889_vm3, %v1088_v33, %v1090_v32  ;;  %v569_v48 = vpop.permute.xlu1 %568 }
  0xff   : >> { %v1738_v10 = vrot.slane %v1685_v41, 5  ;;  %v27083_v23 = vrot.slane %v22772_v53, 3  ;;  %v27082_v35 = vrot.slane %v22776_v19, 4  ;;  %v27081_v16 = vrot.slane %v22787_v17, 6 }
 0x100   : >> { %v22814_v24 = vadd.f32 %v914_v21, %v819_v61  ;;  %v22816_v40 = vadd.f32 %v916_v7, %v820_v29  ;;  %v1246_v63 = vrot.slane %v1188_v59, 3  ;;  %v1404_v12 = vrot.slane %v1346_v46, 4 }
 0x101   : >> { %v1582_v37 = vsel %vm1392_vm5, %v1580_v38, %v1581_v6  ;;  %v1158_v33 = vadd.f32 %v1089_v44, %v22661_v13  ;;  %v1159_v41 = vadd.f32 %v1091_v15, %v22664_v18  ;;  %v1843_v61 = vmul.f32 %v22409_v3, %v554_v42 }
 0x102   : >> { %v1656_v52 = vadd.f32 %v1582_v37, %v22674_v30  ;;  %v22826_v21 = vadd.f32 %v912_v25, %v818_v8  ;;  %v27183_v29 = vrot.slane %v22714_v57, 4  ;;  %v22833_v46 = vadd.f32 %v1401_v58, %v1314_v49 }
 0x103   : >> { %v1740_v13 = vsel %vm1737_vm6, %v1738_v10, %v27084_v5  ;;  %v1896_v18 = vrot.slane %v1843_v61, 6  ;;  %v22839_v30 = vmul.f32 %v22528_v47, %v569_v48  ;;  %v22842_v8 = vmul.f32 %v22540_v62, %v569_v48 }
 0x104   : >> { %v1403_v59 = vsel %vm1392_vm5, %v27183_v29, %v1402_v60  ;;  %v1814_v38 = vadd.f32 %v1740_v13, %v1656_v52  ;;  %v27184_v57 = vrot.slane %v22710_v43, 3  ;;  %v1249_v58 = vsel %vm1234_vm4, %v1246_v63, %v27083_v23  ;;  %v564_v52 = vpop.permute.xlu0 %563 }
 0x105   : >> { %v22844_v25 = vadd.f32 %v1403_v59, %v1315_v45  ;;  %v1405_v49 = vsel %vm1392_vm5, %v1402_v60, %v1404_v12  ;;  %v1317_v44 = vadd.f32 %v1249_v58, %v1159_v41  ;;  %v1407_v45 = vsel %vm1392_vm5, %v1404_v12, %v27082_v35 }
 0x106   : >> { %v1247_v42 = vsel %vm1234_vm4, %v27184_v57, %v1246_v63  ;;  %v1898_v43 = vsel %vm1895_vm7, %v1896_v18, %v27081_v16  ;;  %v22862_v10 = vmul.f32 %v22532_v55, %v569_v48  ;;  %v22865_v63 = vmul.f32 %v22535_v56, %v569_v48 }
 0x107   : >> { %v1316_v7 = vadd.f32 %v1247_v42, %v1158_v33  ;;  %v1972_v15 = vadd.f32 %v1898_v43, %v1814_v38  ;;  %v22868_v22 = vmul.f32 %v22566_v26, %v569_v48  ;;  %v27085_v60 = vrot.slane %v22839_v30, 1 }
 0x108   : >> { %v27087_v37 = vrot.slane %v22842_v8, 2  ;;  %v22873_v12 = vmul.f32 %v22547_v2, %v569_v48  ;;  %v22876_v33 = vmul.f32 %v22528_v47, %v564_v52  ;;  %v22880_v61 = vmul.f32 %v22552_v14, %v569_v48 }
 0x109   : >> { %v2003_v41 = vadd.f32 %v22414_v4, %v1972_v15  ;;  %v22883_v29 = vmul.f32 %v22569_v27, %v569_v48  ;;  %v1033_v59 = vmul.f32 %v22540_v62, %v564_v52  ;;  %v634_v13 = vmul.f32 %v22532_v55, %v564_v52 }
 0x10a   : >> { %v27086_v38 = vrot.slane %v22876_v33, 1  ;;  %v1190_v18 = vmul.f32 %v22547_v2, %v564_v52  ;;  %v1530_v57 = vmul.f32 %v22566_v26, %v564_v52  ;;  %v1687_v15 = vmul.f32 %v22569_v27, %v564_v52 }
 0x10b   : >> { %v2028_v42 = vmax.f32 %v2003_v41, 0.0  ;;  %v1092_v43 = vrot.slane %v1033_v59, 2  ;;  %v22893_v50 = vmul.f32 %v22409_v3, %v569_v48  ;;  %v1348_v35 = vmul.f32 %v22552_v14, %v564_v52 }
 0x10c   : >> { %v762_v16 = vsel %vm731_vm2, %v27086_v38, %v27085_v60  ;;  %v1583_v23 = vrot.slane %v1530_v57, 4  ;;  %v1741_v5 = vrot.slane %v1687_v15, 5  ;;  %v22913_v58 = vadd.f32 %v1405_v49, %v1316_v7 }
 0x10d   : >> { %2054 = vst.msk [vmem:[%s22903_s30] sm:$0xff] %vm333_vm0, %v2028_v42  ;;  %v22908_v59 = vadd.f32 %v762_v16, %v634_v13  ;;  %v1093_v48 = vsel %vm889_vm3, %v1090_v32, %v1092_v43  ;;  %v27089_v60 = vrot.slane %v22873_v12, 3  ;;  %v27088_v57 = vrot.slane %v22880_v61, 4 }
 0x10e   : >> { %v1250_v38 = vrot.slane %v1190_v18, 3  ;;  %v1095_v42 = vsel %vm889_vm3, %v1092_v43, %v27087_v37  ;;  %v1160_v41 = vadd.f32 %v1093_v48, %v22690_v39  ;;  %v1584_v28 = vsel %vm1392_vm5, %v1581_v6, %v1583_v23  ;;  %v579_v48 = vpop.permute.xlu1 %578 }
 0x10f   : >> { %v27185_v32 = vrot.slane %v22868_v22, 4  ;;  %v22928_v49 = vmul.f32 %v22535_v56, %v564_v52  ;;  %v1408_v7 = vrot.slane %v1348_v35, 4  ;;  %v1657_v13 = vadd.f32 %v1584_v28, %v22718_v9 }
 0x110   : >> { %v27186_v39 = vrot.slane %v22779_v0, 5  ;;  %v27187_v6 = vrot.slane %v22883_v29, 5  ;;  %v27188_v35 = vrot.slane %v22772_v53, 3 }
 0x111   : >> { %v1586_v16 = vsel %vm1392_vm5, %v1583_v23, %v27185_v32  ;;  %v1845_v23 = vmul.f32 %v22409_v3, %v564_v52  ;;  %v1161_v32 = vadd.f32 %v1095_v42, %v22697_v11  ;;  %v27189_v11 = vrot.slane %v22776_v19, 4  ;;  %v574_v19 = vpop.permute.xlu0 %573 }
 0x112   : >> { %v1658_v18 = vadd.f32 %v1586_v16, %v22735_v31  ;;  %v1742_v54 = vsel %vm1737_vm6, %v27186_v39, %v1741_v5  ;;  %v1744_v15 = vsel %vm1737_vm6, %v1741_v5, %v27187_v6  ;;  %v1251_v9 = vsel %vm1234_vm4, %v27188_v35, %v1250_v38 }
 0x113   : >> { %v1815_v31 = vadd.f32 %v1742_v54, %v1657_v13  ;;  %v22944_v16 = vadd.f32 %v1407_v45, %v1317_v44  ;;  %v1318_v39 = vadd.f32 %v1251_v9, %v1160_v41  ;;  %v1899_v37 = vrot.slane %v1845_v23, 6 }
 0x114   : >> { %v1816_v28 = vadd.f32 %v1744_v15, %v1658_v18  ;;  %v1253_v5 = vsel %vm1234_vm4, %v1250_v38, %v27089_v60  ;;  %v1409_v53 = vsel %vm1392_vm5, %v27189_v11, %v1408_v7  ;;  %v22955_v52 = vmul.f32 %v22528_v47, %v579_v48 }
 0x115   : >> { %v1411_v44 = vsel %vm1392_vm5, %v1408_v7, %v27088_v57  ;;  %v27191_v45 = vrot.slane %v22787_v17, 6  ;;  %v27192_v42 = vrot.slane %v22893_v50, 6  ;;  %v22967_v38 = vmul.f32 %v22540_v62, %v579_v48 }
 0x116   : >> { %27190 = vst [vmem:[#allocation12_spill] sm:$0xff] %v22955_v52  ;;  %v1319_v18 = vadd.f32 %v1253_v5, %v1161_v32  ;;  %v22970_v15 = vmul.f32 %v22566_v26, %v579_v48  ;;  %v22972_v23 = vadd.f32 %v1409_v53, %v1318_v39  ;;  %v22975_v17 = vmul.f32 %v22532_v55, %v579_v48 }
 0x117   : >> { %v1900_v41 = vsel %vm1895_vm7, %v27191_v45, %v1899_v37  ;;  %v1902_v13 = vsel %vm1895_vm7, %v1899_v37, %v27192_v42  ;;  %v22978_v7 = vmul.f32 %v22547_v2, %v579_v48  ;;  %v22981_v37 = vmul.f32 %v22552_v14, %v579_v48 }
 0x118   : >> { %v1973_v54 = vadd.f32 %v1900_v41, %v1815_v31  ;;  %v1974_v6 = vadd.f32 %v1902_v13, %v1816_v28  ;;  %27193 = vst [vmem:[#allocation13_spill] sm:$0xff] %v22975_v17  ;;  %v27091_v9 = vrot.slane %v22955_v52, 1  ;;  %v22987_v31 = vmul.f32 %v22528_v47, %v574_v19 }
 0x119   : >> { %v27093_v28 = vrot.slane %v22967_v38, 2  ;;  %v22991_v39 = vmul.f32 %v22569_v27, %v579_v48  ;;  %v1035_v5 = vmul.f32 %v22540_v62, %v574_v19  ;;  %v1192_v11 = vmul.f32 %v22547_v2, %v574_v19 }
 0x11a   : >> { %v2004_v35 = vadd.f32 %v22414_v4, %v1973_v54  ;;  %v2005_v32 = vadd.f32 %v22414_v4, %v1974_v6  ;;  %v27092_v42 = vrot.slane %v22987_v31, 1  ;;  %v22998_v13 = vmul.f32 %v22409_v3, %v579_v48 }
 0x11b   : >> { %v636_v54 = vmul.f32 %v22532_v55, %v574_v19  ;;  %v1096_v6 = vrot.slane %v1035_v5, 2  ;;  %v1532_v0 = vmul.f32 %v22566_v26, %v574_v19  ;;  %v1350_v43 = vmul.f32 %v22552_v14, %v574_v19 }
 0x11c   : >> { %v2029_v53 = vmax.f32 %v2004_v35, 0.0  ;;  %v2030_v45 = vmax.f32 %v2005_v32, 0.0  ;;  %v766_v35 = vsel %vm731_vm2, %v27092_v42, %v27091_v9  ;;  %v1254_v32 = vrot.slane %v1192_v11, 3 }
 0x11d   : >> { %v1689_v57 = vmul.f32 %v22569_v27, %v574_v19  ;;  %v23013_v41 = vadd.f32 %v766_v35, %v636_v54  ;;  %v27194_v5 = vrot.slane %v22842_v8, 2  ;;  %v23022_v1 = vadd.f32 %v1411_v44, %v1319_v18 }
 0x11e   : >> { %2055 = vst.msk [vmem:[%s22903_s30 + $0x8] sm:$0xff] %vm333_vm0, %v2029_v53  ;;  %2056 = vst.msk [vmem:[%s22903_s30 + $0x10] sm:$0xff] %vm333_vm0, %v2030_v45  ;;  %v1099_v53 = vsel %vm889_vm3, %v1096_v6, %v27093_v28  ;;  %v1847_v45 = vmul.f32 %v22409_v3, %v574_v19  ;;  %v23025_v11 = vmul.f32 %v22535_v56, %v579_v48  ;;  %v27094_v9 = vrot.slane %v22978_v7, 3  ;;  %v23036_v48 = vpop.permute.xlu1 %588 }
 0x11f   : >> { %v1097_v60 = vsel %vm889_vm3, %v27194_v5, %v1096_v6  ;;  %v27095_v35 = vrot.slane %v22991_v39, 5  ;;  %v1163_v8 = vadd.f32 %v1099_v53, %v22826_v21  ;;  %v1587_v5 = vrot.slane %v1532_v0, 4  ;;  %27195 = vst [vmem:[#allocation14_spill] sm:$0xff] %v23036_v48 }
 0x120   : >> { %v1162_v54 = vadd.f32 %v1097_v60, %v22759_v20  ;;  %v1745_v42 = vrot.slane %v1689_v57, 5  ;;  %v23034_v44 = vmul.f32 %v22535_v56, %v574_v19  ;;  %v1412_v18 = vrot.slane %v1350_v43, 4 }
 0x121   : >> { %v27196_v28 = vrot.slane %v22873_v12, 3  ;;  %v27197_v60 = vrot.slane %v22868_v22, 4  ;;  %v27198_v57 = vrot.slane %v22970_v15, 4  ;;  %v1903_v53 = vrot.slane %v1847_v45, 6 }
 0x122   : >> { %v1257_v19 = vsel %vm1234_vm4, %v1254_v32, %v27094_v9  ;;  %v23060_v45 = vmul.f32 %v22540_v62, %v23036_v48  ;;  %v27205_v9 = vrot.slane %v22967_v38, 2 }
 0x123   : >> { %v1255_v20 = vsel %vm1234_vm4, %v27196_v28, %v1254_v32  ;;  %v1588_v21 = vsel %vm1392_vm5, %v27197_v60, %v1587_v5  ;;  %v1590_v0 = vsel %vm1392_vm5, %v1587_v5, %v27198_v57  ;;  %v1321_v17 = vadd.f32 %v1257_v19, %v1163_v8  ;;  %v584_v19 = vpop.permute.xlu0 %583 }
 0x124   : >> { %v1320_v43 = vadd.f32 %v1255_v20, %v1162_v54  ;;  %v1659_v6 = vadd.f32 %v1588_v21, %v22833_v46  ;;  %v1660_v12 = vadd.f32 %v1590_v0, %v22844_v25  ;;  %v27199_v28 = vrot.slane %v22883_v29, 5 }
 0x125   : >> { %v1748_v60 = vsel %vm1737_vm6, %v1745_v42, %v27095_v35  ;;  %v27200_v25 = vrot.slane %v22880_v61, 4  ;;  %v27201_v8 = vrot.slane %v22981_v37, 4  ;;  %v27203_v57 = vrot.slane %v22998_v13, 6 }
 0x126   : >> { %v1746_v22 = vsel %vm1737_vm6, %v27199_v28, %v1745_v42  ;;  %v1818_v5 = vadd.f32 %v1748_v60, %v1660_v12  ;;  %v27202_v42 = vrot.slane %v22893_v50, 6  ;;  %v23078_v61 = vmul.f32 %v22528_v47, %v23036_v48 }
 0x127   : >> { %v1817_v46 = vadd.f32 %v1746_v22, %v1659_v6  ;;  %v1413_v29 = vsel %vm1392_vm5, %v27200_v25, %v1412_v18  ;;  %v1415_v20 = vsel %vm1392_vm5, %v1412_v18, %v27201_v8  ;;  %v1906_v0 = vsel %vm1895_vm7, %v1903_v53, %v27203_v57 }
 0x128   : >> { %v1904_v21 = vsel %vm1895_vm7, %v27202_v42, %v1903_v53  ;;  %v1976_v6 = vadd.f32 %v1906_v0, %v1818_v5  ;;  %27204 = vst [vmem:[#allocation15_spill] sm:$0xff] %v23078_v61  ;;  %v23082_v12 = vmul.f32 %v22566_v26, %v23036_v48  ;;  %v23084_v18 = vadd.f32 %v1413_v29, %v1320_v43 }
 0x129   : >> { %v1975_v28 = vadd.f32 %v1904_v21, %v1817_v46  ;;  %v23086_v50 = vadd.f32 %v1415_v20, %v1321_v17  ;;  %v27096_v22 = vrot.slane %v23060_v45, 2  ;;  %v23091_v53 = vmul.f32 %v22547_v2, %v23036_v48 }
 0x12a   : >> { %v2007_v46 = vadd.f32 %v22414_v4, %v1976_v6  ;;  %v23097_v5 = vmul.f32 %v22569_v27, %v23036_v48  ;;  %v1037_v43 = vmul.f32 %v22540_v62, %v584_v19  ;;  %v23102_v17 = vmul.f32 %v22552_v14, %v23036_v48 }
 0x12b   : >> { %v2006_v60 = vadd.f32 %v22414_v4, %v1975_v28  ;;  %v23106_v25 = vmul.f32 %v22409_v3, %v23036_v48  ;;  %v1194_v29 = vmul.f32 %v22547_v2, %v584_v19  ;;  %v1534_v8 = vmul.f32 %v22566_v26, %v584_v19 }
 0x12c   : >> { %v2032_v42 = vmax.f32 %v2007_v46, 0.0  ;;  %v27097_v21 = vrot.slane %v23082_v12, 4  ;;  %v1100_v57 = vrot.slane %v1037_v43, 2  ;;  %v1691_v6 = vmul.f32 %v22569_v27, %v584_v19 }
 0x12d   : >> { %v2031_v20 = vmax.f32 %v2006_v60, 0.0  ;;  %v1591_v28 = vrot.slane %v1534_v8, 4  ;;  %v1849_v32 = vmul.f32 %v22409_v3, %v584_v19  ;;  %v1352_v43 = vmul.f32 %v22552_v14, %v584_v19 }
 0x12e   : >> { %2058 = vst.msk [vmem:[%s22903_s30 + $0x20] sm:$0xff] %vm333_vm0, %v2032_v42  ;;  %v1101_v60 = vsel %vm889_vm3, %v27205_v9, %v1100_v57  ;;  %v1103_v46 = vsel %vm889_vm3, %v1100_v57, %v27096_v22  ;;  %v27098_v8 = vrot.slane %v23106_v25, 6  ;;  %v1258_v35 = vrot.slane %v1194_v29, 3 }
 0x12f   : >> { %2057 = vst.msk [vmem:[%s22903_s30 + $0x18] sm:$0xff] %vm333_vm0, %v2031_v20  ;;  %v1164_v0 = vadd.f32 %v1101_v60, %v22814_v24  ;;  %v1165_v20 = vadd.f32 %v1103_v46, %v22816_v40  ;;  %v27206_v42 = vrot.slane %v22970_v15, 4  ;;  %v1594_v38 = vsel %vm1392_vm5, %v1591_v28, %v27097_v21 }
 0x130   : >> { %v1749_v9 = vrot.slane %v1691_v6, 5  ;;  %v1907_v61 = vrot.slane %v1849_v32, 6  ;;  %v23137_v22 = vmul.f32 %v22528_v47, %v584_v19  ;;  %v1662_v40 = vadd.f32 %v1594_v38, %v22944_v16  ;;  %v23150_v6 = vpop.permute.xlu1 %598 }
 0x131   : >> { %v1592_v54 = vsel %vm1392_vm5, %v27206_v42, %v1591_v28  ;;  %v23142_v29 = vmul.f32 %v22535_v56, %v584_v19  ;;  %v1416_v15 = vrot.slane %v1352_v43, 4  ;;  %v27209_v60 = vrot.slane %v22991_v39, 5  ;;  %27211 = vst [vmem:[#allocation18_spill] sm:$0xff] %v23150_v6 }
 0x132   : >> { %27207 = vst [vmem:[#allocation16_spill] sm:$0xff] %v23137_v22  ;;  %v1661_v24 = vadd.f32 %v1592_v54, %v22913_v58  ;;  %v27210_v28 = vrot.slane %v23097_v5, 5  ;;  %v27212_v42 = vrot.slane %v22978_v7, 3  ;;  %v27213_v16 = vrot.slane %v23091_v53, 3 }
 0x133   : >> { %27208 = vst [vmem:[#allocation17_spill] sm:$0xff] %v23142_v29  ;;  %v1750_v46 = vsel %vm1737_vm6, %v27209_v60, %v1749_v9  ;;  %v27214_v60 = vrot.slane %v22998_v13, 6  ;;  %v23165_v7 = vmul.f32 %v22532_v55, %v584_v19  ;;  %v27216_v13 = vrot.slane %v22981_v37, 4  ;;  %v23179_v19 = vpop.permute.xlu0 %593 }
 0x134   : >> { %v1752_v32 = vsel %vm1737_vm6, %v1749_v9, %v27210_v28  ;;  %v1259_v58 = vsel %vm1234_vm4, %v27212_v42, %v1258_v35  ;;  %v1261_v54 = vsel %vm1234_vm4, %v1258_v35, %v27213_v16  ;;  %v1819_v38 = vadd.f32 %v1750_v46, %v1661_v24  ;;  %27218 = vst [vmem:[#allocation20_spill] sm:$0xff] %v23179_v19 }
 0x135   : >> { %v1820_v43 = vadd.f32 %v1752_v32, %v1662_v40  ;;  %v1322_v21 = vadd.f32 %v1259_v58, %v1164_v0  ;;  %v1323_v39 = vadd.f32 %v1261_v54, %v1165_v20  ;;  %v1908_v57 = vsel %vm1895_vm7, %v27214_v60, %v1907_v61  ;;  %27215 = vst [vmem:[#allocation19_spill] sm:$0xff] %v23165_v7  ;;  %v23234_v20 = vpop.permute.xlu1 %608 }
 0x136   : >> { %v1910_v9 = vsel %vm1895_vm7, %v1907_v61, %v27098_v8  ;;  %v1977_v28 = vadd.f32 %v1908_v57, %v1819_v38  ;;  %v23169_v35 = vmul.f32 %v22566_v26, %v23150_v6  ;;  %v1417_v24 = vsel %vm1392_vm5, %v27216_v13, %v1416_v15  ;;  %27220 = vst [vmem:[#allocation22_spill] sm:$0xff] %v23234_v20 }
 0x137   : >> { %v1978_v42 = vadd.f32 %v1910_v9, %v1820_v43  ;;  %v27217_v40 = vrot.slane %v23102_v17, 4  ;;  %v23185_v32 = vmul.f32 %v22540_v62, %v23150_v6  ;;  %v23189_v37 = vmul.f32 %v22569_v27, %v23150_v6 }
 0x138   : >> { %v2008_v57 = vadd.f32 %v22414_v4, %v1977_v28  ;;  %v23191_v58 = vadd.f32 %v1417_v24, %v1322_v21  ;;  %v23201_v54 = vmul.f32 %v22409_v3, %v23150_v6  ;;  %v1597_v60 = vrot.slane %v23169_v35, 4 }
 0x139   : >> { %v1419_v61 = vsel %vm1392_vm5, %v1416_v15, %v27217_v40  ;;  %v2009_v46 = vadd.f32 %v22414_v4, %v1978_v42  ;;  %v23197_v15 = vmul.f32 %v22547_v2, %v23150_v6  ;;  %v1536_v9 = vmul.f32 %v22566_v26, %v23179_v19 }
 0x13a   : >> { %v23193_v16 = vadd.f32 %v1419_v61, %v1323_v39  ;;  %v2033_v38 = vmax.f32 %v2008_v57, 0.0  ;;  %v23208_v21 = vmul.f32 %v22528_v47, %v23150_v6  ;;  %v23212_v39 = vmul.f32 %v22552_v14, %v23150_v6 }
 0x13b   : >> { %v2034_v43 = vmax.f32 %v2009_v46, 0.0  ;;  %v1693_v28 = vmul.f32 %v22569_v27, %v23179_v19  ;;  %v1851_v42 = vmul.f32 %v22409_v3, %v23179_v19  ;;  %v23226_v24 = vmul.f32 %v22540_v62, %v23179_v19 }
 0x13c   : >> { %27219 = vst [vmem:[#allocation21_spill] sm:$0xff] %v23208_v21  ;;  %2059 = vst.msk [vmem:[%s22903_s30 + $0x28] sm:$0xff] %vm333_vm0, %v2033_v38  ;;  %v1595_v40 = vrot.slane %v1536_v9, 4  ;;  %v23232_v46 = vmul.f32 %v22547_v2, %v23179_v19  ;;  %v27221_v0 = vrot.slane %v23082_v12, 4  ;;  %v23247_v8 = vmul.f32 %v22528_v47, %v23179_v19 }
 0x13d   : >> { %2060 = vst.msk [vmem:[%s22903_s30 + $0x30] sm:$0xff] %vm333_vm0, %v2034_v43  ;;  %v1753_v38 = vrot.slane %v1693_v28, 5  ;;  %v23238_v43 = vmul.f32 %v22552_v14, %v23179_v19  ;;  %v1911_v61 = vrot.slane %v1851_v42, 6  ;;  %v27223_v6 = vrot.slane %v23097_v5, 5 }
 0x13e   : >> { %v1596_v35 = vsel %vm1392_vm5, %v27221_v0, %v1595_v40  ;;  %v1598_v9 = vsel %vm1392_vm5, %v1595_v40, %v1597_v60  ;;  %27222 = vst [vmem:[#allocation23_spill] sm:$0xff] %v23247_v8  ;;  %v27224_v0 = vrot.slane %v23189_v37, 5  ;;  %v23260_v40 = vmul.f32 %v22566_v26, %v23234_v20 }
 0x13f   : >> { %v1663_v28 = vadd.f32 %v1596_v35, %v22972_v23  ;;  %v1664_v13 = vadd.f32 %v1598_v9, %v23022_v1  ;;  %v1754_v12 = vsel %vm1737_vm6, %v27223_v6, %v1753_v38  ;;  %v23265_v1 = vmul.f32 %v22540_v62, %v23234_v20  ;;  %v23267_v35 = vpop.permute.xlu0 %603 }
 0x140   : >> { %v1756_v42 = vsel %vm1737_vm6, %v1753_v38, %v27224_v0  ;;  %27225 = vst [vmem:[#allocation24_spill] sm:$0xff] %v23267_v35  ;;  %v27226_v6 = vrot.slane %v23106_v25, 6  ;;  %v27227_v9 = vrot.slane %v23201_v54, 6  ;;  %v23286_v5 = vmul.f32 %v22547_v2, %v23234_v20 }
 0x141   : >> { %v1821_v21 = vadd.f32 %v1754_v12, %v1663_v28  ;;  %v1822_v23 = vadd.f32 %v1756_v42, %v1664_v13  ;;  %v23278_v28 = vmul.f32 %v22569_v27, %v23234_v20  ;;  %v23282_v42 = vmul.f32 %v22528_v47, %v23234_v20 }
 0x142   : >> { %v1912_v38 = vsel %vm1895_vm7, %v27226_v6, %v1911_v61  ;;  %v1914_v0 = vsel %vm1895_vm7, %v1911_v61, %v27227_v9  ;;  %v23290_v25 = vmul.f32 %v22552_v14, %v23234_v20  ;;  %v23295_v6 = vmul.f32 %v22409_v3, %v23234_v20 }
 0x143   : >> { %v1979_v13 = vadd.f32 %v1912_v38, %v1821_v21  ;;  %v1980_v12 = vadd.f32 %v1914_v0, %v1822_v23  ;;  %27228 = vst [vmem:[#allocation25_spill] sm:$0xff] %v23282_v42  ;;  %v1538_v21 = vmul.f32 %v22566_v26, %v23267_v35  ;;  %v1695_v0 = vmul.f32 %v22569_v27, %v23267_v35 }
 0x144   : >> { %v23307_v7 = vmul.f32 %v22540_v62, %v23267_v35  ;;  %v1853_v20 = vmul.f32 %v22409_v3, %v23267_v35  ;;  %v27229_v57 = vrot.slane %v23260_v40, 4 }
 0x145   : >> { %v2010_v23 = vadd.f32 %v22414_v4, %v1979_v13  ;;  %v2011_v38 = vadd.f32 %v22414_v4, %v1980_v12  ;;  %v1599_v61 = vrot.slane %v1538_v21, 4  ;;  %v23313_v12 = vmul.f32 %v22547_v2, %v23267_v35  ;;  %v23320_v21 = vpop.permute.xlu1 %672 }
 0x146   : >> { %v1757_v9 = vrot.slane %v1695_v0, 5  ;;  %v1915_v48 = vrot.slane %v1853_v20, 6  ;;  %27230 = vst [vmem:[#allocation26_spill] sm:$0xff] %v23320_v21  ;;  %v23336_v20 = vmul.f32 %v22552_v14, %v23267_v35 }
 0x147   : >> { %v2035_v13 = vmax.f32 %v2010_v23, 0.0  ;;  %v2036_v42 = vmax.f32 %v2011_v38, 0.0  ;;  %v1600_v19 = vsel %vm1392_vm5, %v1597_v60, %v1599_v61  ;;  %v1602_v55 = vsel %vm1392_vm5, %v1599_v61, %v27229_v57  ;;  %v23349_v38 = vpop.permute.xlu0 %613 }
 0x148   : >> { %v1665_v0 = vadd.f32 %v1600_v19, %v23084_v18  ;;  %v1666_v8 = vadd.f32 %v1602_v55, %v23086_v50  ;;  %v23332_v60 = vmul.f32 %v22528_v47, %v23267_v35  ;;  %v27232_v57 = vrot.slane %v23189_v37, 5  ;;  %27234 = vst [vmem:[#allocation28_spill] sm:$0xff] %v23349_v38 }
 0x149   : >> { %2061 = vst.msk [vmem:[%s22903_s30 + $0x38] sm:$0xff] %vm333_vm0, %v2035_v13  ;;  %2062 = vst.msk [vmem:[%s22903_s30 + $0x40] sm:$0xff] %vm333_vm0, %v2036_v42  ;;  %v27233_v61 = vrot.slane %v23278_v28, 5  ;;  %v23347_v50 = vmul.f32 %v22566_v26, %v23320_v21  ;;  %v27235_v37 = vrot.slane %v23201_v54, 6  ;;  %v27236_v35 = vrot.slane %v23295_v6, 6 }
 0x14a   : >> { %27231 = vst [vmem:[#allocation27_spill] sm:$0xff] %v23332_v60  ;;  %v1758_v42 = vsel %vm1737_vm6, %v27232_v57, %v1757_v9  ;;  %v23372_v54 = vmul.f32 %v22540_v62, %v23320_v21  ;;  %v23392_v18 = vmul.f32 %v22547_v2, %v23349_v38 }
 0x14b   : >> { %v1760_v13 = vsel %vm1737_vm6, %v1757_v9, %v27233_v61  ;;  %v1823_v19 = vadd.f32 %v1758_v42, %v1665_v0  ;;  %v1916_v57 = vsel %vm1895_vm7, %v27235_v37, %v1915_v48  ;;  %v1918_v9 = vsel %vm1895_vm7, %v1915_v48, %v27236_v35 }
 0x14c   : >> { %v1824_v55 = vadd.f32 %v1760_v13, %v1666_v8  ;;  %v23360_v0 = vmul.f32 %v22569_v27, %v23320_v21  ;;  %v23364_v61 = vmul.f32 %v22528_v47, %v23320_v21  ;;  %v23368_v13 = vmul.f32 %v22535_v56, %v23320_v21 }
 0x14d   : >> { %v1981_v8 = vadd.f32 %v1916_v57, %v1823_v19  ;;  %v23377_v35 = vmul.f32 %v22409_v3, %v23320_v21  ;;  %v23381_v19 = vmul.f32 %v22540_v62, %v23349_v38  ;;  %v1540_v57 = vmul.f32 %v22566_v26, %v23349_v38 }
 0x14e   : >> { %v1982_v42 = vadd.f32 %v1918_v9, %v1824_v55  ;;  %27237 = vst [vmem:[#allocation29_spill] sm:$0xff] %v23364_v61  ;;  %27238 = vst [vmem:[#allocation30_spill] sm:$0xff] %v23368_v13  ;;  %v1697_v9 = vmul.f32 %v22569_v27, %v23349_v38  ;;  %v23396_v48 = vmul.f32 %v22552_v14, %v23349_v38  ;;  %v27242_v22 = vrot.slane %v23360_v0, 5 }
 0x14f   : >> { %v2012_v55 = vadd.f32 %v22414_v4, %v1981_v8  ;;  %v1855_v8 = vmul.f32 %v22409_v3, %v23349_v38  ;;  %v1603_v60 = vrot.slane %v1540_v57, 4  ;;  %v27239_v38 = vrot.slane %v23260_v40, 4 }
 0x150   : >> { %v2013_v37 = vadd.f32 %v22414_v4, %v1982_v42  ;;  %v1761_v21 = vrot.slane %v1697_v9, 5  ;;  %v1112_v29 = vrot.slane %v23381_v19, 2  ;;  %v27241_v40 = vrot.slane %v23278_v28, 5 }
 0x151   : >> { %v2037_v42 = vmax.f32 %v2012_v55, 0.0  ;;  %v1604_v55 = vsel %vm1392_vm5, %v27239_v38, %v1603_v60  ;;  %v1919_v9 = vrot.slane %v1855_v8, 6  ;;  %v27243_v8 = vrot.slane %v22876_v33, 1 }
 0x152   : >> { %v2038_v47 = vmax.f32 %v2013_v37, 0.0  ;;  %v27240_v37 = vrot.slane %v23347_v50, 4  ;;  %v1667_v52 = vadd.f32 %v1604_v55, %v23191_v58  ;;  %v1762_v38 = vsel %vm1737_vm6, %v27241_v40, %v1761_v21 }
 0x153   : >> { %2063 = vst.msk [vmem:[%s22903_s30 + $0x48] sm:$0xff] %vm333_vm0, %v2037_v42  ;;  %v27246_v28 = vrot.slane %v22747_v34, 2  ;;  %v27247_v56 = vrot.slane %v23295_v6, 6  ;;  %v27248_v33 = vrot.slane %v23377_v35, 6 }
 0x154   : >> { %2064 = vst.msk [vmem:[%s22903_s30 + $0x50] sm:$0xff] %vm333_vm0, %v2038_v47  ;;  %v1606_v57 = vsel %vm1392_vm5, %v1603_v60, %v27240_v37  ;;  %v999_v47 = vpop.permute.xlu1 %998  ;;  %v1764_v60 = vsel %vm1737_vm6, %v1761_v21, %v27242_v22  ;;  %v27244_v37 = vrot.slane %v22740_v51, 1  ;;  %v1825_v58 = vadd.f32 %v1762_v38, %v1667_v52 }
 0x155   : >> { %v1668_v42 = vadd.f32 %v1606_v57, %v23193_v16  ;;  %v27245_v57 = vrot.slane %v22928_v49, 2  ;;  %v1920_v22 = vsel %vm1895_vm7, %v27247_v56, %v1919_v9  ;;  %v1922_v51 = vsel %vm1895_vm7, %v1919_v9, %v27248_v33 }
 0x156   : >> { %v760_v23 = vsel %vm731_vm2, %v27244_v37, %v27243_v8  ;;  %v23444_v21 = vmul.f32 %v22540_v62, %v999_v47  ;;  %v27249_v52 = vrot.slane %v22865_v63, 2  ;;  %v1983_v34 = vadd.f32 %v1920_v22, %v1825_v58 }
 0x157   : >> { %v1826_v55 = vadd.f32 %v1764_v60, %v1668_v42  ;;  %v821_v16 = vadd.f32 %v760_v23, %v22744_v36  ;;  %v918_v40 = vsel %vm889_vm3, %v27246_v28, %v27245_v57  ;;  %v27250_v36 = vmov %v27245_v57 }
 0x158   : >> { %v920_v23 = vsel %vm889_vm3, %v27250_v36, %v27249_v52  ;;  %v23453_v56 = vmul.f32 %v22566_v26, %v999_v47  ;;  %v23456_v60 = vmul.f32 %v22569_v27, %v999_v47  ;;  %v27251_v9 = vrot.slane %v23226_v24, 2 }
 0x159   : >> { %v1984_v42 = vadd.f32 %v1922_v51, %v1826_v55  ;;  %v979_v38 = vadd.f32 %v918_v40, %v821_v16  ;;  %v980_v6 = vadd.f32 %v920_v23, %v22908_v59  ;;  %v27252_v8 = vrot.slane %v23060_v45, 2  ;;  %v994_v40 = vpop.permute.xlu0 %993 }
 0x15a   : >> { %v27253_v49 = vrot.slane %v23185_v32, 2  ;;  %v27254_v58 = vmov %v27251_v9  ;;  %v2014_v59 = vadd.f32 %v22414_v4, %v1983_v34  ;;  %v23471_v22 = vmul.f32 %v22547_v2, %v999_v47 }
 0x15b   : >> { %v1105_v37 = vsel %vm889_vm3, %v27252_v8, %v27251_v9  ;;  %v2015_v16 = vadd.f32 %v22414_v4, %v1984_v42  ;;  %v23474_v45 = vmul.f32 %v22552_v14, %v999_v47  ;;  %v27255_v33 = vrot.slane %v23232_v46, 3 }
 0x15c   : >> { %v1107_v55 = vsel %vm889_vm3, %v27254_v58, %v27253_v49  ;;  %v1166_v57 = vadd.f32 %v1105_v37, %v979_v38  ;;  %v27256_v24 = vrot.slane %v23091_v53, 3  ;;  %v27257_v52 = vrot.slane %v23197_v15, 3 }
 0x15d   : >> { %v1167_v28 = vadd.f32 %v1107_v55, %v980_v6  ;;  %v27258_v36 = vmov %v27255_v33  ;;  %v2039_v34 = vmax.f32 %v2014_v59, 0.0  ;;  %v2040_v42 = vmax.f32 %v2015_v16, 0.0 }
 0x15e   : >> { %v1263_v51 = vsel %vm1234_vm4, %v27256_v24, %v27255_v33  ;;  %v1265_v23 = vsel %vm1234_vm4, %v27258_v36, %v27257_v52  ;;  %v1609_v9 = vrot.slane %v23453_v56, 4  ;;  %v1767_v8 = vrot.slane %v23456_v60, 5 }
 0x15f   : >> { %v1324_v38 = vadd.f32 %v1263_v51, %v1166_v57  ;;  %v1325_v6 = vadd.f32 %v1265_v23, %v1167_v28  ;;  %v23489_v37 = vmul.f32 %v22409_v3, %v999_v47  ;;  %v1542_v53 = vmul.f32 %v22566_v26, %v994_v40  ;;  %2065 = vst.msk [vmem:[%s22903_s30 + $0x58] sm:$0xff] %vm333_vm0, %v2039_v34 }
 0x160   : >> { %2066 = vst.msk [vmem:[%s22903_s30 + $0x60] sm:$0xff] %vm333_vm0, %v2040_v42  ;;  %v27259_v46 = vrot.slane %v23238_v43, 4  ;;  %v27260_v49 = vrot.slane %v23102_v17, 4  ;;  %v27261_v55 = vrot.slane %v23212_v39, 4  ;;  %v1699_v47 = vmul.f32 %v22569_v27, %v994_v40 }
 0x161   : >> { %v1857_v57 = vmul.f32 %v22409_v3, %v994_v40  ;;  %v23509_v28 = vmul.f32 %v22540_v62, %v994_v40  ;;  %v23512_v33 = vmul.f32 %v22547_v2, %v994_v40  ;;  %v23515_v17 = vmul.f32 %v22552_v14, %v994_v40 }
 0x162   : >> { %v1421_v58 = vsel %vm1392_vm5, %v27260_v49, %v27259_v46  ;;  %v27262_v59 = vmov %v27259_v46  ;;  %v1607_v24 = vrot.slane %v1542_v53, 4  ;;  %v1765_v36 = vrot.slane %v1699_v47, 5  ;;  %v1009_v47 = vpop.permute.xlu1 %1008 }
 0x163   : >> { %v1423_v16 = vsel %vm1392_vm5, %v27262_v59, %v27261_v55  ;;  %v1482_v51 = vadd.f32 %v1421_v58, %v1324_v38  ;;  %v1923_v43 = vrot.slane %v1857_v57, 6  ;;  %v1925_v34 = vrot.slane %v23489_v37, 6  ;;  %v27308_v58 = vld [vmem:[#allocation18_spill] sm:$0xff] }
 0x164   : >> { %v1483_v52 = vadd.f32 %v1423_v16, %v1325_v6  ;;  %v27263_v42 = vrot.slane %v23347_v50, 4  ;;  %v1610_v49 = vsel %vm1392_vm5, %v1607_v24, %v1609_v9  ;;  %v27264_v59 = vrot.slane %v23360_v0, 5 }
 0x165   : >> { %v1768_v16 = vsel %vm1737_vm6, %v1765_v36, %v1767_v8  ;;  %v27266_v0 = vrot.slane %v22987_v31, 1  ;;  %v27269_v57 = vrot.slane %v22865_v63, 2  ;;  %v23558_v31 = vmul.f32 %v22540_v62, %v1009_v47 }
 0x166   : >> { %v1608_v46 = vsel %vm1392_vm5, %v27263_v42, %v1607_v24  ;;  %v1670_v6 = vadd.f32 %v1610_v49, %v1483_v52  ;;  %v1766_v50 = vsel %vm1737_vm6, %v27264_v59, %v1765_v36  ;;  %v27267_v49 = vrot.slane %v22839_v30, 1 }
 0x167   : >> { %v1669_v38 = vadd.f32 %v1608_v46, %v1482_v51  ;;  %v27265_v51 = vrot.slane %v23377_v35, 6  ;;  %v1926_v46 = vsel %vm1895_vm7, %v1923_v43, %v1925_v34  ;;  %v27268_v36 = vrot.slane %v23034_v44, 2 }
 0x168   : >> { %v1828_v42 = vadd.f32 %v1768_v16, %v1670_v6  ;;  %v764_v59 = vsel %vm731_vm2, %v27267_v49, %v27266_v0  ;;  %v27270_v35 = vrot.slane %v23025_v11, 2  ;;  %v23561_v30 = vmul.f32 %v22566_v26, %v1009_v47 }
 0x169   : >> { %v1827_v24 = vadd.f32 %v1766_v50, %v1669_v38  ;;  %v1924_v52 = vsel %vm1895_vm7, %v27265_v51, %v1923_v43  ;;  %v922_v38 = vsel %vm889_vm3, %v27269_v57, %v27268_v36  ;;  %v27271_v6 = vmov %v27268_v36 }
 0x16a   : >> { %v924_v50 = vsel %vm889_vm3, %v27271_v6, %v27270_v35  ;;  %v1986_v43 = vadd.f32 %v1926_v46, %v1828_v42  ;;  %v23564_v51 = vmul.f32 %v22569_v27, %v1009_v47  ;;  %v823_v63 = vadd.f32 %v764_v59, %v22862_v10  ;;  %v1004_v59 = vpop.permute.xlu0 %1003 }
 0x16b   : >> { %v1985_v16 = vadd.f32 %v1924_v52, %v1827_v24  ;;  %v982_v57 = vadd.f32 %v924_v50, %v23013_v41  ;;  %v27272_v0 = vrot.slane %v23265_v1, 2  ;;  %v27273_v44 = vrot.slane %v23307_v7, 2 }
 0x16c   : >> { %v2017_v52 = vadd.f32 %v22414_v4, %v1986_v43  ;;  %v23576_v46 = vmul.f32 %v22409_v3, %v1009_v47  ;;  %v27275_v10 = vrot.slane %v23185_v32, 2  ;;  %v23584_v36 = vmul.f32 %v22547_v2, %v1009_v47 }
 0x16d   : >> { %v1111_v24 = vsel %vm889_vm3, %v27273_v44, %v27272_v0  ;;  %v2016_v42 = vadd.f32 %v22414_v4, %v1985_v16  ;;  %v27274_v49 = vmov %v27273_v44  ;;  %v23587_v35 = vmul.f32 %v22552_v14, %v1009_v47 }
 0x16e   : >> { %v1109_v41 = vsel %vm889_vm3, %v27275_v10, %v27274_v49  ;;  %v981_v6 = vadd.f32 %v922_v38, %v823_v63  ;;  %v1169_v50 = vadd.f32 %v1111_v24, %v982_v57  ;;  %v2042_v43 = vmax.f32 %v2017_v52, 0.0 }
 0x16f   : >> { %27276 = vst [vmem:[#allocation31_spill] sm:$0xff] %v23587_v35  ;;  %v2041_v16 = vmax.f32 %v2016_v42, 0.0  ;;  %v1613_v0 = vrot.slane %v23561_v30, 4  ;;  %v27277_v7 = vrot.slane %v23286_v5, 3  ;;  %v27278_v32 = vrot.slane %v23313_v12, 3  ;;  %v27306_v30 = vld [vmem:[#allocation11_spill] sm:$0xff] }
 0x170   : >> { %v1771_v49 = vrot.slane %v23564_v51, 5  ;;  %v1168_v10 = vadd.f32 %v1109_v41, %v981_v6  ;;  %v1544_v55 = vmul.f32 %v22566_v26, %v1004_v59  ;;  %2068 = vst.msk [vmem:[%s22903_s30 + $0x70] sm:$0xff] %vm333_vm0, %v2042_v43  ;;  %v1929_v47 = vrot.slane %v23576_v46, 6 }
 0x171   : >> { %v1269_v44 = vsel %vm1234_vm4, %v27278_v32, %v27277_v7  ;;  %2067 = vst.msk [vmem:[%s22903_s30 + $0x68] sm:$0xff] %vm333_vm0, %v2041_v16  ;;  %v27279_v38 = vmov %v27278_v32  ;;  %v27280_v63 = vrot.slane %v23197_v15, 3  ;;  %v1701_v24 = vmul.f32 %v22569_v27, %v1004_v59 }
 0x172   : >> { %v1327_v53 = vadd.f32 %v1269_v44, %v1169_v50  ;;  %v1859_v42 = vmul.f32 %v22409_v3, %v1004_v59  ;;  %v27281_v41 = vrot.slane %v23290_v25, 4  ;;  %v27282_v6 = vrot.slane %v23336_v20, 4  ;;  %v1019_v20 = vpop.permute.xlu1 %1018 }
 0x173   : >> { %v1267_v57 = vsel %vm1234_vm4, %v27280_v63, %v27279_v38  ;;  %v23615_v16 = vmul.f32 %v22540_v62, %v1004_v59  ;;  %v1611_v43 = vrot.slane %v1544_v55, 4  ;;  %v27284_v15 = vrot.slane %v23212_v39, 4 }
 0x174   : >> { %v1326_v52 = vadd.f32 %v1267_v57, %v1168_v10  ;;  %v1427_v50 = vsel %vm1392_vm5, %v27282_v6, %v27281_v41  ;;  %v27283_v12 = vmov %v27282_v6  ;;  %v23623_v44 = vmul.f32 %v22547_v2, %v1004_v59 }
 0x175   : >> { %v1425_v7 = vsel %vm1392_vm5, %v27284_v15, %v27283_v12  ;;  %v1485_v32 = vadd.f32 %v1427_v50, %v1327_v53  ;;  %v1769_v10 = vrot.slane %v1701_v24, 5  ;;  %v1612_v63 = vsel %vm1392_vm5, %v1609_v9, %v1611_v43  ;;  %v27290_v53 = vld [vmem:[#allocation17_spill] sm:$0xff] }
 0x176   : >> { %v1484_v38 = vadd.f32 %v1425_v7, %v1326_v52  ;;  %v1614_v55 = vsel %vm1392_vm5, %v1611_v43, %v1613_v0  ;;  %v1927_v57 = vrot.slane %v1859_v42, 6  ;;  %v23636_v52 = vmul.f32 %v22552_v14, %v1004_v59  ;;  %v27286_v7 = vld [vmem:[#allocation16_spill] sm:$0xff] }
 0x177   : >> { %v1672_v6 = vadd.f32 %v1614_v55, %v1485_v32  ;;  %v1772_v9 = vsel %vm1737_vm6, %v1769_v10, %v1771_v49  ;;  %v1770_v50 = vsel %vm1737_vm6, %v1767_v8, %v1769_v10  ;;  %v23646_v12 = vmul.f32 %v22540_v62, %v1019_v20 }
 0x178   : >> { %v1671_v56 = vadd.f32 %v1612_v63, %v1484_v38  ;;  %v1930_v59 = vsel %vm1895_vm7, %v1927_v57, %v1929_v47  ;;  %v27287_v32 = vrot.slane %v27286_v7, 1  ;;  %v27288_v38 = vld [vmem:[#allocation12_spill] sm:$0xff]  ;;  %v27291_v41 = vrot.slane %v27290_v53, 2 }
 0x179   : >> { %v1830_v43 = vadd.f32 %v1772_v9, %v1672_v6  ;;  %27285 = vst [vmem:[#allocation32_spill] sm:$0xff] %v23646_v12  ;;  %v27289_v63 = vrot.slane %v27288_v38, 1  ;;  %v27292_v60 = vrot.slane %v23025_v11, 2  ;;  %v1928_v10 = vsel %vm1895_vm7, %v1925_v34, %v1927_v57 }
 0x17a   : >> { %v1829_v15 = vadd.f32 %v1770_v50, %v1671_v56  ;;  %v23665_v56 = vmul.f32 %v22566_v26, %v1019_v20  ;;  %v23668_v9 = vmul.f32 %v22569_v27, %v1019_v20  ;;  %v23670_v50 = vpop.permute.xlu0 %1013  ;;  %v23674_v11 = vmul.f32 %v22547_v2, %v1019_v20 }
 0x17b   : >> { %v768_v55 = vsel %vm731_vm2, %v27289_v63, %v27287_v32  ;;  %v926_v8 = vsel %vm889_vm3, %v27292_v60, %v27291_v41  ;;  %v1988_v6 = vadd.f32 %v1930_v59, %v1830_v43  ;;  %v27293_v41 = vld [vmem:[#allocation13_spill] sm:$0xff]  ;;  %v23679_v34 = vmul.f32 %v22552_v14, %v1019_v20 }
 0x17c   : >> { %v1987_v38 = vadd.f32 %v1928_v10, %v1829_v15  ;;  %v825_v63 = vadd.f32 %v768_v55, %v27293_v41  ;;  %v23682_v57 = vmul.f32 %v22409_v3, %v1019_v20  ;;  %v27295_v43 = vrot.slane %v23265_v1, 2  ;;  %v27304_v1 = vld [vmem:[#allocation23_spill] sm:$0xff] }
 0x17d   : >> { %v2019_v37 = vadd.f32 %v22414_v4, %v1988_v6  ;;  %27294 = vst [vmem:[#allocation16_spill] sm:$0xff] %v23679_v34  ;;  %v1546_v55 = vmul.f32 %v22566_v26, %v23670_v50  ;;  %v23694_v10 = vmul.f32 %v22569_v27, %v23670_v50  ;;  %v1502_v6 = vpop.permute.xlu1 %1501  ;;  %v27126_v32 = vrot.slane %v23665_v56, 4 }
 0x17e   : >> { %v1113_v15 = vsel %vm889_vm3, %v27295_v43, %v1112_v29  ;;  %v2018_v59 = vadd.f32 %v22414_v4, %v1987_v38  ;;  %v983_v60 = vadd.f32 %v926_v8, %v825_v63  ;;  %v27296_v63 = vrot.slane %v23392_v18, 3 }
 0x17f   : >> { %v2044_v20 = vmax.f32 %v2019_v37, 0.0  ;;  %v1615_v38 = vrot.slane %v1546_v55, 4  ;;  %v27125_v8 = vrot.slane %v23694_v10, 5  ;;  %v27297_v39 = vrot.slane %v23286_v5, 3 }
 0x180   : >> { %v2043_v43 = vmax.f32 %v2018_v59, 0.0  ;;  %v1170_v42 = vadd.f32 %v1113_v15, %v983_v60  ;;  %v23709_v37 = vmul.f32 %v22409_v3, %v23670_v50  ;;  %v23712_v41 = vmul.f32 %v22566_v26, %v1502_v6  ;;  %v27302_v59 = vld [vmem:[#allocation20_spill] sm:$0xff] }
 0x181   : >> { %2070 = vst.msk [vmem:[%s22903_s30 + $0x80] sm:$0xff] %vm333_vm0, %v2044_v20  ;;  %v1271_v24 = vsel %vm1234_vm4, %v27297_v39, %v27296_v63  ;;  %v23715_v15 = vmul.f32 %v22569_v27, %v1502_v6  ;;  %v27298_v55 = vrot.slane %v23396_v48, 4  ;;  %v27299_v5 = vrot.slane %v23290_v25, 4 }
 0x182   : >> { %2069 = vst.msk [vmem:[%s22903_s30 + $0x78] sm:$0xff] %vm333_vm0, %v2043_v43  ;;  %v1328_v60 = vadd.f32 %v1271_v24, %v1170_v42  ;;  %v23726_v20 = vmul.f32 %v22409_v3, %v1502_v6  ;;  %v1616_v63 = vsel %vm1392_vm5, %v1613_v0, %v1615_v38  ;;  %v23734_v43 = vsel %vm1392_vm5, %v1615_v38, %v27126_v32  ;;  %v27301_v0 = vld [vmem:[#allocation10_spill] sm:$0xff]  ;;  %v27305_v6 = vld [vmem:[#allocation21_spill] sm:$0xff] }
 0x183   : >> { %v1429_v39 = vsel %vm1392_vm5, %v27299_v5, %v27298_v55  ;;  %v1774_v25 = vsel %vm1737_vm6, %v1771_v49, %v27125_v8  ;;  %v27127_v24 = vrot.slane %v23709_v37, 6  ;;  %v27300_v55 = vld [vmem:[#allocation14_spill] sm:$0xff]  ;;  %v640_v51 = vmul.f32 %v27301_v0, %v27302_v59  ;;  %v27303_v49 = vld [vmem:[#allocation15_spill] sm:$0xff] }
 0x184   : >> { %v1486_v42 = vadd.f32 %v1429_v39, %v1328_v60  ;;  %v639_v5 = vmul.f32 %v27301_v0, %v27300_v55  ;;  %v769_v8 = vrot.slane %v27303_v49, 1  ;;  %v771_v60 = vrot.slane %v27304_v1, 1 }
 0x185   : >> { %v1932_v38 = vsel %vm1895_vm7, %v1929_v47, %v27127_v24  ;;  %v773_v32 = vrot.slane %v27305_v6, 1  ;;  %v856_v40 = vmul.f32 %v27306_v30, %v27300_v55  ;;  %v857_v23 = vmul.f32 %v27306_v30, %v27302_v59 }
 0x186   : >> { %v1673_v39 = vadd.f32 %v1616_v63, %v1486_v42  ;;  %v27307_v46 = vrot.slane %v27286_v7, 1  ;;  %v772_v24 = vsel %vm731_vm2, %v769_v8, %v771_v60  ;;  %v23766_v49 = vmul.f32 %v27306_v30, %v27308_v58  ;;  %v27310_v7 = vld [vmem:[#allocation19_spill] sm:$0xff] }
 0x187   : >> { %v27309_v1 = vrot.slane %v23372_v54, 2  ;;  %v774_v59 = vsel %vm731_vm2, %v771_v60, %v773_v32  ;;  %v929_v12 = vrot.slane %v857_v23, 2  ;;  %v27311_v35 = vrot.slane %v23509_v28, 2 }
 0x188   : >> { %v770_v47 = vsel %vm731_vm2, %v27307_v46, %v769_v8  ;;  %v1831_v42 = vadd.f32 %v1774_v25, %v1673_v39  ;;  %v827_v46 = vadd.f32 %v772_v24, %v639_v5  ;;  %v828_v34 = vadd.f32 %v774_v59, %v640_v51 }
 0x189   : >> { %v1115_v63 = vsel %vm889_vm3, %v1112_v29, %v27309_v1  ;;  %v826_v55 = vadd.f32 %v770_v47, %v27310_v7  ;;  %v927_v8 = vrot.slane %v856_v40, 2  ;;  %v931_v13 = vrot.slane %v23766_v49, 2  ;;  %v27315_v47 = vld [vmem:[#allocation26_spill] sm:$0xff]  ;;  %v1497_v40 = vpop.permute.xlu0 %1496 }
 0x18a   : >> { %v1989_v61 = vadd.f32 %v1932_v38, %v1831_v42  ;;  %v27312_v19 = vmov %v27309_v1  ;;  %v27313_v25 = vrot.slane %v23444_v21, 2  ;;  %v27314_v39 = vmov %v27311_v35 }
 0x18b   : >> { %v1117_v29 = vsel %vm889_vm3, %v27312_v19, %v27311_v35  ;;  %v1201_v24 = vmul.f32 %v22547_v2, %v27315_v47  ;;  %v27316_v23 = vrot.slane %v27290_v53, 2  ;;  %v930_v38 = vsel %vm889_vm3, %v927_v8, %v929_v12 }
 0x18c   : >> { %v1119_v60 = vsel %vm889_vm3, %v27314_v39, %v27313_v25  ;;  %v932_v54 = vsel %vm889_vm3, %v929_v12, %v931_v13  ;;  %v27317_v35 = vrot.slane %v23471_v22, 3  ;;  %v27318_v28 = vrot.slane %v23512_v33, 3 }
 0x18d   : >> { %v928_v5 = vsel %vm889_vm3, %v27316_v23, %v927_v8  ;;  %v2020_v1 = vadd.f32 %v22414_v4, %v1989_v61  ;;  %v985_v59 = vadd.f32 %v930_v38, %v827_v46  ;;  %v986_v53 = vadd.f32 %v932_v54, %v828_v34 }
 0x18e   : >> { %v1277_v51 = vsel %vm1234_vm4, %v27318_v28, %v27317_v35  ;;  %v984_v42 = vadd.f32 %v928_v5, %v826_v55  ;;  %v1272_v7 = vrot.slane %v1201_v24, 3  ;;  %v1359_v8 = vmul.f32 %v22552_v14, %v27315_v47 }
 0x18f   : >> { %v27319_v19 = vrot.slane %v23474_v45, 4  ;;  %v27320_v12 = vrot.slane %v23515_v17, 4  ;;  %v1548_v39 = vmul.f32 %v22566_v26, %v1497_v40  ;;  %v2045_v23 = vmax.f32 %v2020_v1, 0.0 }
 0x190   : >> { %v1171_v35 = vadd.f32 %v1115_v63, %v984_v42  ;;  %v1172_v28 = vadd.f32 %v1117_v29, %v985_v59  ;;  %v1173_v61 = vadd.f32 %v1119_v60, %v986_v53  ;;  %v27321_v55 = vrot.slane %v23392_v18, 3 }
 0x191   : >> { %v1435_v25 = vsel %vm1392_vm5, %v27320_v12, %v27319_v19  ;;  %v27322_v46 = vrot.slane %v23512_v33, 3  ;;  %v1430_v24 = vrot.slane %v1359_v8, 4  ;;  %v1619_v5 = vrot.slane %v1548_v39, 4  ;;  %2071 = vst.msk [vmem:[%s22903_s30 + $0x88] sm:$0xff] %vm333_vm0, %v2045_v23  ;;  %v1512_v23 = vpop.permute.xlu1 %1511 }
 0x192   : >> { %v1273_v34 = vsel %vm1234_vm4, %v27321_v55, %v1272_v7  ;;  %v1331_v19 = vadd.f32 %v1277_v51, %v1173_v61  ;;  %v1705_v1 = vmul.f32 %v22569_v27, %v1497_v40  ;;  %v27323_v63 = vrot.slane %v23396_v48, 4 }
 0x193   : >> { %v1275_v47 = vsel %vm1234_vm4, %v1272_v7, %v27322_v46  ;;  %v1329_v38 = vadd.f32 %v1273_v34, %v1171_v35  ;;  %v27324_v18 = vmov %v27320_v12  ;;  %v27325_v33 = vrot.slane %v23665_v56, 4 }
 0x194   : >> { %v1330_v54 = vadd.f32 %v1275_v47, %v1172_v28  ;;  %v1431_v29 = vsel %vm1392_vm5, %v27323_v63, %v1430_v24  ;;  %v1433_v60 = vsel %vm1392_vm5, %v1430_v24, %v27324_v18  ;;  %v27326_v59 = vrot.slane %v23712_v41, 4 }
 0x195   : >> { %v1620_v42 = vsel %vm1392_vm5, %v27325_v33, %v1619_v5  ;;  %v1487_v7 = vadd.f32 %v1431_v29, %v1329_v38  ;;  %v1489_v8 = vadd.f32 %v1435_v25, %v1331_v19  ;;  %v1777_v12 = vrot.slane %v1705_v1, 5 }
 0x196   : >> { %v1622_v53 = vsel %vm1392_vm5, %v1619_v5, %v27326_v59  ;;  %v1488_v51 = vadd.f32 %v1433_v60, %v1330_v54  ;;  %v1284_v48 = vrot.slane %v23674_v11, 3  ;;  %v23835_v39 = vmul.f32 %v22540_v62, %v23670_v50  ;;  %v27334_v59 = vld [vmem:[#allocation27_spill] sm:$0xff] }
 0x197   : >> { %v1937_v17 = vrot.slane %v23726_v20, 6  ;;  %v1863_v56 = vmul.f32 %v22409_v3, %v1497_v40  ;;  %v27327_v35 = vrot.slane %v23668_v9, 5  ;;  %v27328_v28 = vrot.slane %v23694_v10, 5 }
 0x198   : >> { %v1674_v25 = vadd.f32 %v23734_v43, %v1487_v7  ;;  %v1675_v55 = vadd.f32 %v1620_v42, %v1488_v51  ;;  %v1676_v34 = vadd.f32 %v1622_v53, %v1489_v8  ;;  %v27329_v46 = vrot.slane %v23682_v57, 6  ;;  %v27335_v7 = vld [vmem:[#allocation24_spill] sm:$0xff]  ;;  %v27336_v51 = vld [vmem:[#allocation25_spill] sm:$0xff] }
 0x199   : >> { %v1776_v61 = vsel %vm1737_vm6, %v27328_v28, %v27327_v35  ;;  %v27330_v62 = vrot.slane %v23709_v37, 6  ;;  %v27331_v24 = vmov %v27327_v35  ;;  %v27332_v5 = vrot.slane %v23715_v15, 5 }
 0x19a   : >> { %v1778_v40 = vsel %vm1737_vm6, %v27331_v24, %v1777_v12  ;;  %v1935_v38 = vrot.slane %v1863_v56, 6  ;;  %v1832_v54 = vadd.f32 %v1776_v61, %v1674_v25  ;;  %v23857_v1 = vmul.f32 %v22566_v26, %v1512_v23  ;;  %v27337_v56 = vld [vmem:[#allocation22_spill] sm:$0xff] }
 0x19b   : >> { %v1934_v47 = vsel %vm1895_vm7, %v27330_v62, %v27329_v46  ;;  %v1780_v10 = vsel %vm1737_vm6, %v1777_v12, %v27332_v5  ;;  %v1833_v19 = vadd.f32 %v1778_v40, %v1675_v55  ;;  %v27333_v63 = vmov %v27329_v46 }
 0x19c   : >> { %v1834_v43 = vadd.f32 %v1780_v10, %v1676_v34  ;;  %v1936_v37 = vsel %vm1895_vm7, %v27333_v63, %v1935_v38  ;;  %v1938_v9 = vsel %vm1895_vm7, %v1935_v38, %v1937_v17  ;;  %v23866_v29 = vmul.f32 %v22569_v27, %v1512_v23  ;;  %v1507_v10 = vpop.permute.xlu0 %1506 }
 0x19d   : >> { %v641_v18 = vmul.f32 %v27301_v0, %v27308_v58  ;;  %v1990_v60 = vadd.f32 %v1934_v47, %v1832_v54  ;;  %v1991_v33 = vadd.f32 %v1936_v37, %v1833_v19  ;;  %v775_v53 = vrot.slane %v27334_v59, 1 }
 0x19e   : >> { %v1992_v42 = vadd.f32 %v1938_v9, %v1834_v43  ;;  %v642_v57 = vmul.f32 %v27301_v0, %v27335_v7  ;;  %v777_v8 = vrot.slane %v27336_v51, 1  ;;  %v859_v12 = vmul.f32 %v27306_v30, %v27335_v7 }
 0x19f   : >> { %v23878_v35 = vmul.f32 %v27306_v30, %v27337_v56  ;;  %v2021_v28 = vadd.f32 %v22414_v4, %v1990_v60  ;;  %v2022_v58 = vadd.f32 %v22414_v4, %v1991_v33  ;;  %v776_v25 = vsel %vm731_vm2, %v773_v32, %v775_v53 }
 0x1a0   : >> { %v2023_v61 = vadd.f32 %v22414_v4, %v1992_v42  ;;  %v778_v55 = vsel %vm731_vm2, %v775_v53, %v777_v8  ;;  %v829_v34 = vadd.f32 %v776_v25, %v641_v18  ;;  %v933_v46 = vrot.slane %v859_v12, 2 }
 0x1a1   : >> { %v935_v62 = vrot.slane %v23878_v35, 2  ;;  %v2046_v47 = vmax.f32 %v2021_v28, 0.0  ;;  %v2047_v24 = vmax.f32 %v2022_v58, 0.0  ;;  %v830_v5 = vadd.f32 %v778_v55, %v642_v57 }
 0x1a2   : >> { %v2048_v40 = vmax.f32 %v2023_v61, 0.0  ;;  %v934_v32 = vsel %vm889_vm3, %v931_v13, %v933_v46  ;;  %v27338_v38 = vrot.slane %v23615_v16, 2  ;;  %v27339_v54 = vrot.slane %v23444_v21, 2 }
 0x1a3   : >> { %v936_v6 = vsel %vm889_vm3, %v933_v46, %v935_v62  ;;  %v27340_v43 = vrot.slane %v23558_v31, 2  ;;  %v23908_v49 = vmul.f32 %v22547_v2, %v23670_v50  ;;  %v23912_v13 = vmul.f32 %v22552_v14, %v23670_v50  ;;  %2072 = vst.msk [vmem:[%s22903_s30 + $0x90] sm:$0xff] %vm333_vm0, %v2046_v47  ;;  %2073 = vst.msk [vmem:[%s22903_s30 + $0x98] sm:$0xff] %vm333_vm0, %v2047_v24  ;;  %v1522_v47 = vpop.permute.xlu1 %1521 }
 0x1a4   : >> { %v1121_v19 = vsel %vm889_vm3, %v27339_v54, %v27338_v38  ;;  %v27341_v63 = vmov %v27338_v38  ;;  %2074 = vst.msk [vmem:[%s22903_s30 + $0xa0] sm:$0xff] %vm333_vm0, %v2048_v40  ;;  %v987_v21 = vadd.f32 %v934_v32, %v829_v34  ;;  %v988_v9 = vadd.f32 %v936_v6, %v830_v5 }
 0x1a5   : >> { %v1123_v37 = vsel %vm889_vm3, %v27341_v63, %v27340_v43  ;;  %v1625_v16 = vrot.slane %v23857_v1, 4  ;;  %v1550_v18 = vmul.f32 %v22566_v26, %v1507_v10  ;;  %v1707_v60 = vmul.f32 %v22569_v27, %v1507_v10 }
 0x1a6   : >> { %v1865_v2 = vmul.f32 %v22409_v3, %v1507_v10  ;;  %v1124_v33 = vrot.slane %v23835_v39, 2  ;;  %v23926_v14 = vmul.f32 %v22409_v3, %v1512_v23  ;;  %v1174_v50 = vadd.f32 %v1121_v19, %v987_v21 }
 0x1a7   : >> { %v1175_v42 = vadd.f32 %v1123_v37, %v988_v9  ;;  %v1783_v59 = vrot.slane %v23866_v29, 5  ;;  %v27342_v53 = vrot.slane %v23623_v44, 3  ;;  %v27343_v7 = vrot.slane %v23471_v22, 3  ;;  %v27348_v22 = vld [vmem:[#allocation31_spill] sm:$0xff]  ;;  %v27353_v37 = vld [vmem:[#allocation9_spill] sm:$0xff] }
 0x1a8   : >> { %v27344_v12 = vrot.slane %v23584_v36, 3  ;;  %v1623_v39 = vrot.slane %v1550_v18, 4  ;;  %v27346_v25 = vrot.slane %v23636_v52, 4  ;;  %v27347_v55 = vrot.slane %v23474_v45, 4 }
 0x1a9   : >> { %v1279_v57 = vsel %vm1234_vm4, %v27343_v7, %v27342_v53  ;;  %v27345_v28 = vmov %v27342_v53  ;;  %v1781_v46 = vrot.slane %v1707_v60, 5  ;;  %v27349_v24 = vrot.slane %v27348_v22, 4 }
 0x1aa   : >> { %v1281_v58 = vsel %vm1234_vm4, %v27345_v28, %v27344_v12  ;;  %v1332_v61 = vadd.f32 %v1279_v57, %v1174_v50  ;;  %v1437_v34 = vsel %vm1392_vm5, %v27347_v55, %v27346_v25  ;;  %v27350_v40 = vmov %v27346_v25 }
 0x1ab   : >> { %v1333_v23 = vadd.f32 %v1281_v58, %v1175_v42  ;;  %v1439_v5 = vsel %vm1392_vm5, %v27350_v40, %v27349_v24  ;;  %v27351_v44 = vrot.slane %v23712_v41, 4  ;;  %v1626_v32 = vsel %vm1392_vm5, %v1623_v39, %v1625_v16  ;;  %v27352_v41 = vld [vmem:[#allocation28_spill] sm:$0xff]  ;;  %v27355_v58 = vld [vmem:[#allocation29_spill] sm:$0xff] }
 0x1ac   : >> { %v1939_v6 = vrot.slane %v1865_v2, 6  ;;  %v1282_v45 = vrot.slane %v23908_v49, 3  ;;  %v1440_v38 = vrot.slane %v23912_v13, 4  ;;  %v1490_v54 = vadd.f32 %v1437_v34, %v1332_v61  ;;  %v1517_v13 = vpop.permute.xlu0 %1516  ;;  %v27357_v34 = vld [vmem:[#allocation30_spill] sm:$0xff]  ;;  %v27360_v40 = vld [vmem:[#allocation32_spill] sm:$0xff] }
 0x1ad   : >> { %v1624_v10 = vsel %vm1392_vm5, %v27351_v44, %v1623_v39  ;;  %v1491_v19 = vadd.f32 %v1439_v5, %v1333_v23  ;;  %v1941_v43 = vrot.slane %v23926_v14, 6  ;;  %v1553_v52 = vmul.f32 %v22566_v26, %v1522_v47  ;;  %v3373_v14 = vld [vmem:[%s27070_s3 + $0x20] sm:$0xff] (%p447_p5) }
 0x1ae   : >> { %v1710_v63 = vmul.f32 %v22569_v27, %v1522_v47  ;;  %v703_v21 = vmul.f32 %v27353_v37, %v27352_v41  ;;  %v1677_v9 = vadd.f32 %v1624_v10, %v1490_v54  ;;  %v27354_v60 = vrot.slane %v23715_v15, 5 }
 0x1af   : >> { %v1678_v18 = vadd.f32 %v1626_v32, %v1491_v19  ;;  %v861_v49 = vmul.f32 %v27306_v30, %v27352_v41  ;;  %v1784_v50 = vsel %vm1737_vm6, %v1781_v46, %v1783_v59  ;;  %v1940_v42 = vsel %vm1895_vm7, %v1937_v17, %v1939_v6  ;;  %v27362_v32 = vld [vmem:[#allocation16_spill] sm:$0xff] }
 0x1b0   : >> { %v1782_v2 = vsel %vm1737_vm6, %v27354_v60, %v1781_v46  ;;  %v643_v53 = vmul.f32 %v27301_v0, %v27337_v56  ;;  %v779_v7 = vrot.slane %v703_v21, 1  ;;  %v644_v12 = vmul.f32 %v27301_v0, %v27352_v41 }
 0x1b1   : >> { %v1835_v57 = vadd.f32 %v1782_v2, %v1677_v9  ;;  %v1836_v15 = vadd.f32 %v1784_v50, %v1678_v18  ;;  %v937_v28 = vrot.slane %v861_v49, 2  ;;  %v1942_v30 = vsel %vm1895_vm7, %v1939_v6, %v1941_v43 }
 0x1b2   : >> { %v780_v20 = vsel %vm731_vm2, %v777_v8, %v779_v7  ;;  %v27356_v17 = vrot.slane %v27355_v58, 1  ;;  %v1552_v56 = vmul.f32 %v22566_v26, %v1517_v13  ;;  %v27358_v46 = vrot.slane %v27357_v34, 2 }
 0x1b3   : >> { %v1993_v61 = vadd.f32 %v1940_v42, %v1835_v57  ;;  %v1994_v23 = vadd.f32 %v1942_v30, %v1836_v15  ;;  %v831_v25 = vadd.f32 %v780_v20, %v643_v53  ;;  %v938_v0 = vsel %vm889_vm3, %v935_v62, %v937_v28 }
 0x1b4   : >> { %v782_v39 = vsel %vm731_vm2, %v779_v7, %v27356_v17  ;;  %v940_v51 = vsel %vm889_vm3, %v937_v28, %v27358_v46  ;;  %v27359_v8 = vrot.slane %v23558_v31, 2  ;;  %v27361_v5 = vrot.slane %v27360_v40, 2 }
 0x1b5   : >> { %v832_v55 = vadd.f32 %v782_v39, %v644_v12  ;;  %v2024_v44 = vadd.f32 %v22414_v4, %v1993_v61  ;;  %v2025_v10 = vadd.f32 %v22414_v4, %v1994_v23  ;;  %v989_v35 = vadd.f32 %v938_v0, %v831_v25  ;;  %v3375_v61 = vld [vmem:[%s27070_s3 + $0x30] sm:$0xff] (%p447_p5) }
 0x1b6   : >> { %v1125_v24 = vsel %vm889_vm3, %v27359_v8, %v1124_v33  ;;  %v1127_v26 = vsel %vm889_vm3, %v1124_v33, %v27361_v5  ;;  %v1442_v6 = vrot.slane %v27362_v32, 4  ;;  %v1629_v54 = vrot.slane %v1553_v52, 4  ;;  %v4922_v23 = vld [vmem:[#allocation3 + $0xa] sm:$0xff] (%p447_p5)  ;;  %v4923_v0 = vld [vmem:[#allocation3 + $0x12] sm:$0xff] (%p447_p5) }
 0x1b7   : >> { %v990_v62 = vadd.f32 %v940_v51, %v832_v55  ;;  %v1627_v19 = vrot.slane %v1552_v56, 4  ;;  %v1709_v31 = vmul.f32 %v22569_v27, %v1517_v13  ;;  %v2049_v41 = vmax.f32 %v2024_v44, 0.0 }
 0x1b8   : >> { %v2050_v37 = vmax.f32 %v2025_v10, 0.0  ;;  %v1176_v21 = vadd.f32 %v1125_v24, %v989_v35  ;;  %v1868_v33 = vmul.f32 %v22409_v3, %v1522_v47  ;;  %v27363_v18 = vrot.slane %v23584_v36, 3 }
 0x1b9   : >> { %v1177_v9 = vadd.f32 %v1127_v26, %v990_v62  ;;  %v1285_v2 = vsel %vm1234_vm4, %v1282_v45, %v1284_v48  ;;  %v1867_v49 = vmul.f32 %v22409_v3, %v1517_v13  ;;  %2075 = vst.msk [vmem:[%s22903_s30 + $0xa8] sm:$0xff] %vm333_vm0, %v2049_v41  ;;  %v1787_v27 = vrot.slane %v1710_v63, 5  ;;  %v3376_v3 = vld [vmem:[%s27070_s3 + $0x38] sm:$0xff] (%p447_p5) }
 0x1ba   : >> { %v1283_v60 = vsel %vm1234_vm4, %v27363_v18, %v1282_v45  ;;  %2076 = vst.msk [vmem:[%s22903_s30 + $0xb0] sm:$0xff] %vm333_vm0, %v2050_v37  ;;  %v27364_v42 = vrot.slane %v27348_v22, 4  ;;  %v1443_v36 = vsel %vm1392_vm5, %v1440_v38, %v1442_v6  ;;  %v1628_v11 = vsel %vm1392_vm5, %v1625_v16, %v1627_v19 }
 0x1bb   : >> { %v1334_v52 = vadd.f32 %v1283_v60, %v1176_v21  ;;  %v1335_v50 = vadd.f32 %v1285_v2, %v1177_v9  ;;  %v1630_v48 = vsel %vm1392_vm5, %v1627_v19, %v1629_v54  ;;  %v1785_v45 = vrot.slane %v1709_v31, 5  ;;  %v3377_v31 = vld [vmem:[%s27070_s3 + $0x40] sm:$0xff] (%p447_p5) }
 0x1bc   : >> { %v1441_v47 = vsel %vm1392_vm5, %v27364_v42, %v1440_v38  ;;  %v1945_v7 = vrot.slane %v1868_v33, 6  ;;  %v1943_v63 = vrot.slane %v1867_v49, 6  ;;  %v3378_v33 = vld [vmem:[%s27070_s3 + $0x48] sm:$0xff] (%p447_p5)  ;;  %vm11317_vm3 = vcmask (%p447_p5), 253952  }
 0x1bd   : >> { %v1492_v13 = vadd.f32 %v1441_v47, %v1334_v52  ;;  %v1493_v53 = vadd.f32 %v1443_v36, %v1335_v50  ;;  %v1786_v22 = vsel %vm1737_vm6, %v1783_v59, %v1785_v45  ;;  %v1788_v38 = vsel %vm1737_vm6, %v1785_v45, %v1787_v27  ;;  %v3374_v59 = vld [vmem:[%s27070_s3 + $0x28] sm:$0xff] (%p447_p5) }
 0x1be   : >> { %v1944_v16 = vsel %vm1895_vm7, %v1941_v43, %v1943_v63  ;;  %v1946_v28 = vsel %vm1895_vm7, %v1943_v63, %v1945_v7  ;;  %v4921_v43 = vld [vmem:[#allocation3 + $0x2] sm:$0xff] (%p447_p5)  ;;  %v24046_v56 = vpack.c.bf16 (%p447_p5), %v3374_v59, %v3373_v14  ;;  %v24065_v27 = vpack.c.bf16 (%p447_p5), %v3378_v33, %v3377_v31 }
 0x1bf   : >> { %v1679_v57 = vadd.f32 %v1628_v11, %v1492_v13  ;;  %v1680_v15 = vadd.f32 %v1630_v48, %v1493_v53  ;;  %19343 = vmatprep.mubr.msk.f32.mxu0 (%p447_p5), %vm333_vm0, %v4921_v43  ;;  %vm11330_vm4 = vcmask (%p447_p5), 261126  }
 0x1c0   : > { %20920 = vmatprep.subr.bf16.mxu0 (%p447_p5), %v24046_v56 }
 0x1c1   : >> { %v1837_v1 = vadd.f32 %v1786_v22, %v1679_v57  ;;  %v1838_v12 = vadd.f32 %v1788_v38, %v1680_v15  ;;  %20922 = vmatpush3.bf16.msra.mxu0 (%p447_p5), %v24046_v56 }
 0x1c3   : >> { %v1995_v30 = vadd.f32 %v1944_v16, %v1837_v1  ;;  %v1996_v20 = vadd.f32 %v1946_v28, %v1838_v12  ;;  %449 = sbr.rel (!%p447_p5) target bundleno = 70 (0x46), region = 484 }
 0x1c4   : > { %19344 = vmatmul.mubr.msk.f32.vlgmr.msra.gmra.mrb[0].mxu0 (%p447_p5), %vm333_vm0, %v4922_v23 }
 0x1c5   : >> { %v2026_v58 = vadd.f32 %v22414_v4, %v1995_v30  ;;  %v2027_v17 = vadd.f32 %v22414_v4, %v1996_v20  ;;  %v20923_v4 = vpack.c.bf16 (%p447_p5), %v3376_v3, %v3375_v61  ;;  %19346 = vmatprep.mubr.msk.f32.mxu0 (%p447_p5), %vm333_vm0, %v4923_v0 }
 0x1c7   : >> { %v2051_v39 = vmax.f32 %v2026_v58, 0.0  ;;  %v2052_v29 = vmax.f32 %v2027_v17, 0.0  ;;  %20924 = vmatprep.subr.bf16.mxu0 (%p447_p5), %v20923_v4 }
 0x1c8   : > { %20926 = vmatpush3.bf16.msra.mxu0 (%p447_p5), %v20923_v4 }
 0x1c9   : >> { %2077 = vst.msk [vmem:[%s22903_s30 + $0xb8] sm:$0xff] %vm333_vm0, %v2051_v39  ;;  %2078 = vst.msk [vmem:[%s22903_s30 + $0xc0] sm:$0xff] %vm333_vm0, %v2052_v29  ;;  %20928 = vmatprep.subr.bf16.mxu0 (%p447_p5), %v24065_v27 }
 0x1d0   : > { %v2079_v25 = vld [vmem:[#allocation2] ss:$2 sm:$0xff]  ;;  %v2085_v55 = vld [vmem:[#allocation2 + $0x30] ss:$2 sm:$0xff]  ;;  %v2379_v46 = vld [vmem:[#allocation2 + $0x1] ss:$2 sm:$0xff] }
 0x1d1   : > { %v2087_v34 = vld [vmem:[#allocation2 + $0x40] ss:$2 sm:$0xff]  ;;  %v2385_v51 = vld [vmem:[#allocation2 + $0x31] ss:$2 sm:$0xff]  ;;  %v2387_v8 = vld [vmem:[#allocation2 + $0x41] ss:$2 sm:$0xff]  ;;  %v2678_v62 = vmax.f32 %v2079_v25, %v2379_v46 }
 0x1d2   : > { %v2681_v24 = vmax.f32 %v2085_v55, %v2385_v51  ;;  %v2081_v40 = vld [vmem:[#allocation2 + $0x10] ss:$2 sm:$0xff]  ;;  %v2682_v26 = vmax.f32 %v2087_v34, %v2387_v8  ;;  %v2381_v44 = vld [vmem:[#allocation2 + $0x11] ss:$2 sm:$0xff]  ;;  %v2083_v35 = vld [vmem:[#allocation2 + $0x20] ss:$2 sm:$0xff] }
 0x1d3   : > { %v2089_v5 = vld [vmem:[#allocation2 + $0x50] ss:$2 sm:$0xff]  ;;  %v2389_v10 = vld [vmem:[#allocation2 + $0x51] ss:$2 sm:$0xff]  ;;  %v2091_v54 = vld [vmem:[#allocation2 + $0x60] ss:$2 sm:$0xff]  ;;  %v2679_v37 = vmax.f32 %v2081_v40, %v2381_v44 }
 0x1d4   : > { %v2833_v32 = vrot.slane %v2681_v24, 1  ;;  %v2683_v6 = vmax.f32 %v2089_v5, %v2389_v10  ;;  %v2383_v19 = vld [vmem:[#allocation2 + $0x21] ss:$2 sm:$0xff]  ;;  %v2834_v41 = vrot.slane %v2682_v26, 1  ;;  %v2097_v9 = vld [vmem:[#allocation2 + $0x90] ss:$2 sm:$0xff] }
 0x1d5   : > { %v2391_v21 = vld [vmem:[#allocation2 + $0x61] ss:$2 sm:$0xff]  ;;  %v2099_v2 = vld [vmem:[#allocation2 + $0xa0] ss:$2 sm:$0xff]  ;;  %v2397_v49 = vld [vmem:[#allocation2 + $0x91] ss:$2 sm:$0xff]  ;;  %v2680_v50 = vmax.f32 %v2083_v35, %v2383_v19 }
 0x1d6   : > { %v2836_v18 = vrot.slane %v2683_v6, 1  ;;  %v2684_v60 = vmax.f32 %v2091_v54, %v2391_v21  ;;  %v2835_v52 = vsel %vm731_vm2, %v2833_v32, %v2834_v41  ;;  %v2399_v42 = vld [vmem:[#allocation2 + $0xa1] ss:$2 sm:$0xff]  ;;  %v2687_v47 = vmax.f32 %v2097_v9, %v2397_v49  ;;  %v2093_v36 = vld [vmem:[#allocation2 + $0x70] ss:$2 sm:$0xff] }
 0x1d7   : > { %v2101_v11 = vld [vmem:[#allocation2 + $0xb0] ss:$2 sm:$0xff]  ;;  %v2843_v48 = vmax.f32 %v2678_v62, %v2835_v52  ;;  %v2688_v53 = vmax.f32 %v2099_v2, %v2399_v42  ;;  %v2393_v7 = vld [vmem:[#allocation2 + $0x71] ss:$2 sm:$0xff]  ;;  %v2095_v38 = vld [vmem:[#allocation2 + $0x80] ss:$2 sm:$0xff] }
 0x1d8   : > { %v2837_v45 = vsel %vm731_vm2, %v2834_v41, %v2836_v18  ;;  %v2838_v13 = vrot.slane %v2684_v60, 1  ;;  %v2401_v63 = vld [vmem:[#allocation2 + $0xb1] ss:$2 sm:$0xff]  ;;  %v2853_v15 = vrot.slane %v2687_v47, 1  ;;  %v2103_v1 = vld [vmem:[#allocation2 + $0xc0] ss:$2 sm:$0xff]  ;;  %v2685_v28 = vmax.f32 %v2093_v36, %v2393_v7 }
 0x1d9   : > { %v2844_v57 = vmax.f32 %v2679_v37, %v2837_v45  ;;  %v2689_v22 = vmax.f32 %v2101_v11, %v2401_v63  ;;  %2846 = vst.msk [vmem:[#allocation3 + $0x1b] sm:$0xff] %vm333_vm0, %v2843_v48  ;;  %v2854_v16 = vrot.slane %v2688_v53, 1  ;;  %v2395_v30 = vld [vmem:[#allocation2 + $0x81] ss:$2 sm:$0xff]  ;;  %v2109_v29 = vld [vmem:[#allocation2 + $0xf0] ss:$2 sm:$0xff] }
 0x1da   : > { %v2839_v12 = vsel %vm731_vm2, %v2836_v18, %v2838_v13  ;;  %v2403_v20 = vld [vmem:[#allocation2 + $0xc1] ss:$2 sm:$0xff]  ;;  %v2111_v14 = vld [vmem:[#allocation2 + $0x100] ss:$2 sm:$0xff]  ;;  %v2686_v43 = vmax.f32 %v2095_v38, %v2395_v30  ;;  %v2409_v61 = vld [vmem:[#allocation2 + $0xf1] ss:$2 sm:$0xff] }
 0x1db   : > { %2847 = vst.msk [vmem:[#allocation3 + $0x23] sm:$0xff] %vm333_vm0, %v2844_v57  ;;  %v2845_v58 = vmax.f32 %v2680_v50, %v2839_v12  ;;  %v2856_v17 = vrot.slane %v2689_v22, 1  ;;  %v24073_v39 = vmax.f32 %v2103_v1, %v2403_v20  ;;  %v2855_v59 = vsel %vm731_vm2, %v2853_v15, %v2854_v16  ;;  %v2411_v3 = vld [vmem:[#allocation2 + $0x101] ss:$2 sm:$0xff]  ;;  %v2105_v4 = vld [vmem:[#allocation2 + $0xd0] ss:$2 sm:$0xff] }
 0x1dc   : > { %v2864_v23 = vmax.f32 %v2684_v60, %v2855_v59  ;;  %v2693_v0 = vmax.f32 %v2109_v29, %v2409_v61  ;;  %v2113_v34 = vld [vmem:[#allocation2 + $0x110] ss:$2 sm:$0xff]  ;;  %v2405_v46 = vld [vmem:[#allocation2 + $0xd1] ss:$2 sm:$0xff]  ;;  %v2694_v8 = vmax.f32 %v2111_v14, %v2411_v3  ;;  %v2107_v40 = vld [vmem:[#allocation2 + $0xe0] ss:$2 sm:$0xff] }
 0x1dd   : > { %2848 = vst.msk [vmem:[#allocation3 + $0x2b] sm:$0xff] %vm333_vm0, %v2845_v58  ;;  %v2857_v25 = vsel %vm731_vm2, %v2854_v16, %v2856_v17  ;;  %v2858_v55 = vrot.slane %v24073_v39, 1  ;;  %v2413_v24 = vld [vmem:[#allocation2 + $0x111] ss:$2 sm:$0xff]  ;;  %v2115_v5 = vld [vmem:[#allocation2 + $0x120] ss:$2 sm:$0xff]  ;;  %v2691_v19 = vmax.f32 %v2105_v4, %v2405_v46 }
 0x1de   : > { %v2865_v51 = vmax.f32 %v2685_v28, %v2857_v25  ;;  %2869 = vst.msk [vmem:[#allocation3 + $0x33] sm:$0xfc] %vm2868_vm8, %v2864_v23  ;;  %v2878_v10 = vrot.slane %v2693_v0, 1  ;;  %v2695_v35 = vmax.f32 %v2113_v34, %v2413_v24  ;;  %v2407_v62 = vld [vmem:[#allocation2 + $0xe1] ss:$2 sm:$0xff]  ;;  %v2879_v54 = vrot.slane %v2694_v8, 1 }
 0x1df   : > { %v2859_v26 = vsel %vm731_vm2, %v2856_v17, %v2858_v55  ;;  %v2867_v44 = vmax.f32 %v2687_v47, %v2858_v55  ;;  %v2415_v32 = vld [vmem:[#allocation2 + $0x121] ss:$2 sm:$0xff]  ;;  %v2121_v41 = vld [vmem:[#allocation2 + $0x150] ss:$2 sm:$0xff]  ;;  %v2123_v37 = vld [vmem:[#allocation2 + $0x160] ss:$2 sm:$0xff]  ;;  %v2692_v33 = vmax.f32 %v2107_v40, %v2407_v62 }
 0x1e0   : > { %2870 = vst.msk [vmem:[#allocation3 + $0x3b] sm:$0xff] %vm333_vm0, %v2865_v51  ;;  %v2866_v6 = vmax.f32 %v2686_v43, %v2859_v26  ;;  %v24082_v31 = vmax.f32 %v2115_v5, %v2415_v32  ;;  %v4924_v21 = vld [vmem:[#allocation3 + $0x1a] sm:$0xff]  ;;  %v2881_v9 = vrot.slane %v2695_v35, 1  ;;  %v2880_v49 = vsel %vm731_vm2, %v2878_v10, %v2879_v54 }
 0x1e1   : > { %2873 = vst.msk [vmem:[#allocation3 + $0x4b] sm:$0x3] %vm2872_vm9, %v2867_v44  ;;  %v2421_v18 = vld [vmem:[#allocation2 + $0x151] ss:$2 sm:$0xff]  ;;  %v2423_v60 = vld [vmem:[#allocation2 + $0x161] ss:$2 sm:$0xff]  ;;  %19347 = vmatmul.mubr.msk.f32.gmra.mrb[2].mxu0 %vm333_vm0, %v4924_v21  ;;  %v2889_v11 = vmax.f32 %v24073_v39, %v2880_v49 }
 0x1e2   : > { %v4925_v2 = vld [vmem:[#allocation3 + $0x22] sm:$0xff]  ;;  %2871 = vst.msk [vmem:[#allocation3 + $0x43] sm:$0xff] %vm333_vm0, %v2866_v6  ;;  %v2883_v52 = vrot.slane %v24082_v31, 1  ;;  %v24089_v50 = vmax.f32 %v2121_v41, %v2421_v18  ;;  %v2700_v42 = vmax.f32 %v2123_v37, %v2423_v60  ;;  %v2117_v47 = vld [vmem:[#allocation2 + $0x130] ss:$2 sm:$0xff]  ;;  %v2882_v48 = vsel %vm731_vm2, %v2879_v54, %v2881_v9 }
 0x1e3   : > { %v2125_v36 = vld [vmem:[#allocation2 + $0x170] ss:$2 sm:$0xff]  ;;  %19349 = vmatprep.mubr.msk.f32.mxu0 %vm333_vm0, %v4925_v2  ;;  %v2417_v45 = vld [vmem:[#allocation2 + $0x131] ss:$2 sm:$0xff]  ;;  %v2119_v53 = vld [vmem:[#allocation2 + $0x140] ss:$2 sm:$0xff]  ;;  %v2890_v63 = vmax.f32 %v2691_v19, %v2882_v48 }
 0x1e4   : > { %v2425_v13 = vld [vmem:[#allocation2 + $0x171] ss:$2 sm:$0xff]  ;;  %v2884_v57 = vsel %vm731_vm2, %v2881_v9, %v2883_v52  ;;  %v2892_v15 = vmax.f32 %v2693_v0, %v2883_v52  ;;  %v2903_v22 = vrot.slane %v24089_v50, 1  ;;  %v2127_v38 = vld [vmem:[#allocation2 + $0x180] ss:$2 sm:$0xff]  ;;  %v2904_v16 = vrot.slane %v2700_v42, 1 }
 0x1e5   : > { %v4926_v7 = vld [vmem:[#allocation3 + $0x2a] sm:$0xff]  ;;  %2894 = vst.msk [vmem:[#allocation3 + $0x4b] sm:$0xf0] %vm2893_vm10, %v2889_v11  ;;  %v2891_v12 = vmax.f32 %v2692_v33, %v2884_v57  ;;  %v2701_v28 = vmax.f32 %v2125_v36, %v2425_v13  ;;  %v4927_v58 = vld [vmem:[#allocation3 + $0x32] sm:$0xff]  ;;  %v2697_v17 = vmax.f32 %v2117_v47, %v2417_v45 }
 0x1e6   : > { %v2419_v1 = vld [vmem:[#allocation2 + $0x141] ss:$2 sm:$0xff]  ;;  %v2129_v20 = vld [vmem:[#allocation2 + $0x190] ss:$2 sm:$0xff]  ;;  %19350 = vmatmul.mubr.msk.f32.gmra.mrb[4].mxu0 %vm333_vm0, %v4926_v7  ;;  %2895 = vst.msk [vmem:[#allocation3 + $0x53] sm:$0xff] %vm333_vm0, %v2890_v63  ;;  %v2905_v43 = vsel %vm731_vm2, %v2903_v22, %v2904_v16 }
 0x1e7   : > { %v2427_v30 = vld [vmem:[#allocation2 + $0x181] ss:$2 sm:$0xff]  ;;  %2898 = vst.msk [vmem:[#allocation3 + $0x63] sm:$0xf] %vm2897_vm11, %v2892_v15  ;;  %v2135_v29 = vld [vmem:[#allocation2 + $0x1c0] ss:$2 sm:$0xff]  ;;  %19352 = vmatprep.mubr.msk.f32.mxu0 %vm333_vm0, %v4927_v58  ;;  %v2698_v3 = vmax.f32 %v2119_v53, %v2419_v1  ;;  %v2914_v25 = vmax.f32 %v24082_v31, %v2905_v43 }
 0x1e8   : > { %v2702_v39 = vmax.f32 %v2127_v38, %v2427_v30  ;;  %v2137_v14 = vld [vmem:[#allocation2 + $0x1d0] ss:$2 sm:$0xff]  ;;  %2896 = vst.msk [vmem:[#allocation3 + $0x5b] sm:$0xff] %vm333_vm0, %v2891_v12  ;;  %v2906_v61 = vrot.slane %v2701_v28, 1  ;;  %v2429_v4 = vld [vmem:[#allocation2 + $0x191] ss:$2 sm:$0xff] }
 0x1e9   : > { %v4928_v59 = vld [vmem:[#allocation3 + $0x3a] sm:$0xff]  ;;  %v4929_v51 = vld [vmem:[#allocation3 + $0x42] sm:$0xff]  ;;  %v2703_v24 = vmax.f32 %v2129_v20, %v2429_v4  ;;  %2919 = vst.msk [vmem:[#allocation3 + $0x63] sm:$0xc0] %vm2918_vm12, %v2914_v25 }
 0x1ea   : > { %v2435_v23 = vld [vmem:[#allocation2 + $0x1c1] ss:$2 sm:$0xff]  ;;  %v2908_v55 = vrot.slane %v2702_v39, 1  ;;  %v2437_v0 = vld [vmem:[#allocation2 + $0x1d1] ss:$2 sm:$0xff]  ;;  %v2907_v8 = vsel %vm731_vm2, %v2904_v16, %v2906_v61  ;;  %19353 = vmatmul.mubr.msk.f32.gmra.mrb[6].mxu0 %vm333_vm0, %v4928_v59 }
 0x1eb   : > { %v2706_v34 = vmax.f32 %v2135_v29, %v2435_v23  ;;  %v2131_v46 = vld [vmem:[#allocation2 + $0x1a0] ss:$2 sm:$0xff]  ;;  %v2707_v40 = vmax.f32 %v2137_v14, %v2437_v0  ;;  %v2431_v26 = vld [vmem:[#allocation2 + $0x1a1] ss:$2 sm:$0xff]  ;;  %v2915_v44 = vmax.f32 %v2697_v17, %v2907_v8  ;;  %v2133_v6 = vld [vmem:[#allocation2 + $0x1b0] ss:$2 sm:$0xff]  ;;  %19355 = vmatprep.mubr.msk.f32.mxu0 %vm333_vm0, %v4929_v51 }
 0x1ec   : > { %v2139_v5 = vld [vmem:[#allocation2 + $0x1e0] ss:$2 sm:$0xff]  ;;  %v2909_v10 = vsel %vm731_vm2, %v2906_v61, %v2908_v55  ;;  %v2917_v35 = vmax.f32 %v24089_v50, %v2908_v55  ;;  %v2439_v32 = vld [vmem:[#allocation2 + $0x1e1] ss:$2 sm:$0xff]  ;;  %v2141_v41 = vld [vmem:[#allocation2 + $0x1f0] ss:$2 sm:$0xff]  ;;  %v2704_v9 = vmax.f32 %v2131_v46, %v2431_v26 }
 0x1ed   : > { %v2928_v62 = vrot.slane %v2706_v34, 1  ;;  %v2916_v54 = vmax.f32 %v2698_v3, %v2909_v10  ;;  %v2929_v19 = vrot.slane %v2707_v40, 1  ;;  %v2708_v31 = vmax.f32 %v2139_v5, %v2439_v32  ;;  %v2433_v37 = vld [vmem:[#allocation2 + $0x1b1] ss:$2 sm:$0xff]  ;;  %2920 = vst.msk [vmem:[#allocation3 + $0x6b] sm:$0xff] %vm333_vm0, %v2915_v44 }
 0x1ee   : > { %v4930_v21 = vld [vmem:[#allocation3 + $0x4a] sm:$0xff]  ;;  %2923 = vst.msk [vmem:[#allocation3 + $0x7b] sm:$0x3f] %vm2922_vm13, %v2917_v35  ;;  %v4931_v60 = vld [vmem:[#allocation3 + $0x52] sm:$0xff]  ;;  %v2705_v36 = vmax.f32 %v2133_v6, %v2433_v37 }
 0x1ef   : > { %v2441_v33 = vld [vmem:[#allocation2 + $0x1f1] ss:$2 sm:$0xff]  ;;  %v2147_v18 = vld [vmem:[#allocation2 + $0x220] ss:$2 sm:$0xff]  ;;  %2921 = vst.msk [vmem:[#allocation3 + $0x73] sm:$0xff] %vm333_vm0, %v2916_v54  ;;  %v2930_v2 = vsel %vm731_vm2, %v2928_v62, %v2929_v19  ;;  %v2931_v49 = vrot.slane %v2708_v31, 1  ;;  %19356 = vmatmul.mubr.msk.f32.gmra.mrb[8].mxu0 %vm333_vm0, %v4930_v21 }
 0x1f0   : > { %v2709_v52 = vmax.f32 %v2141_v41, %v2441_v33  ;;  %v2149_v50 = vld [vmem:[#allocation2 + $0x230] ss:$2 sm:$0xff]  ;;  %v2447_v42 = vld [vmem:[#allocation2 + $0x221] ss:$2 sm:$0xff]  ;;  %v2938_v47 = vmax.f32 %v2703_v24, %v2930_v2  ;;  %v2449_v11 = vld [vmem:[#allocation2 + $0x231] ss:$2 sm:$0xff]  ;;  %19358 = vmatprep.mubr.msk.f32.mxu0 %vm333_vm0, %v4931_v60 }
 0x1f1   : > { %v2712_v48 = vmax.f32 %v2147_v18, %v2447_v42  ;;  %v2143_v45 = vld [vmem:[#allocation2 + $0x200] ss:$2 sm:$0xff]  ;;  %v2932_v53 = vsel %vm731_vm2, %v2929_v19, %v2931_v49  ;;  %v2713_v63 = vmax.f32 %v2149_v50, %v2449_v11  ;;  %v2443_v15 = vld [vmem:[#allocation2 + $0x201] ss:$2 sm:$0xff]  ;;  %v2145_v12 = vld [vmem:[#allocation2 + $0x210] ss:$2 sm:$0xff] }
 0x1f2   : > { %v4932_v13 = vld [vmem:[#allocation3 + $0x5a] sm:$0xff]  ;;  %v2933_v7 = vrot.slane %v2709_v52, 1  ;;  %2941 = vst.msk [vmem:[#allocation3 + $0x83] sm:$0xff] %vm333_vm0, %v2938_v47  ;;  %v2939_v22 = vmax.f32 %v2704_v9, %v2932_v53  ;;  %v4933_v16 = vld [vmem:[#allocation3 + $0x62] sm:$0xff]  ;;  %v2710_v29 = vmax.f32 %v2143_v45, %v2443_v15 }
 0x1f3   : > { %v2151_v57 = vld [vmem:[#allocation2 + $0x240] ss:$2 sm:$0xff]  ;;  %v2948_v38 = vrot.slane %v2712_v48, 1  ;;  %v2451_v1 = vld [vmem:[#allocation2 + $0x241] ss:$2 sm:$0xff]  ;;  %v2949_v30 = vrot.slane %v2713_v63, 1  ;;  %19359 = vmatmul.mubr.msk.f32.gmra.mrb[10].mxu0 %vm333_vm0, %v4932_v13 }
 0x1f4   : > { %v2934_v28 = vsel %vm731_vm2, %v2931_v49, %v2933_v7  ;;  %v2714_v20 = vmax.f32 %v2151_v57, %v2451_v1  ;;  %v2153_v58 = vld [vmem:[#allocation2 + $0x250] ss:$2 sm:$0xff]  ;;  %v2445_v17 = vld [vmem:[#allocation2 + $0x211] ss:$2 sm:$0xff]  ;;  %2942 = vst.msk [vmem:[#allocation3 + $0x8b] sm:$0xff] %vm333_vm0, %v2939_v22  ;;  %19361 = vmatprep.mubr.msk.f32.mxu0 %vm333_vm0, %v4933_v16 }
 0x1f5   : > { %v2940_v39 = vmax.f32 %v2705_v36, %v2934_v28  ;;  %v2453_v14 = vld [vmem:[#allocation2 + $0x251] ss:$2 sm:$0xff]  ;;  %v2159_v59 = vld [vmem:[#allocation2 + $0x280] ss:$2 sm:$0xff]  ;;  %v2161_v43 = vld [vmem:[#allocation2 + $0x290] ss:$2 sm:$0xff]  ;;  %v2950_v3 = vsel %vm731_vm2, %v2948_v38, %v2949_v30  ;;  %v2711_v46 = vmax.f32 %v2145_v12, %v2445_v17 }
 0x1f6   : > { %v4934_v61 = vld [vmem:[#allocation3 + $0x6a] sm:$0xff]  ;;  %v2951_v4 = vrot.slane %v2714_v20, 1  ;;  %v2715_v23 = vmax.f32 %v2153_v58, %v2453_v14  ;;  %v4935_v0 = vld [vmem:[#allocation3 + $0x72] sm:$0xff]  ;;  %v2959_v34 = vmax.f32 %v2709_v52, %v2950_v3  ;;  %v4936_v40 = vld [vmem:[#allocation3 + $0x7a] sm:$0xff] }
 0x1f7   : > { %v2459_v25 = vld [vmem:[#allocation2 + $0x281] ss:$2 sm:$0xff]  ;;  %v2461_v55 = vld [vmem:[#allocation2 + $0x291] ss:$2 sm:$0xff]  ;;  %2943 = vst.msk [vmem:[#allocation3 + $0x93] sm:$0xff] %vm333_vm0, %v2940_v39  ;;  %19362 = vmatmul.mubr.msk.f32.gmra.mrb[12].mxu0 %vm333_vm0, %v4934_v61 }
 0x1f8   : > { %v2718_v51 = vmax.f32 %v2159_v59, %v2459_v25  ;;  %v2719_v8 = vmax.f32 %v2161_v43, %v2461_v55  ;;  %v2155_v24 = vld [vmem:[#allocation2 + $0x260] ss:$2 sm:$0xff]  ;;  %v2952_v5 = vsel %vm731_vm2, %v2949_v30, %v2951_v4  ;;  %v2953_v26 = vrot.slane %v2715_v23, 1  ;;  %v2455_v10 = vld [vmem:[#allocation2 + $0x261] ss:$2 sm:$0xff]  ;;  %19364 = vmatprep.mubr.msk.f32.mxu0 %vm333_vm0, %v4935_v0 }
 0x1f9   : > { %v2163_v44 = vld [vmem:[#allocation2 + $0x2a0] ss:$2 sm:$0xff]  ;;  %2963 = vst.msk [vmem:[#allocation3 + $0x9b] sm:$0xfc] %vm2868_vm8, %v2959_v34  ;;  %v2960_v35 = vmax.f32 %v2710_v29, %v2952_v5  ;;  %v2463_v6 = vld [vmem:[#allocation2 + $0x2a1] ss:$2 sm:$0xff]  ;;  %v2716_v60 = vmax.f32 %v2155_v24, %v2455_v10 }
 0x1fa   : > { %v2971_v62 = vrot.slane %v2718_v51, 1  ;;  %v2972_v32 = vrot.slane %v2719_v8, 1  ;;  %v2157_v54 = vld [vmem:[#allocation2 + $0x270] ss:$2 sm:$0xff]  ;;  %v4937_v19 = vld [vmem:[#allocation3 + $0x82] sm:$0xff]  ;;  %v2954_v31 = vsel %vm731_vm2, %v2951_v4, %v2953_v26  ;;  %v2962_v41 = vmax.f32 %v2712_v48, %v2953_v26 }
 0x1fb   : > { %v2720_v37 = vmax.f32 %v2163_v44, %v2463_v6  ;;  %v2165_v21 = vld [vmem:[#allocation2 + $0x2b0] ss:$2 sm:$0xff]  ;;  %v2457_v9 = vld [vmem:[#allocation2 + $0x271] ss:$2 sm:$0xff]  ;;  %2964 = vst.msk [vmem:[#allocation3 + $0xa3] sm:$0xff] %vm333_vm0, %v2960_v35  ;;  %v2961_v33 = vmax.f32 %v2711_v46, %v2954_v31  ;;  %19365 = vmatmul.mubr.msk.f32.gmra.mrb[14].mxu0 %vm333_vm0, %v4936_v40 }
 0x1fc   : > { %v2973_v18 = vsel %vm731_vm2, %v2971_v62, %v2972_v32  ;;  %v2465_v2 = vld [vmem:[#allocation2 + $0x2b1] ss:$2 sm:$0xff]  ;;  %v2171_v49 = vld [vmem:[#allocation2 + $0x2e0] ss:$2 sm:$0xff]  ;;  %v2173_v52 = vld [vmem:[#allocation2 + $0x2f0] ss:$2 sm:$0xff]  ;;  %v2717_v45 = vmax.f32 %v2157_v54, %v2457_v9  ;;  %19367 = vmatprep.mubr.msk.f32.mxu0 %vm333_vm0, %v4937_v19 }
 0x1fd   : > { %v4938_v50 = vld [vmem:[#allocation3 + $0x8a] sm:$0xff]  ;;  %2966 = vst.msk [vmem:[#allocation3 + $0xb3] sm:$0x3] %vm2872_vm9, %v2962_v41  ;;  %v2982_v42 = vmax.f32 %v2715_v23, %v2973_v18  ;;  %v2974_v47 = vrot.slane %v2720_v37, 1  ;;  %v2721_v36 = vmax.f32 %v2165_v21, %v2465_v2 }
 0x1fe   : > { %v2471_v11 = vld [vmem:[#allocation2 + $0x2e1] ss:$2 sm:$0xff]  ;;  %v2473_v48 = vld [vmem:[#allocation2 + $0x2f1] ss:$2 sm:$0xff]  ;;  %2965 = vst.msk [vmem:[#allocation3 + $0xab] sm:$0xff] %vm333_vm0, %v2961_v33 }
 0x1ff   : > { %v24134_v13 = vmax.f32 %v2171_v49, %v2471_v11  ;;  %v2725_v53 = vmax.f32 %v2173_v52, %v2473_v48  ;;  %v2167_v7 = vld [vmem:[#allocation2 + $0x2c0] ss:$2 sm:$0xff]  ;;  %v2467_v57 = vld [vmem:[#allocation2 + $0x2c1] ss:$2 sm:$0xff]  ;;  %v4939_v15 = vld [vmem:[#allocation3 + $0x92] sm:$0xff]  ;;  %v2975_v22 = vsel %vm731_vm2, %v2972_v32, %v2974_v47  ;;  %v2976_v38 = vrot.slane %v2721_v36, 1  ;;  %19368 = vmatmul.mubr.msk.f32.gmra.mrb[16].mxu0 %vm333_vm0, %v4938_v50 }
 0x200   : > { %v2175_v63 = vld [vmem:[#allocation2 + $0x300] ss:$2 sm:$0xff]  ;;  %2986 = vst.msk [vmem:[#allocation3 + $0xb3] sm:$0xf0] %vm2893_vm10, %v2982_v42  ;;  %v2475_v1 = vld [vmem:[#allocation2 + $0x301] ss:$2 sm:$0xff]  ;;  %v2983_v16 = vmax.f32 %v2716_v60, %v2975_v22  ;;  %v2722_v14 = vmax.f32 %v2167_v7, %v2467_v57  ;;  %19370 = vmatprep.mubr.msk.f32.mxu0 %vm333_vm0, %v4939_v15 }
 0x201   : > { %v2169_v12 = vld [vmem:[#allocation2 + $0x2d0] ss:$2 sm:$0xff]  ;;  %v2994_v28 = vrot.slane %v24134_v13, 1  ;;  %v2995_v30 = vrot.slane %v2725_v53, 1  ;;  %v2726_v20 = vmax.f32 %v2175_v63, %v2475_v1  ;;  %v2469_v17 = vld [vmem:[#allocation2 + $0x2d1] ss:$2 sm:$0xff]  ;;  %v2977_v39 = vsel %vm731_vm2, %v2974_v47, %v2976_v38 }
 0x202   : > { %v2177_v58 = vld [vmem:[#allocation2 + $0x310] ss:$2 sm:$0xff]  ;;  %v2985_v29 = vmax.f32 %v2718_v51, %v2976_v38  ;;  %v2477_v59 = vld [vmem:[#allocation2 + $0x311] ss:$2 sm:$0xff]  ;;  %2987 = vst.msk [vmem:[#allocation3 + $0xbb] sm:$0xff] %vm333_vm0, %v2983_v16  ;;  %v2984_v61 = vmax.f32 %v2717_v45, %v2977_v39  ;;  %v2723_v34 = vmax.f32 %v2169_v12, %v2469_v17  ;;  %v4941_v24 = vld [vmem:[#allocation3 + $0xa2] sm:$0xff] }
 0x203   : > { %v4940_v43 = vld [vmem:[#allocation3 + $0x9a] sm:$0xff]  ;;  %v2996_v3 = vsel %vm731_vm2, %v2994_v28, %v2995_v30  ;;  %v2997_v4 = vrot.slane %v2726_v20, 1  ;;  %v2727_v23 = vmax.f32 %v2177_v58, %v2477_v59 }
 0x204   : > { %v2185_v25 = vld [vmem:[#allocation2 + $0x350] ss:$2 sm:$0xff]  ;;  %v2187_v55 = vld [vmem:[#allocation2 + $0x360] ss:$2 sm:$0xff]  ;;  %2989 = vst.msk [vmem:[#allocation3 + $0xcb] sm:$0xf] %vm2897_vm11, %v2985_v29  ;;  %v3005_v0 = vmax.f32 %v2721_v36, %v2996_v3  ;;  %19371 = vmatmul.mubr.msk.f32.gmra.mrb[18].mxu0 %vm333_vm0, %v4940_v43 }
 0x205   : > { %v2179_v46 = vld [vmem:[#allocation2 + $0x320] ss:$2 sm:$0xff]  ;;  %v2479_v51 = vld [vmem:[#allocation2 + $0x321] ss:$2 sm:$0xff]  ;;  %v2485_v8 = vld [vmem:[#allocation2 + $0x351] ss:$2 sm:$0xff]  ;;  %v2998_v40 = vsel %vm731_vm2, %v2995_v30, %v2997_v4  ;;  %19373 = vmatprep.mubr.msk.f32.mxu0 %vm333_vm0, %v4941_v24 }
 0x206   : > { %2988 = vst.msk [vmem:[#allocation3 + $0xc3] sm:$0xff] %vm333_vm0, %v2984_v61  ;;  %v2999_v5 = vrot.slane %v2727_v23, 1  ;;  %v2487_v26 = vld [vmem:[#allocation2 + $0x361] ss:$2 sm:$0xff]  ;;  %v2731_v44 = vmax.f32 %v2185_v25, %v2485_v8  ;;  %v3006_v10 = vmax.f32 %v2722_v14, %v2998_v40  ;;  %v2181_v62 = vld [vmem:[#allocation2 + $0x330] ss:$2 sm:$0xff]  ;;  %v2728_v41 = vmax.f32 %v2179_v46, %v2479_v51 }
 0x207   : > { %3009 = vst.msk [vmem:[#allocation3 + $0xcb] sm:$0xc0] %vm2918_vm12, %v3005_v0  ;;  %v2732_v35 = vmax.f32 %v2187_v55, %v2487_v26  ;;  %v2189_v32 = vld [vmem:[#allocation2 + $0x370] ss:$2 sm:$0xff]  ;;  %v2481_v6 = vld [vmem:[#allocation2 + $0x331] ss:$2 sm:$0xff] }
 0x208   : > { %v4942_v54 = vld [vmem:[#allocation3 + $0xaa] sm:$0xff]  ;;  %v3000_v19 = vsel %vm731_vm2, %v2997_v4, %v2999_v5  ;;  %v3008_v31 = vmax.f32 %v24134_v13, %v2999_v5  ;;  %v3017_v37 = vrot.slane %v2731_v44, 1  ;;  %v4943_v33 = vld [vmem:[#allocation3 + $0xb2] sm:$0xff]  ;;  %3010 = vst.msk [vmem:[#allocation3 + $0xd3] sm:$0xff] %vm333_vm0, %v3006_v10  ;;  %v2729_v50 = vmax.f32 %v2181_v62, %v2481_v6 }
 0x209   : > { %v2489_v21 = vld [vmem:[#allocation2 + $0x371] ss:$2 sm:$0xff]  ;;  %v2183_v9 = vld [vmem:[#allocation2 + $0x340] ss:$2 sm:$0xff]  ;;  %v3007_v18 = vmax.f32 %v2723_v34, %v3000_v19  ;;  %v3018_v60 = vrot.slane %v2732_v35, 1  ;;  %19374 = vmatmul.mubr.msk.f32.gmra.mrb[20].mxu0 %vm333_vm0, %v4942_v54 }
 0x20a   : > { %v2733_v2 = vmax.f32 %v2189_v32, %v2489_v21  ;;  %v2191_v49 = vld [vmem:[#allocation2 + $0x380] ss:$2 sm:$0xff]  ;;  %v2483_v52 = vld [vmem:[#allocation2 + $0x341] ss:$2 sm:$0xff]  ;;  %3012 = vst.msk [vmem:[#allocation3 + $0xe3] sm:$0x3f] %vm2922_vm13, %v3008_v31  ;;  %19376 = vmatprep.mubr.msk.f32.mxu0 %vm333_vm0, %v4943_v33 }
 0x20b   : > { %v2491_v42 = vld [vmem:[#allocation2 + $0x381] ss:$2 sm:$0xff]  ;;  %v2197_v47 = vld [vmem:[#allocation2 + $0x3b0] ss:$2 sm:$0xff]  ;;  %v2199_v36 = vld [vmem:[#allocation2 + $0x3c0] ss:$2 sm:$0xff]  ;;  %v3019_v11 = vsel %vm731_vm2, %v3017_v37, %v3018_v60  ;;  %v2730_v63 = vmax.f32 %v2183_v9, %v2483_v52 }
 0x20c   : > { %3011 = vst.msk [vmem:[#allocation3 + $0xdb] sm:$0xff] %vm333_vm0, %v3007_v18  ;;  %v3020_v48 = vrot.slane %v2733_v2, 1  ;;  %v2734_v45 = vmax.f32 %v2191_v49, %v2491_v42  ;;  %v2497_v13 = vld [vmem:[#allocation2 + $0x3b1] ss:$2 sm:$0xff]  ;;  %v2499_v53 = vld [vmem:[#allocation2 + $0x3c1] ss:$2 sm:$0xff]  ;;  %v3027_v7 = vmax.f32 %v2728_v41, %v3019_v11 }
 0x20d   : > { %v2737_v57 = vmax.f32 %v2197_v47, %v2497_v13  ;;  %v2738_v15 = vmax.f32 %v2199_v36, %v2499_v53  ;;  %v2193_v22 = vld [vmem:[#allocation2 + $0x390] ss:$2 sm:$0xff]  ;;  %v2493_v1 = vld [vmem:[#allocation2 + $0x391] ss:$2 sm:$0xff]  ;;  %v4945_v16 = vld [vmem:[#allocation3 + $0xc2] sm:$0xff] }
 0x20e   : > { %v2201_v38 = vld [vmem:[#allocation2 + $0x3d0] ss:$2 sm:$0xff]  ;;  %v3021_v28 = vsel %vm731_vm2, %v3018_v60, %v3020_v48  ;;  %v3022_v30 = vrot.slane %v2734_v45, 1  ;;  %v2501_v20 = vld [vmem:[#allocation2 + $0x3d1] ss:$2 sm:$0xff]  ;;  %3030 = vst.msk [vmem:[#allocation3 + $0xeb] sm:$0xff] %vm333_vm0, %v3027_v7  ;;  %v2735_v61 = vmax.f32 %v2193_v22, %v2493_v1 }
 0x20f   : > { %v4944_v12 = vld [vmem:[#allocation3 + $0xba] sm:$0xff]  ;;  %v3028_v58 = vmax.f32 %v2729_v50, %v3021_v28  ;;  %v3037_v17 = vrot.slane %v2737_v57, 1  ;;  %v3038_v39 = vrot.slane %v2738_v15, 1  ;;  %v2739_v29 = vmax.f32 %v2201_v38, %v2501_v20  ;;  %v4946_v51 = vld [vmem:[#allocation3 + $0xca] sm:$0xff]  ;;  %v4947_v44 = vld [vmem:[#allocation3 + $0xd2] sm:$0xff] }
 0x210   : > { %v2195_v14 = vld [vmem:[#allocation2 + $0x3a0] ss:$2 sm:$0xff]  ;;  %v3023_v43 = vsel %vm731_vm2, %v3020_v48, %v3022_v30  ;;  %v2495_v3 = vld [vmem:[#allocation2 + $0x3a1] ss:$2 sm:$0xff]  ;;  %v2209_v23 = vld [vmem:[#allocation2 + $0x410] ss:$2 sm:$0xff]  ;;  %19377 = vmatmul.mubr.msk.f32.gmra.mrb[22].mxu0 %vm333_vm0, %v4944_v12 }
 0x211   : > { %v2203_v59 = vld [vmem:[#allocation2 + $0x3e0] ss:$2 sm:$0xff]  ;;  %v2503_v4 = vld [vmem:[#allocation2 + $0x3e1] ss:$2 sm:$0xff]  ;;  %3031 = vst.msk [vmem:[#allocation3 + $0xf3] sm:$0xff] %vm333_vm0, %v3028_v58  ;;  %v3029_v25 = vmax.f32 %v2730_v63, %v3023_v43  ;;  %v3039_v55 = vsel %vm731_vm2, %v3037_v17, %v3038_v39  ;;  %v3040_v0 = vrot.slane %v2739_v29, 1  ;;  %19379 = vmatprep.mubr.msk.f32.mxu0 %vm333_vm0, %v4945_v16  ;;  %v2736_v35 = vmax.f32 %v2195_v14, %v2495_v3 }
 0x212   : > { %v2211_v34 = vld [vmem:[#allocation2 + $0x420] ss:$2 sm:$0xff]  ;;  %v2509_v46 = vld [vmem:[#allocation2 + $0x411] ss:$2 sm:$0xff]  ;;  %v3048_v8 = vmax.f32 %v2734_v45, %v3039_v55  ;;  %v2740_v24 = vmax.f32 %v2203_v59, %v2503_v4  ;;  %v2511_v40 = vld [vmem:[#allocation2 + $0x421] ss:$2 sm:$0xff] }
 0x213   : > { %v2743_v5 = vmax.f32 %v2209_v23, %v2509_v46  ;;  %v2213_v26 = vld [vmem:[#allocation2 + $0x430] ss:$2 sm:$0xff]  ;;  %3032 = vst.msk [vmem:[#allocation3 + $0xfb] sm:$0xff] %vm333_vm0, %v3029_v25  ;;  %v3041_v10 = vsel %vm731_vm2, %v3038_v39, %v3040_v0  ;;  %v2744_v62 = vmax.f32 %v2211_v34, %v2511_v40  ;;  %v2505_v6 = vld [vmem:[#allocation2 + $0x3f1] ss:$2 sm:$0xff]  ;;  %v4949_v47 = vld [vmem:[#allocation3 + $0xe2] sm:$0xff] }
 0x214   : > { %v2205_v32 = vld [vmem:[#allocation2 + $0x3f0] ss:$2 sm:$0xff]  ;;  %3052 = vst.msk [vmem:[#allocation3 + $0x103] sm:$0xfc] %vm2868_vm8, %v3048_v8  ;;  %v3049_v54 = vmax.f32 %v2735_v61, %v3041_v10  ;;  %v3042_v19 = vrot.slane %v2740_v24, 1  ;;  %19380 = vmatmul.mubr.msk.f32.gmra.mrb[24].mxu0 %vm333_vm0, %v4946_v51 }
 0x215   : > { %v3060_v31 = vrot.slane %v2743_v5, 1  ;;  %v2513_v41 = vld [vmem:[#allocation2 + $0x431] ss:$2 sm:$0xff]  ;;  %v2207_v37 = vld [vmem:[#allocation2 + $0x400] ss:$2 sm:$0xff]  ;;  %v3061_v21 = vrot.slane %v2744_v62, 1  ;;  %19382 = vmatprep.mubr.msk.f32.mxu0 %vm333_vm0, %v4947_v44  ;;  %v2741_v52 = vmax.f32 %v2205_v32, %v2505_v6 }
 0x216   : > { %v2745_v9 = vmax.f32 %v2213_v26, %v2513_v41  ;;  %v2215_v33 = vld [vmem:[#allocation2 + $0x440] ss:$2 sm:$0xff]  ;;  %v2507_v18 = vld [vmem:[#allocation2 + $0x401] ss:$2 sm:$0xff]  ;;  %3053 = vst.msk [vmem:[#allocation3 + $0x10b] sm:$0xff] %vm333_vm0, %v3049_v54  ;;  %v3043_v2 = vsel %vm731_vm2, %v3040_v0, %v3042_v19  ;;  %v3051_v49 = vmax.f32 %v2737_v57, %v3042_v19 }
 0x217   : > { %v4948_v60 = vld [vmem:[#allocation3 + $0xda] sm:$0xff]  ;;  %v3050_v36 = vmax.f32 %v2736_v35, %v3043_v2  ;;  %v3062_v11 = vsel %vm731_vm2, %v3060_v31, %v3061_v21  ;;  %v2742_v63 = vmax.f32 %v2207_v37, %v2507_v18  ;;  %v4950_v30 = vld [vmem:[#allocation3 + $0xea] sm:$0xff] }
 0x218   : > { %v2515_v50 = vld [vmem:[#allocation2 + $0x441] ss:$2 sm:$0xff]  ;;  %v2221_v42 = vld [vmem:[#allocation2 + $0x470] ss:$2 sm:$0xff]  ;;  %v3063_v48 = vrot.slane %v2745_v9, 1  ;;  %v3071_v7 = vmax.f32 %v2740_v24, %v3062_v11  ;;  %19383 = vmatmul.mubr.msk.f32.gmra.mrb[26].mxu0 %vm333_vm0, %v4948_v60 }
 0x219   : > { %v2746_v45 = vmax.f32 %v2215_v33, %v2515_v50  ;;  %v2223_v13 = vld [vmem:[#allocation2 + $0x480] ss:$2 sm:$0xff]  ;;  %v2521_v53 = vld [vmem:[#allocation2 + $0x471] ss:$2 sm:$0xff]  ;;  %3055 = vst.msk [vmem:[#allocation3 + $0x11b] sm:$0x3] %vm2872_vm9, %v3051_v49  ;;  %19385 = vmatprep.mubr.msk.f32.mxu0 %vm333_vm0, %v4949_v47 }
 0x21a   : > { %v2523_v15 = vld [vmem:[#allocation2 + $0x481] ss:$2 sm:$0xff]  ;;  %v24175_v22 = vmax.f32 %v2221_v42, %v2521_v53  ;;  %v2217_v38 = vld [vmem:[#allocation2 + $0x450] ss:$2 sm:$0xff]  ;;  %3054 = vst.msk [vmem:[#allocation3 + $0x113] sm:$0xff] %vm333_vm0, %v3050_v36  ;;  %v3064_v57 = vsel %vm731_vm2, %v3061_v21, %v3063_v48 }
 0x21b   : > { %v3065_v1 = vrot.slane %v2746_v45, 1  ;;  %v2750_v12 = vmax.f32 %v2223_v13, %v2523_v15  ;;  %v2225_v16 = vld [vmem:[#allocation2 + $0x490] ss:$2 sm:$0xff]  ;;  %v2517_v28 = vld [vmem:[#allocation2 + $0x451] ss:$2 sm:$0xff]  ;;  %v3072_v20 = vmax.f32 %v2741_v52, %v3064_v57  ;;  %v24192_v62 = vld [vmem:[#allocation3 + $0x102] sm:$0xff] }
 0x21c   : > { %3075 = vst.msk [vmem:[#allocation3 + $0x11b] sm:$0xf0] %vm2893_vm10, %v3071_v7  ;;  %v3083_v58 = vrot.slane %v24175_v22, 1  ;;  %v2525_v17 = vld [vmem:[#allocation2 + $0x491] ss:$2 sm:$0xff]  ;;  %v2747_v25 = vmax.f32 %v2217_v38, %v2517_v28  ;;  %19386 = vmatmul.mubr.msk.f32.gmra.mrb[28].mxu0 %vm333_vm0, %v4950_v30 }
 0x21d   : > { %v2219_v39 = vld [vmem:[#allocation2 + $0x460] ss:$2 sm:$0xff]  ;;  %v4951_v29 = vld [vmem:[#allocation3 + $0xf2] sm:$0xff]  ;;  %v3066_v14 = vsel %vm731_vm2, %v3063_v48, %v3065_v1  ;;  %v3074_v59 = vmax.f32 %v2743_v5, %v3065_v1  ;;  %v3084_v43 = vrot.slane %v2750_v12, 1  ;;  %v2751_v61 = vmax.f32 %v2225_v16, %v2525_v17  ;;  %v2519_v4 = vld [vmem:[#allocation2 + $0x461] ss:$2 sm:$0xff] }
 0x21e   : > { %v2227_v3 = vld [vmem:[#allocation2 + $0x4a0] ss:$2 sm:$0xff]  ;;  %3076 = vst.msk [vmem:[#allocation3 + $0x123] sm:$0xff] %vm333_vm0, %v3072_v20  ;;  %v3073_v23 = vmax.f32 %v2742_v63, %v3066_v14  ;;  %v2527_v55 = vld [vmem:[#allocation2 + $0x4a1] ss:$2 sm:$0xff]  ;;  %19388 = vmatprep.mubr.msk.f32.mxu0 %vm333_vm0, %v4951_v29  ;;  %v2748_v44 = vmax.f32 %v2219_v39, %v2519_v4 }
 0x21f   : > { %v2229_v0 = vld [vmem:[#allocation2 + $0x4b0] ss:$2 sm:$0xff]  ;;  %v2235_v34 = vld [vmem:[#allocation2 + $0x4e0] ss:$2 sm:$0xff]  ;;  %3078 = vst.msk [vmem:[#allocation3 + $0x133] sm:$0xf] %vm2897_vm11, %v3074_v59  ;;  %v3085_v46 = vsel %vm731_vm2, %v3083_v58, %v3084_v43  ;;  %v2752_v8 = vmax.f32 %v2227_v3, %v2527_v55 }
 0x220   : > { %v3086_v51 = vrot.slane %v2751_v61, 1  ;;  %v2237_v24 = vld [vmem:[#allocation2 + $0x4f0] ss:$2 sm:$0xff]  ;;  %v2529_v40 = vld [vmem:[#allocation2 + $0x4b1] ss:$2 sm:$0xff]  ;;  %3077 = vst.msk [vmem:[#allocation3 + $0x12b] sm:$0xff] %vm333_vm0, %v3073_v23  ;;  %v3094_v26 = vmax.f32 %v2746_v45, %v3085_v46 }
 0x221   : > { %v24189_v5 = vld [vmem:[#allocation3 + $0xfa] sm:$0xff]  ;;  %v3088_v6 = vrot.slane %v2752_v8, 1  ;;  %v24195_v41 = vld [vmem:[#allocation3 + $0x10a] sm:$0xff]  ;;  %v2753_v21 = vmax.f32 %v2229_v0, %v2529_v40  ;;  %v24205_v13 = vld [vmem:[#allocation3 + $0x112] sm:$0xff] }
 0x222   : > { %v2535_v10 = vld [vmem:[#allocation2 + $0x4e1] ss:$2 sm:$0xff]  ;;  %v2537_v35 = vld [vmem:[#allocation2 + $0x4f1] ss:$2 sm:$0xff]  ;;  %v3087_v32 = vsel %vm731_vm2, %v3084_v43, %v3086_v51  ;;  %v2239_v31 = vld [vmem:[#allocation2 + $0x500] ss:$2 sm:$0xff]  ;;  %19389 = vmatmul.mubr.msk.f32.gmra.mrb[30].mxu0 %vm333_vm0, %v24189_v5 }
 0x223   : > { %v2756_v54 = vmax.f32 %v2235_v34, %v2535_v10  ;;  %v2757_v19 = vmax.f32 %v2237_v24, %v2537_v35  ;;  %3098 = vst.msk [vmem:[#allocation3 + $0x133] sm:$0xc0] %vm2918_vm12, %v3094_v26  ;;  %v3095_v37 = vmax.f32 %v2747_v25, %v3087_v32  ;;  %v2231_v9 = vld [vmem:[#allocation2 + $0x4c0] ss:$2 sm:$0xff]  ;;  %v2531_v33 = vld [vmem:[#allocation2 + $0x4c1] ss:$2 sm:$0xff]  ;;  %v3089_v60 = vsel %vm731_vm2, %v3086_v51, %v3088_v6 }
 0x224   : > { %v2539_v18 = vld [vmem:[#allocation2 + $0x501] ss:$2 sm:$0xff]  ;;  %v3097_v2 = vmax.f32 %v24175_v22, %v3088_v6  ;;  %v2233_v50 = vld [vmem:[#allocation2 + $0x4d0] ss:$2 sm:$0xff]  ;;  %19391 = vmatprep.mubr.msk.f32.mxu0 %vm333_vm0, %v24192_v62  ;;  %v3096_v47 = vmax.f32 %v2748_v44, %v3089_v60  ;;  %v2533_v11 = vld [vmem:[#allocation2 + $0x4d1] ss:$2 sm:$0xff]  ;;  %v2754_v7 = vmax.f32 %v2231_v9, %v2531_v33 }
 0x225   : > { %v3106_v49 = vrot.slane %v2756_v54, 1  ;;  %v3107_v52 = vrot.slane %v2757_v19, 1  ;;  %v2241_v42 = vld [vmem:[#allocation2 + $0x510] ss:$2 sm:$0xff]  ;;  %3099 = vst.msk [vmem:[#allocation3 + $0x13b] sm:$0xff] %vm333_vm0, %v3095_v37  ;;  %v2758_v36 = vmax.f32 %v2239_v31, %v2539_v18  ;;  %v2755_v1 = vmax.f32 %v2233_v50, %v2533_v11  ;;  %v24218_v61 = vld [vmem:[#allocation3 + $0x122] sm:$0xff] }
 0x226   : > { %v2541_v48 = vld [vmem:[#allocation2 + $0x511] ss:$2 sm:$0xff]  ;;  %v2247_v45 = vld [vmem:[#allocation2 + $0x540] ss:$2 sm:$0xff]  ;;  %3101 = vst.msk [vmem:[#allocation3 + $0x14b] sm:$0x3f] %vm2922_vm13, %v3097_v2  ;;  %19392 = vmatmul.mubr.msk.f32.gmra.mrb[32].mxu0 %vm333_vm0, %v24195_v41 }
 0x227   : > { %v3108_v53 = vsel %vm731_vm2, %v3106_v49, %v3107_v52  ;;  %v2759_v63 = vmax.f32 %v2241_v42, %v2541_v48  ;;  %v2249_v15 = vld [vmem:[#allocation2 + $0x550] ss:$2 sm:$0xff]  ;;  %v2547_v22 = vld [vmem:[#allocation2 + $0x541] ss:$2 sm:$0xff]  ;;  %3100 = vst.msk [vmem:[#allocation3 + $0x143] sm:$0xff] %vm333_vm0, %v3096_v47  ;;  %v3109_v57 = vrot.slane %v2758_v36, 1  ;;  %19394 = vmatprep.mubr.msk.f32.mxu0 %vm333_vm0, %v24205_v13 }
 0x228   : > { %v3116_v38 = vmax.f32 %v2753_v21, %v3108_v53  ;;  %v2549_v12 = vld [vmem:[#allocation2 + $0x551] ss:$2 sm:$0xff]  ;;  %v2762_v16 = vmax.f32 %v2247_v45, %v2547_v22  ;;  %v2243_v28 = vld [vmem:[#allocation2 + $0x520] ss:$2 sm:$0xff]  ;;  %v2543_v17 = vld [vmem:[#allocation2 + $0x521] ss:$2 sm:$0xff] }
 0x229   : > { %v3111_v30 = vrot.slane %v2759_v63, 1  ;;  %v2763_v20 = vmax.f32 %v2249_v15, %v2549_v12  ;;  %v2251_v58 = vld [vmem:[#allocation2 + $0x560] ss:$2 sm:$0xff]  ;;  %v3110_v29 = vsel %vm731_vm2, %v3107_v52, %v3109_v57  ;;  %v2551_v59 = vld [vmem:[#allocation2 + $0x561] ss:$2 sm:$0xff]  ;;  %v2760_v46 = vmax.f32 %v2243_v28, %v2543_v17 }
 0x22a   : > { %v24214_v39 = vld [vmem:[#allocation3 + $0x11a] sm:$0xff]  ;;  %3119 = vst.msk [vmem:[#allocation3 + $0x153] sm:$0xff] %vm333_vm0, %v3116_v38  ;;  %v3126_v14 = vrot.slane %v2762_v16, 1  ;;  %v3117_v3 = vmax.f32 %v2754_v7, %v3110_v29  ;;  %v2764_v25 = vmax.f32 %v2251_v58, %v2551_v59  ;;  %v24223_v40 = vld [vmem:[#allocation3 + $0x12a] sm:$0xff]  ;;  %v24230_v33 = vld [vmem:[#allocation3 + $0x132] sm:$0xff] }
 0x22b   : > { %v2245_v43 = vld [vmem:[#allocation2 + $0x530] ss:$2 sm:$0xff]  ;;  %v3112_v4 = vsel %vm731_vm2, %v3109_v57, %v3111_v30  ;;  %v3127_v23 = vrot.slane %v2763_v20, 1  ;;  %v2545_v0 = vld [vmem:[#allocation2 + $0x531] ss:$2 sm:$0xff]  ;;  %19395 = vmatmul.mubr.msk.f32.gmra.mrb[34].mxu0 %vm333_vm0, %v24214_v39 }
 0x22c   : > { %v2253_v55 = vld [vmem:[#allocation2 + $0x570] ss:$2 sm:$0xff]  ;;  %v3118_v34 = vmax.f32 %v2755_v1, %v3112_v4  ;;  %v2553_v51 = vld [vmem:[#allocation2 + $0x571] ss:$2 sm:$0xff]  ;;  %v2259_v8 = vld [vmem:[#allocation2 + $0x5a0] ss:$2 sm:$0xff]  ;;  %19397 = vmatprep.mubr.msk.f32.mxu0 %vm333_vm0, %v24218_v61  ;;  %v2761_v54 = vmax.f32 %v2245_v43, %v2545_v0 }
 0x22d   : > { %v2261_v24 = vld [vmem:[#allocation2 + $0x5b0] ss:$2 sm:$0xff]  ;;  %3120 = vst.msk [vmem:[#allocation3 + $0x15b] sm:$0xff] %vm333_vm0, %v3117_v3  ;;  %v3128_v26 = vsel %vm731_vm2, %v3126_v14, %v3127_v23  ;;  %v3129_v44 = vrot.slane %v2764_v25, 1  ;;  %v2765_v10 = vmax.f32 %v2253_v55, %v2553_v51  ;;  %v2559_v35 = vld [vmem:[#allocation2 + $0x5a1] ss:$2 sm:$0xff] }
 0x22e   : > { %v2561_v32 = vld [vmem:[#allocation2 + $0x5b1] ss:$2 sm:$0xff]  ;;  %3121 = vst.msk [vmem:[#allocation3 + $0x163] sm:$0xff] %vm333_vm0, %v3118_v34  ;;  %v3137_v6 = vmax.f32 %v2759_v63, %v3128_v26  ;;  %v2768_v19 = vmax.f32 %v2259_v8, %v2559_v35  ;;  %v2255_v37 = vld [vmem:[#allocation2 + $0x580] ss:$2 sm:$0xff] }
 0x22f   : > { %v2769_v31 = vmax.f32 %v2261_v24, %v2561_v32  ;;  %v2263_v21 = vld [vmem:[#allocation2 + $0x5c0] ss:$2 sm:$0xff]  ;;  %v2555_v9 = vld [vmem:[#allocation2 + $0x581] ss:$2 sm:$0xff]  ;;  %v3130_v18 = vsel %vm731_vm2, %v3127_v23, %v3129_v44  ;;  %v3131_v60 = vrot.slane %v2765_v10, 1  ;;  %19398 = vmatmul.mubr.msk.f32.gmra.mrb[36].mxu0 %vm333_vm0, %v24223_v40 }
 0x230   : > { %v2563_v2 = vld [vmem:[#allocation2 + $0x5c1] ss:$2 sm:$0xff]  ;;  %3141 = vst.msk [vmem:[#allocation3 + $0x16b] sm:$0xfc] %vm2868_vm8, %v3137_v6  ;;  %v3138_v49 = vmax.f32 %v2760_v46, %v3130_v18  ;;  %v3149_v52 = vrot.slane %v2768_v19, 1  ;;  %v2766_v48 = vmax.f32 %v2255_v37, %v2555_v9  ;;  %19400 = vmatprep.mubr.msk.f32.mxu0 %vm333_vm0, %v24230_v33 }
 0x231   : > { %v3150_v50 = vrot.slane %v2769_v31, 1  ;;  %v2770_v42 = vmax.f32 %v2263_v21, %v2563_v2  ;;  %v2265_v47 = vld [vmem:[#allocation2 + $0x5d0] ss:$2 sm:$0xff]  ;;  %v3132_v36 = vsel %vm731_vm2, %v3129_v44, %v3131_v60  ;;  %v3140_v11 = vmax.f32 %v2762_v16, %v3131_v60  ;;  %v2557_v53 = vld [vmem:[#allocation2 + $0x591] ss:$2 sm:$0xff]  ;;  %v24243_v12 = vld [vmem:[#allocation3 + $0x142] sm:$0xff] }
 0x232   : > { %v2257_v45 = vld [vmem:[#allocation2 + $0x590] ss:$2 sm:$0xff]  ;;  %v2565_v7 = vld [vmem:[#allocation2 + $0x5d1] ss:$2 sm:$0xff]  ;;  %3142 = vst.msk [vmem:[#allocation3 + $0x173] sm:$0xff] %vm333_vm0, %v3138_v49  ;;  %v3139_v15 = vmax.f32 %v2761_v54, %v3132_v36 }
 0x233   : > { %v24239_v63 = vld [vmem:[#allocation3 + $0x13a] sm:$0xff]  ;;  %v3151_v22 = vsel %vm731_vm2, %v3149_v52, %v3150_v50  ;;  %v3152_v38 = vrot.slane %v2770_v42, 1  ;;  %3144 = vst.msk [vmem:[#allocation3 + $0x183] sm:$0x3] %vm2872_vm9, %v3140_v11  ;;  %v2771_v28 = vmax.f32 %v2265_v47, %v2565_v7  ;;  %v2767_v17 = vmax.f32 %v2257_v45, %v2557_v53  ;;  %v24252_v4 = vld [vmem:[#allocation3 + $0x14a] sm:$0xff]  ;;  %v24258_v26 = vld [vmem:[#allocation3 + $0x152] sm:$0xff] }
 0x234   : > { %v2271_v57 = vld [vmem:[#allocation2 + $0x600] ss:$2 sm:$0xff]  ;;  %v2273_v1 = vld [vmem:[#allocation2 + $0x610] ss:$2 sm:$0xff]  ;;  %v3160_v16 = vmax.f32 %v2765_v10, %v3151_v22  ;;  %v2571_v30 = vld [vmem:[#allocation2 + $0x601] ss:$2 sm:$0xff]  ;;  %19401 = vmatmul.mubr.msk.f32.gmra.mrb[38].mxu0 %vm333_vm0, %v24239_v63 }
 0x235   : > { %v2573_v20 = vld [vmem:[#allocation2 + $0x611] ss:$2 sm:$0xff]  ;;  %3143 = vst.msk [vmem:[#allocation3 + $0x17b] sm:$0xff] %vm333_vm0, %v3139_v15  ;;  %v3153_v58 = vsel %vm731_vm2, %v3150_v50, %v3152_v38  ;;  %v24248_v29 = vmax.f32 %v2271_v57, %v2571_v30  ;;  %v2267_v59 = vld [vmem:[#allocation2 + $0x5e0] ss:$2 sm:$0xff]  ;;  %v3154_v25 = vrot.slane %v2771_v28, 1  ;;  %19403 = vmatprep.mubr.msk.f32.mxu0 %vm333_vm0, %v24243_v12 }
 0x236   : > { %v2775_v14 = vmax.f32 %v2273_v1, %v2573_v20  ;;  %v2275_v43 = vld [vmem:[#allocation2 + $0x620] ss:$2 sm:$0xff]  ;;  %v2567_v3 = vld [vmem:[#allocation2 + $0x5e1] ss:$2 sm:$0xff]  ;;  %3164 = vst.msk [vmem:[#allocation3 + $0x183] sm:$0xf0] %vm2893_vm10, %v3160_v16  ;;  %v3161_v23 = vmax.f32 %v2766_v48, %v3153_v58 }
 0x237   : > { %v2575_v55 = vld [vmem:[#allocation2 + $0x621] ss:$2 sm:$0xff]  ;;  %v2269_v0 = vld [vmem:[#allocation2 + $0x5f0] ss:$2 sm:$0xff]  ;;  %v3172_v34 = vrot.slane %v24248_v29, 1  ;;  %v3155_v44 = vsel %vm731_vm2, %v3152_v38, %v3154_v25  ;;  %v3163_v10 = vmax.f32 %v2768_v19, %v3154_v25  ;;  %v2772_v35 = vmax.f32 %v2267_v59, %v2567_v3 }
 0x238   : > { %v3173_v46 = vrot.slane %v2775_v14, 1  ;;  %v2776_v51 = vmax.f32 %v2275_v43, %v2575_v55  ;;  %v2277_v8 = vld [vmem:[#allocation2 + $0x630] ss:$2 sm:$0xff]  ;;  %v2569_v24 = vld [vmem:[#allocation2 + $0x5f1] ss:$2 sm:$0xff]  ;;  %3165 = vst.msk [vmem:[#allocation3 + $0x18b] sm:$0xff] %vm333_vm0, %v3161_v23  ;;  %v3162_v6 = vmax.f32 %v2767_v17, %v3155_v44  ;;  %19404 = vmatmul.mubr.msk.f32.gmra.mrb[40].mxu0 %vm333_vm0, %v24252_v4 }
 0x239   : > { %v2577_v32 = vld [vmem:[#allocation2 + $0x631] ss:$2 sm:$0xff]  ;;  %v2285_v21 = vld [vmem:[#allocation2 + $0x670] ss:$2 sm:$0xff]  ;;  %v2287_v9 = vld [vmem:[#allocation2 + $0x680] ss:$2 sm:$0xff]  ;;  %v2773_v60 = vmax.f32 %v2269_v0, %v2569_v24  ;;  %19406 = vmatprep.mubr.msk.f32.mxu0 %vm333_vm0, %v24258_v26 }
 0x23a   : > { %v3174_v54 = vsel %vm731_vm2, %v3172_v34, %v3173_v46  ;;  %v3175_v31 = vrot.slane %v2776_v51, 1  ;;  %v2777_v37 = vmax.f32 %v2277_v8, %v2577_v32  ;;  %3167 = vst.msk [vmem:[#allocation3 + $0x19b] sm:$0xf] %vm2897_vm11, %v3163_v10  ;;  %v2279_v2 = vld [vmem:[#allocation2 + $0x640] ss:$2 sm:$0xff]  ;;  %v24285_v23 = vld [vmem:[#allocation3 + $0x172] sm:$0xff] }
 0x23b   : > { %v3183_v18 = vmax.f32 %v2771_v28, %v3174_v54  ;;  %v2579_v49 = vld [vmem:[#allocation2 + $0x641] ss:$2 sm:$0xff]  ;;  %v2585_v52 = vld [vmem:[#allocation2 + $0x671] ss:$2 sm:$0xff]  ;;  %3166 = vst.msk [vmem:[#allocation3 + $0x193] sm:$0xff] %vm333_vm0, %v3162_v6 }
 0x23c   : > { %v24268_v19 = vld [vmem:[#allocation3 + $0x15a] sm:$0xff]  ;;  %v24270_v50 = vld [vmem:[#allocation3 + $0x162] sm:$0xff]  ;;  %v3176_v42 = vsel %vm731_vm2, %v3173_v46, %v3175_v31  ;;  %v3177_v47 = vrot.slane %v2777_v37, 1  ;;  %v2781_v11 = vmax.f32 %v2285_v21, %v2585_v52  ;;  %v2778_v57 = vmax.f32 %v2279_v2, %v2579_v49  ;;  %v24282_v59 = vld [vmem:[#allocation3 + $0x16a] sm:$0xff] }
 0x23d   : > { %v2587_v36 = vld [vmem:[#allocation2 + $0x681] ss:$2 sm:$0xff]  ;;  %3187 = vst.msk [vmem:[#allocation3 + $0x19b] sm:$0xc0] %vm2918_vm12, %v3183_v18  ;;  %v3184_v48 = vmax.f32 %v2772_v35, %v3176_v42  ;;  %v2281_v53 = vld [vmem:[#allocation2 + $0x650] ss:$2 sm:$0xff]  ;;  %19407 = vmatmul.mubr.msk.f32.gmra.mrb[42].mxu0 %vm333_vm0, %v24268_v19 }
 0x23e   : > { %v2782_v45 = vmax.f32 %v2287_v9, %v2587_v36  ;;  %v2289_v7 = vld [vmem:[#allocation2 + $0x690] ss:$2 sm:$0xff]  ;;  %v2581_v15 = vld [vmem:[#allocation2 + $0x651] ss:$2 sm:$0xff]  ;;  %v3178_v22 = vsel %vm731_vm2, %v3175_v31, %v3177_v47  ;;  %v3186_v38 = vmax.f32 %v24248_v29, %v3177_v47  ;;  %v3195_v1 = vrot.slane %v2781_v11, 1  ;;  %19409 = vmatprep.mubr.msk.f32.mxu0 %vm333_vm0, %v24270_v50  ;;  %v24297_v52 = vld [vmem:[#allocation3 + $0x182] sm:$0xff] }
 0x23f   : > { %v2589_v16 = vld [vmem:[#allocation2 + $0x691] ss:$2 sm:$0xff]  ;;  %v2283_v28 = vld [vmem:[#allocation2 + $0x660] ss:$2 sm:$0xff]  ;;  %3188 = vst.msk [vmem:[#allocation3 + $0x1a3] sm:$0xff] %vm333_vm0, %v3184_v48  ;;  %v3185_v30 = vmax.f32 %v2773_v60, %v3178_v22  ;;  %v2779_v29 = vmax.f32 %v2281_v53, %v2581_v15 }
 0x240   : > { %v3196_v20 = vrot.slane %v2782_v45, 1  ;;  %v2783_v58 = vmax.f32 %v2289_v7, %v2589_v16  ;;  %v2291_v17 = vld [vmem:[#allocation2 + $0x6a0] ss:$2 sm:$0xff]  ;;  %v2583_v14 = vld [vmem:[#allocation2 + $0x661] ss:$2 sm:$0xff] }
 0x241   : > { %3190 = vst.msk [vmem:[#allocation3 + $0x1b3] sm:$0x3f] %vm2922_vm13, %v3186_v38  ;;  %v2591_v43 = vld [vmem:[#allocation2 + $0x6a1] ss:$2 sm:$0xff]  ;;  %v2297_v3 = vld [vmem:[#allocation2 + $0x6d0] ss:$2 sm:$0xff]  ;;  %v2780_v8 = vmax.f32 %v2283_v28, %v2583_v14  ;;  %19410 = vmatmul.mubr.msk.f32.gmra.mrb[44].mxu0 %vm333_vm0, %v24282_v59 }
 0x242   : > { %3189 = vst.msk [vmem:[#allocation3 + $0x1ab] sm:$0xff] %vm333_vm0, %v3185_v30  ;;  %v3197_v25 = vsel %vm731_vm2, %v3195_v1, %v3196_v20  ;;  %v3198_v55 = vrot.slane %v2783_v58, 1  ;;  %v2784_v0 = vmax.f32 %v2291_v17, %v2591_v43  ;;  %v2299_v34 = vld [vmem:[#allocation2 + $0x6e0] ss:$2 sm:$0xff]  ;;  %v2597_v46 = vld [vmem:[#allocation2 + $0x6d1] ss:$2 sm:$0xff]  ;;  %19412 = vmatprep.mubr.msk.f32.mxu0 %vm333_vm0, %v24285_v23 }
 0x243   : > { %v3205_v51 = vmax.f32 %v2778_v57, %v3197_v25  ;;  %v2599_v24 = vld [vmem:[#allocation2 + $0x6e1] ss:$2 sm:$0xff]  ;;  %v2787_v44 = vmax.f32 %v2297_v3, %v2597_v46  ;;  %v2293_v10 = vld [vmem:[#allocation2 + $0x6b0] ss:$2 sm:$0xff]  ;;  %v2593_v31 = vld [vmem:[#allocation2 + $0x6b1] ss:$2 sm:$0xff] }
 0x244   : > { %v2301_v35 = vld [vmem:[#allocation2 + $0x6f0] ss:$2 sm:$0xff]  ;;  %v3199_v32 = vsel %vm731_vm2, %v3196_v20, %v3198_v55  ;;  %v3200_v6 = vrot.slane %v2784_v0, 1  ;;  %v2788_v54 = vmax.f32 %v2299_v34, %v2599_v24  ;;  %v2601_v37 = vld [vmem:[#allocation2 + $0x6f1] ss:$2 sm:$0xff]  ;;  %v2785_v36 = vmax.f32 %v2293_v10, %v2593_v31 }
 0x245   : > { %v24294_v21 = vld [vmem:[#allocation3 + $0x17a] sm:$0xff]  ;;  %3208 = vst.msk [vmem:[#allocation3 + $0x1bb] sm:$0xff] %vm333_vm0, %v3205_v51  ;;  %v3206_v9 = vmax.f32 %v2779_v29, %v3199_v32  ;;  %v3215_v18 = vrot.slane %v2787_v44, 1  ;;  %v2789_v60 = vmax.f32 %v2301_v35, %v2601_v37  ;;  %v24305_v38 = vld [vmem:[#allocation3 + $0x18a] sm:$0xff]  ;;  %v24310_v30 = vld [vmem:[#allocation3 + $0x192] sm:$0xff] }
 0x246   : > { %v2295_v2 = vld [vmem:[#allocation2 + $0x6c0] ss:$2 sm:$0xff]  ;;  %v3201_v42 = vsel %vm731_vm2, %v3198_v55, %v3200_v6  ;;  %v3216_v47 = vrot.slane %v2788_v54, 1  ;;  %v2595_v11 = vld [vmem:[#allocation2 + $0x6c1] ss:$2 sm:$0xff]  ;;  %19413 = vmatmul.mubr.msk.f32.gmra.mrb[46].mxu0 %vm333_vm0, %v24294_v21 }
 0x247   : > { %v2303_v49 = vld [vmem:[#allocation2 + $0x700] ss:$2 sm:$0xff]  ;;  %v2603_v48 = vld [vmem:[#allocation2 + $0x701] ss:$2 sm:$0xff]  ;;  %3209 = vst.msk [vmem:[#allocation3 + $0x1c3] sm:$0xff] %vm333_vm0, %v3206_v9  ;;  %v3207_v45 = vmax.f32 %v2780_v8, %v3201_v42  ;;  %v3218_v53 = vrot.slane %v2789_v60, 1  ;;  %v2786_v1 = vmax.f32 %v2295_v2, %v2595_v11  ;;  %19415 = vmatprep.mubr.msk.f32.mxu0 %vm333_vm0, %v24297_v52 }
 0x248   : > { %v24301_v7 = vmax.f32 %v2303_v49, %v2603_v48  ;;  %v2309_v15 = vld [vmem:[#allocation2 + $0x730] ss:$2 sm:$0xff]  ;;  %v2311_v22 = vld [vmem:[#allocation2 + $0x740] ss:$2 sm:$0xff]  ;;  %v3217_v57 = vsel %vm731_vm2, %v3215_v18, %v3216_v47  ;;  %v2609_v16 = vld [vmem:[#allocation2 + $0x731] ss:$2 sm:$0xff] }
 0x249   : > { %v2611_v28 = vld [vmem:[#allocation2 + $0x741] ss:$2 sm:$0xff]  ;;  %3210 = vst.msk [vmem:[#allocation3 + $0x1cb] sm:$0xff] %vm333_vm0, %v3207_v45  ;;  %v3226_v20 = vmax.f32 %v2784_v0, %v3217_v57  ;;  %v3219_v58 = vsel %vm731_vm2, %v3216_v47, %v3218_v53  ;;  %v2793_v14 = vmax.f32 %v2309_v15, %v2609_v16  ;;  %v2305_v29 = vld [vmem:[#allocation2 + $0x710] ss:$2 sm:$0xff] }
 0x24a   : > { %v3220_v17 = vrot.slane %v24301_v7, 1  ;;  %v2313_v43 = vld [vmem:[#allocation2 + $0x750] ss:$2 sm:$0xff]  ;;  %v3227_v3 = vmax.f32 %v2785_v36, %v3219_v58  ;;  %v2794_v25 = vmax.f32 %v2311_v22, %v2611_v28  ;;  %v2605_v55 = vld [vmem:[#allocation2 + $0x711] ss:$2 sm:$0xff]  ;;  %19416 = vmatmul.mubr.msk.f32.gmra.mrb[48].mxu0 %vm333_vm0, %v24305_v38  ;;  %v24325_v42 = vld [vmem:[#allocation3 + $0x1a2] sm:$0xff] }
 0x24b   : > { %v2613_v34 = vld [vmem:[#allocation2 + $0x751] ss:$2 sm:$0xff]  ;;  %v2307_v46 = vld [vmem:[#allocation2 + $0x720] ss:$2 sm:$0xff]  ;;  %3230 = vst.msk [vmem:[#allocation3 + $0x1d3] sm:$0xfc] %vm2868_vm8, %v3226_v20  ;;  %19418 = vmatprep.mubr.msk.f32.mxu0 %vm333_vm0, %v24310_v30 }
 0x24c   : > { %v3221_v51 = vsel %vm731_vm2, %v3218_v53, %v3220_v17  ;;  %v3229_v8 = vmax.f32 %v2787_v44, %v3220_v17  ;;  %v3238_v24 = vrot.slane %v2793_v14, 1  ;;  %v2315_v10 = vld [vmem:[#allocation2 + $0x760] ss:$2 sm:$0xff]  ;;  %v2607_v0 = vld [vmem:[#allocation2 + $0x721] ss:$2 sm:$0xff]  ;;  %3231 = vst.msk [vmem:[#allocation3 + $0x1db] sm:$0xff] %vm333_vm0, %v3227_v3  ;;  %v2795_v54 = vmax.f32 %v2313_v43, %v2613_v34 }
 0x24d   : > { %v24319_v35 = vld [vmem:[#allocation3 + $0x19a] sm:$0xff]  ;;  %v3228_v32 = vmax.f32 %v2786_v1, %v3221_v51  ;;  %v3239_v6 = vrot.slane %v2794_v25, 1  ;;  %v2791_v44 = vmax.f32 %v2305_v29, %v2605_v55  ;;  %v2792_v9 = vmax.f32 %v2307_v46, %v2607_v0  ;;  %v24334_v16 = vld [vmem:[#allocation3 + $0x1aa] sm:$0xff]  ;;  %v24342_v46 = vld [vmem:[#allocation3 + $0x1b2] sm:$0xff] }
 0x24e   : > { %v2615_v31 = vld [vmem:[#allocation2 + $0x761] ss:$2 sm:$0xff]  ;;  %v2321_v37 = vld [vmem:[#allocation2 + $0x790] ss:$2 sm:$0xff]  ;;  %3233 = vst.msk [vmem:[#allocation3 + $0x1eb] sm:$0x3] %vm2872_vm9, %v3229_v8  ;;  %19419 = vmatmul.mubr.msk.f32.gmra.mrb[50].mxu0 %vm333_vm0, %v24319_v35 }
 0x24f   : > { %v2796_v18 = vmax.f32 %v2315_v10, %v2615_v31  ;;  %v2323_v60 = vld [vmem:[#allocation2 + $0x7a0] ss:$2 sm:$0xff]  ;;  %v2621_v2 = vld [vmem:[#allocation2 + $0x791] ss:$2 sm:$0xff]  ;;  %v2623_v49 = vld [vmem:[#allocation2 + $0x7a1] ss:$2 sm:$0xff]  ;;  %v3240_v47 = vsel %vm731_vm2, %v3238_v24, %v3239_v6  ;;  %19421 = vmatprep.mubr.msk.f32.mxu0 %vm333_vm0, %v24325_v42 }
 0x250   : > { %3232 = vst.msk [vmem:[#allocation3 + $0x1e3] sm:$0xff] %vm333_vm0, %v3228_v32  ;;  %v3241_v36 = vrot.slane %v2795_v54, 1  ;;  %v24329_v11 = vmax.f32 %v2321_v37, %v2621_v2  ;;  %v2800_v48 = vmax.f32 %v2323_v60, %v2623_v49  ;;  %v2317_v45 = vld [vmem:[#allocation2 + $0x770] ss:$2 sm:$0xff]  ;;  %v3249_v15 = vmax.f32 %v24301_v7, %v3240_v47  ;;  %v2617_v57 = vld [vmem:[#allocation2 + $0x771] ss:$2 sm:$0xff] }
 0x251   : > { %v2325_v53 = vld [vmem:[#allocation2 + $0x7b0] ss:$2 sm:$0xff]  ;;  %v3243_v22 = vrot.slane %v2796_v18, 1  ;;  %v2625_v1 = vld [vmem:[#allocation2 + $0x7b1] ss:$2 sm:$0xff]  ;;  %v2797_v24 = vmax.f32 %v2317_v45, %v2617_v57  ;;  %v24354_v49 = vld [vmem:[#allocation3 + $0x1c2] sm:$0xff] }
 0x252   : > { %v3242_v28 = vsel %vm731_vm2, %v3239_v6, %v3241_v36  ;;  %v3261_v20 = vrot.slane %v24329_v11, 1  ;;  %v3262_v58 = vrot.slane %v2800_v48, 1  ;;  %v2319_v17 = vld [vmem:[#allocation2 + $0x780] ss:$2 sm:$0xff]  ;;  %3253 = vst.msk [vmem:[#allocation3 + $0x1eb] sm:$0xf0] %vm2893_vm10, %v3249_v15  ;;  %v2801_v3 = vmax.f32 %v2325_v53, %v2625_v1  ;;  %19422 = vmatmul.mubr.msk.f32.gmra.mrb[52].mxu0 %vm333_vm0, %v24334_v16 }
 0x253   : > { %v3250_v7 = vmax.f32 %v2791_v44, %v3242_v28  ;;  %v3244_v29 = vsel %vm731_vm2, %v3241_v36, %v3243_v22  ;;  %v3252_v43 = vmax.f32 %v2793_v14, %v3243_v22  ;;  %v2327_v25 = vld [vmem:[#allocation2 + $0x7c0] ss:$2 sm:$0xff]  ;;  %v2619_v55 = vld [vmem:[#allocation2 + $0x781] ss:$2 sm:$0xff]  ;;  %v2337_v32 = vld [vmem:[#allocation2 + $0x810] ss:$2 sm:$0xff]  ;;  %19424 = vmatprep.mubr.msk.f32.mxu0 %vm333_vm0, %v24342_v46 }
 0x254   : > { %v2627_v34 = vld [vmem:[#allocation2 + $0x7c1] ss:$2 sm:$0xff]  ;;  %v3251_v51 = vmax.f32 %v2792_v9, %v3244_v29  ;;  %v3263_v8 = vsel %vm731_vm2, %v3261_v20, %v3262_v58  ;;  %v2335_v0 = vld [vmem:[#allocation2 + $0x800] ss:$2 sm:$0xff]  ;;  %v3264_v54 = vrot.slane %v2801_v3, 1  ;;  %v2798_v14 = vmax.f32 %v2319_v17, %v2619_v55 }
 0x255   : > { %v2802_v10 = vmax.f32 %v2327_v25, %v2627_v34  ;;  %3254 = vst.msk [vmem:[#allocation3 + $0x1f3] sm:$0xff] %vm333_vm0, %v3250_v7  ;;  %v3272_v6 = vmax.f32 %v2796_v18, %v3263_v8  ;;  %v2329_v31 = vld [vmem:[#allocation2 + $0x7d0] ss:$2 sm:$0xff]  ;;  %v2629_v37 = vld [vmem:[#allocation2 + $0x7d1] ss:$2 sm:$0xff] }
 0x256   : > { %3256 = vst.msk [vmem:[#allocation3 + $0x203] sm:$0xf] %vm2897_vm11, %v3252_v43  ;;  %v24349_v44 = vld [vmem:[#allocation3 + $0x1ba] sm:$0xff]  ;;  %v3265_v18 = vsel %vm731_vm2, %v3262_v58, %v3264_v54  ;;  %v2803_v47 = vmax.f32 %v2329_v31, %v2629_v37  ;;  %v24362_v55 = vld [vmem:[#allocation3 + $0x1ca] sm:$0xff] }
 0x257   : > { %3255 = vst.msk [vmem:[#allocation3 + $0x1fb] sm:$0xff] %vm333_vm0, %v3251_v51  ;;  %v3266_v9 = vrot.slane %v2802_v10, 1  ;;  %v2635_v60 = vld [vmem:[#allocation2 + $0x801] ss:$2 sm:$0xff]  ;;  %v2637_v2 = vld [vmem:[#allocation2 + $0x811] ss:$2 sm:$0xff]  ;;  %v3273_v15 = vmax.f32 %v2797_v24, %v3265_v18  ;;  %19425 = vmatmul.mubr.msk.f32.gmra.mrb[54].mxu0 %vm333_vm0, %v24349_v44 }
 0x258   : > { %3276 = vst.msk [vmem:[#allocation3 + $0x203] sm:$0xc0] %vm2918_vm12, %v3272_v6  ;;  %v2806_v36 = vmax.f32 %v2335_v0, %v2635_v60  ;;  %v2807_v48 = vmax.f32 %v2337_v32, %v2637_v2  ;;  %v2339_v45 = vld [vmem:[#allocation2 + $0x820] ss:$2 sm:$0xff]  ;;  %v2639_v53 = vld [vmem:[#allocation2 + $0x821] ss:$2 sm:$0xff]  ;;  %19427 = vmatprep.mubr.msk.f32.mxu0 %vm333_vm0, %v24354_v49 }
 0x259   : > { %v3267_v22 = vsel %vm731_vm2, %v3264_v54, %v3266_v9  ;;  %v3275_v57 = vmax.f32 %v24329_v11, %v3266_v9  ;;  %v2331_v1 = vld [vmem:[#allocation2 + $0x7e0] ss:$2 sm:$0xff]  ;;  %v2631_v28 = vld [vmem:[#allocation2 + $0x7e1] ss:$2 sm:$0xff]  ;;  %v2808_v20 = vmax.f32 %v2339_v45, %v2639_v53  ;;  %v2341_v17 = vld [vmem:[#allocation2 + $0x830] ss:$2 sm:$0xff] }
 0x25a   : > { %v3274_v7 = vmax.f32 %v2798_v14, %v3267_v22  ;;  %v3284_v29 = vrot.slane %v2806_v36, 1  ;;  %v3285_v43 = vrot.slane %v2807_v48, 1  ;;  %v2804_v3 = vmax.f32 %v2331_v1, %v2631_v28  ;;  %v2333_v25 = vld [vmem:[#allocation2 + $0x7f0] ss:$2 sm:$0xff]  ;;  %v2633_v58 = vld [vmem:[#allocation2 + $0x7f1] ss:$2 sm:$0xff] }
 0x25b   : > { %3277 = vst.msk [vmem:[#allocation3 + $0x20b] sm:$0xff] %vm333_vm0, %v3273_v15  ;;  %v3287_v11 = vrot.slane %v2808_v20, 1  ;;  %v2641_v34 = vld [vmem:[#allocation2 + $0x831] ss:$2 sm:$0xff]  ;;  %v2347_v51 = vld [vmem:[#allocation2 + $0x860] ss:$2 sm:$0xff]  ;;  %v2805_v24 = vmax.f32 %v2333_v25, %v2633_v58  ;;  %19428 = vmatmul.mubr.msk.f32.gmra.mrb[56].mxu0 %vm333_vm0, %v24362_v55 }
 0x25c   : > { %3279 = vst.msk [vmem:[#allocation3 + $0x21b] sm:$0x3f] %vm2922_vm13, %v3275_v57  ;;  %v3286_v8 = vsel %vm731_vm2, %v3284_v29, %v3285_v43  ;;  %v2809_v10 = vmax.f32 %v2341_v17, %v2641_v34  ;;  %v2349_v0 = vld [vmem:[#allocation2 + $0x870] ss:$2 sm:$0xff]  ;;  %v2647_v32 = vld [vmem:[#allocation2 + $0x861] ss:$2 sm:$0xff] }
 0x25d   : > { %3278 = vst.msk [vmem:[#allocation3 + $0x213] sm:$0xff] %vm333_vm0, %v3274_v7  ;;  %v2649_v6 = vld [vmem:[#allocation2 + $0x871] ss:$2 sm:$0xff]  ;;  %v3294_v14 = vmax.f32 %v2803_v47, %v3286_v8  ;;  %v3288_v31 = vsel %vm731_vm2, %v3285_v43, %v3287_v11  ;;  %v2812_v37 = vmax.f32 %v2347_v51, %v2647_v32  ;;  %v2351_v60 = vld [vmem:[#allocation2 + $0x880] ss:$2 sm:$0xff] }
 0x25e   : > { %v5766_v54 = vld [vmem:[#allocation3 + $0x1a] sm:$0xff]  ;;  %v2813_v9 = vmax.f32 %v2349_v0, %v2649_v6  ;;  %v3295_v18 = vmax.f32 %v2804_v3, %v3288_v31  ;;  %v3289_v36 = vrot.slane %v2809_v10, 1  ;;  %v5767_v15 = vld [vmem:[#allocation3 + $0x22] sm:$0xff]  ;;  %v5768_v28 = vld [vmem:[#allocation3 + $0x2a] sm:$0xff] }
 0x25f   : > { %v2651_v2 = vld [vmem:[#allocation2 + $0x881] ss:$2 sm:$0xff]  ;;  %v2343_v48 = vld [vmem:[#allocation2 + $0x840] ss:$2 sm:$0xff]  ;;  %3297 = vst.msk [vmem:[#allocation3 + $0x223] sm:$0xff] %vm333_vm0, %v3294_v14  ;;  %v3304_v22 = vrot.slane %v2812_v37, 1  ;;  %19464 = vmatprep.mubr.msk.f32.mxu0 %vm333_vm0, %v5766_v54 }
 0x260   : > { %v2643_v45 = vld [vmem:[#allocation2 + $0x841] ss:$2 sm:$0xff]  ;;  %v2814_v53 = vmax.f32 %v2351_v60, %v2651_v2  ;;  %v3305_v57 = vrot.slane %v2813_v9, 1  ;;  %v2353_v1 = vld [vmem:[#allocation2 + $0x890] ss:$2 sm:$0xff]  ;;  %3298 = vst.msk [vmem:[#allocation3 + $0x22b] sm:$0xff] %vm333_vm0, %v3295_v18  ;;  %v3290_v20 = vsel %vm731_vm2, %v3287_v11, %v3289_v36  ;;  %19465 = vmatmul.mubr.msk.f32.vlgmr.msra.gmra.mrb[0].mxu0 %vm333_vm0, %v5767_v15 }
 0x261   : > { %v2810_v47 = vmax.f32 %v2343_v48, %v2643_v45  ;;  %v2653_v7 = vld [vmem:[#allocation2 + $0x891] ss:$2 sm:$0xff]  ;;  %v2359_v29 = vld [vmem:[#allocation2 + $0x8c0] ss:$2 sm:$0xff]  ;;  %v3296_v43 = vmax.f32 %v2805_v24, %v3290_v20  ;;  %v2345_v25 = vld [vmem:[#allocation2 + $0x850] ss:$2 sm:$0xff]  ;;  %20930 = vmatpush3.bf16.msra.mxu0 %v24065_v27  ;;  %19467 = vmatprep.mubr.msk.f32.mxu0 %vm333_vm0, %v5768_v28 }
 0x262   : > { %v3307_v17 = vrot.slane %v2814_v53, 1  ;;  %v3306_v3 = vsel %vm731_vm2, %v3304_v22, %v3305_v57  ;;  %v2645_v58 = vld [vmem:[#allocation2 + $0x851] ss:$2 sm:$0xff]  ;;  %v2815_v34 = vmax.f32 %v2353_v1, %v2653_v7  ;;  %v2361_v51 = vld [vmem:[#allocation2 + $0x8d0] ss:$2 sm:$0xff]  ;;  %v5771_v28 = vld [vmem:[#allocation3 + $0x42] sm:$0xff] }
 0x263   : > { %v3315_v8 = vmax.f32 %v2809_v10, %v3306_v3  ;;  %v2811_v32 = vmax.f32 %v2345_v25, %v2645_v58  ;;  %v2659_v6 = vld [vmem:[#allocation2 + $0x8c1] ss:$2 sm:$0xff]  ;;  %v2661_v54 = vld [vmem:[#allocation2 + $0x8d1] ss:$2 sm:$0xff]  ;;  %3299 = vst.msk [vmem:[#allocation3 + $0x233] sm:$0xff] %vm333_vm0, %v3296_v43 }
 0x264   : > { %v3308_v0 = vsel %vm731_vm2, %v3305_v57, %v3307_v17  ;;  %v5769_v14 = vld [vmem:[#allocation3 + $0x32] sm:$0xff]  ;;  %v5770_v11 = vld [vmem:[#allocation3 + $0x3a] sm:$0xff]  ;;  %v3309_v24 = vrot.slane %v2815_v34, 1  ;;  %v2818_v9 = vmax.f32 %v2359_v29, %v2659_v6  ;;  %v2819_v60 = vmax.f32 %v2361_v51, %v2661_v54 }
 0x265   : > { %v3316_v31 = vmax.f32 %v2810_v47, %v3308_v0  ;;  %v2363_v2 = vld [vmem:[#allocation2 + $0x8e0] ss:$2 sm:$0xff]  ;;  %3319 = vst.msk [vmem:[#allocation3 + $0x23b] sm:$0xfc] %vm2868_vm8, %v3315_v8  ;;  %v2663_v10 = vld [vmem:[#allocation2 + $0x8e1] ss:$2 sm:$0xff]  ;;  %19468 = vmatmul.mubr.msk.f32.gmra.mrb[2].mxu0 %vm333_vm0, %v5769_v14 }
 0x266   : > { %v2365_v18 = vld [vmem:[#allocation2 + $0x8f0] ss:$2 sm:$0xff]  ;;  %v2665_v36 = vld [vmem:[#allocation2 + $0x8f1] ss:$2 sm:$0xff]  ;;  %v3310_v48 = vsel %vm731_vm2, %v3307_v17, %v3309_v24  ;;  %v3318_v45 = vmax.f32 %v2812_v37, %v3309_v24  ;;  %v3327_v53 = vrot.slane %v2818_v9, 1  ;;  %v3328_v15 = vrot.slane %v2819_v60, 1  ;;  %19470 = vmatprep.mubr.msk.f32.mxu0 %vm333_vm0, %v5770_v11 }
 0x267   : > { %3320 = vst.msk [vmem:[#allocation3 + $0x243] sm:$0xff] %vm333_vm0, %v3316_v31  ;;  %v2355_v22 = vld [vmem:[#allocation2 + $0x8a0] ss:$2 sm:$0xff]  ;;  %v2655_v57 = vld [vmem:[#allocation2 + $0x8a1] ss:$2 sm:$0xff]  ;;  %v3317_v47 = vmax.f32 %v2811_v32, %v3310_v48  ;;  %v2820_v1 = vmax.f32 %v2363_v2, %v2663_v10  ;;  %v2821_v7 = vmax.f32 %v2365_v18, %v2665_v36  ;;  %vm11333_vm8 = vcmask 256000  }
 0x268   : > { %v2357_v20 = vld [vmem:[#allocation2 + $0x8b0] ss:$2 sm:$0xff]  ;;  %v2657_v27 = vld [vmem:[#allocation2 + $0x8b1] ss:$2 sm:$0xff]  ;;  %3322 = vst.msk [vmem:[#allocation3 + $0x253] sm:$0x3] %vm2872_vm9, %v3318_v45  ;;  %v3329_v29 = vsel %vm731_vm2, %v3327_v53, %v3328_v15  ;;  %v2816_v43 = vmax.f32 %v2355_v22, %v2655_v57 }
 0x269   : > { %v2817_v3 = vmax.f32 %v2357_v20, %v2657_v27  ;;  %v2371_v17 = vld [vmem:[#allocation2 + $0x920] ss:$2 sm:$0xff]  ;;  %v2373_v37 = vld [vmem:[#allocation2 + $0x930] ss:$2 sm:$0xff]  ;;  %3321 = vst.msk [vmem:[#allocation3 + $0x24b] sm:$0xff] %vm333_vm0, %v3317_v47  ;;  %v3338_v25 = vmax.f32 %v2815_v34, %v3329_v29  ;;  %v3330_v58 = vrot.slane %v2820_v1, 1  ;;  %19471 = vmatmul.mubr.msk.f32.gmra.mrb[4].mxu0 %vm333_vm0, %v5771_v28 }
 0x26a   : > { %v3332_v51 = vrot.slane %v2821_v7, 1  ;;  %v2671_v8 = vld [vmem:[#allocation2 + $0x921] ss:$2 sm:$0xff]  ;;  %v2673_v0 = vld [vmem:[#allocation2 + $0x931] ss:$2 sm:$0xff]  ;;  %vm16786_vm9 = vcmask 519168  }
 0x26b   : > { %v5772_v32 = vld [vmem:[#allocation3 + $0x4a] sm:$0xff]  ;;  %v2824_v6 = vmax.f32 %v2371_v17, %v2671_v8  ;;  %v2825_v54 = vmax.f32 %v2373_v37, %v2673_v0  ;;  %3342 = vst.msk [vmem:[#allocation3 + $0x253] sm:$0xf0] %vm2893_vm10, %v3338_v25  ;;  %v3331_v24 = vsel %vm731_vm2, %v3328_v15, %v3330_v58  ;;  %v5773_v53 = vld [vmem:[#allocation3 + $0x52] sm:$0xff]  ;;  %v5774_v15 = vld [vmem:[#allocation3 + $0x5a] sm:$0xff] }
 0x26c   : > { %v2375_v14 = vld [vmem:[#allocation2 + $0x940] ss:$2 sm:$0xff]  ;;  %v2675_v31 = vld [vmem:[#allocation2 + $0x941] ss:$2 sm:$0xff]  ;;  %v3333_v60 = vsel %vm731_vm2, %v3330_v58, %v3332_v51  ;;  %v3339_v34 = vmax.f32 %v2816_v43, %v3331_v24  ;;  %v2377_v45 = vld [vmem:[#allocation2 + $0x950] ss:$2 sm:$0xff]  ;;  %19473 = vmatprep.mubr.msk.f32.mxu0 %vm333_vm0, %v5772_v32  ;;  %v3341_v22 = vmax.f32 %v2818_v9, %v3332_v51 }
 0x26d   : > { %v2367_v2 = vld [vmem:[#allocation2 + $0x900] ss:$2 sm:$0xff]  ;;  %v2667_v11 = vld [vmem:[#allocation2 + $0x901] ss:$2 sm:$0xff]  ;;  %v2826_v10 = vmax.f32 %v2375_v14, %v2675_v31  ;;  %v3340_v18 = vmax.f32 %v2817_v3, %v3333_v60  ;;  %v3350_v36 = vrot.slane %v2824_v6, 1  ;;  %v3351_v48 = vrot.slane %v2825_v54, 1  ;;  %19474 = vmatmul.mubr.msk.f32.gmra.mrb[6].mxu0 %vm333_vm0, %v5773_v53 }
 0x26e   : > { %v2822_v57 = vmax.f32 %v2367_v2, %v2667_v11  ;;  %v2677_v1 = vld [vmem:[#allocation2 + $0x951] ss:$2 sm:$0xff]  ;;  %3343 = vst.msk [vmem:[#allocation3 + $0x25b] sm:$0xff] %vm333_vm0, %v3339_v34  ;;  %v2369_v27 = vld [vmem:[#allocation2 + $0x910] ss:$2 sm:$0xff]  ;;  %19476 = vmatprep.mubr.msk.f32.mxu0 %vm333_vm0, %v5774_v15  ;;  %v5775_v25 = vld [vmem:[#allocation3 + $0x62] sm:$0xff] }
 0x26f   : > { %v3353_v47 = vrot.slane %v2826_v10, 1  ;;  %3344 = vst.msk [vmem:[#allocation3 + $0x263] sm:$0xff] %vm333_vm0, %v3340_v18  ;;  %v3352_v20 = vsel %vm731_vm2, %v3350_v36, %v3351_v48  ;;  %v2669_v28 = vld [vmem:[#allocation2 + $0x911] ss:$2 sm:$0xff]  ;;  %v2827_v29 = vmax.f32 %v2377_v45, %v2677_v1  ;;  %v5779_v54 = vld [vmem:[#allocation3 + $0x82] sm:$0xff] }
 0x270   : > { %3345 = vst.msk [vmem:[#allocation3 + $0x26b] sm:$0xf] %vm2897_vm11, %v3341_v22  ;;  %v3361_v43 = vmax.f32 %v2821_v7, %v3352_v20  ;;  %v2823_v17 = vmax.f32 %v2369_v27, %v2669_v28  ;;  %v5776_v58 = vld [vmem:[#allocation3 + $0x6a] sm:$0xff]  ;;  %v5777_v7 = vld [vmem:[#allocation3 + $0x72] sm:$0xff]  ;;  %v5778_v32 = vld [vmem:[#allocation3 + $0x7a] sm:$0xff] }
 0x271   : > { %v3354_v3 = vsel %vm731_vm2, %v3351_v48, %v3353_v47  ;;  %v3355_v37 = vrot.slane %v2827_v29, 1  ;;  %19477 = vmatmul.mubr.msk.f32.gmra.mrb[8].mxu0 %vm333_vm0, %v5775_v25  ;;  %v5780_v14 = vld [vmem:[#allocation3 + $0x8a] sm:$0xff]  ;;  %v3380_v24 = vld [vmem:[%s27070_s3 + $0x58] sm:$0xff]  ;;  %v22134_v11 = vld [vmem:[#allocation3 + $0xa2] sm:$0xff] }
 0x272   : > { %v3362_v9 = vmax.f32 %v2822_v57, %v3354_v3  ;;  %3365 = vst.msk [vmem:[#allocation3 + $0x26b] sm:$0xc0] %vm2918_vm12, %v3361_v43  ;;  %19479 = vmatprep.mubr.msk.f32.mxu0 %vm333_vm0, %v5776_v58  ;;  %v3379_v31 = vld [vmem:[%s27070_s3 + $0x50] sm:$0xff]  ;;  %v22133_v2 = vld [vmem:[#allocation3 + $0x9a] sm:$0xff]  ;;  %v22138_v36 = vld [vmem:[#allocation3 + $0xc2] sm:$0xff] }
 0x273   : > { %v3356_v51 = vsel %vm731_vm2, %v3353_v47, %v3355_v37  ;;  %v3364_v8 = vmax.f32 %v2824_v6, %v3355_v37  ;;  %v5781_v6 = vld [vmem:[#allocation3 + $0x92] sm:$0xff]  ;;  %v24420_v60 = vpack.c.bf16 %v3380_v24, %v3379_v31  ;;  %v22135_v10 = vld [vmem:[#allocation3 + $0xaa] sm:$0xff]  ;;  %v22137_v18 = vld [vmem:[#allocation3 + $0xba] sm:$0xff]  ;;  %vm11314_vm2 = vcmask 261124  }
 0x274   : > { %3366 = vst.msk [vmem:[#allocation3 + $0x273] sm:$0xff] %vm333_vm0, %v3362_v9  ;;  %v3363_v0 = vmax.f32 %v2823_v17, %v3356_v51  ;;  %v22136_v34 = vld [vmem:[#allocation3 + $0xb2] sm:$0xff]  ;;  %v22139_v48 = vld [vmem:[#allocation3 + $0xca] sm:$0xff]  ;;  %v22141_v53 = vld [vmem:[#allocation3 + $0xda] sm:$0xff] }
 0x275   : > { %3368 = vst.msk [vmem:[#allocation3 + $0x283] sm:$0x3f] %vm2922_vm13, %v3364_v8  ;;  %19480 = vmatmul.mubr.msk.f32.gmra.mrb[10].mxu0 %vm333_vm0, %v5777_v7  ;;  %20932 = vmatprep.subr.bf16.mxu0 %v24420_v60  ;;  %v22140_v45 = vld [vmem:[#allocation3 + $0xd2] sm:$0xff]  ;;  %v22142_v22 = vld [vmem:[#allocation3 + $0xe2] sm:$0xff]  ;;  %v22143_v57 = vld [vmem:[#allocation3 + $0xea] sm:$0xff] }
 0x276   : > { %3367 = vst.msk [vmem:[#allocation3 + $0x27b] sm:$0xff] %vm333_vm0, %v3363_v0  ;;  %19482 = vmatprep.mubr.msk.f32.mxu0 %vm333_vm0, %v5778_v32  ;;  %v22144_v47 = vld [vmem:[#allocation3 + $0xf2] sm:$0xff]  ;;  %v6615_v1 = vld [vmem:[#allocation3 + $0x3b] sm:$0xff]  ;;  %v6616_v15 = vld [vmem:[#allocation3 + $0x43] sm:$0xff] }
 0x277   : > { %v6617_v20 = vld [vmem:[#allocation3 + $0x4b] sm:$0xff]  ;;  %v6618_v27 = vld [vmem:[#allocation3 + $0x53] sm:$0xff]  ;;  %v6619_v28 = vld [vmem:[#allocation3 + $0x5b] sm:$0xff] }
 0x278   : > { %v6620_v29 = vld [vmem:[#allocation3 + $0x63] sm:$0xff]  ;;  %v6621_v43 = vld [vmem:[#allocation3 + $0x6b] sm:$0xff]  ;;  %v6622_v3 = vld [vmem:[#allocation3 + $0x73] sm:$0xff] }
 0x279   : > { %19483 = vmatmul.mubr.msk.f32.gmra.mrb[12].mxu0 %vm333_vm0, %v5779_v54  ;;  %v6623_v17 = vld [vmem:[#allocation3 + $0x7b] sm:$0xff]  ;;  %v6624_v9 = vld [vmem:[#allocation3 + $0x83] sm:$0xff]  ;;  %v6625_v37 = vld [vmem:[#allocation3 + $0x8b] sm:$0xff] }
 0x27a   : > { %19485 = vmatprep.mubr.msk.f32.mxu0 %vm333_vm0, %v5780_v14  ;;  %v6626_v25 = vld [vmem:[#allocation3 + $0x93] sm:$0xff]  ;;  %v3381_v58 = vld [vmem:[%s27070_s3 + $0x60] sm:$0xff]  ;;  %v3382_v51 = vld [vmem:[%s27070_s3 + $0x68] sm:$0xff] }
 0x27b   : > { %v6627_v8 = vld [vmem:[#allocation3 + $0x9b] sm:$0xff]  ;;  %v24535_v0 = vpack.c.bf16 %v3382_v51, %v3381_v58  ;;  %v6628_v7 = vld [vmem:[#allocation3 + $0xa3] sm:$0xff]  ;;  %v6629_v32 = vld [vmem:[#allocation3 + $0xab] sm:$0xff] }
 0x27c   : > { %v6630_v54 = vld [vmem:[#allocation3 + $0xb3] sm:$0xff]  ;;  %v6631_v14 = vld [vmem:[#allocation3 + $0xbb] sm:$0xff]  ;;  %v6633_v31 = vld [vmem:[#allocation3 + $0xcb] sm:$0xff] }
 0x27d   : > { %19486 = vmatmul.mubr.msk.f32.gmra.mrb[14].mxu0 %vm333_vm0, %v5781_v6  ;;  %v6632_v6 = vld [vmem:[#allocation3 + $0xc3] sm:$0xff]  ;;  %v6634_v24 = vld [vmem:[#allocation3 + $0xd3] sm:$0xff] }
 0x27e   : > { %19488 = vmatprep.mubr.msk.f32.mxu0 %vm333_vm0, %v22133_v2  ;;  %v6636_v2 = vld [vmem:[#allocation3 + $0xe3] sm:$0xff] }
 0x27f   : > { %v3465_v58 = vld [vmem:[#allocation3 + $0x1] sm:$0xff]  ;;  %v3466_v51 = vld [vmem:[#allocation3 + $0x9] sm:$0xff] }
 0x280   : > { %19101 = vmatprep.mubr.msk.f32.mxu1 %vm333_vm0, %v3465_v58  ;;  %v3495_v58 = vld [vmem:[#allocation3 + $0xf1] sm:$0xff] }
 0x281   : > { %19489 = vmatmul.mubr.msk.f32.gmra.mrb[16].mxu0 %vm333_vm0, %v22134_v11  ;;  %v6637_v11 = vld [vmem:[#allocation3 + $0xeb] sm:$0xff] }
 0x282   : > { %19491 = vmatprep.mubr.msk.f32.mxu0 %vm333_vm0, %v22135_v10  ;;  %v6638_v10 = vld [vmem:[#allocation3 + $0xf3] sm:$0xff] }
 0x285   : > { %19492 = vmatmul.mubr.msk.f32.gmra.mrb[18].mxu0 %vm333_vm0, %v22136_v34  ;;  %v6639_v34 = vld [vmem:[#allocation3 + $0xfb] sm:$0xff] }
 0x286   : > { %19494 = vmatprep.mubr.msk.f32.mxu0 %vm333_vm0, %v22137_v18  ;;  %v6640_v18 = vld [vmem:[#allocation3 + $0x103] sm:$0xff] }
 0x289   : > { %19495 = vmatmul.mubr.msk.f32.gmra.mrb[20].mxu0 %vm333_vm0, %v22138_v36  ;;  %v6641_v36 = vld [vmem:[#allocation3 + $0x10b] sm:$0xff] }
 0x28a   : > { %19497 = vmatprep.mubr.msk.f32.mxu0 %vm333_vm0, %v22139_v48  ;;  %v6642_v48 = vld [vmem:[#allocation3 + $0x113] sm:$0xff] }
 0x28d   : > { %19498 = vmatmul.mubr.msk.f32.gmra.mrb[22].mxu0 %vm333_vm0, %v22140_v45  ;;  %v6643_v45 = vld [vmem:[#allocation3 + $0x11b] sm:$0xff] }
 0x28e   : > { %19500 = vmatprep.mubr.msk.f32.mxu0 %vm333_vm0, %v22141_v53  ;;  %v6644_v53 = vld [vmem:[#allocation3 + $0x123] sm:$0xff] }
 0x291   : > { %19501 = vmatmul.mubr.msk.f32.gmra.mrb[24].mxu0 %vm333_vm0, %v22142_v22  ;;  %v6645_v22 = vld [vmem:[#allocation3 + $0x12b] sm:$0xff] }
 0x292   : > { %19503 = vmatprep.mubr.msk.f32.mxu0 %vm333_vm0, %v22143_v57  ;;  %v6646_v57 = vld [vmem:[#allocation3 + $0x133] sm:$0xff] }
 0x295   : > { %19504 = vmatmul.mubr.msk.f32.gmra.mrb[26].mxu0 %vm333_vm0, %v22144_v47  ;;  %v6647_v47 = vld [vmem:[#allocation3 + $0x13b] sm:$0xff] }
 0x296   : > { %19506 = vmatprep.mubr.msk.f32.mxu0 %vm333_vm0, %v24189_v5  ;;  %v5821_v5 = vld [vmem:[#allocation3 + $0x1d2] sm:$0xff] }
 0x299   : > { %19507 = vmatmul.mubr.msk.f32.gmra.mrb[28].mxu0 %vm333_vm0, %v24192_v62  ;;  %v5822_v62 = vld [vmem:[#allocation3 + $0x1da] sm:$0xff] }
 0x29a   : > { %19509 = vmatprep.mubr.msk.f32.mxu0 %vm333_vm0, %v24195_v41  ;;  %v5823_v41 = vld [vmem:[#allocation3 + $0x1e2] sm:$0xff] }
 0x29d   : > { %19510 = vmatmul.mubr.msk.f32.gmra.mrb[30].mxu0 %vm333_vm0, %v24205_v13  ;;  %v5824_v13 = vld [vmem:[#allocation3 + $0x1ea] sm:$0xff] }
 0x29e   : > { %19512 = vmatprep.mubr.msk.f32.mxu0 %vm333_vm0, %v24214_v39  ;;  %v5825_v39 = vld [vmem:[#allocation3 + $0x1f2] sm:$0xff] }
 0x2a1   : > { %19513 = vmatmul.mubr.msk.f32.gmra.mrb[32].mxu0 %vm333_vm0, %v24218_v61  ;;  %v5826_v61 = vld [vmem:[#allocation3 + $0x1fa] sm:$0xff] }
 0x2a2   : > { %19515 = vmatprep.mubr.msk.f32.mxu0 %vm333_vm0, %v24223_v40  ;;  %v5827_v40 = vld [vmem:[#allocation3 + $0x202] sm:$0xff] }
 0x2a5   : > { %19516 = vmatmul.mubr.msk.f32.gmra.mrb[34].mxu0 %vm333_vm0, %v24230_v33  ;;  %v5828_v33 = vld [vmem:[#allocation3 + $0x20a] sm:$0xff] }
 0x2a6   : > { %19518 = vmatprep.mubr.msk.f32.mxu0 %vm333_vm0, %v24239_v63  ;;  %v5829_v63 = vld [vmem:[#allocation3 + $0x212] sm:$0xff] }
 0x2a9   : > { %19519 = vmatmul.mubr.msk.f32.gmra.mrb[36].mxu0 %vm333_vm0, %v24243_v12  ;;  %v5830_v12 = vld [vmem:[#allocation3 + $0x21a] sm:$0xff] }
 0x2aa   : > { %19521 = vmatprep.mubr.msk.f32.mxu0 %vm333_vm0, %v24252_v4  ;;  %v5831_v4 = vld [vmem:[#allocation3 + $0x222] sm:$0xff] }
 0x2ad   : > { %19522 = vmatmul.mubr.msk.f32.gmra.mrb[38].mxu0 %vm333_vm0, %v24258_v26  ;;  %v5832_v26 = vld [vmem:[#allocation3 + $0x22a] sm:$0xff] }
 0x2ae   : > { %19524 = vmatprep.mubr.msk.f32.mxu0 %vm333_vm0, %v24268_v19  ;;  %v5833_v19 = vld [vmem:[#allocation3 + $0x232] sm:$0xff] }
 0x2b1   : > { %19525 = vmatmul.mubr.msk.f32.gmra.mrb[40].mxu0 %vm333_vm0, %v24270_v50  ;;  %v5834_v50 = vld [vmem:[#allocation3 + $0x23a] sm:$0xff] }
 0x2b2   : > { %19527 = vmatprep.mubr.msk.f32.mxu0 %vm333_vm0, %v24282_v59  ;;  %v5835_v59 = vld [vmem:[#allocation3 + $0x242] sm:$0xff] }
 0x2b5   : > { %19528 = vmatmul.mubr.msk.f32.gmra.mrb[42].mxu0 %vm333_vm0, %v24285_v23  ;;  %v5836_v23 = vld [vmem:[#allocation3 + $0x24a] sm:$0xff] }
 0x2b6   : > { %19530 = vmatprep.mubr.msk.f32.mxu0 %vm333_vm0, %v24294_v21  ;;  %v5837_v21 = vld [vmem:[#allocation3 + $0x252] sm:$0xff] }
 0x2b9   : > { %19531 = vmatmul.mubr.msk.f32.gmra.mrb[44].mxu0 %vm333_vm0, %v24297_v52  ;;  %v5838_v52 = vld [vmem:[#allocation3 + $0x25a] sm:$0xff] }
 0x2ba   : > { %19533 = vmatprep.mubr.msk.f32.mxu0 %vm333_vm0, %v24305_v38  ;;  %v5839_v38 = vld [vmem:[#allocation3 + $0x262] sm:$0xff] }
 0x2bd   : > { %19534 = vmatmul.mubr.msk.f32.gmra.mrb[46].mxu0 %vm333_vm0, %v24310_v30  ;;  %v5840_v30 = vld [vmem:[#allocation3 + $0x26a] sm:$0xff] }
 0x2be   : > { %19536 = vmatprep.mubr.msk.f32.mxu0 %vm333_vm0, %v24319_v35  ;;  %v5841_v35 = vld [vmem:[#allocation3 + $0x272] sm:$0xff] }
 0x2c1   : > { %19537 = vmatmul.mubr.msk.f32.gmra.mrb[48].mxu0 %vm333_vm0, %v24325_v42  ;;  %v5842_v42 = vld [vmem:[#allocation3 + $0x27a] sm:$0xff] }
 0x2c2   : > { %19539 = vmatprep.mubr.msk.f32.mxu0 %vm333_vm0, %v24334_v16  ;;  %v5843_v16 = vld [vmem:[#allocation3 + $0x282] sm:$0xff] }
 0x2c5   : > { %19540 = vmatmul.mubr.msk.f32.gmra.mrb[50].mxu0 %vm333_vm0, %v24342_v46  ;;  %v6611_v46 = vld [vmem:[#allocation3 + $0x1b] sm:$0xff] }
 0x2c6   : > { %19542 = vmatprep.mubr.msk.f32.mxu0 %vm333_vm0, %v24349_v44  ;;  %v6612_v44 = vld [vmem:[#allocation3 + $0x23] sm:$0xff] }
 0x2c9   : > { %19543 = vmatmul.mubr.msk.f32.gmra.mrb[52].mxu0 %vm333_vm0, %v24354_v49  ;;  %v6613_v49 = vld [vmem:[#allocation3 + $0x2b] sm:$0xff] }
 0x2ca   : > { %19545 = vmatprep.mubr.msk.f32.mxu0 %vm333_vm0, %v24362_v55  ;;  %v6614_v55 = vld [vmem:[#allocation3 + $0x33] sm:$0xff] }
 0x2cd   : > { %19546 = vmatmul.mubr.msk.f32.gmra.mrb[54].mxu0 %vm333_vm0, %v5821_v5  ;;  %v6648_v5 = vld [vmem:[#allocation3 + $0x143] sm:$0xff] }
 0x2ce   : > { %19548 = vmatprep.mubr.msk.f32.mxu0 %vm333_vm0, %v5822_v62  ;;  %v6649_v62 = vld [vmem:[#allocation3 + $0x14b] sm:$0xff] }
 0x2d1   : > { %19549 = vmatmul.mubr.msk.f32.gmra.mrb[56].mxu0 %vm333_vm0, %v5823_v41  ;;  %v6650_v41 = vld [vmem:[#allocation3 + $0x153] sm:$0xff] }
 0x2d2   : > { %19551 = vmatprep.mubr.msk.f32.mxu0 %vm333_vm0, %v5824_v13  ;;  %v6651_v13 = vld [vmem:[#allocation3 + $0x15b] sm:$0xff] }
 0x2d5   : > { %19552 = vmatmul.mubr.msk.f32.gmra.mrb[58].mxu0 %vm333_vm0, %v5825_v39  ;;  %v6652_v39 = vld [vmem:[#allocation3 + $0x163] sm:$0xff] }
 0x2d6   : > { %19554 = vmatprep.mubr.msk.f32.mxu0 %vm333_vm0, %v5826_v61  ;;  %v6653_v61 = vld [vmem:[#allocation3 + $0x16b] sm:$0xff] }
 0x2d9   : > { %19555 = vmatmul.mubr.msk.f32.gmra.mrb[60].mxu0 %vm333_vm0, %v5827_v40  ;;  %v6654_v40 = vld [vmem:[#allocation3 + $0x173] sm:$0xff] }
 0x2da   : > { %19557 = vmatprep.mubr.msk.f32.mxu0 %vm333_vm0, %v5828_v33  ;;  %v6655_v33 = vld [vmem:[#allocation3 + $0x17b] sm:$0xff] }
 0x2dd   : > { %19558 = vmatmul.mubr.msk.f32.gmra.mrb[62].mxu0 %vm333_vm0, %v5829_v63  ;;  %v6656_v63 = vld [vmem:[#allocation3 + $0x183] sm:$0xff] }
 0x2de   : > { %19560 = vmatprep.mubr.msk.f32.mxu0 %vm333_vm0, %v5830_v12  ;;  %v6657_v12 = vld [vmem:[#allocation3 + $0x18b] sm:$0xff] }
 0x2e1   : > { %19561 = vmatmul.mubr.msk.f32.gmra.mrb[64].mxu0 %vm333_vm0, %v5831_v4  ;;  %v6658_v4 = vld [vmem:[#allocation3 + $0x193] sm:$0xff] }
 0x2e2   : > { %19563 = vmatprep.mubr.msk.f32.mxu0 %vm333_vm0, %v5832_v26  ;;  %v6659_v26 = vld [vmem:[#allocation3 + $0x19b] sm:$0xff] }
 0x2e5   : > { %19564 = vmatmul.mubr.msk.f32.gmra.mrb[66].mxu0 %vm333_vm0, %v5833_v19  ;;  %v6660_v19 = vld [vmem:[#allocation3 + $0x1a3] sm:$0xff] }
 0x2e6   : > { %19566 = vmatprep.mubr.msk.f32.mxu0 %vm333_vm0, %v5834_v50  ;;  %v6661_v50 = vld [vmem:[#allocation3 + $0x1ab] sm:$0xff] }
 0x2e9   : > { %19567 = vmatmul.mubr.msk.f32.gmra.mrb[68].mxu0 %vm333_vm0, %v5835_v59  ;;  %v6662_v59 = vld [vmem:[#allocation3 + $0x1b3] sm:$0xff] }
 0x2ea   : > { %19569 = vmatprep.mubr.msk.f32.mxu0 %vm333_vm0, %v5836_v23  ;;  %v6663_v23 = vld [vmem:[#allocation3 + $0x1bb] sm:$0xff] }
 0x2ed   : > { %19570 = vmatmul.mubr.msk.f32.gmra.mrb[70].mxu0 %vm333_vm0, %v5837_v21  ;;  %v6664_v21 = vld [vmem:[#allocation3 + $0x1c3] sm:$0xff] }
 0x2ee   : > { %19572 = vmatprep.mubr.msk.f32.mxu0 %vm333_vm0, %v5838_v52  ;;  %v6665_v52 = vld [vmem:[#allocation3 + $0x1cb] sm:$0xff] }
 0x2f1   : > { %19573 = vmatmul.mubr.msk.f32.gmra.mrb[72].mxu0 %vm333_vm0, %v5839_v38  ;;  %v6666_v38 = vld [vmem:[#allocation3 + $0x1d3] sm:$0xff] }
 0x2f2   : > { %19575 = vmatprep.mubr.msk.f32.mxu0 %vm333_vm0, %v5840_v30  ;;  %v6667_v30 = vld [vmem:[#allocation3 + $0x1db] sm:$0xff] }
 0x2f5   : > { %19576 = vmatmul.mubr.msk.f32.gmra.mrb[74].mxu0 %vm333_vm0, %v5841_v35  ;;  %v6668_v35 = vld [vmem:[#allocation3 + $0x1e3] sm:$0xff] }
 0x2f6   : > { %19578 = vmatprep.mubr.msk.f32.mxu0 %vm333_vm0, %v5842_v42  ;;  %v6669_v42 = vld [vmem:[#allocation3 + $0x1eb] sm:$0xff] }
 0x2f9   : > { %19579 = vmatmul.mubr.msk.f32.gmra.mrb[76].mxu0 %vm333_vm0, %v5843_v16  ;;  %v6670_v16 = vld [vmem:[#allocation3 + $0x1f3] sm:$0xff] }
 0x2fa   : > { %19585 = vmatprep.mubr.msk.f32.mxu0 %vm333_vm0, %v6611_v46  ;;  %v6671_v46 = vld [vmem:[#allocation3 + $0x1fb] sm:$0xff] }
 0x2fd   : > { %19586 = vmatmul.mubr.msk.f32.vlgmr.msra.gmra.mrb[0].mxu0 %vm333_vm0, %v6612_v44  ;;  %v6672_v44 = vld [vmem:[#allocation3 + $0x203] sm:$0xff] }
 0x2fe   : > { %20934 = vmatpush3.bf16.msra.mxu0 %v24420_v60  ;;  %19588 = vmatprep.mubr.msk.f32.mxu0 %vm333_vm0, %v6613_v49  ;;  %v6635_v60 = vld [vmem:[#allocation3 + $0xdb] sm:$0xff]  ;;  %v6673_v49 = vld [vmem:[#allocation3 + $0x20b] sm:$0xff] }
 0x2ff   : > { %20936 = vmatprep.subr.bf16.mxu0 %v24535_v0 }
 0x301   : > { %19589 = vmatmul.mubr.msk.f32.gmra.mrb[2].mxu0 %vm333_vm0, %v6614_v55  ;;  %v6674_v55 = vld [vmem:[#allocation3 + $0x213] sm:$0xff] }
 0x302   : > { %19591 = vmatprep.mubr.msk.f32.mxu0 %vm333_vm0, %v6615_v1  ;;  %v6675_v1 = vld [vmem:[#allocation3 + $0x21b] sm:$0xff] }
 0x305   : > { %19592 = vmatmul.mubr.msk.f32.gmra.mrb[4].mxu0 %vm333_vm0, %v6616_v15  ;;  %v6676_v15 = vld [vmem:[#allocation3 + $0x223] sm:$0xff] }
 0x306   : > { %19594 = vmatprep.mubr.msk.f32.mxu0 %vm333_vm0, %v6617_v20  ;;  %v6677_v20 = vld [vmem:[#allocation3 + $0x22b] sm:$0xff] }
 0x309   : > { %19595 = vmatmul.mubr.msk.f32.gmra.mrb[6].mxu0 %vm333_vm0, %v6618_v27  ;;  %v6678_v27 = vld [vmem:[#allocation3 + $0x233] sm:$0xff] }
 0x30a   : > { %19597 = vmatprep.mubr.msk.f32.mxu0 %vm333_vm0, %v6619_v28  ;;  %v6679_v28 = vld [vmem:[#allocation3 + $0x23b] sm:$0xff] }
 0x30d   : > { %19598 = vmatmul.mubr.msk.f32.gmra.mrb[8].mxu0 %vm333_vm0, %v6620_v29  ;;  %v6680_v29 = vld [vmem:[#allocation3 + $0x243] sm:$0xff] }
 0x30e   : > { %19600 = vmatprep.mubr.msk.f32.mxu0 %vm333_vm0, %v6621_v43  ;;  %v6681_v43 = vld [vmem:[#allocation3 + $0x24b] sm:$0xff] }
 0x311   : > { %19601 = vmatmul.mubr.msk.f32.gmra.mrb[10].mxu0 %vm333_vm0, %v6622_v3  ;;  %v3371_v3 = vld [vmem:[%s27070_s3 + $0x10] sm:$0xff] }
 0x312   : > { %19603 = vmatprep.mubr.msk.f32.mxu0 %vm333_vm0, %v6623_v17  ;;  %v3372_v17 = vld [vmem:[%s27070_s3 + $0x18] sm:$0xff] }
 0x315   : > { %19604 = vmatmul.mubr.msk.f32.gmra.mrb[12].mxu0 %vm333_vm0, %v6624_v9  ;;  %v6682_v9 = vld [vmem:[#allocation3 + $0x253] sm:$0xff] }
 0x316   : > { %19606 = vmatprep.mubr.msk.f32.mxu0 %vm333_vm0, %v6625_v37  ;;  %v20911_v37 = vpack.c.bf16 %v3372_v17, %v3371_v3  ;;  %v24721_v3 = vld [vmem:[#allocation3 + $0xcc] sm:$0xff]  ;;  %v3493_v17 = vld [vmem:[#allocation3 + $0xe1] sm:$0xff] }
 0x318   : > { %20912 = vmatprep.subr.bf16.mxu1 %v20911_v37 }
 0x319   : > { %19607 = vmatmul.mubr.msk.f32.gmra.mrb[14].mxu0 %vm333_vm0, %v6626_v25  ;;  %v6683_v25 = vld [vmem:[#allocation3 + $0x25b] sm:$0xff]  ;;  %20914 = vmatpush3.bf16.msra.mxu1 %v20911_v37 }
 0x31a   : > { %19609 = vmatprep.mubr.msk.f32.mxu0 %vm333_vm0, %v6627_v8  ;;  %v6684_v8 = vld [vmem:[#allocation3 + $0x263] sm:$0xff]  ;;  %v24728_v37 = vld [vmem:[#allocation3 + $0xd4] sm:$0xff] }
 0x31c   : > { %19102 = vmatmul.mubr.msk.f32.vlgmr.msra.gmra.mrb[0].mxu1 %vm333_vm0, %v3466_v51  ;;  %v3496_v51 = vld [vmem:[#allocation3 + $0xf9] sm:$0xff] }
 0x31d   : > { %19610 = vmatmul.mubr.msk.f32.gmra.mrb[16].mxu0 %vm333_vm0, %v6628_v7  ;;  %v6685_v7 = vld [vmem:[#allocation3 + $0x26b] sm:$0xff] }
 0x31e   : > { %19612 = vmatprep.mubr.msk.f32.mxu0 %vm333_vm0, %v6629_v32  ;;  %v3467_v32 = vld [vmem:[#allocation3 + $0x11] sm:$0xff] }
 0x31f   : > { %19104 = vmatprep.mubr.msk.f32.mxu1 %vm333_vm0, %v3467_v32  ;;  %v3497_v32 = vld [vmem:[#allocation3 + $0x101] sm:$0xff] }
 0x321   : > { %19613 = vmatmul.mubr.msk.f32.gmra.mrb[18].mxu0 %vm333_vm0, %v6630_v54  ;;  %v3468_v54 = vld [vmem:[#allocation3 + $0x19] sm:$0xff] }
 0x322   : > { %19615 = vmatprep.mubr.msk.f32.mxu0 %vm333_vm0, %v6631_v14  ;;  %v6686_v14 = vld [vmem:[#allocation3 + $0x273] sm:$0xff]  ;;  %19105 = vmatmul.mubr.msk.f32.gmra.mrb[2].mxu1 %vm333_vm0, %v3468_v54  ;;  %v3498_v54 = vld [vmem:[#allocation3 + $0x109] sm:$0xff] }
 0x325   : > { %19616 = vmatmul.mubr.msk.f32.gmra.mrb[20].mxu0 %vm333_vm0, %v6632_v6  ;;  %v6687_v6 = vld [vmem:[#allocation3 + $0x27b] sm:$0xff] }
 0x326   : > { %19618 = vmatprep.mubr.msk.f32.mxu0 %vm333_vm0, %v6633_v31  ;;  %v3469_v31 = vld [vmem:[#allocation3 + $0x21] sm:$0xff] }
 0x327   : > { %19107 = vmatprep.mubr.msk.f32.mxu1 %vm333_vm0, %v3469_v31  ;;  %v3499_v31 = vld [vmem:[#allocation3 + $0x111] sm:$0xff] }
 0x329   : > { %19619 = vmatmul.mubr.msk.f32.gmra.mrb[22].mxu0 %vm333_vm0, %v6634_v24  ;;  %v3470_v24 = vld [vmem:[#allocation3 + $0x29] sm:$0xff] }
 0x32a   : > { %19621 = vmatprep.mubr.msk.f32.mxu0 %vm333_vm0, %v6635_v60  ;;  %v6688_v60 = vld [vmem:[#allocation3 + $0x283] sm:$0xff]  ;;  %19108 = vmatmul.mubr.msk.f32.gmra.mrb[4].mxu1 %vm333_vm0, %v3470_v24  ;;  %v3500_v24 = vld [vmem:[#allocation3 + $0x119] sm:$0xff] }
 0x32d   : > { %19622 = vmatmul.mubr.msk.f32.gmra.mrb[24].mxu0 %vm333_vm0, %v6636_v2  ;;  %v7456_v2 = vld [vmem:[#allocation3 + $0x1c] sm:$0xff] }
 0x32e   : > { %19624 = vmatprep.mubr.msk.f32.mxu0 %vm333_vm0, %v6637_v11  ;;  %v3471_v11 = vld [vmem:[#allocation3 + $0x31] sm:$0xff] }
 0x32f   : > { %19110 = vmatprep.mubr.msk.f32.mxu1 %vm333_vm0, %v3471_v11  ;;  %v3501_v11 = vld [vmem:[#allocation3 + $0x121] sm:$0xff] }
 0x331   : > { %19625 = vmatmul.mubr.msk.f32.gmra.mrb[26].mxu0 %vm333_vm0, %v6638_v10  ;;  %v3472_v10 = vld [vmem:[#allocation3 + $0x39] sm:$0xff] }
 0x332   : > { %19627 = vmatprep.mubr.msk.f32.mxu0 %vm333_vm0, %v6639_v34  ;;  %v7457_v34 = vld [vmem:[#allocation3 + $0x24] sm:$0xff]  ;;  %19111 = vmatmul.mubr.msk.f32.gmra.mrb[6].mxu1 %vm333_vm0, %v3472_v10 }
 0x333   : > { %v3502_v10 = vld [vmem:[#allocation3 + $0x129] sm:$0xff] }
 0x335   : > { %19628 = vmatmul.mubr.msk.f32.gmra.mrb[28].mxu0 %vm333_vm0, %v6640_v18  ;;  %v7458_v18 = vld [vmem:[#allocation3 + $0x2c] sm:$0xff] }
 0x336   : > { %19630 = vmatprep.mubr.msk.f32.mxu0 %vm333_vm0, %v6641_v36  ;;  %v3473_v36 = vld [vmem:[#allocation3 + $0x41] sm:$0xff] }
 0x337   : > { %19113 = vmatprep.mubr.msk.f32.mxu1 %vm333_vm0, %v3473_v36  ;;  %v3503_v36 = vld [vmem:[#allocation3 + $0x131] sm:$0xff] }
 0x339   : > { %19631 = vmatmul.mubr.msk.f32.gmra.mrb[30].mxu0 %vm333_vm0, %v6642_v48  ;;  %v3474_v48 = vld [vmem:[#allocation3 + $0x49] sm:$0xff] }
 0x33a   : > { %19633 = vmatprep.mubr.msk.f32.mxu0 %vm333_vm0, %v6643_v45  ;;  %v24619_v45 = vld [vmem:[#allocation3 + $0x34] sm:$0xff]  ;;  %19114 = vmatmul.mubr.msk.f32.gmra.mrb[8].mxu1 %vm333_vm0, %v3474_v48 }
 0x33b   : > { %v3504_v48 = vld [vmem:[#allocation3 + $0x139] sm:$0xff] }
 0x33d   : > { %19634 = vmatmul.mubr.msk.f32.gmra.mrb[32].mxu0 %vm333_vm0, %v6644_v53  ;;  %v24621_v53 = vld [vmem:[#allocation3 + $0x3c] sm:$0xff] }
 0x33e   : > { %19636 = vmatprep.mubr.msk.f32.mxu0 %vm333_vm0, %v6645_v22  ;;  %v3475_v22 = vld [vmem:[#allocation3 + $0x51] sm:$0xff] }
 0x33f   : > { %19116 = vmatprep.mubr.msk.f32.mxu1 %vm333_vm0, %v3475_v22  ;;  %v24778_v22 = vld [vmem:[#allocation3 + $0x124] sm:$0xff] }
 0x341   : > { %19637 = vmatmul.mubr.msk.f32.gmra.mrb[34].mxu0 %vm333_vm0, %v6646_v57  ;;  %v3476_v57 = vld [vmem:[#allocation3 + $0x59] sm:$0xff] }
 0x342   : > { %19639 = vmatprep.mubr.msk.f32.mxu0 %vm333_vm0, %v6647_v47  ;;  %v24629_v47 = vld [vmem:[#allocation3 + $0x44] sm:$0xff]  ;;  %19117 = vmatmul.mubr.msk.f32.gmra.mrb[10].mxu1 %vm333_vm0, %v3476_v57  ;;  %v24781_v57 = vld [vmem:[#allocation3 + $0x12c] sm:$0xff] }
 0x345   : > { %19640 = vmatmul.mubr.msk.f32.gmra.mrb[36].mxu0 %vm333_vm0, %v6648_v5  ;;  %v3477_v5 = vld [vmem:[#allocation3 + $0x61] sm:$0xff] }
 0x346   : > { %19642 = vmatprep.mubr.msk.f32.mxu0 %vm333_vm0, %v6649_v62  ;;  %v3478_v62 = vld [vmem:[#allocation3 + $0x69] sm:$0xff]  ;;  %19119 = vmatprep.mubr.msk.f32.mxu1 %vm333_vm0, %v3477_v5  ;;  %v3505_v5 = vld [vmem:[#allocation3 + $0x141] sm:$0xff] }
 0x347   : > { %19120 = vmatmul.mubr.msk.f32.gmra.mrb[12].mxu1 %vm333_vm0, %v3478_v62  ;;  %v3506_v62 = vld [vmem:[#allocation3 + $0x149] sm:$0xff] }
 0x349   : > { %19643 = vmatmul.mubr.msk.f32.gmra.mrb[38].mxu0 %vm333_vm0, %v6650_v41  ;;  %v24639_v41 = vld [vmem:[#allocation3 + $0x54] sm:$0xff] }
 0x34a   : > { %19645 = vmatprep.mubr.msk.f32.mxu0 %vm333_vm0, %v6651_v13  ;;  %v24642_v13 = vld [vmem:[#allocation3 + $0x5c] sm:$0xff] }
 0x34d   : > { %19646 = vmatmul.mubr.msk.f32.gmra.mrb[40].mxu0 %vm333_vm0, %v6652_v39  ;;  %v3479_v39 = vld [vmem:[#allocation3 + $0x71] sm:$0xff] }
 0x34e   : > { %19648 = vmatprep.mubr.msk.f32.mxu0 %vm333_vm0, %v6653_v61  ;;  %v3480_v61 = vld [vmem:[#allocation3 + $0x79] sm:$0xff]  ;;  %19122 = vmatprep.mubr.msk.f32.mxu1 %vm333_vm0, %v3479_v39 }
 0x34f   : > { %19123 = vmatmul.mubr.msk.f32.gmra.mrb[14].mxu1 %vm333_vm0, %v3480_v61  ;;  %v24788_v39 = vld [vmem:[#allocation3 + $0x134] sm:$0xff]  ;;  %v24791_v61 = vld [vmem:[#allocation3 + $0x13c] sm:$0xff] }
 0x351   : > { %19649 = vmatmul.mubr.msk.f32.gmra.mrb[42].mxu0 %vm333_vm0, %v6654_v40  ;;  %v24649_v40 = vld [vmem:[#allocation3 + $0x64] sm:$0xff] }
 0x352   : > { %19651 = vmatprep.mubr.msk.f32.mxu0 %vm333_vm0, %v6655_v33  ;;  %v24652_v33 = vld [vmem:[#allocation3 + $0x6c] sm:$0xff] }
 0x355   : > { %19652 = vmatmul.mubr.msk.f32.gmra.mrb[44].mxu0 %vm333_vm0, %v6656_v63  ;;  %v3481_v63 = vld [vmem:[#allocation3 + $0x81] sm:$0xff] }
 0x356   : > { %19654 = vmatprep.mubr.msk.f32.mxu0 %vm333_vm0, %v6657_v12  ;;  %v3482_v12 = vld [vmem:[#allocation3 + $0x89] sm:$0xff]  ;;  %19125 = vmatprep.mubr.msk.f32.mxu1 %vm333_vm0, %v3481_v63  ;;  %v3507_v63 = vld [vmem:[#allocation3 + $0x151] sm:$0xff] }
 0x357   : > { %19126 = vmatmul.mubr.msk.f32.gmra.mrb[16].mxu1 %vm333_vm0, %v3482_v12  ;;  %v3508_v12 = vld [vmem:[#allocation3 + $0x159] sm:$0xff] }
 0x359   : > { %19655 = vmatmul.mubr.msk.f32.gmra.mrb[46].mxu0 %vm333_vm0, %v6658_v4  ;;  %v24659_v4 = vld [vmem:[#allocation3 + $0x74] sm:$0xff] }
 0x35a   : > { %19657 = vmatprep.mubr.msk.f32.mxu0 %vm333_vm0, %v6659_v26  ;;  %v24662_v26 = vld [vmem:[#allocation3 + $0x7c] sm:$0xff] }
 0x35d   : > { %19658 = vmatmul.mubr.msk.f32.gmra.mrb[48].mxu0 %vm333_vm0, %v6660_v19  ;;  %v3483_v19 = vld [vmem:[#allocation3 + $0x91] sm:$0xff] }
 0x35e   : > { %19660 = vmatprep.mubr.msk.f32.mxu0 %vm333_vm0, %v6661_v50  ;;  %v3484_v50 = vld [vmem:[#allocation3 + $0x99] sm:$0xff]  ;;  %19128 = vmatprep.mubr.msk.f32.mxu1 %vm333_vm0, %v3483_v19  ;;  %v24798_v19 = vld [vmem:[#allocation3 + $0x144] sm:$0xff] }
 0x35f   : > { %19129 = vmatmul.mubr.msk.f32.gmra.mrb[18].mxu1 %vm333_vm0, %v3484_v50  ;;  %v24801_v50 = vld [vmem:[#allocation3 + $0x14c] sm:$0xff] }
 0x361   : > { %19661 = vmatmul.mubr.msk.f32.gmra.mrb[50].mxu0 %vm333_vm0, %v6662_v59  ;;  %v24669_v59 = vld [vmem:[#allocation3 + $0x84] sm:$0xff] }
 0x362   : > { %19663 = vmatprep.mubr.msk.f32.mxu0 %vm333_vm0, %v6663_v23  ;;  %v24672_v23 = vld [vmem:[#allocation3 + $0x8c] sm:$0xff] }
 0x365   : > { %19664 = vmatmul.mubr.msk.f32.gmra.mrb[52].mxu0 %vm333_vm0, %v6664_v21  ;;  %v3485_v21 = vld [vmem:[#allocation3 + $0xa1] sm:$0xff] }
 0x366   : > { %19666 = vmatprep.mubr.msk.f32.mxu0 %vm333_vm0, %v6665_v52  ;;  %v3486_v52 = vld [vmem:[#allocation3 + $0xa9] sm:$0xff]  ;;  %19131 = vmatprep.mubr.msk.f32.mxu1 %vm333_vm0, %v3485_v21  ;;  %v3509_v21 = vld [vmem:[#allocation3 + $0x161] sm:$0xff] }
 0x367   : > { %19132 = vmatmul.mubr.msk.f32.gmra.mrb[20].mxu1 %vm333_vm0, %v3486_v52  ;;  %v3510_v52 = vld [vmem:[#allocation3 + $0x169] sm:$0xff] }
 0x369   : > { %19667 = vmatmul.mubr.msk.f32.gmra.mrb[54].mxu0 %vm333_vm0, %v6666_v38  ;;  %v24679_v38 = vld [vmem:[#allocation3 + $0x94] sm:$0xff] }
 0x36a   : > { %19669 = vmatprep.mubr.msk.f32.mxu0 %vm333_vm0, %v6667_v30  ;;  %v3383_v30 = vld [vmem:[%s27070_s3 + $0x70] sm:$0xff] }
 0x36d   : > { %19670 = vmatmul.mubr.msk.f32.gmra.mrb[56].mxu0 %vm333_vm0, %v6668_v35  ;;  %v3384_v35 = vld [vmem:[%s27070_s3 + $0x78] sm:$0xff] }
 0x36e   : > { %19672 = vmatprep.mubr.msk.f32.mxu0 %vm333_vm0, %v6669_v42  ;;  %v24688_v42 = vld [vmem:[#allocation3 + $0x9c] sm:$0xff] }
 0x371   : > { %19673 = vmatmul.mubr.msk.f32.gmra.mrb[58].mxu0 %vm333_vm0, %v6670_v16  ;;  %v24690_v16 = vpack.c.bf16 %v3384_v35, %v3383_v30  ;;  %v24808_v30 = vld [vmem:[#allocation3 + $0x154] sm:$0xff]  ;;  %v24811_v35 = vld [vmem:[#allocation3 + $0x15c] sm:$0xff] }
 0x372   : > { %19675 = vmatprep.mubr.msk.f32.mxu0 %vm333_vm0, %v6671_v46  ;;  %v24698_v46 = vld [vmem:[#allocation3 + $0xa4] sm:$0xff] }
 0x375   : > { %19676 = vmatmul.mubr.msk.f32.gmra.mrb[60].mxu0 %vm333_vm0, %v6672_v44  ;;  %v3487_v44 = vld [vmem:[#allocation3 + $0xb1] sm:$0xff] }
 0x376   : > { %19678 = vmatprep.mubr.msk.f32.mxu0 %vm333_vm0, %v6673_v49  ;;  %v3488_v49 = vld [vmem:[#allocation3 + $0xb9] sm:$0xff]  ;;  %19134 = vmatprep.mubr.msk.f32.mxu1 %vm333_vm0, %v3487_v44  ;;  %v3511_v44 = vld [vmem:[#allocation3 + $0x171] sm:$0xff] }
 0x377   : > { %19135 = vmatmul.mubr.msk.f32.gmra.mrb[22].mxu1 %vm333_vm0, %v3488_v49  ;;  %v3512_v49 = vld [vmem:[#allocation3 + $0x179] sm:$0xff] }
 0x379   : > { %19679 = vmatmul.mubr.msk.f32.gmra.mrb[62].mxu0 %vm333_vm0, %v6674_v55  ;;  %v24700_v55 = vld [vmem:[#allocation3 + $0xac] sm:$0xff] }
 0x37a   : > { %19681 = vmatprep.mubr.msk.f32.mxu0 %vm333_vm0, %v6675_v1  ;;  %v3489_v1 = vld [vmem:[#allocation3 + $0xc1] sm:$0xff] }
 0x37b   : > { %19137 = vmatprep.mubr.msk.f32.mxu1 %vm333_vm0, %v3489_v1  ;;  %v24818_v1 = vld [vmem:[#allocation3 + $0x164] sm:$0xff] }
 0x37d   : > { %19682 = vmatmul.mubr.msk.f32.gmra.mrb[64].mxu0 %vm333_vm0, %v6676_v15  ;;  %v3490_v15 = vld [vmem:[#allocation3 + $0xc9] sm:$0xff] }
 0x37e   : > { %19684 = vmatprep.mubr.msk.f32.mxu0 %vm333_vm0, %v6677_v20  ;;  %v24708_v20 = vld [vmem:[#allocation3 + $0xb4] sm:$0xff]  ;;  %19138 = vmatmul.mubr.msk.f32.gmra.mrb[24].mxu1 %vm333_vm0, %v3490_v15  ;;  %v24821_v15 = vld [vmem:[#allocation3 + $0x16c] sm:$0xff] }
 0x381   : > { %19685 = vmatmul.mubr.msk.f32.gmra.mrb[66].mxu0 %vm333_vm0, %v6678_v27  ;;  %v24711_v27 = vld [vmem:[#allocation3 + $0xbc] sm:$0xff] }
 0x382   : > { %19687 = vmatprep.mubr.msk.f32.mxu0 %vm333_vm0, %v6679_v28  ;;  %v3491_v28 = vld [vmem:[#allocation3 + $0xd1] sm:$0xff] }
 0x383   : > { %19140 = vmatprep.mubr.msk.f32.mxu1 %vm333_vm0, %v3491_v28  ;;  %v3513_v28 = vld [vmem:[#allocation3 + $0x181] sm:$0xff] }
 0x385   : > { %19688 = vmatmul.mubr.msk.f32.gmra.mrb[68].mxu0 %vm333_vm0, %v6680_v29  ;;  %v3492_v29 = vld [vmem:[#allocation3 + $0xd9] sm:$0xff] }
 0x386   : > { %19690 = vmatprep.mubr.msk.f32.mxu0 %vm333_vm0, %v6681_v43  ;;  %v24718_v43 = vld [vmem:[#allocation3 + $0xc4] sm:$0xff]  ;;  %19141 = vmatmul.mubr.msk.f32.gmra.mrb[26].mxu1 %vm333_vm0, %v3492_v29 }
 0x387   : > { %19143 = vmatprep.mubr.msk.f32.mxu1 %vm333_vm0, %v3493_v17  ;;  %v3514_v29 = vld [vmem:[#allocation3 + $0x189] sm:$0xff]  ;;  %v24828_v17 = vld [vmem:[#allocation3 + $0x174] sm:$0xff] }
 0x389   : > { %19691 = vmatmul.mubr.msk.f32.gmra.mrb[70].mxu0 %vm333_vm0, %v6682_v9  ;;  %v3494_v9 = vld [vmem:[#allocation3 + $0xe9] sm:$0xff] }
 0x38a   : > { %19693 = vmatprep.mubr.msk.f32.mxu0 %vm333_vm0, %v6683_v25  ;;  %v24731_v25 = vld [vmem:[#allocation3 + $0xdc] sm:$0xff]  ;;  %19144 = vmatmul.mubr.msk.f32.gmra.mrb[28].mxu1 %vm333_vm0, %v3494_v9 }
 0x38b   : > { %19146 = vmatprep.mubr.msk.f32.mxu1 %vm333_vm0, %v3495_v58  ;;  %v24831_v9 = vld [vmem:[#allocation3 + $0x17c] sm:$0xff]  ;;  %v3515_v58 = vld [vmem:[#allocation3 + $0x191] sm:$0xff] }
 0x38d   : > { %19694 = vmatmul.mubr.msk.f32.gmra.mrb[72].mxu0 %vm333_vm0, %v6684_v8  ;;  %v24738_v8 = vld [vmem:[#allocation3 + $0xe4] sm:$0xff] }
 0x38e   : > { %19696 = vmatprep.mubr.msk.f32.mxu0 %vm333_vm0, %v6685_v7  ;;  %v24741_v7 = vld [vmem:[#allocation3 + $0xec] sm:$0xff]  ;;  %19147 = vmatmul.mubr.msk.f32.gmra.mrb[30].mxu1 %vm333_vm0, %v3496_v51  ;;  %v3516_v51 = vld [vmem:[#allocation3 + $0x199] sm:$0xff] }
 0x38f   : > { %19149 = vmatprep.mubr.msk.f32.mxu1 %vm333_vm0, %v3497_v32  ;;  %v24838_v32 = vld [vmem:[#allocation3 + $0x184] sm:$0xff] }
 0x391   : > { %19697 = vmatmul.mubr.msk.f32.gmra.mrb[74].mxu0 %vm333_vm0, %v6686_v14  ;;  %v24748_v14 = vld [vmem:[#allocation3 + $0xf4] sm:$0xff] }
 0x392   : > { %19699 = vmatprep.mubr.msk.f32.mxu0 %vm333_vm0, %v6687_v6  ;;  %v24751_v6 = vld [vmem:[#allocation3 + $0xfc] sm:$0xff]  ;;  %19150 = vmatmul.mubr.msk.f32.gmra.mrb[32].mxu1 %vm333_vm0, %v3498_v54  ;;  %v24841_v54 = vld [vmem:[#allocation3 + $0x18c] sm:$0xff] }
 0x393   : > { %19152 = vmatprep.mubr.msk.f32.mxu1 %vm333_vm0, %v3499_v31  ;;  %v3517_v31 = vld [vmem:[#allocation3 + $0x1a1] sm:$0xff] }
 0x395   : > { %19700 = vmatmul.mubr.msk.f32.gmra.mrb[76].mxu0 %vm333_vm0, %v6688_v60  ;;  %v24758_v60 = vld [vmem:[#allocation3 + $0x104] sm:$0xff] }
 0x396   : > { %19706 = vmatprep.mubr.msk.f32.mxu0 %vm333_vm0, %v7456_v2  ;;  %v24761_v2 = vld [vmem:[#allocation3 + $0x10c] sm:$0xff]  ;;  %19153 = vmatmul.mubr.msk.f32.gmra.mrb[34].mxu1 %vm333_vm0, %v3500_v24 }
 0x397   : > { %19155 = vmatprep.mubr.msk.f32.mxu1 %vm333_vm0, %v3501_v11  ;;  %v3518_v24 = vld [vmem:[#allocation3 + $0x1a9] sm:$0xff]  ;;  %v24848_v11 = vld [vmem:[#allocation3 + $0x194] sm:$0xff] }
 0x399   : > { %19707 = vmatmul.mubr.msk.f32.vlgmr.msra.gmra.mrb[0].mxu0 %vm333_vm0, %v7457_v34  ;;  %v24768_v34 = vld [vmem:[#allocation3 + $0x114] sm:$0xff] }
 0x39a   : > { %20938 = vmatpush3.bf16.msra.mxu0 %v24535_v0  ;;  %19709 = vmatprep.mubr.msk.f32.mxu0 %vm333_vm0, %v7458_v18  ;;  %v24632_v0 = vld [vmem:[#allocation3 + $0x4c] sm:$0xff]  ;;  %v24771_v18 = vld [vmem:[#allocation3 + $0x11c] sm:$0xff] }
 0x39b   : > { %20940 = vmatprep.subr.bf16.mxu0 %v24690_v16  ;;  %19156 = vmatmul.mubr.msk.f32.gmra.mrb[36].mxu1 %vm333_vm0, %v3502_v10  ;;  %v24851_v10 = vld [vmem:[#allocation3 + $0x19c] sm:$0xff] }
 0x39c   : > { %19158 = vmatprep.mubr.msk.f32.mxu1 %vm333_vm0, %v3503_v36  ;;  %v3519_v36 = vld [vmem:[#allocation3 + $0x1b1] sm:$0xff] }
 0x39d   : > { %19710 = vmatmul.mubr.msk.f32.gmra.mrb[2].mxu0 %vm333_vm0, %v24619_v45 }
 0x39e   : > { %19712 = vmatprep.mubr.msk.f32.mxu0 %vm333_vm0, %v24621_v53 }
 0x39f   : > { %19159 = vmatmul.mubr.msk.f32.gmra.mrb[38].mxu1 %vm333_vm0, %v3504_v48  ;;  %v3520_v48 = vld [vmem:[#allocation3 + $0x1b9] sm:$0xff] }
 0x3a0   : > { %19161 = vmatprep.mubr.msk.f32.mxu1 %vm333_vm0, %v3505_v5  ;;  %v24858_v5 = vld [vmem:[#allocation3 + $0x1a4] sm:$0xff] }
 0x3a1   : > { %19713 = vmatmul.mubr.msk.f32.gmra.mrb[4].mxu0 %vm333_vm0, %v24629_v47 }
 0x3a2   : > { %19715 = vmatprep.mubr.msk.f32.mxu0 %vm333_vm0, %v24632_v0 }
 0x3a3   : > { %19162 = vmatmul.mubr.msk.f32.gmra.mrb[40].mxu1 %vm333_vm0, %v3506_v62  ;;  %v24861_v62 = vld [vmem:[#allocation3 + $0x1ac] sm:$0xff] }
 0x3a4   : > { %19164 = vmatprep.mubr.msk.f32.mxu1 %vm333_vm0, %v3507_v63  ;;  %v3521_v63 = vld [vmem:[#allocation3 + $0x1c1] sm:$0xff] }
 0x3a5   : > { %19716 = vmatmul.mubr.msk.f32.gmra.mrb[6].mxu0 %vm333_vm0, %v24639_v41 }
 0x3a6   : > { %19718 = vmatprep.mubr.msk.f32.mxu0 %vm333_vm0, %v24642_v13 }
 0x3a7   : > { %19165 = vmatmul.mubr.msk.f32.gmra.mrb[42].mxu1 %vm333_vm0, %v3508_v12  ;;  %v3522_v12 = vld [vmem:[#allocation3 + $0x1c9] sm:$0xff] }
 0x3a8   : > { %19167 = vmatprep.mubr.msk.f32.mxu1 %vm333_vm0, %v3509_v21  ;;  %v24868_v21 = vld [vmem:[#allocation3 + $0x1b4] sm:$0xff] }
 0x3a9   : > { %19719 = vmatmul.mubr.msk.f32.gmra.mrb[8].mxu0 %vm333_vm0, %v24649_v40 }
 0x3aa   : > { %19721 = vmatprep.mubr.msk.f32.mxu0 %vm333_vm0, %v24652_v33 }
 0x3ab   : > { %19168 = vmatmul.mubr.msk.f32.gmra.mrb[44].mxu1 %vm333_vm0, %v3510_v52  ;;  %v24871_v52 = vld [vmem:[#allocation3 + $0x1bc] sm:$0xff] }
 0x3ac   : > { %19170 = vmatprep.mubr.msk.f32.mxu1 %vm333_vm0, %v3511_v44  ;;  %v3523_v44 = vld [vmem:[#allocation3 + $0x1d1] sm:$0xff] }
 0x3ad   : > { %19722 = vmatmul.mubr.msk.f32.gmra.mrb[10].mxu0 %vm333_vm0, %v24659_v4 }
 0x3ae   : > { %19724 = vmatprep.mubr.msk.f32.mxu0 %vm333_vm0, %v24662_v26 }
 0x3af   : > { %19171 = vmatmul.mubr.msk.f32.gmra.mrb[46].mxu1 %vm333_vm0, %v3512_v49  ;;  %v3524_v49 = vld [vmem:[#allocation3 + $0x1d9] sm:$0xff] }
 0x3b0   : > { %19173 = vmatprep.mubr.msk.f32.mxu1 %vm333_vm0, %v3513_v28  ;;  %v24878_v28 = vld [vmem:[#allocation3 + $0x1c4] sm:$0xff] }
 0x3b1   : > { %19725 = vmatmul.mubr.msk.f32.gmra.mrb[12].mxu0 %vm333_vm0, %v24669_v59 }
 0x3b2   : > { %19727 = vmatprep.mubr.msk.f32.mxu0 %vm333_vm0, %v24672_v23 }
 0x3b3   : > { %19174 = vmatmul.mubr.msk.f32.gmra.mrb[48].mxu1 %vm333_vm0, %v3514_v29  ;;  %v24881_v29 = vld [vmem:[#allocation3 + $0x1cc] sm:$0xff] }
 0x3b4   : > { %19176 = vmatprep.mubr.msk.f32.mxu1 %vm333_vm0, %v3515_v58  ;;  %v3525_v58 = vld [vmem:[#allocation3 + $0x1e1] sm:$0xff] }
 0x3b5   : > { %19728 = vmatmul.mubr.msk.f32.gmra.mrb[14].mxu0 %vm333_vm0, %v24679_v38 }
 0x3b6   : > { %19730 = vmatprep.mubr.msk.f32.mxu0 %vm333_vm0, %v24688_v42 }
 0x3b7   : > { %19177 = vmatmul.mubr.msk.f32.gmra.mrb[50].mxu1 %vm333_vm0, %v3516_v51  ;;  %v3526_v51 = vld [vmem:[#allocation3 + $0x1e9] sm:$0xff] }
 0x3b8   : > { %19179 = vmatprep.mubr.msk.f32.mxu1 %vm333_vm0, %v3517_v31  ;;  %v24888_v31 = vld [vmem:[#allocation3 + $0x1d4] sm:$0xff] }
 0x3b9   : > { %19731 = vmatmul.mubr.msk.f32.gmra.mrb[16].mxu0 %vm333_vm0, %v24698_v46  ;;  %27365 = vst [vmem:[#allocation8_spill] sm:$0xff] %v24888_v31 }
 0x3ba   : > { %19733 = vmatprep.mubr.msk.f32.mxu0 %vm333_vm0, %v24700_v55 }
 0x3bb   : > { %19180 = vmatmul.mubr.msk.f32.gmra.mrb[52].mxu1 %vm333_vm0, %v3518_v24  ;;  %v24891_v24 = vld [vmem:[#allocation3 + $0x1dc] sm:$0xff] }
 0x3bc   : > { %19182 = vmatprep.mubr.msk.f32.mxu1 %vm333_vm0, %v3519_v36  ;;  %27366 = vst [vmem:[#allocation33_spill] sm:$0xff] %v24891_v24  ;;  %v3527_v36 = vld [vmem:[#allocation3 + $0x1f1] sm:$0xff] }
 0x3bd   : > { %19734 = vmatmul.mubr.msk.f32.gmra.mrb[18].mxu0 %vm333_vm0, %v24708_v20 }
 0x3be   : > { %19736 = vmatprep.mubr.msk.f32.mxu0 %vm333_vm0, %v24711_v27 }
 0x3bf   : > { %19183 = vmatmul.mubr.msk.f32.gmra.mrb[54].mxu1 %vm333_vm0, %v3520_v48  ;;  %v3528_v48 = vld [vmem:[#allocation3 + $0x1f9] sm:$0xff] }
 0x3c0   : > { %19185 = vmatprep.mubr.msk.f32.mxu1 %vm333_vm0, %v3521_v63  ;;  %v24898_v63 = vld [vmem:[#allocation3 + $0x1e4] sm:$0xff] }
 0x3c1   : > { %19737 = vmatmul.mubr.msk.f32.gmra.mrb[20].mxu0 %vm333_vm0, %v24718_v43  ;;  %27367 = vst [vmem:[#allocation34_spill] sm:$0xff] %v24898_v63 }
 0x3c2   : > { %19739 = vmatprep.mubr.msk.f32.mxu0 %vm333_vm0, %v24721_v3 }
 0x3c3   : > { %19186 = vmatmul.mubr.msk.f32.gmra.mrb[56].mxu1 %vm333_vm0, %v3522_v12  ;;  %v24901_v12 = vld [vmem:[#allocation3 + $0x1ec] sm:$0xff] }
 0x3c4   : > { %19188 = vmatprep.mubr.msk.f32.mxu1 %vm333_vm0, %v3523_v44  ;;  %27368 = vst [vmem:[#allocation35_spill] sm:$0xff] %v24901_v12  ;;  %v3529_v44 = vld [vmem:[#allocation3 + $0x201] sm:$0xff] }
 0x3c5   : > { %19740 = vmatmul.mubr.msk.f32.gmra.mrb[22].mxu0 %vm333_vm0, %v24728_v37 }
 0x3c6   : > { %19742 = vmatprep.mubr.msk.f32.mxu0 %vm333_vm0, %v24731_v25 }
 0x3c7   : > { %19189 = vmatmul.mubr.msk.f32.gmra.mrb[58].mxu1 %vm333_vm0, %v3524_v49  ;;  %v3530_v49 = vld [vmem:[#allocation3 + $0x209] sm:$0xff] }
 0x3c8   : > { %19191 = vmatprep.mubr.msk.f32.mxu1 %vm333_vm0, %v3525_v58  ;;  %v24908_v58 = vld [vmem:[#allocation3 + $0x1f4] sm:$0xff] }
 0x3c9   : > { %19743 = vmatmul.mubr.msk.f32.gmra.mrb[24].mxu0 %vm333_vm0, %v24738_v8  ;;  %27369 = vst [vmem:[#allocation36_spill] sm:$0xff] %v24908_v58 }
 0x3ca   : > { %19745 = vmatprep.mubr.msk.f32.mxu0 %vm333_vm0, %v24741_v7 }
 0x3cb   : > { %19192 = vmatmul.mubr.msk.f32.gmra.mrb[60].mxu1 %vm333_vm0, %v3526_v51  ;;  %v24911_v51 = vld [vmem:[#allocation3 + $0x1fc] sm:$0xff] }
 0x3cc   : > { %19194 = vmatprep.mubr.msk.f32.mxu1 %vm333_vm0, %v3527_v36  ;;  %27370 = vst [vmem:[#allocation37_spill] sm:$0xff] %v24911_v51  ;;  %v3531_v36 = vld [vmem:[#allocation3 + $0x211] sm:$0xff] }
 0x3cd   : > { %19746 = vmatmul.mubr.msk.f32.gmra.mrb[26].mxu0 %vm333_vm0, %v24748_v14 }
 0x3ce   : > { %19748 = vmatprep.mubr.msk.f32.mxu0 %vm333_vm0, %v24751_v6 }
 0x3cf   : > { %19195 = vmatmul.mubr.msk.f32.gmra.mrb[62].mxu1 %vm333_vm0, %v3528_v48  ;;  %v3532_v48 = vld [vmem:[#allocation3 + $0x219] sm:$0xff] }
 0x3d0   : > { %19197 = vmatprep.mubr.msk.f32.mxu1 %vm333_vm0, %v3529_v44  ;;  %v3533_v44 = vld [vmem:[#allocation3 + $0x221] sm:$0xff] }
 0x3d1   : > { %19749 = vmatmul.mubr.msk.f32.gmra.mrb[28].mxu0 %vm333_vm0, %v24758_v60 }
 0x3d2   : > { %19751 = vmatprep.mubr.msk.f32.mxu0 %vm333_vm0, %v24761_v2 }
 0x3d3   : > { %19198 = vmatmul.mubr.msk.f32.gmra.mrb[64].mxu1 %vm333_vm0, %v3530_v49  ;;  %v3534_v49 = vld [vmem:[#allocation3 + $0x229] sm:$0xff] }
 0x3d4   : > { %19200 = vmatprep.mubr.msk.f32.mxu1 %vm333_vm0, %v3531_v36  ;;  %v3535_v36 = vld [vmem:[#allocation3 + $0x231] sm:$0xff] }
 0x3d5   : > { %19752 = vmatmul.mubr.msk.f32.gmra.mrb[30].mxu0 %vm333_vm0, %v24768_v34 }
 0x3d6   : > { %19754 = vmatprep.mubr.msk.f32.mxu0 %vm333_vm0, %v24771_v18 }
 0x3d7   : > { %19201 = vmatmul.mubr.msk.f32.gmra.mrb[66].mxu1 %vm333_vm0, %v3532_v48  ;;  %v3536_v48 = vld [vmem:[#allocation3 + $0x239] sm:$0xff] }
 0x3d8   : > { %19203 = vmatprep.mubr.msk.f32.mxu1 %vm333_vm0, %v3533_v44  ;;  %v3537_v44 = vld [vmem:[#allocation3 + $0x241] sm:$0xff] }
 0x3d9   : > { %19755 = vmatmul.mubr.msk.f32.gmra.mrb[32].mxu0 %vm333_vm0, %v24778_v22 }
 0x3da   : > { %19757 = vmatprep.mubr.msk.f32.mxu0 %vm333_vm0, %v24781_v57 }
 0x3db   : > { %19204 = vmatmul.mubr.msk.f32.gmra.mrb[68].mxu1 %vm333_vm0, %v3534_v49  ;;  %v3538_v49 = vld [vmem:[#allocation3 + $0x249] sm:$0xff] }
 0x3dc   : > { %19206 = vmatprep.mubr.msk.f32.mxu1 %vm333_vm0, %v3535_v36  ;;  %v3539_v36 = vld [vmem:[#allocation3 + $0x251] sm:$0xff] }
 0x3dd   : > { %19758 = vmatmul.mubr.msk.f32.gmra.mrb[34].mxu0 %vm333_vm0, %v24788_v39 }
 0x3de   : > { %19760 = vmatprep.mubr.msk.f32.mxu0 %vm333_vm0, %v24791_v61 }
 0x3df   : > { %19207 = vmatmul.mubr.msk.f32.gmra.mrb[70].mxu1 %vm333_vm0, %v3536_v48  ;;  %v3540_v48 = vld [vmem:[#allocation3 + $0x259] sm:$0xff] }
 0x3e0   : > { %19209 = vmatprep.mubr.msk.f32.mxu1 %vm333_vm0, %v3537_v44  ;;  %v3541_v44 = vld [vmem:[#allocation3 + $0x261] sm:$0xff] }
 0x3e1   : > { %19761 = vmatmul.mubr.msk.f32.gmra.mrb[36].mxu0 %vm333_vm0, %v24798_v19 }
 0x3e2   : > { %19763 = vmatprep.mubr.msk.f32.mxu0 %vm333_vm0, %v24801_v50 }
 0x3e3   : > { %19210 = vmatmul.mubr.msk.f32.gmra.mrb[72].mxu1 %vm333_vm0, %v3538_v49  ;;  %v3542_v49 = vld [vmem:[#allocation3 + $0x269] sm:$0xff] }
 0x3e4   : > { %19212 = vmatprep.mubr.msk.f32.mxu1 %vm333_vm0, %v3539_v36  ;;  %v3370_v36 = vld [vmem:[%s27070_s3 + $0x8] sm:$0xff] }
 0x3e5   : > { %19764 = vmatmul.mubr.msk.f32.gmra.mrb[38].mxu0 %vm333_vm0, %v24808_v30 }
 0x3e6   : > { %19766 = vmatprep.mubr.msk.f32.mxu0 %vm333_vm0, %v24811_v35 }
 0x3e7   : > { %19213 = vmatmul.mubr.msk.f32.gmra.mrb[74].mxu1 %vm333_vm0, %v3540_v48  ;;  %v24977_v48 = vld [vmem:[#allocation3 + $0x25c] sm:$0xff] }
 0x3e8   : > { %19215 = vmatprep.mubr.msk.f32.mxu1 %vm333_vm0, %v3541_v44  ;;  %v3388_v44 = vld [vmem:[#allocation3 + $0x8] sm:$0xff] }
 0x3e9   : > { %19767 = vmatmul.mubr.msk.f32.gmra.mrb[40].mxu0 %vm333_vm0, %v24818_v1 }
 0x3ea   : > { %19769 = vmatprep.mubr.msk.f32.mxu0 %vm333_vm0, %v24821_v15 }
 0x3eb   : > { %19216 = vmatmul.mubr.msk.f32.gmra.mrb[76].mxu1 %vm333_vm0, %v3542_v49  ;;  %v24995_v49 = vld [vmem:[#allocation3 + $0x274] sm:$0xff] }
 0x3ed   : > { %19770 = vmatmul.mubr.msk.f32.gmra.mrb[42].mxu0 %vm333_vm0, %v24828_v17 }
 0x3ee   : > { %19772 = vmatprep.mubr.msk.f32.mxu0 %vm333_vm0, %v24831_v9 }
 0x3f1   : > { %19773 = vmatmul.mubr.msk.f32.gmra.mrb[44].mxu0 %vm333_vm0, %v24838_v32 }
 0x3f2   : > { %19775 = vmatprep.mubr.msk.f32.mxu0 %vm333_vm0, %v24841_v54 }
 0x3f5   : > { %19776 = vmatmul.mubr.msk.f32.gmra.mrb[46].mxu0 %vm333_vm0, %v24848_v11 }
 0x3f6   : > { %19778 = vmatprep.mubr.msk.f32.mxu0 %vm333_vm0, %v24851_v10 }
 0x3f9   : > { %19779 = vmatmul.mubr.msk.f32.gmra.mrb[48].mxu0 %vm333_vm0, %v24858_v5 }
 0x3fa   : > { %19781 = vmatprep.mubr.msk.f32.mxu0 %vm333_vm0, %v24861_v62 }
 0x3fd   : > { %19782 = vmatmul.mubr.msk.f32.gmra.mrb[50].mxu0 %vm333_vm0, %v24868_v21 }
 0x3fe   : > { %19784 = vmatprep.mubr.msk.f32.mxu0 %vm333_vm0, %v24871_v52 }
 0x401   : > { %19785 = vmatmul.mubr.msk.f32.gmra.mrb[52].mxu0 %vm333_vm0, %v24878_v28 }
 0x402   : > { %19787 = vmatprep.mubr.msk.f32.mxu0 %vm333_vm0, %v24881_v29 }
 0x405   : > { %19788 = vmatmul.mubr.msk.f32.gmra.mrb[54].mxu0 %vm333_vm0, %v24888_v31  ;;  %v24986_v31 = vld [vmem:[#allocation3 + $0x26c] sm:$0xff] }
 0x406   : > { %19790 = vmatprep.mubr.msk.f32.mxu0 %vm333_vm0, %v24891_v24  ;;  %v3387_v24 = vld [vmem:[#allocation3] sm:$0xff]  ;;  %27381 = vst [vmem:[#allocation48_spill] sm:$0xff] %v24986_v31 }
 0x407   : > { %19222 = vmatprep.mubr.msk.f32.mxu1 %vm333_vm0, %v3387_v24  ;;  %v3391_v24 = vld [vmem:[#allocation3 + $0x20] sm:$0xff] }
 0x409   : > { %19791 = vmatmul.mubr.msk.f32.gmra.mrb[56].mxu0 %vm333_vm0, %v24898_v63  ;;  %v24918_v63 = vld [vmem:[#allocation3 + $0x204] sm:$0xff] }
 0x40a   : > { %19793 = vmatprep.mubr.msk.f32.mxu0 %vm333_vm0, %v24901_v12  ;;  %27371 = vst [vmem:[#allocation38_spill] sm:$0xff] %v24918_v63  ;;  %v24921_v12 = vld [vmem:[#allocation3 + $0x20c] sm:$0xff] }
 0x40b   : > { %27372 = vst [vmem:[#allocation39_spill] sm:$0xff] %v24921_v12 }
 0x40d   : > { %19794 = vmatmul.mubr.msk.f32.gmra.mrb[58].mxu0 %vm333_vm0, %v24908_v58  ;;  %v24928_v58 = vld [vmem:[#allocation3 + $0x214] sm:$0xff] }
 0x40e   : > { %19796 = vmatprep.mubr.msk.f32.mxu0 %vm333_vm0, %v24911_v51  ;;  %27373 = vst [vmem:[#allocation40_spill] sm:$0xff] %v24928_v58  ;;  %v24931_v51 = vld [vmem:[#allocation3 + $0x21c] sm:$0xff] }
 0x40f   : > { %27374 = vst [vmem:[#allocation41_spill] sm:$0xff] %v24931_v51 }
 0x411   : > { %19797 = vmatmul.mubr.msk.f32.gmra.mrb[60].mxu0 %vm333_vm0, %v24918_v63  ;;  %v24938_v63 = vld [vmem:[#allocation3 + $0x224] sm:$0xff] }
 0x412   : > { %19799 = vmatprep.mubr.msk.f32.mxu0 %vm333_vm0, %v24921_v12  ;;  %27375 = vst [vmem:[#allocation42_spill] sm:$0xff] %v24938_v63  ;;  %v24941_v12 = vld [vmem:[#allocation3 + $0x22c] sm:$0xff] }
 0x413   : > { %27376 = vst [vmem:[#allocation43_spill] sm:$0xff] %v24941_v12 }
 0x415   : > { %19800 = vmatmul.mubr.msk.f32.gmra.mrb[62].mxu0 %vm333_vm0, %v24928_v58  ;;  %v24948_v58 = vld [vmem:[#allocation3 + $0x234] sm:$0xff] }
 0x416   : > { %19802 = vmatprep.mubr.msk.f32.mxu0 %vm333_vm0, %v24931_v51  ;;  %27377 = vst [vmem:[#allocation44_spill] sm:$0xff] %v24948_v58  ;;  %v24951_v51 = vld [vmem:[#allocation3 + $0x23c] sm:$0xff] }
 0x417   : > { %27378 = vst [vmem:[#allocation45_spill] sm:$0xff] %v24951_v51 }
 0x419   : > { %19803 = vmatmul.mubr.msk.f32.gmra.mrb[64].mxu0 %vm333_vm0, %v24938_v63  ;;  %v24958_v63 = vld [vmem:[#allocation3 + $0x244] sm:$0xff] }
 0x41a   : > { %19805 = vmatprep.mubr.msk.f32.mxu0 %vm333_vm0, %v24941_v12  ;;  %27379 = vst [vmem:[#allocation46_spill] sm:$0xff] %v24958_v63  ;;  %v24961_v12 = vld [vmem:[#allocation3 + $0x24c] sm:$0xff] }
 0x41b   : > { %27380 = vst [vmem:[#allocation47_spill] sm:$0xff] %v24961_v12 }
 0x41d   : > { %19806 = vmatmul.mubr.msk.f32.gmra.mrb[66].mxu0 %vm333_vm0, %v24948_v58  ;;  %v3369_v58 = vld [vmem:[%s27070_s3] sm:$0xff] }
 0x41e   : > { %19808 = vmatprep.mubr.msk.f32.mxu0 %vm333_vm0, %v24951_v51  ;;  %v24971_v51 = vld [vmem:[#allocation3 + $0x254] sm:$0xff] }
 0x421   : > { %19809 = vmatmul.mubr.msk.f32.gmra.mrb[68].mxu0 %vm333_vm0, %v24958_v63  ;;  %v20915_v63 = vpack.c.bf16 %v3370_v36, %v3369_v58  ;;  %v3389_v58 = vld [vmem:[#allocation3 + $0x10] sm:$0xff]  ;;  %v24998_v36 = vld [vmem:[#allocation3 + $0x27c] sm:$0xff] }
 0x422   : > { %19811 = vmatprep.mubr.msk.f32.mxu0 %vm333_vm0, %v24961_v12  ;;  %v24984_v12 = vld [vmem:[#allocation3 + $0x264] sm:$0xff] }
 0x423   : > { %20916 = vmatprep.subr.bf16.mxu1 %v20915_v63 }
 0x424   : > { %20918 = vmatpush3.bf16.msra.mxu1 %v20915_v63  ;;  %v3390_v63 = vld [vmem:[#allocation3 + $0x18] sm:$0xff] }
 0x425   : > { %19812 = vmatmul.mubr.msk.f32.gmra.mrb[70].mxu0 %vm333_vm0, %v24971_v51  ;;  %21147 = vmatprep.subr.bf16.mxu1 %v24046_v56 }
 0x426   : > { %19814 = vmatprep.mubr.msk.f32.mxu0 %vm333_vm0, %v24977_v48 }
 0x427   : > { %19223 = vmatmul.mubr.msk.f32.vlgmr.msra.gmra.mrb[0].mxu1 %vm333_vm0, %v3388_v44  ;;  %v25006_v44 = vld [vmem:[#allocation3 + $0x284] sm:$0xff] }
 0x428   : > { %19225 = vmatprep.mubr.msk.f32.mxu1 %vm333_vm0, %v3389_v58  ;;  %21148 = vmatpush3.bf16.msra.mxu1 %v24046_v56  ;;  %v3393_v56 = vld [vmem:[#allocation3 + $0x30] sm:$0xff]  ;;  %v3394_v58 = vld [vmem:[#allocation3 + $0x38] sm:$0xff] }
 0x429   : > { %19815 = vmatmul.mubr.msk.f32.gmra.mrb[72].mxu0 %vm333_vm0, %v24984_v12 }
 0x42a   : > { %19817 = vmatprep.mubr.msk.f32.mxu0 %vm333_vm0, %v24986_v31  ;;  %v3392_v31 = vld [vmem:[#allocation3 + $0x28] sm:$0xff] }
 0x42b   : > { %19226 = vmatmul.mubr.msk.f32.gmra.mrb[2].mxu1 %vm333_vm0, %v3390_v63  ;;  %v3395_v63 = vld [vmem:[#allocation3 + $0x40] sm:$0xff] }
 0x42c   : > { %19228 = vmatprep.mubr.msk.f32.mxu1 %vm333_vm0, %v3391_v24  ;;  %v3396_v24 = vld [vmem:[#allocation3 + $0x48] sm:$0xff] }
 0x42d   : > { %19818 = vmatmul.mubr.msk.f32.gmra.mrb[74].mxu0 %vm333_vm0, %v24995_v49 }
 0x42e   : > { %19820 = vmatprep.mubr.msk.f32.mxu0 %vm333_vm0, %v24998_v36 }
 0x42f   : > { %19229 = vmatmul.mubr.msk.f32.gmra.mrb[4].mxu1 %vm333_vm0, %v3392_v31 }
 0x430   : > { %19231 = vmatprep.mubr.msk.f32.mxu1 %vm333_vm0, %v3393_v56  ;;  %v3411_v56 = vld [vmem:[#allocation3 + $0xc0] sm:$0xff] }
 0x431   : > { %19821 = vmatmul.mubr.msk.f32.gmra.mrb[76].mxu0 %vm333_vm0, %v25006_v44 }
 0x432   : > { %19827 = vmatprep.mubr.msk.f32.mxu0 %vm333_vm0, %v24619_v45  ;;  %v3397_v45 = vld [vmem:[#allocation3 + $0x50] sm:$0xff] }
 0x433   : > { %19232 = vmatmul.mubr.msk.f32.gmra.mrb[6].mxu1 %vm333_vm0, %v3394_v58  ;;  %v27382_v58 = vld [vmem:[#allocation8_spill] sm:$0xff] }
 0x434   : > { %19234 = vmatprep.mubr.msk.f32.mxu1 %vm333_vm0, %v3395_v63  ;;  %v27383_v63 = vld [vmem:[#allocation33_spill] sm:$0xff] }
 0x435   : > { %19828 = vmatmul.mubr.msk.f32.vlgmr.msra.gmra.mrb[0].mxu0 %vm333_vm0, %v24621_v53  ;;  %v3398_v53 = vld [vmem:[#allocation3 + $0x58] sm:$0xff] }
 0x436   : > { %20942 = vmatpush3.bf16.msra.mxu0 %v24690_v16  ;;  %19830 = vmatprep.mubr.msk.f32.mxu0 %vm333_vm0, %v24629_v47  ;;  %v3399_v47 = vld [vmem:[#allocation3 + $0x60] sm:$0xff] }
 0x437   : > { %19235 = vmatmul.mubr.msk.f32.gmra.mrb[8].mxu1 %vm333_vm0, %v3396_v24  ;;  %v3385_v16 = vld [vmem:[%s27070_s3 + $0x80] sm:$0xff]  ;;  %v27384_v24 = vld [vmem:[#allocation34_spill] sm:$0xff] }
 0x438   : > { %19237 = vmatprep.mubr.msk.f32.mxu1 %vm333_vm0, %v3397_v45  ;;  %v27385_v45 = vld [vmem:[#allocation35_spill] sm:$0xff] }
 0x439   : > { %19831 = vmatmul.mubr.msk.f32.gmra.mrb[2].mxu0 %vm333_vm0, %v24632_v0  ;;  %v3400_v0 = vld [vmem:[#allocation3 + $0x68] sm:$0xff] }
 0x43a   : > { %19833 = vmatprep.mubr.msk.f32.mxu0 %vm333_vm0, %v24639_v41  ;;  %v3401_v41 = vld [vmem:[#allocation3 + $0x70] sm:$0xff] }
 0x43b   : > { %19238 = vmatmul.mubr.msk.f32.gmra.mrb[10].mxu1 %vm333_vm0, %v3398_v53  ;;  %v3449_v53 = vld [vmem:[#allocation3 + $0x1f0] sm:$0xff] }
 0x43c   : > { %19240 = vmatprep.mubr.msk.f32.mxu1 %vm333_vm0, %v3399_v47  ;;  %v27386_v47 = vld [vmem:[#allocation36_spill] sm:$0xff] }
 0x43d   : > { %19834 = vmatmul.mubr.msk.f32.gmra.mrb[4].mxu0 %vm333_vm0, %v24642_v13  ;;  %v3402_v13 = vld [vmem:[#allocation3 + $0x78] sm:$0xff] }
 0x43e   : > { %19836 = vmatprep.mubr.msk.f32.mxu0 %vm333_vm0, %v24649_v40  ;;  %v3403_v40 = vld [vmem:[#allocation3 + $0x80] sm:$0xff] }
 0x43f   : > { %19241 = vmatmul.mubr.msk.f32.gmra.mrb[12].mxu1 %vm333_vm0, %v3400_v0  ;;  %v3450_v0 = vld [vmem:[#allocation3 + $0x1f8] sm:$0xff] }
 0x440   : > { %19243 = vmatprep.mubr.msk.f32.mxu1 %vm333_vm0, %v3401_v41  ;;  %v27387_v41 = vld [vmem:[#allocation37_spill] sm:$0xff] }
 0x441   : > { %19837 = vmatmul.mubr.msk.f32.gmra.mrb[6].mxu0 %vm333_vm0, %v24652_v33  ;;  %v3404_v33 = vld [vmem:[#allocation3 + $0x88] sm:$0xff] }
 0x442   : > { %19839 = vmatprep.mubr.msk.f32.mxu0 %vm333_vm0, %v24659_v4  ;;  %v3405_v4 = vld [vmem:[#allocation3 + $0x90] sm:$0xff] }
 0x443   : > { %19244 = vmatmul.mubr.msk.f32.gmra.mrb[14].mxu1 %vm333_vm0, %v3402_v13  ;;  %v3451_v13 = vld [vmem:[#allocation3 + $0x200] sm:$0xff] }
 0x444   : > { %19246 = vmatprep.mubr.msk.f32.mxu1 %vm333_vm0, %v3403_v40  ;;  %v27388_v40 = vld [vmem:[#allocation38_spill] sm:$0xff] }
 0x445   : > { %19840 = vmatmul.mubr.msk.f32.gmra.mrb[8].mxu0 %vm333_vm0, %v24662_v26  ;;  %v3406_v26 = vld [vmem:[#allocation3 + $0x98] sm:$0xff] }
 0x446   : > { %19842 = vmatprep.mubr.msk.f32.mxu0 %vm333_vm0, %v24669_v59  ;;  %v3407_v59 = vld [vmem:[#allocation3 + $0xa0] sm:$0xff] }
 0x447   : > { %19247 = vmatmul.mubr.msk.f32.gmra.mrb[16].mxu1 %vm333_vm0, %v3404_v33  ;;  %v3452_v33 = vld [vmem:[#allocation3 + $0x208] sm:$0xff] }
 0x448   : > { %19249 = vmatprep.mubr.msk.f32.mxu1 %vm333_vm0, %v3405_v4  ;;  %v27389_v4 = vld [vmem:[#allocation39_spill] sm:$0xff] }
 0x449   : > { %19843 = vmatmul.mubr.msk.f32.gmra.mrb[10].mxu0 %vm333_vm0, %v24672_v23  ;;  %v3408_v23 = vld [vmem:[#allocation3 + $0xa8] sm:$0xff] }
 0x44a   : > { %19845 = vmatprep.mubr.msk.f32.mxu0 %vm333_vm0, %v24679_v38  ;;  %v3386_v38 = vld [vmem:[%s27070_s3 + $0x88] sm:$0xff] }
 0x44b   : > { %19250 = vmatmul.mubr.msk.f32.gmra.mrb[18].mxu1 %vm333_vm0, %v3406_v26  ;;  %v25064_v31 = vpack.c.bf16 %v3386_v38, %v3385_v16  ;;  %v3453_v26 = vld [vmem:[#allocation3 + $0x210] sm:$0xff]  ;;  %v27391_v16 = vld [vmem:[#allocation41_spill] sm:$0xff] }
 0x44c   : > { %19252 = vmatprep.mubr.msk.f32.mxu1 %vm333_vm0, %v3407_v59  ;;  %v27390_v59 = vld [vmem:[#allocation40_spill] sm:$0xff] }
 0x44d   : > { %19846 = vmatmul.mubr.msk.f32.gmra.mrb[12].mxu0 %vm333_vm0, %v24688_v42  ;;  %20944 = vmatprep.subr.bf16.mxu0 %v25064_v31  ;;  %v3409_v42 = vld [vmem:[#allocation3 + $0xb0] sm:$0xff]  ;;  %v3455_v38 = vld [vmem:[#allocation3 + $0x220] sm:$0xff] }
 0x44e   : > { %19848 = vmatprep.mubr.msk.f32.mxu0 %vm333_vm0, %v24698_v46  ;;  %v3410_v46 = vld [vmem:[#allocation3 + $0xb8] sm:$0xff] }
 0x44f   : > { %19253 = vmatmul.mubr.msk.f32.gmra.mrb[20].mxu1 %vm333_vm0, %v3408_v23  ;;  %v3454_v23 = vld [vmem:[#allocation3 + $0x218] sm:$0xff] }
 0x450   : > { %19255 = vmatprep.mubr.msk.f32.mxu1 %vm333_vm0, %v3409_v42  ;;  %v27392_v42 = vld [vmem:[#allocation42_spill] sm:$0xff] }
 0x451   : > { %19849 = vmatmul.mubr.msk.f32.gmra.mrb[14].mxu0 %vm333_vm0, %v24700_v55  ;;  %v3412_v55 = vld [vmem:[#allocation3 + $0xc8] sm:$0xff] }
 0x452   : > { %19851 = vmatprep.mubr.msk.f32.mxu0 %vm333_vm0, %v24708_v20  ;;  %v3413_v20 = vld [vmem:[#allocation3 + $0xd0] sm:$0xff] }
 0x453   : > { %19256 = vmatmul.mubr.msk.f32.gmra.mrb[22].mxu1 %vm333_vm0, %v3410_v46  ;;  %v3456_v46 = vld [vmem:[#allocation3 + $0x228] sm:$0xff] }
 0x454   : > { %19258 = vmatprep.mubr.msk.f32.mxu1 %vm333_vm0, %v3411_v56  ;;  %v27393_v56 = vld [vmem:[#allocation43_spill] sm:$0xff] }
 0x455   : > { %19852 = vmatmul.mubr.msk.f32.gmra.mrb[16].mxu0 %vm333_vm0, %v24711_v27  ;;  %v3414_v27 = vld [vmem:[#allocation3 + $0xd8] sm:$0xff] }
 0x456   : > { %19854 = vmatprep.mubr.msk.f32.mxu0 %vm333_vm0, %v24718_v43  ;;  %v3415_v43 = vld [vmem:[#allocation3 + $0xe0] sm:$0xff] }
 0x457   : > { %19259 = vmatmul.mubr.msk.f32.gmra.mrb[24].mxu1 %vm333_vm0, %v3412_v55  ;;  %v3457_v55 = vld [vmem:[#allocation3 + $0x230] sm:$0xff] }
 0x458   : > { %19261 = vmatprep.mubr.msk.f32.mxu1 %vm333_vm0, %v3413_v20  ;;  %v27394_v20 = vld [vmem:[#allocation44_spill] sm:$0xff] }
 0x459   : > { %19855 = vmatmul.mubr.msk.f32.gmra.mrb[18].mxu0 %vm333_vm0, %v24721_v3  ;;  %v3416_v3 = vld [vmem:[#allocation3 + $0xe8] sm:$0xff] }
 0x45a   : > { %19857 = vmatprep.mubr.msk.f32.mxu0 %vm333_vm0, %v24728_v37  ;;  %v3417_v37 = vld [vmem:[#allocation3 + $0xf0] sm:$0xff] }
 0x45b   : > { %19262 = vmatmul.mubr.msk.f32.gmra.mrb[26].mxu1 %vm333_vm0, %v3414_v27  ;;  %v3458_v27 = vld [vmem:[#allocation3 + $0x238] sm:$0xff] }
 0x45c   : > { %19264 = vmatprep.mubr.msk.f32.mxu1 %vm333_vm0, %v3415_v43  ;;  %v27395_v43 = vld [vmem:[#allocation45_spill] sm:$0xff] }
 0x45d   : > { %19858 = vmatmul.mubr.msk.f32.gmra.mrb[20].mxu0 %vm333_vm0, %v24731_v25  ;;  %v3418_v25 = vld [vmem:[#allocation3 + $0xf8] sm:$0xff] }
 0x45e   : > { %19860 = vmatprep.mubr.msk.f32.mxu0 %vm333_vm0, %v24738_v8  ;;  %v3419_v8 = vld [vmem:[#allocation3 + $0x100] sm:$0xff] }
 0x45f   : > { %19265 = vmatmul.mubr.msk.f32.gmra.mrb[28].mxu1 %vm333_vm0, %v3416_v3  ;;  %v3459_v3 = vld [vmem:[#allocation3 + $0x240] sm:$0xff] }
 0x460   : > { %19267 = vmatprep.mubr.msk.f32.mxu1 %vm333_vm0, %v3417_v37  ;;  %v27396_v37 = vld [vmem:[#allocation46_spill] sm:$0xff] }
 0x461   : > { %19861 = vmatmul.mubr.msk.f32.gmra.mrb[22].mxu0 %vm333_vm0, %v24741_v7  ;;  %v3420_v7 = vld [vmem:[#allocation3 + $0x108] sm:$0xff] }
 0x462   : > { %19863 = vmatprep.mubr.msk.f32.mxu0 %vm333_vm0, %v24748_v14  ;;  %v3421_v14 = vld [vmem:[#allocation3 + $0x110] sm:$0xff] }
 0x463   : > { %19268 = vmatmul.mubr.msk.f32.gmra.mrb[30].mxu1 %vm333_vm0, %v3418_v25  ;;  %v3460_v25 = vld [vmem:[#allocation3 + $0x248] sm:$0xff] }
 0x464   : > { %19270 = vmatprep.mubr.msk.f32.mxu1 %vm333_vm0, %v3419_v8  ;;  %v27397_v8 = vld [vmem:[#allocation47_spill] sm:$0xff] }
 0x465   : > { %19864 = vmatmul.mubr.msk.f32.gmra.mrb[24].mxu0 %vm333_vm0, %v24751_v6  ;;  %v3422_v6 = vld [vmem:[#allocation3 + $0x118] sm:$0xff] }
 0x466   : > { %19866 = vmatprep.mubr.msk.f32.mxu0 %vm333_vm0, %v24758_v60  ;;  %v3423_v60 = vld [vmem:[#allocation3 + $0x120] sm:$0xff] }
 0x467   : > { %19271 = vmatmul.mubr.msk.f32.gmra.mrb[32].mxu1 %vm333_vm0, %v3420_v7  ;;  %v3461_v7 = vld [vmem:[#allocation3 + $0x250] sm:$0xff] }
 0x468   : > { %19273 = vmatprep.mubr.msk.f32.mxu1 %vm333_vm0, %v3421_v14  ;;  %v3462_v14 = vld [vmem:[#allocation3 + $0x258] sm:$0xff] }
 0x469   : > { %19867 = vmatmul.mubr.msk.f32.gmra.mrb[26].mxu0 %vm333_vm0, %v24761_v2  ;;  %v3424_v2 = vld [vmem:[#allocation3 + $0x128] sm:$0xff] }
 0x46a   : > { %19869 = vmatprep.mubr.msk.f32.mxu0 %vm333_vm0, %v24768_v34  ;;  %v3425_v34 = vld [vmem:[#allocation3 + $0x130] sm:$0xff] }
 0x46b   : > { %19274 = vmatmul.mubr.msk.f32.gmra.mrb[34].mxu1 %vm333_vm0, %v3422_v6  ;;  %v3463_v6 = vld [vmem:[#allocation3 + $0x260] sm:$0xff] }
 0x46c   : > { %19276 = vmatprep.mubr.msk.f32.mxu1 %vm333_vm0, %v3423_v60  ;;  %v3464_v60 = vld [vmem:[#allocation3 + $0x268] sm:$0xff] }
 0x46d   : > { %19870 = vmatmul.mubr.msk.f32.gmra.mrb[28].mxu0 %vm333_vm0, %v24771_v18  ;;  %v3426_v18 = vld [vmem:[#allocation3 + $0x138] sm:$0xff] }
 0x46e   : > { %19872 = vmatprep.mubr.msk.f32.mxu0 %vm333_vm0, %v24778_v22  ;;  %v3427_v22 = vld [vmem:[#allocation3 + $0x140] sm:$0xff] }
 0x46f   : > { %19277 = vmatmul.mubr.msk.f32.gmra.mrb[36].mxu1 %vm333_vm0, %v3424_v2  ;;  %v27398_v2 = vld [vmem:[#allocation48_spill] sm:$0xff] }
 0x470   : > { %19279 = vmatprep.mubr.msk.f32.mxu1 %vm333_vm0, %v3425_v34  ;;  %v8376_v34 = vld [vmem:[#allocation3 + $0x28c] sm:$0xff] }
 0x471   : > { %19873 = vmatmul.mubr.msk.f32.gmra.mrb[30].mxu0 %vm333_vm0, %v24781_v57  ;;  %v3428_v57 = vld [vmem:[#allocation3 + $0x148] sm:$0xff] }
 0x472   : > { %19875 = vmatprep.mubr.msk.f32.mxu0 %vm333_vm0, %v24788_v39  ;;  %v3429_v39 = vld [vmem:[#allocation3 + $0x150] sm:$0xff] }
 0x473   : > { %19280 = vmatmul.mubr.msk.f32.gmra.mrb[38].mxu1 %vm333_vm0, %v3426_v18  ;;  %v4982_v18 = vld [vmem:[#allocation3 + $0x1ea] sm:$0xff] }
 0x474   : > { %19282 = vmatprep.mubr.msk.f32.mxu1 %vm333_vm0, %v3427_v22  ;;  %v8377_v22 = vld [vmem:[#allocation3 + $0x294] sm:$0xff] }
 0x475   : > { %19876 = vmatmul.mubr.msk.f32.gmra.mrb[32].mxu0 %vm333_vm0, %v24791_v61  ;;  %v3430_v61 = vld [vmem:[#allocation3 + $0x158] sm:$0xff] }
 0x476   : > { %19878 = vmatprep.mubr.msk.f32.mxu0 %vm333_vm0, %v24798_v19  ;;  %v3431_v19 = vld [vmem:[#allocation3 + $0x160] sm:$0xff] }
 0x477   : > { %19283 = vmatmul.mubr.msk.f32.gmra.mrb[40].mxu1 %vm333_vm0, %v3428_v57  ;;  %v8378_v57 = vld [vmem:[#allocation3 + $0x29c] sm:$0xff] }
 0x478   : > { %19285 = vmatprep.mubr.msk.f32.mxu1 %vm333_vm0, %v3429_v39  ;;  %v9146_v39 = vld [vmem:[#allocation3 + $0x35] sm:$0xff] }
 0x479   : > { %19879 = vmatmul.mubr.msk.f32.gmra.mrb[34].mxu0 %vm333_vm0, %v24801_v50  ;;  %v3432_v50 = vld [vmem:[#allocation3 + $0x168] sm:$0xff] }
 0x47a   : > { %19881 = vmatprep.mubr.msk.f32.mxu0 %vm333_vm0, %v24808_v30  ;;  %v3433_v30 = vld [vmem:[#allocation3 + $0x170] sm:$0xff] }
 0x47b   : > { %19286 = vmatmul.mubr.msk.f32.gmra.mrb[42].mxu1 %vm333_vm0, %v3430_v61  ;;  %v9147_v61 = vld [vmem:[#allocation3 + $0x3d] sm:$0xff] }
 0x47c   : > { %19288 = vmatprep.mubr.msk.f32.mxu1 %vm333_vm0, %v3431_v19  ;;  %v4986_v19 = vld [vmem:[#allocation3 + $0x20a] sm:$0xff] }
 0x47d   : > { %19882 = vmatmul.mubr.msk.f32.gmra.mrb[36].mxu0 %vm333_vm0, %v24811_v35  ;;  %v3434_v35 = vld [vmem:[#allocation3 + $0x178] sm:$0xff] }
 0x47e   : > { %19884 = vmatprep.mubr.msk.f32.mxu0 %vm333_vm0, %v24818_v1  ;;  %v3435_v1 = vld [vmem:[#allocation3 + $0x180] sm:$0xff] }
 0x47f   : > { %19289 = vmatmul.mubr.msk.f32.gmra.mrb[44].mxu1 %vm333_vm0, %v3432_v50  ;;  %v9148_v50 = vld [vmem:[#allocation3 + $0x45] sm:$0xff] }
 0x480   : > { %19291 = vmatprep.mubr.msk.f32.mxu1 %vm333_vm0, %v3433_v30  ;;  %v4987_v30 = vld [vmem:[#allocation3 + $0x212] sm:$0xff] }
 0x481   : > { %19885 = vmatmul.mubr.msk.f32.gmra.mrb[38].mxu0 %vm333_vm0, %v24821_v15  ;;  %v3436_v15 = vld [vmem:[#allocation3 + $0x188] sm:$0xff] }
 0x482   : > { %19887 = vmatprep.mubr.msk.f32.mxu0 %vm333_vm0, %v24828_v17  ;;  %v3437_v17 = vld [vmem:[#allocation3 + $0x190] sm:$0xff] }
 0x483   : > { %19292 = vmatmul.mubr.msk.f32.gmra.mrb[46].mxu1 %vm333_vm0, %v3434_v35  ;;  %v9149_v35 = vld [vmem:[#allocation3 + $0x4d] sm:$0xff] }
 0x484   : > { %19294 = vmatprep.mubr.msk.f32.mxu1 %vm333_vm0, %v3435_v1  ;;  %v4988_v1 = vld [vmem:[#allocation3 + $0x21a] sm:$0xff] }
 0x485   : > { %19888 = vmatmul.mubr.msk.f32.gmra.mrb[40].mxu0 %vm333_vm0, %v24831_v9  ;;  %v3438_v9 = vld [vmem:[#allocation3 + $0x198] sm:$0xff] }
 0x486   : > { %19890 = vmatprep.mubr.msk.f32.mxu0 %vm333_vm0, %v24838_v32  ;;  %v3439_v32 = vld [vmem:[#allocation3 + $0x1a0] sm:$0xff] }
 0x487   : > { %19295 = vmatmul.mubr.msk.f32.gmra.mrb[48].mxu1 %vm333_vm0, %v3436_v15  ;;  %v9150_v15 = vld [vmem:[#allocation3 + $0x55] sm:$0xff] }
 0x488   : > { %19297 = vmatprep.mubr.msk.f32.mxu1 %vm333_vm0, %v3437_v17  ;;  %v4989_v17 = vld [vmem:[#allocation3 + $0x222] sm:$0xff] }
 0x489   : > { %19891 = vmatmul.mubr.msk.f32.gmra.mrb[42].mxu0 %vm333_vm0, %v24841_v54  ;;  %v3440_v54 = vld [vmem:[#allocation3 + $0x1a8] sm:$0xff] }
 0x48a   : > { %19893 = vmatprep.mubr.msk.f32.mxu0 %vm333_vm0, %v24848_v11  ;;  %v3441_v11 = vld [vmem:[#allocation3 + $0x1b0] sm:$0xff] }
 0x48b   : > { %19298 = vmatmul.mubr.msk.f32.gmra.mrb[50].mxu1 %vm333_vm0, %v3438_v9  ;;  %v9151_v9 = vld [vmem:[#allocation3 + $0x5d] sm:$0xff] }
 0x48c   : > { %19300 = vmatprep.mubr.msk.f32.mxu1 %vm333_vm0, %v3439_v32  ;;  %v4990_v32 = vld [vmem:[#allocation3 + $0x22a] sm:$0xff] }
 0x48d   : > { %19894 = vmatmul.mubr.msk.f32.gmra.mrb[44].mxu0 %vm333_vm0, %v24851_v10  ;;  %v3442_v10 = vld [vmem:[#allocation3 + $0x1b8] sm:$0xff] }
 0x48e   : > { %19896 = vmatprep.mubr.msk.f32.mxu0 %vm333_vm0, %v24858_v5  ;;  %v3443_v5 = vld [vmem:[#allocation3 + $0x1c0] sm:$0xff] }
 0x48f   : > { %19301 = vmatmul.mubr.msk.f32.gmra.mrb[52].mxu1 %vm333_vm0, %v3440_v54  ;;  %v9152_v54 = vld [vmem:[#allocation3 + $0x65] sm:$0xff] }
 0x490   : > { %19303 = vmatprep.mubr.msk.f32.mxu1 %vm333_vm0, %v3441_v11  ;;  %v9153_v11 = vld [vmem:[#allocation3 + $0x6d] sm:$0xff] }
 0x491   : > { %19897 = vmatmul.mubr.msk.f32.gmra.mrb[46].mxu0 %vm333_vm0, %v24861_v62  ;;  %v3444_v62 = vld [vmem:[#allocation3 + $0x1c8] sm:$0xff] }
 0x492   : > { %19899 = vmatprep.mubr.msk.f32.mxu0 %vm333_vm0, %v24868_v21  ;;  %v3445_v21 = vld [vmem:[#allocation3 + $0x1d0] sm:$0xff] }
 0x493   : > { %19304 = vmatmul.mubr.msk.f32.gmra.mrb[54].mxu1 %vm333_vm0, %v3442_v10  ;;  %v4992_v10 = vld [vmem:[#allocation3 + $0x23a] sm:$0xff] }
 0x494   : > { %19306 = vmatprep.mubr.msk.f32.mxu1 %vm333_vm0, %v3443_v5  ;;  %v9154_v5 = vld [vmem:[#allocation3 + $0x75] sm:$0xff] }
 0x495   : > { %19900 = vmatmul.mubr.msk.f32.gmra.mrb[48].mxu0 %vm333_vm0, %v24871_v52  ;;  %v3446_v52 = vld [vmem:[#allocation3 + $0x1d8] sm:$0xff] }
 0x496   : > { %19902 = vmatprep.mubr.msk.f32.mxu0 %vm333_vm0, %v24878_v28  ;;  %v3447_v28 = vld [vmem:[#allocation3 + $0x1e0] sm:$0xff] }
 0x497   : > { %19307 = vmatmul.mubr.msk.f32.gmra.mrb[56].mxu1 %vm333_vm0, %v3444_v62  ;;  %v4993_v62 = vld [vmem:[#allocation3 + $0x242] sm:$0xff] }
 0x498   : > { %19309 = vmatprep.mubr.msk.f32.mxu1 %vm333_vm0, %v3445_v21  ;;  %v9155_v21 = vld [vmem:[#allocation3 + $0x7d] sm:$0xff] }
 0x499   : > { %19903 = vmatmul.mubr.msk.f32.gmra.mrb[50].mxu0 %vm333_vm0, %v24881_v29  ;;  %v3448_v29 = vld [vmem:[#allocation3 + $0x1e8] sm:$0xff] }
 0x49a   : > { %19905 = vmatprep.mubr.msk.f32.mxu0 %vm333_vm0, %v27382_v58  ;;  %v4994_v58 = vld [vmem:[#allocation3 + $0x24a] sm:$0xff] }
 0x49b   : > { %19310 = vmatmul.mubr.msk.f32.gmra.mrb[58].mxu1 %vm333_vm0, %v3446_v52  ;;  %v9156_v52 = vld [vmem:[#allocation3 + $0x85] sm:$0xff] }
 0x49c   : > { %19312 = vmatprep.mubr.msk.f32.mxu1 %vm333_vm0, %v3447_v28  ;;  %v9157_v28 = vld [vmem:[#allocation3 + $0x8d] sm:$0xff] }
 0x49d   : > { %19906 = vmatmul.mubr.msk.f32.gmra.mrb[52].mxu0 %vm333_vm0, %v27383_v63  ;;  %v4995_v63 = vld [vmem:[#allocation3 + $0x252] sm:$0xff] }
 0x49e   : > { %19908 = vmatprep.mubr.msk.f32.mxu0 %vm333_vm0, %v27384_v24  ;;  %v4996_v24 = vld [vmem:[#allocation3 + $0x25a] sm:$0xff] }
 0x49f   : > { %19313 = vmatmul.mubr.msk.f32.gmra.mrb[60].mxu1 %vm333_vm0, %v3448_v29  ;;  %v9158_v29 = vld [vmem:[#allocation3 + $0x95] sm:$0xff] }
 0x4a0   : > { %19315 = vmatprep.mubr.msk.f32.mxu1 %vm333_vm0, %v3449_v53  ;;  %v9159_v53 = vld [vmem:[#allocation3 + $0x9d] sm:$0xff] }
 0x4a1   : > { %19909 = vmatmul.mubr.msk.f32.gmra.mrb[54].mxu0 %vm333_vm0, %v27385_v45  ;;  %v4997_v45 = vld [vmem:[#allocation3 + $0x262] sm:$0xff] }
 0x4a2   : > { %19911 = vmatprep.mubr.msk.f32.mxu0 %vm333_vm0, %v27386_v47  ;;  %v4998_v47 = vld [vmem:[#allocation3 + $0x26a] sm:$0xff] }
 0x4a3   : > { %19316 = vmatmul.mubr.msk.f32.gmra.mrb[62].mxu1 %vm333_vm0, %v3450_v0  ;;  %v9160_v0 = vld [vmem:[#allocation3 + $0xa5] sm:$0xff] }
 0x4a4   : > { %19318 = vmatprep.mubr.msk.f32.mxu1 %vm333_vm0, %v3451_v13  ;;  %v9162_v13 = vld [vmem:[#allocation3 + $0xb5] sm:$0xff] }
 0x4a5   : > { %19912 = vmatmul.mubr.msk.f32.gmra.mrb[56].mxu0 %vm333_vm0, %v27387_v41  ;;  %v9161_v41 = vld [vmem:[#allocation3 + $0xad] sm:$0xff] }
 0x4a6   : > { %19914 = vmatprep.mubr.msk.f32.mxu0 %vm333_vm0, %v27388_v40  ;;  %v9163_v40 = vld [vmem:[#allocation3 + $0xbd] sm:$0xff] }
 0x4a7   : > { %19319 = vmatmul.mubr.msk.f32.gmra.mrb[64].mxu1 %vm333_vm0, %v3452_v33  ;;  %v9164_v33 = vld [vmem:[#allocation3 + $0xc5] sm:$0xff] }
 0x4a8   : > { %19321 = vmatprep.mubr.msk.f32.mxu1 %vm333_vm0, %v3453_v26  ;;  %v9166_v26 = vld [vmem:[#allocation3 + $0xd5] sm:$0xff] }
 0x4a9   : > { %19915 = vmatmul.mubr.msk.f32.gmra.mrb[58].mxu0 %vm333_vm0, %v27389_v4  ;;  %v9165_v4 = vld [vmem:[#allocation3 + $0xcd] sm:$0xff] }
 0x4aa   : > { %19917 = vmatprep.mubr.msk.f32.mxu0 %vm333_vm0, %v27390_v59  ;;  %v9167_v59 = vld [vmem:[#allocation3 + $0xdd] sm:$0xff] }
 0x4ab   : > { %19322 = vmatmul.mubr.msk.f32.gmra.mrb[66].mxu1 %vm333_vm0, %v3454_v23  ;;  %v9168_v23 = vld [vmem:[#allocation3 + $0xe5] sm:$0xff] }
 0x4ac   : > { %19324 = vmatprep.mubr.msk.f32.mxu1 %vm333_vm0, %v3455_v38  ;;  %v9170_v38 = vld [vmem:[#allocation3 + $0xf5] sm:$0xff] }
 0x4ad   : > { %19918 = vmatmul.mubr.msk.f32.gmra.mrb[60].mxu0 %vm333_vm0, %v27391_v16  ;;  %v9169_v16 = vld [vmem:[#allocation3 + $0xed] sm:$0xff] }
 0x4ae   : > { %19920 = vmatprep.mubr.msk.f32.mxu0 %vm333_vm0, %v27392_v42  ;;  %v9171_v42 = vld [vmem:[#allocation3 + $0xfd] sm:$0xff] }
 0x4af   : > { %19325 = vmatmul.mubr.msk.f32.gmra.mrb[68].mxu1 %vm333_vm0, %v3456_v46  ;;  %v9172_v46 = vld [vmem:[#allocation3 + $0x105] sm:$0xff] }
 0x4b0   : > { %19327 = vmatprep.mubr.msk.f32.mxu1 %vm333_vm0, %v3457_v55  ;;  %v9174_v55 = vld [vmem:[#allocation3 + $0x115] sm:$0xff] }
 0x4b1   : > { %19921 = vmatmul.mubr.msk.f32.gmra.mrb[62].mxu0 %vm333_vm0, %v27393_v56  ;;  %v9173_v56 = vld [vmem:[#allocation3 + $0x10d] sm:$0xff] }
 0x4b2   : > { %19923 = vmatprep.mubr.msk.f32.mxu0 %vm333_vm0, %v27394_v20  ;;  %v9175_v20 = vld [vmem:[#allocation3 + $0x11d] sm:$0xff] }
 0x4b3   : > { %19328 = vmatmul.mubr.msk.f32.gmra.mrb[70].mxu1 %vm333_vm0, %v3458_v27  ;;  %v9176_v27 = vld [vmem:[#allocation3 + $0x125] sm:$0xff] }
 0x4b4   : > { %19330 = vmatprep.mubr.msk.f32.mxu1 %vm333_vm0, %v3459_v3  ;;  %v9178_v3 = vld [vmem:[#allocation3 + $0x135] sm:$0xff] }
 0x4b5   : > { %19924 = vmatmul.mubr.msk.f32.gmra.mrb[64].mxu0 %vm333_vm0, %v27395_v43  ;;  %v9177_v43 = vld [vmem:[#allocation3 + $0x12d] sm:$0xff] }
 0x4b6   : > { %19926 = vmatprep.mubr.msk.f32.mxu0 %vm333_vm0, %v27396_v37  ;;  %v9179_v37 = vld [vmem:[#allocation3 + $0x13d] sm:$0xff] }
 0x4b7   : > { %19331 = vmatmul.mubr.msk.f32.gmra.mrb[72].mxu1 %vm333_vm0, %v3460_v25  ;;  %v9180_v25 = vld [vmem:[#allocation3 + $0x145] sm:$0xff] }
 0x4b8   : > { %19333 = vmatprep.mubr.msk.f32.mxu1 %vm333_vm0, %v3461_v7  ;;  %v9182_v7 = vld [vmem:[#allocation3 + $0x155] sm:$0xff] }
 0x4b9   : > { %19927 = vmatmul.mubr.msk.f32.gmra.mrb[66].mxu0 %vm333_vm0, %v27397_v8  ;;  %v9181_v8 = vld [vmem:[#allocation3 + $0x14d] sm:$0xff] }
 0x4ba   : > { %19929 = vmatprep.mubr.msk.f32.mxu0 %vm333_vm0, %v24971_v51  ;;  %v4979_v51 = vld [vmem:[#allocation3 + $0x1d2] sm:$0xff] }
 0x4bb   : > { %19334 = vmatmul.mubr.msk.f32.gmra.mrb[74].mxu1 %vm333_vm0, %v3462_v14  ;;  %v9183_v14 = vld [vmem:[#allocation3 + $0x15d] sm:$0xff] }
 0x4bc   : > { %19336 = vmatprep.mubr.msk.f32.mxu1 %vm333_vm0, %v3463_v6  ;;  %v9184_v6 = vld [vmem:[#allocation3 + $0x165] sm:$0xff] }
 0x4bd   : > { %19930 = vmatmul.mubr.msk.f32.gmra.mrb[68].mxu0 %vm333_vm0, %v24977_v48  ;;  %v4980_v48 = vld [vmem:[#allocation3 + $0x1da] sm:$0xff] }
 0x4be   : > { %19932 = vmatprep.mubr.msk.f32.mxu0 %vm333_vm0, %v24984_v12  ;;  %v4981_v12 = vld [vmem:[#allocation3 + $0x1e2] sm:$0xff] }
 0x4bf   : > { %19337 = vmatmul.mubr.msk.f32.gmra.mrb[76].mxu1 %vm333_vm0, %v3464_v60  ;;  %v9185_v60 = vld [vmem:[#allocation3 + $0x16d] sm:$0xff] }
 0x4c0   : > { %19430 = vmatprep.mubr.msk.f32.mxu1 %vm333_vm0, %v4979_v51  ;;  %v9187_v51 = vld [vmem:[#allocation3 + $0x17d] sm:$0xff] }
 0x4c1   : > { %19933 = vmatmul.mubr.msk.f32.gmra.mrb[70].mxu0 %vm333_vm0, %v27398_v2  ;;  %v9186_v2 = vld [vmem:[#allocation3 + $0x175] sm:$0xff] }
 0x4c2   : > { %19935 = vmatprep.mubr.msk.f32.mxu0 %vm333_vm0, %v24995_v49  ;;  %v4983_v49 = vld [vmem:[#allocation3 + $0x1f2] sm:$0xff] }
 0x4c3   : > { %19431 = vmatmul.mubr.msk.f32.vlgmr.msra.gmra.mrb[58].mxu1 %vm333_vm0, %v4980_v48  ;;  %v9188_v48 = vld [vmem:[#allocation3 + $0x185] sm:$0xff] }
 0x4c4   : > { %19433 = vmatprep.mubr.msk.f32.mxu1 %vm333_vm0, %v4981_v12 }
 0x4c5   : > { %19936 = vmatmul.mubr.msk.f32.gmra.mrb[72].mxu0 %vm333_vm0, %v24998_v36  ;;  %v4984_v36 = vld [vmem:[#allocation3 + $0x1fa] sm:$0xff] }
 0x4c6   : > { %19938 = vmatprep.mubr.msk.f32.mxu0 %vm333_vm0, %v25006_v44  ;;  %v4985_v44 = vld [vmem:[#allocation3 + $0x202] sm:$0xff] }
 0x4c7   : > { %19434 = vmatmul.mubr.msk.f32.gmra.mrb[60].mxu1 %vm333_vm0, %v4982_v18 }
 0x4c8   : > { %19436 = vmatprep.mubr.msk.f32.mxu1 %vm333_vm0, %v4983_v49 }
 0x4c9   : > { %19939 = vmatmul.mubr.msk.f32.gmra.mrb[74].mxu0 %vm333_vm0, %v8376_v34  ;;  %v9189_v34 = vld [vmem:[#allocation3 + $0x18d] sm:$0xff] }
 0x4ca   : > { %19941 = vmatprep.mubr.msk.f32.mxu0 %vm333_vm0, %v8377_v22  ;;  %v9190_v22 = vld [vmem:[#allocation3 + $0x195] sm:$0xff] }
 0x4cb   : > { %19437 = vmatmul.mubr.msk.f32.gmra.mrb[62].mxu1 %vm333_vm0, %v4984_v36 }
 0x4cc   : > { %19439 = vmatprep.mubr.msk.f32.mxu1 %vm333_vm0, %v4985_v44 }
 0x4cd   : > { %19942 = vmatmul.mubr.msk.f32.gmra.mrb[76].mxu0 %vm333_vm0, %v8378_v57  ;;  %v9191_v57 = vld [vmem:[#allocation3 + $0x19d] sm:$0xff] }
 0x4ce   : > { %19948 = vmatprep.mubr.msk.f32.mxu0 %vm333_vm0, %v9146_v39  ;;  %v9192_v39 = vld [vmem:[#allocation3 + $0x1a5] sm:$0xff] }
 0x4cf   : > { %19440 = vmatmul.mubr.msk.f32.gmra.mrb[64].mxu1 %vm333_vm0, %v4986_v19 }
 0x4d0   : > { %19442 = vmatprep.mubr.msk.f32.mxu1 %vm333_vm0, %v4987_v30 }
 0x4d1   : > { %19949 = vmatmul.mubr.msk.f32.vlgmr.msra.gmra.mrb[0].mxu0 %vm333_vm0, %v9147_v61  ;;  %v9193_v61 = vld [vmem:[#allocation3 + $0x1ad] sm:$0xff] }
 0x4d2   : > { %20946 = vmatpush3.bf16.msra.mxu0 %v25064_v31  ;;  %19951 = vmatprep.mubr.msk.f32.mxu0 %vm333_vm0, %v9148_v50  ;;  %v4991_v31 = vld [vmem:[#allocation3 + $0x232] sm:$0xff] }
 0x4d3   : > { %19443 = vmatmul.mubr.msk.f32.gmra.mrb[66].mxu1 %vm333_vm0, %v4988_v1  ;;  %v9194_v50 = vld [vmem:[#allocation3 + $0x1b5] sm:$0xff] }
 0x4d4   : > { %19445 = vmatprep.mubr.msk.f32.mxu1 %vm333_vm0, %v4989_v17 }
 0x4d5   : > { %19952 = vmatmul.mubr.msk.f32.gmra.mrb[2].mxu0 %vm333_vm0, %v9149_v35  ;;  %v9195_v35 = vld [vmem:[#allocation3 + $0x1bd] sm:$0xff] }
 0x4d6   : > { %19954 = vmatprep.mubr.msk.f32.mxu0 %vm333_vm0, %v9150_v15  ;;  %v9196_v15 = vld [vmem:[#allocation3 + $0x1c5] sm:$0xff] }
 0x4d7   : > { %19446 = vmatmul.mubr.msk.f32.gmra.mrb[68].mxu1 %vm333_vm0, %v4990_v32 }
 0x4d8   : > { %19448 = vmatprep.mubr.msk.f32.mxu1 %vm333_vm0, %v4991_v31 }
 0x4d9   : > { %19955 = vmatmul.mubr.msk.f32.gmra.mrb[4].mxu0 %vm333_vm0, %v9151_v9  ;;  %v9197_v9 = vld [vmem:[#allocation3 + $0x1cd] sm:$0xff] }
 0x4da   : > { %19957 = vmatprep.mubr.msk.f32.mxu0 %vm333_vm0, %v9152_v54  ;;  %v9198_v54 = vld [vmem:[#allocation3 + $0x1d5] sm:$0xff] }
 0x4db   : > { %19449 = vmatmul.mubr.msk.f32.gmra.mrb[70].mxu1 %vm333_vm0, %v4992_v10 }
 0x4dc   : > { %19451 = vmatprep.mubr.msk.f32.mxu1 %vm333_vm0, %v4993_v62 }
 0x4dd   : > { %19958 = vmatmul.mubr.msk.f32.gmra.mrb[6].mxu0 %vm333_vm0, %v9153_v11  ;;  %v9199_v11 = vld [vmem:[#allocation3 + $0x1dd] sm:$0xff] }
 0x4de   : > { %19960 = vmatprep.mubr.msk.f32.mxu0 %vm333_vm0, %v9154_v5  ;;  %v9200_v5 = vld [vmem:[#allocation3 + $0x1e5] sm:$0xff] }
 0x4df   : > { %19452 = vmatmul.mubr.msk.f32.gmra.mrb[72].mxu1 %vm333_vm0, %v4994_v58 }
 0x4e0   : > { %19454 = vmatprep.mubr.msk.f32.mxu1 %vm333_vm0, %v4995_v63 }
 0x4e1   : > { %19961 = vmatmul.mubr.msk.f32.gmra.mrb[8].mxu0 %vm333_vm0, %v9155_v21  ;;  %v9201_v21 = vld [vmem:[#allocation3 + $0x1ed] sm:$0xff] }
 0x4e2   : > { %19963 = vmatprep.mubr.msk.f32.mxu0 %vm333_vm0, %v9156_v52  ;;  %v9202_v52 = vld [vmem:[#allocation3 + $0x1f5] sm:$0xff] }
 0x4e3   : > { %19455 = vmatmul.mubr.msk.f32.gmra.mrb[74].mxu1 %vm333_vm0, %v4996_v24 }
 0x4e4   : > { %19457 = vmatprep.mubr.msk.f32.mxu1 %vm333_vm0, %v4997_v45 }
 0x4e5   : > { %19964 = vmatmul.mubr.msk.f32.gmra.mrb[10].mxu0 %vm333_vm0, %v9157_v28  ;;  %v9203_v28 = vld [vmem:[#allocation3 + $0x1fd] sm:$0xff] }
 0x4e6   : > { %19966 = vmatprep.mubr.msk.f32.mxu0 %vm333_vm0, %v9158_v29  ;;  %v9204_v29 = vld [vmem:[#allocation3 + $0x205] sm:$0xff] }
 0x4e7   : > { %19458 = vmatmul.mubr.msk.f32.gmra.mrb[76].mxu1 %vm333_vm0, %v4998_v47 }
 0x4e9   : > { %19967 = vmatmul.mubr.msk.f32.gmra.mrb[12].mxu0 %vm333_vm0, %v9159_v53  ;;  %v9205_v53 = vld [vmem:[#allocation3 + $0x20d] sm:$0xff] }
 0x4ea   : > { %19969 = vmatprep.mubr.msk.f32.mxu0 %vm333_vm0, %v9160_v0  ;;  %v9206_v0 = vld [vmem:[#allocation3 + $0x215] sm:$0xff] }
 0x4ed   : > { %19970 = vmatmul.mubr.msk.f32.gmra.mrb[14].mxu0 %vm333_vm0, %v9161_v41 }
 0x4ee   : > { %19972 = vmatprep.mubr.msk.f32.mxu0 %vm333_vm0, %v9162_v13  ;;  %v9207_v13 = vld [vmem:[#allocation3 + $0x21d] sm:$0xff] }
 0x4f1   : > { %19973 = vmatmul.mubr.msk.f32.gmra.mrb[16].mxu0 %vm333_vm0, %v9163_v40 }
 0x4f2   : > { %19975 = vmatprep.mubr.msk.f32.mxu0 %vm333_vm0, %v9164_v33  ;;  %v9208_v33 = vld [vmem:[#allocation3 + $0x225] sm:$0xff] }
 0x4f5   : > { %19976 = vmatmul.mubr.msk.f32.gmra.mrb[18].mxu0 %vm333_vm0, %v9165_v4 }
 0x4f6   : > { %19978 = vmatprep.mubr.msk.f32.mxu0 %vm333_vm0, %v9166_v26  ;;  %v9209_v26 = vld [vmem:[#allocation3 + $0x22d] sm:$0xff] }
 0x4f9   : > { %19979 = vmatmul.mubr.msk.f32.gmra.mrb[20].mxu0 %vm333_vm0, %v9167_v59 }
 0x4fa   : > { %19981 = vmatprep.mubr.msk.f32.mxu0 %vm333_vm0, %v9168_v23  ;;  %v25310_v12 = vpop.f32.mrb[0].mxu1  ;;  %v9210_v23 = vld [vmem:[#allocation3 + $0x235] sm:$0xff] }
 0x4fb   : > { %v25313_v18 = vpop.f32.mrb[1].mxu1 }
 0x4fd   : > { %19982 = vmatmul.mubr.msk.f32.gmra.mrb[22].mxu0 %vm333_vm0, %v9169_v16 }
 0x4fe   : > { %19984 = vmatprep.mubr.msk.f32.mxu0 %vm333_vm0, %v9170_v38  ;;  %v25316_v49 = vpop.f32.mrb[2].mxu1  ;;  %v9211_v38 = vld [vmem:[#allocation3 + $0x23d] sm:$0xff] }
 0x4ff   : > { %v25319_v36 = vpop.f32.mrb[3].mxu1 }
 0x501   : > { %19985 = vmatmul.mubr.msk.f32.gmra.mrb[24].mxu0 %vm333_vm0, %v9171_v42 }
 0x502   : > { %19987 = vmatprep.mubr.msk.f32.mxu0 %vm333_vm0, %v9172_v46  ;;  %v25322_v44 = vpop.f32.mrb[4].mxu1  ;;  %v9212_v46 = vld [vmem:[#allocation3 + $0x245] sm:$0xff] }
 0x503   : > { %v25325_v19 = vpop.f32.mrb[5].mxu1 }
 0x505   : > { %19988 = vmatmul.mubr.msk.f32.gmra.mrb[26].mxu0 %vm333_vm0, %v9173_v56 }
 0x506   : > { %19990 = vmatprep.mubr.msk.f32.mxu0 %vm333_vm0, %v9174_v55  ;;  %v25328_v30 = vpop.f32.mrb[6].mxu1  ;;  %v9213_v55 = vld [vmem:[#allocation3 + $0x24d] sm:$0xff] }
 0x507   : > { %v25331_v1 = vpop.f32.mrb[7].mxu1 }
 0x509   : > { %19991 = vmatmul.mubr.msk.f32.gmra.mrb[28].mxu0 %vm333_vm0, %v9175_v20 }
 0x50a   : > { %19993 = vmatprep.mubr.msk.f32.mxu0 %vm333_vm0, %v9176_v27  ;;  %v25334_v17 = vpop.f32.mrb[8].mxu1  ;;  %v9214_v27 = vld [vmem:[#allocation3 + $0x255] sm:$0xff] }
 0x50b   : > { %v25337_v32 = vpop.f32.mrb[9].mxu1 }
 0x50d   : > { %19994 = vmatmul.mubr.msk.f32.gmra.mrb[30].mxu0 %vm333_vm0, %v9177_v43 }
 0x50e   : > { %19996 = vmatprep.mubr.msk.f32.mxu0 %vm333_vm0, %v9178_v3  ;;  %v25340_v31 = vpop.f32.mrb[10].mxu1  ;;  %v9215_v3 = vld [vmem:[#allocation3 + $0x25d] sm:$0xff] }
 0x50f   : > { %v25343_v10 = vpop.f32.mrb[11].mxu1 }
 0x511   : > { %19997 = vmatmul.mubr.msk.f32.gmra.mrb[32].mxu0 %vm333_vm0, %v9179_v37 }
 0x512   : > { %19999 = vmatprep.mubr.msk.f32.mxu0 %vm333_vm0, %v9180_v25  ;;  %v25346_v62 = vpop.f32.mrb[12].mxu1  ;;  %v9216_v25 = vld [vmem:[#allocation3 + $0x265] sm:$0xff] }
 0x513   : > { %v25349_v58 = vpop.f32.mrb[13].mxu1 }
 0x515   : > { %20000 = vmatmul.mubr.msk.f32.gmra.mrb[34].mxu0 %vm333_vm0, %v9181_v8 }
 0x516   : > { %20002 = vmatprep.mubr.msk.f32.mxu0 %vm333_vm0, %v9182_v7  ;;  %v25352_v63 = vpop.f32.mrb[14].mxu1  ;;  %v9217_v7 = vld [vmem:[#allocation3 + $0x26d] sm:$0xff] }
 0x517   : > { %v25355_v24 = vpop.f32.mrb[15].mxu1 }
 0x519   : > { %20003 = vmatmul.mubr.msk.f32.gmra.mrb[36].mxu0 %vm333_vm0, %v9183_v14 }
 0x51a   : > { %20005 = vmatprep.mubr.msk.f32.mxu0 %vm333_vm0, %v9184_v6  ;;  %v25358_v45 = vpop.f32.mrb[16].mxu1  ;;  %v9218_v6 = vld [vmem:[#allocation3 + $0x275] sm:$0xff] }
 0x51b   : > { %v25361_v47 = vpop.f32.mrb[17].mxu1 }
 0x51d   : > { %20006 = vmatmul.mubr.msk.f32.gmra.mrb[38].mxu0 %vm333_vm0, %v9185_v60 }
 0x51e   : > { %20008 = vmatprep.mubr.msk.f32.mxu0 %vm333_vm0, %v9186_v2  ;;  %v25364_v41 = vpop.f32.mrb[18].mxu1  ;;  %v9219_v2 = vld [vmem:[#allocation3 + $0x27d] sm:$0xff] }
 0x51f   : > { %v25367_v40 = vpop.f32.mrb[19].mxu1 }
 0x521   : > { %20009 = vmatmul.mubr.msk.f32.gmra.mrb[40].mxu0 %vm333_vm0, %v9187_v51 }
 0x522   : > { %20011 = vmatprep.mubr.msk.f32.mxu0 %vm333_vm0, %v9188_v48  ;;  %v25370_v4 = vpop.f32.mrb[20].mxu1  ;;  %v9220_v48 = vld [vmem:[#allocation3 + $0x285] sm:$0xff] }
 0x523   : > { %v25373_v59 = vpop.f32.mrb[21].mxu1 }
 0x525   : > { %20012 = vmatmul.mubr.msk.f32.gmra.mrb[42].mxu0 %vm333_vm0, %v9189_v34 }
 0x526   : > { %20014 = vmatprep.mubr.msk.f32.mxu0 %vm333_vm0, %v9190_v22  ;;  %v25376_v16 = vpop.f32.mrb[22].mxu1  ;;  %v9221_v22 = vld [vmem:[#allocation3 + $0x28d] sm:$0xff] }
 0x527   : > { %v25379_v42 = vpop.f32.mrb[23].mxu1 }
 0x529   : > { %20015 = vmatmul.mubr.msk.f32.gmra.mrb[44].mxu0 %vm333_vm0, %v9191_v57 }
 0x52a   : > { %20017 = vmatprep.mubr.msk.f32.mxu0 %vm333_vm0, %v9192_v39  ;;  %v25382_v56 = vpop.f32.mrb[24].mxu1  ;;  %v9222_v39 = vld [vmem:[#allocation3 + $0x295] sm:$0xff] }
 0x52b   : > { %v25385_v20 = vpop.f32.mrb[25].mxu1 }
 0x52d   : > { %20018 = vmatmul.mubr.msk.f32.gmra.mrb[46].mxu0 %vm333_vm0, %v9193_v61 }
 0x52e   : > { %20020 = vmatprep.mubr.msk.f32.mxu0 %vm333_vm0, %v9194_v50  ;;  %v25388_v43 = vpop.f32.mrb[26].mxu1  ;;  %v9223_v50 = vld [vmem:[#allocation3 + $0x29d] sm:$0xff] }
 0x52f   : > { %v25391_v37 = vpop.f32.mrb[27].mxu1 }
 0x531   : > { %20021 = vmatmul.mubr.msk.f32.gmra.mrb[48].mxu0 %vm333_vm0, %v9195_v35 }
 0x532   : > { %20023 = vmatprep.mubr.msk.f32.mxu0 %vm333_vm0, %v9196_v15  ;;  %v25394_v8 = vpop.f32.mrb[28].mxu1  ;;  %v9991_v15 = vld [vmem:[#allocation3 + $0x36] sm:$0xff] }
 0x533   : > { %v25397_v14 = vpop.f32.mrb[29].mxu1 }
 0x535   : > { %20024 = vmatmul.mubr.msk.f32.gmra.mrb[50].mxu0 %vm333_vm0, %v9197_v9 }
 0x536   : > { %20026 = vmatprep.mubr.msk.f32.mxu0 %vm333_vm0, %v9198_v54  ;;  %v25400_v60 = vpop.f32.mrb[30].mxu1  ;;  %v9992_v54 = vld [vmem:[#allocation3 + $0x3e] sm:$0xff] }
 0x537   : > { %v25403_v51 = vpop.f32.mrb[31].mxu1 }
 0x539   : > { %20027 = vmatmul.mubr.msk.f32.gmra.mrb[52].mxu0 %vm333_vm0, %v9199_v11 }
 0x53a   : > { %20029 = vmatprep.mubr.msk.f32.mxu0 %vm333_vm0, %v9200_v5  ;;  %v25406_v34 = vpop.f32.mrb[32].mxu1  ;;  %v9993_v5 = vld [vmem:[#allocation3 + $0x46] sm:$0xff] }
 0x53b   : > { %v25409_v57 = vpop.f32.mrb[33].mxu1 }
 0x53d   : > { %20030 = vmatmul.mubr.msk.f32.gmra.mrb[54].mxu0 %vm333_vm0, %v9201_v21 }
 0x53e   : > { %20032 = vmatprep.mubr.msk.f32.mxu0 %vm333_vm0, %v9202_v52  ;;  %v25412_v61 = vpop.f32.mrb[34].mxu1  ;;  %v9994_v52 = vld [vmem:[#allocation3 + $0x4e] sm:$0xff] }
 0x53f   : > { %v25415_v35 = vpop.f32.mrb[35].mxu1 }
 0x541   : > { %20033 = vmatmul.mubr.msk.f32.gmra.mrb[56].mxu0 %vm333_vm0, %v9203_v28 }
 0x542   : > { %20035 = vmatprep.mubr.msk.f32.mxu0 %vm333_vm0, %v9204_v29  ;;  %v25418_v9 = vpop.f32.mrb[36].mxu1  ;;  %v9995_v29 = vld [vmem:[#allocation3 + $0x56] sm:$0xff] }
 0x543   : > { %v25421_v11 = vpop.f32.mrb[37].mxu1 }
 0x545   : > { %20036 = vmatmul.mubr.msk.f32.gmra.mrb[58].mxu0 %vm333_vm0, %v9205_v53 }
 0x546   : > { %20038 = vmatprep.mubr.msk.f32.mxu0 %vm333_vm0, %v9206_v0  ;;  %v25424_v21 = vpop.f32.mrb[38].mxu1  ;;  %v9996_v0 = vld [vmem:[#allocation3 + $0x5e] sm:$0xff] }
 0x547   : > { %v25427_v28 = vpop.f32.mrb[39].mxu1 }
 0x549   : > { %20039 = vmatmul.mubr.msk.f32.gmra.mrb[60].mxu0 %vm333_vm0, %v9207_v13 }
 0x54a   : > { %20041 = vmatprep.mubr.msk.f32.mxu0 %vm333_vm0, %v9208_v33  ;;  %v25430_v53 = vpop.f32.mrb[40].mxu1  ;;  %v9997_v33 = vld [vmem:[#allocation3 + $0x66] sm:$0xff] }
 0x54b   : > { %v25433_v13 = vpop.f32.mrb[41].mxu1 }
 0x54d   : > { %20042 = vmatmul.mubr.msk.f32.gmra.mrb[62].mxu0 %vm333_vm0, %v9209_v26 }
 0x54e   : > { %20044 = vmatprep.mubr.msk.f32.mxu0 %vm333_vm0, %v9210_v23  ;;  %v25436_v26 = vpop.f32.mrb[42].mxu1  ;;  %v9998_v23 = vld [vmem:[#allocation3 + $0x6e] sm:$0xff] }
 0x551   : > { %20045 = vmatmul.mubr.msk.f32.gmra.mrb[64].mxu0 %vm333_vm0, %v9211_v38  ;;  %v25439_v38 = vpop.f32.mrb[43].mxu1 }
 0x552   : > { %20047 = vmatprep.mubr.msk.f32.mxu0 %vm333_vm0, %v9212_v46  ;;  %v9999_v46 = vld [vmem:[#allocation3 + $0x76] sm:$0xff] }
 0x555   : > { %20048 = vmatmul.mubr.msk.f32.gmra.mrb[66].mxu0 %vm333_vm0, %v9213_v55  ;;  %v25442_v55 = vpop.f32.mrb[44].mxu1 }
 0x556   : > { %20050 = vmatprep.mubr.msk.f32.mxu0 %vm333_vm0, %v9214_v27  ;;  %v10000_v27 = vld [vmem:[#allocation3 + $0x7e] sm:$0xff] }
 0x559   : > { %20051 = vmatmul.mubr.msk.f32.gmra.mrb[68].mxu0 %vm333_vm0, %v9215_v3  ;;  %v25445_v3 = vpop.f32.mrb[45].mxu1 }
 0x55a   : > { %20053 = vmatprep.mubr.msk.f32.mxu0 %vm333_vm0, %v9216_v25  ;;  %v10001_v25 = vld [vmem:[#allocation3 + $0x86] sm:$0xff] }
 0x55d   : > { %20054 = vmatmul.mubr.msk.f32.gmra.mrb[70].mxu0 %vm333_vm0, %v9217_v7  ;;  %v25448_v7 = vpop.f32.mrb[46].mxu1 }
 0x55e   : > { %20056 = vmatprep.mubr.msk.f32.mxu0 %vm333_vm0, %v9218_v6  ;;  %v10002_v6 = vld [vmem:[#allocation3 + $0x8e] sm:$0xff] }
 0x561   : > { %20057 = vmatmul.mubr.msk.f32.gmra.mrb[72].mxu0 %vm333_vm0, %v9219_v2  ;;  %v25451_v2 = vpop.f32.mrb[47].mxu1 }
 0x562   : > { %20059 = vmatprep.mubr.msk.f32.mxu0 %vm333_vm0, %v9220_v48  ;;  %v10003_v48 = vld [vmem:[#allocation3 + $0x96] sm:$0xff] }
 0x565   : > { %20060 = vmatmul.mubr.msk.f32.gmra.mrb[74].mxu0 %vm333_vm0, %v9221_v22  ;;  %v25454_v22 = vpop.f32.mrb[48].mxu1 }
 0x566   : > { %20062 = vmatprep.mubr.msk.f32.mxu0 %vm333_vm0, %v9222_v39  ;;  %v10004_v39 = vld [vmem:[#allocation3 + $0x9e] sm:$0xff] }
 0x569   : > { %20063 = vmatmul.mubr.msk.f32.gmra.mrb[76].mxu0 %vm333_vm0, %v9223_v50  ;;  %v25457_v50 = vpop.f32.mrb[49].mxu1 }
 0x56a   : > { %20069 = vmatprep.mubr.msk.f32.mxu0 %vm333_vm0, %v9991_v15  ;;  %v10005_v15 = vld [vmem:[#allocation3 + $0xa6] sm:$0xff] }
 0x56d   : > { %20070 = vmatmul.mubr.msk.f32.vlgmr.msra.gmra.mrb[0].mxu0 %vm333_vm0, %v9992_v54  ;;  %v25460_v54 = vpop.f32.mrb[50].mxu1 }
 0x56e   : > { %20072 = vmatprep.mubr.msk.f32.mxu0 %vm333_vm0, %v9993_v5  ;;  %27399 = vst [vmem:[#allocation8_spill] sm:$0xff] %v25460_v54  ;;  %v10006_v5 = vld [vmem:[#allocation3 + $0xae] sm:$0xff]  ;;  %v11447_v54 = vld [vmem:[%s27072_s5] sm:$0xff] }
 0x571   : > { %20073 = vmatmul.mubr.msk.f32.gmra.mrb[2].mxu0 %vm333_vm0, %v9994_v52  ;;  %v25463_v52 = vpop.f32.mrb[51].mxu1 }
 0x572   : > { %20075 = vmatprep.mubr.msk.f32.mxu0 %vm333_vm0, %v9995_v29  ;;  %27400 = vst [vmem:[#allocation33_spill] sm:$0xff] %v25463_v52  ;;  %v10007_v29 = vld [vmem:[#allocation3 + $0xb6] sm:$0xff] }
 0x575   : > { %20076 = vmatmul.mubr.msk.f32.gmra.mrb[4].mxu0 %vm333_vm0, %v9996_v0  ;;  %v25465_v0 = vpop.f32.mrb[52].mxu1 }
 0x576   : > { %20078 = vmatprep.mubr.msk.f32.mxu0 %vm333_vm0, %v9997_v33  ;;  %27401 = vst [vmem:[#allocation34_spill] sm:$0xff] %v25465_v0  ;;  %v25467_v33 = vpop.f32.mrb[53].mxu1 }
 0x577   : > { %27402 = vst [vmem:[#allocation35_spill] sm:$0xff] %v25467_v33 }
 0x579   : > { %20079 = vmatmul.mubr.msk.f32.gmra.mrb[6].mxu0 %vm333_vm0, %v9998_v23  ;;  %v25470_v23 = vpop.f32.mrb[54].mxu1 }
 0x57a   : > { %20081 = vmatprep.mubr.msk.f32.mxu0 %vm333_vm0, %v9999_v46  ;;  %27403 = vst [vmem:[#allocation36_spill] sm:$0xff] %v25470_v23  ;;  %v10008_v46 = vld [vmem:[#allocation3 + $0xbe] sm:$0xff] }
 0x57d   : > { %20082 = vmatmul.mubr.msk.f32.gmra.mrb[8].mxu0 %vm333_vm0, %v10000_v27  ;;  %v25473_v27 = vpop.f32.mrb[55].mxu1 }
 0x57e   : > { %20084 = vmatprep.mubr.msk.f32.mxu0 %vm333_vm0, %v10001_v25  ;;  %27404 = vst [vmem:[#allocation37_spill] sm:$0xff] %v25473_v27  ;;  %v10009_v25 = vld [vmem:[#allocation3 + $0xc6] sm:$0xff]  ;;  %v10014_v27 = vld [vmem:[#allocation3 + $0xee] sm:$0xff] }
 0x581   : > { %20085 = vmatmul.mubr.msk.f32.gmra.mrb[10].mxu0 %vm333_vm0, %v10002_v6  ;;  %v25475_v6 = vpop.f32.mrb[56].mxu1 }
 0x582   : > { %20087 = vmatprep.mubr.msk.f32.mxu0 %vm333_vm0, %v10003_v48  ;;  %27405 = vst [vmem:[#allocation38_spill] sm:$0xff] %v25475_v6  ;;  %v25477_v48 = vpop.f32.mrb[57].mxu1  ;;  %v10015_v6 = vld [vmem:[#allocation3 + $0xf6] sm:$0xff] }
 0x583   : > { %27406 = vst [vmem:[#allocation39_spill] sm:$0xff] %v25477_v48 }
 0x585   : > { %20088 = vmatmul.mubr.msk.f32.gmra.mrb[12].mxu0 %vm333_vm0, %v10004_v39  ;;  %v10010_v39 = vld [vmem:[#allocation3 + $0xce] sm:$0xff] }
 0x586   : > { %20090 = vmatprep.mubr.msk.f32.mxu0 %vm333_vm0, %v10005_v15  ;;  %v10011_v15 = vld [vmem:[#allocation3 + $0xd6] sm:$0xff] }
 0x589   : > { %20091 = vmatmul.mubr.msk.f32.gmra.mrb[14].mxu0 %vm333_vm0, %v10006_v5  ;;  %v10012_v5 = vld [vmem:[#allocation3 + $0xde] sm:$0xff] }
 0x58a   : > { %20093 = vmatprep.mubr.msk.f32.mxu0 %vm333_vm0, %v10007_v29  ;;  %v10013_v29 = vld [vmem:[#allocation3 + $0xe6] sm:$0xff] }
 0x58d   : > { %20094 = vmatmul.mubr.msk.f32.gmra.mrb[16].mxu0 %vm333_vm0, %v10008_v46 }
 0x58e   : > { %20096 = vmatprep.mubr.msk.f32.mxu0 %vm333_vm0, %v10009_v25  ;;  %v10016_v25 = vld [vmem:[#allocation3 + $0xfe] sm:$0xff] }
 0x591   : > { %20097 = vmatmul.mubr.msk.f32.gmra.mrb[18].mxu0 %vm333_vm0, %v10010_v39  ;;  %v10017_v39 = vld [vmem:[#allocation3 + $0x106] sm:$0xff] }
 0x592   : > { %20099 = vmatprep.mubr.msk.f32.mxu0 %vm333_vm0, %v10011_v15 }
 0x595   : > { %20100 = vmatmul.mubr.msk.f32.gmra.mrb[20].mxu0 %vm333_vm0, %v10012_v5  ;;  %v10018_v5 = vld [vmem:[#allocation3 + $0x10e] sm:$0xff] }
 0x596   : > { %20102 = vmatprep.mubr.msk.f32.mxu0 %vm333_vm0, %v10013_v29  ;;  %v25485_v23 = vpop.f32.mrb[58].mxu1  ;;  %v10019_v29 = vld [vmem:[#allocation3 + $0x116] sm:$0xff] }
 0x597   : > { %27407 = vst [vmem:[#allocation40_spill] sm:$0xff] %v25485_v23  ;;  %v25488_v46 = vpop.f32.mrb[59].mxu1 }
 0x598   : > { %27408 = vst [vmem:[#allocation41_spill] sm:$0xff] %v25488_v46  ;;  %v10021_v46 = vld [vmem:[#allocation3 + $0x126] sm:$0xff] }
 0x599   : > { %20103 = vmatmul.mubr.msk.f32.gmra.mrb[22].mxu0 %vm333_vm0, %v10014_v27 }
 0x59a   : > { %20105 = vmatprep.mubr.msk.f32.mxu0 %vm333_vm0, %v10015_v6  ;;  %v25491_v48 = vpop.f32.mrb[60].mxu1  ;;  %v10020_v6 = vld [vmem:[#allocation3 + $0x11e] sm:$0xff] }
 0x59b   : > { %27409 = vst [vmem:[#allocation42_spill] sm:$0xff] %v25491_v48  ;;  %v25494_v15 = vpop.f32.mrb[61].mxu1 }
 0x59c   : > { %27410 = vst [vmem:[#allocation43_spill] sm:$0xff] %v25494_v15  ;;  %v10023_v15 = vld [vmem:[#allocation3 + $0x136] sm:$0xff] }
 0x59d   : > { %20106 = vmatmul.mubr.msk.f32.gmra.mrb[24].mxu0 %vm333_vm0, %v10016_v25 }
 0x59e   : > { %20108 = vmatprep.mubr.msk.f32.mxu0 %vm333_vm0, %v10017_v39  ;;  %v25497_v33 = vpop.f32.mrb[62].mxu1  ;;  %v10022_v39 = vld [vmem:[#allocation3 + $0x12e] sm:$0xff] }
 0x59f   : > { %27411 = vst [vmem:[#allocation44_spill] sm:$0xff] %v25497_v33  ;;  %v25500_v27 = vpop.f32.mrb[63].mxu1 }
 0x5a0   : > { %27412 = vst [vmem:[#allocation45_spill] sm:$0xff] %v25500_v27  ;;  %v10025_v27 = vld [vmem:[#allocation3 + $0x146] sm:$0xff] }
 0x5a1   : > { %20109 = vmatmul.mubr.msk.f32.gmra.mrb[26].mxu0 %vm333_vm0, %v10018_v5 }
 0x5a2   : > { %20111 = vmatprep.mubr.msk.f32.mxu0 %vm333_vm0, %v10019_v29  ;;  %v25503_v23 = vpop.f32.mrb[64].mxu1  ;;  %v10024_v29 = vld [vmem:[#allocation3 + $0x13e] sm:$0xff] }
 0x5a3   : > { %27413 = vst [vmem:[#allocation46_spill] sm:$0xff] %v25503_v23  ;;  %v25506_v25 = vpop.f32.mrb[65].mxu1 }
 0x5a4   : > { %27414 = vst [vmem:[#allocation47_spill] sm:$0xff] %v25506_v25  ;;  %v10027_v25 = vld [vmem:[#allocation3 + $0x156] sm:$0xff] }
 0x5a5   : > { %20112 = vmatmul.mubr.msk.f32.gmra.mrb[28].mxu0 %vm333_vm0, %v10020_v6 }
 0x5a6   : > { %20114 = vmatprep.mubr.msk.f32.mxu0 %vm333_vm0, %v10021_v46  ;;  %v25509_v48 = vpop.f32.mrb[66].mxu1  ;;  %v10026_v46 = vld [vmem:[#allocation3 + $0x14e] sm:$0xff] }
 0x5a7   : > { %27415 = vst [vmem:[#allocation48_spill] sm:$0xff] %v25509_v48  ;;  %v25512_v5 = vpop.f32.mrb[67].mxu1 }
 0x5a8   : > { %27416 = vst [vmem:[#allocation49_spill] sm:$0xff] %v25512_v5  ;;  %v10029_v5 = vld [vmem:[#allocation3 + $0x166] sm:$0xff] }
 0x5a9   : > { %20115 = vmatmul.mubr.msk.f32.gmra.mrb[30].mxu0 %vm333_vm0, %v10022_v39 }
 0x5aa   : > { %20117 = vmatprep.mubr.msk.f32.mxu0 %vm333_vm0, %v10023_v15  ;;  %v25515_v33 = vpop.f32.mrb[68].mxu1  ;;  %v10028_v15 = vld [vmem:[#allocation3 + $0x15e] sm:$0xff] }
 0x5ab   : > { %27417 = vst [vmem:[#allocation50_spill] sm:$0xff] %v25515_v33  ;;  %v25518_v6 = vpop.f32.mrb[69].mxu1 }
 0x5ac   : > { %27418 = vst [vmem:[#allocation51_spill] sm:$0xff] %v25518_v6  ;;  %v10031_v6 = vld [vmem:[#allocation3 + $0x176] sm:$0xff] }
 0x5ad   : > { %20118 = vmatmul.mubr.msk.f32.gmra.mrb[32].mxu0 %vm333_vm0, %v10024_v29 }
 0x5ae   : > { %20120 = vmatprep.mubr.msk.f32.mxu0 %vm333_vm0, %v10025_v27  ;;  %v25521_v23 = vpop.f32.mrb[70].mxu1  ;;  %v10030_v27 = vld [vmem:[#allocation3 + $0x16e] sm:$0xff] }
 0x5af   : > { %27419 = vst [vmem:[#allocation52_spill] sm:$0xff] %v25521_v23  ;;  %v25524_v39 = vpop.f32.mrb[71].mxu1 }
 0x5b0   : > { %27420 = vst [vmem:[#allocation53_spill] sm:$0xff] %v25524_v39  ;;  %v10033_v39 = vld [vmem:[#allocation3 + $0x186] sm:$0xff] }
 0x5b1   : > { %20121 = vmatmul.mubr.msk.f32.gmra.mrb[34].mxu0 %vm333_vm0, %v10026_v46 }
 0x5b2   : > { %20123 = vmatprep.mubr.msk.f32.mxu0 %vm333_vm0, %v10027_v25  ;;  %v25527_v48 = vpop.f32.mrb[72].mxu1  ;;  %v10032_v25 = vld [vmem:[#allocation3 + $0x17e] sm:$0xff] }
 0x5b3   : > { %27421 = vst [vmem:[#allocation54_spill] sm:$0xff] %v25527_v48  ;;  %v25530_v29 = vpop.f32.mrb[73].mxu1  ;;  %v10063_v48 = vld [vmem:[#allocation3 + $0x276] sm:$0xff] }
 0x5b4   : > { %27422 = vst [vmem:[#allocation55_spill] sm:$0xff] %v25530_v29  ;;  %v10035_v29 = vld [vmem:[#allocation3 + $0x196] sm:$0xff] }
 0x5b5   : > { %20124 = vmatmul.mubr.msk.f32.gmra.mrb[36].mxu0 %vm333_vm0, %v10028_v15 }
 0x5b6   : > { %20126 = vmatprep.mubr.msk.f32.mxu0 %vm333_vm0, %v10029_v5  ;;  %v25533_v33 = vpop.f32.mrb[74].mxu1  ;;  %v10034_v5 = vld [vmem:[#allocation3 + $0x18e] sm:$0xff] }
 0x5b7   : > { %27423 = vst [vmem:[#allocation56_spill] sm:$0xff] %v25533_v33  ;;  %v25536_v46 = vpop.f32.mrb[75].mxu1 }
 0x5b8   : > { %27424 = vst [vmem:[#allocation57_spill] sm:$0xff] %v25536_v46  ;;  %v10037_v46 = vld [vmem:[#allocation3 + $0x1a6] sm:$0xff] }
 0x5b9   : > { %20127 = vmatmul.mubr.msk.f32.gmra.mrb[38].mxu0 %vm333_vm0, %v10030_v27  ;;  %v10036_v27 = vld [vmem:[#allocation3 + $0x19e] sm:$0xff] }
 0x5ba   : > { %20129 = vmatprep.mubr.msk.f32.mxu0 %vm333_vm0, %v10031_v6  ;;  %v25539_v23 = vpop.f32.mrb[76].mxu1  ;;  %v10038_v6 = vld [vmem:[#allocation3 + $0x1ae] sm:$0xff] }
 0x5bb   : > { %27425 = vst [vmem:[#allocation58_spill] sm:$0xff] %v25539_v23  ;;  %v25542_v15 = vpop.f32.mrb[77].mxu1  ;;  %v10039_v23 = vld [vmem:[#allocation3 + $0x1b6] sm:$0xff] }
 0x5bc   : > { %27426 = vst [vmem:[#allocation59_spill] sm:$0xff] %v25542_v15  ;;  %v10057_v15 = vld [vmem:[#allocation3 + $0x246] sm:$0xff] }
 0x5bd   : > { %20130 = vmatmul.mubr.msk.f32.gmra.mrb[40].mxu0 %vm333_vm0, %v10032_v25  ;;  %v10040_v25 = vld [vmem:[#allocation3 + $0x1be] sm:$0xff] }
 0x5be   : > { %20132 = vmatprep.mubr.msk.f32.mxu0 %vm333_vm0, %v10033_v39  ;;  %v10041_v39 = vld [vmem:[#allocation3 + $0x1c6] sm:$0xff] }
 0x5c1   : > { %20133 = vmatmul.mubr.msk.f32.gmra.mrb[42].mxu0 %vm333_vm0, %v10034_v5  ;;  %v10042_v5 = vld [vmem:[#allocation3 + $0x1ce] sm:$0xff] }
 0x5c2   : > { %20135 = vmatprep.mubr.msk.f32.mxu0 %vm333_vm0, %v10035_v29  ;;  %v10043_v29 = vld [vmem:[#allocation3 + $0x1d6] sm:$0xff] }
 0x5c5   : > { %20136 = vmatmul.mubr.msk.f32.gmra.mrb[44].mxu0 %vm333_vm0, %v10036_v27  ;;  %v10044_v27 = vld [vmem:[#allocation3 + $0x1de] sm:$0xff] }
 0x5c6   : > { %20138 = vmatprep.mubr.msk.f32.mxu0 %vm333_vm0, %v10037_v46  ;;  %v10045_v46 = vld [vmem:[#allocation3 + $0x1e6] sm:$0xff] }
 0x5c9   : > { %20139 = vmatmul.mubr.msk.f32.gmra.mrb[46].mxu0 %vm333_vm0, %v10038_v6  ;;  %v10046_v6 = vld [vmem:[#allocation3 + $0x1ee] sm:$0xff] }
 0x5ca   : > { %20141 = vmatprep.mubr.msk.f32.mxu0 %vm333_vm0, %v10039_v23  ;;  %v10047_v23 = vld [vmem:[#allocation3 + $0x1f6] sm:$0xff] }
 0x5cd   : > { %20142 = vmatmul.mubr.msk.f32.gmra.mrb[48].mxu0 %vm333_vm0, %v10040_v25  ;;  %v10048_v25 = vld [vmem:[#allocation3 + $0x1fe] sm:$0xff] }
 0x5ce   : > { %20144 = vmatprep.mubr.msk.f32.mxu0 %vm333_vm0, %v10041_v39  ;;  %v10049_v39 = vld [vmem:[#allocation3 + $0x206] sm:$0xff] }
 0x5d1   : > { %20145 = vmatmul.mubr.msk.f32.gmra.mrb[50].mxu0 %vm333_vm0, %v10042_v5  ;;  %v10050_v5 = vld [vmem:[#allocation3 + $0x20e] sm:$0xff] }
 0x5d2   : > { %20147 = vmatprep.mubr.msk.f32.mxu0 %vm333_vm0, %v10043_v29  ;;  %v10051_v29 = vld [vmem:[#allocation3 + $0x216] sm:$0xff] }
 0x5d5   : > { %20148 = vmatmul.mubr.msk.f32.gmra.mrb[52].mxu0 %vm333_vm0, %v10044_v27  ;;  %v10052_v27 = vld [vmem:[#allocation3 + $0x21e] sm:$0xff] }
 0x5d6   : > { %20150 = vmatprep.mubr.msk.f32.mxu0 %vm333_vm0, %v10045_v46  ;;  %v10053_v46 = vld [vmem:[#allocation3 + $0x226] sm:$0xff] }
 0x5d9   : > { %20151 = vmatmul.mubr.msk.f32.gmra.mrb[54].mxu0 %vm333_vm0, %v10046_v6  ;;  %v10054_v6 = vld [vmem:[#allocation3 + $0x22e] sm:$0xff] }
 0x5da   : > { %20153 = vmatprep.mubr.msk.f32.mxu0 %vm333_vm0, %v10047_v23  ;;  %v10055_v23 = vld [vmem:[#allocation3 + $0x236] sm:$0xff] }
 0x5dd   : > { %20154 = vmatmul.mubr.msk.f32.gmra.mrb[56].mxu0 %vm333_vm0, %v10048_v25  ;;  %v11451_v25 = vld [vmem:[%s27072_s5 + $0x20] sm:$0xff] }
 0x5de   : > { %20156 = vmatprep.mubr.msk.f32.mxu0 %vm333_vm0, %v10049_v39  ;;  %v11452_v39 = vld [vmem:[%s27072_s5 + $0x28] sm:$0xff] }
 0x5e1   : > { %20157 = vmatmul.mubr.msk.f32.gmra.mrb[58].mxu0 %vm333_vm0, %v10050_v5  ;;  %v20947_v5 = vpack.c.bf16 %v11452_v39, %v11451_v25  ;;  %v10059_v25 = vld [vmem:[#allocation3 + $0x256] sm:$0xff]  ;;  %v10061_v39 = vld [vmem:[#allocation3 + $0x266] sm:$0xff] }
 0x5e2   : > { %20159 = vmatprep.mubr.msk.f32.mxu0 %vm333_vm0, %v10051_v29  ;;  %v10056_v29 = vld [vmem:[#allocation3 + $0x23e] sm:$0xff] }
 0x5e3   : > { %20948 = vmatprep.subr.bf16.mxu1 %v20947_v5 }
 0x5e4   : > { %20950 = vmatpush3.bf16.msra.mxu1 %v20947_v5  ;;  %v10062_v5 = vld [vmem:[#allocation3 + $0x26e] sm:$0xff] }
 0x5e5   : > { %20160 = vmatmul.mubr.msk.f32.gmra.mrb[60].mxu0 %vm333_vm0, %v10052_v27  ;;  %v11453_v27 = vld [vmem:[%s27072_s5 + $0x30] sm:$0xff] }
 0x5e6   : > { %20162 = vmatprep.mubr.msk.f32.mxu0 %vm333_vm0, %v10053_v46  ;;  %v11454_v46 = vld [vmem:[%s27072_s5 + $0x38] sm:$0xff] }
 0x5e7   : > { %v20951_v33 = vpack.c.bf16 %v11454_v46, %v11453_v27  ;;  %v10067_v27 = vld [vmem:[#allocation3 + $0x296] sm:$0xff]  ;;  %v10068_v46 = vld [vmem:[#allocation3 + $0x29e] sm:$0xff] }
 0x5e9   : > { %20163 = vmatmul.mubr.msk.f32.gmra.mrb[62].mxu0 %vm333_vm0, %v10054_v6  ;;  %v10058_v6 = vld [vmem:[#allocation3 + $0x24e] sm:$0xff]  ;;  %20952 = vmatprep.subr.bf16.mxu1 %v20951_v33 }
 0x5ea   : > { %20165 = vmatprep.mubr.msk.f32.mxu0 %vm333_vm0, %v10055_v23  ;;  %20954 = vmatpush3.bf16.msra.mxu1 %v20951_v33  ;;  %v10060_v23 = vld [vmem:[#allocation3 + $0x25e] sm:$0xff]  ;;  %v10066_v33 = vld [vmem:[#allocation3 + $0x28e] sm:$0xff] }
 0x5ed   : > { %20166 = vmatmul.mubr.msk.f32.gmra.mrb[64].mxu0 %vm333_vm0, %v10056_v29  ;;  %v10065_v29 = vld [vmem:[#allocation3 + $0x286] sm:$0xff] }
 0x5ee   : > { %20168 = vmatprep.mubr.msk.f32.mxu0 %vm333_vm0, %v10057_v15  ;;  %v10064_v15 = vld [vmem:[#allocation3 + $0x27e] sm:$0xff] }
 0x5f1   : > { %20169 = vmatmul.mubr.msk.f32.gmra.mrb[66].mxu0 %vm333_vm0, %v10058_v6 }
 0x5f2   : > { %20171 = vmatprep.mubr.msk.f32.mxu0 %vm333_vm0, %v10059_v25 }
 0x5f5   : > { %20172 = vmatmul.mubr.msk.f32.gmra.mrb[68].mxu0 %vm333_vm0, %v10060_v23 }
 0x5f6   : > { %20174 = vmatprep.mubr.msk.f32.mxu0 %vm333_vm0, %v10061_v39 }
 0x5f9   : > { %20175 = vmatmul.mubr.msk.f32.gmra.mrb[70].mxu0 %vm333_vm0, %v10062_v5 }
 0x5fa   : > { %20177 = vmatprep.mubr.msk.f32.mxu0 %vm333_vm0, %v10063_v48  ;;  %v25595_v48 = vld [vmem:[%s27071_s4] ss:$0 sm:$0xff] }
 0x5fd   : > { %20178 = vmatmul.mubr.msk.f32.gmra.mrb[72].mxu0 %vm333_vm0, %v10064_v15 }
 0x5fe   : > { %20180 = vmatprep.mubr.msk.f32.mxu0 %vm333_vm0, %v10065_v29 }
 0x601   : > { %20181 = vmatmul.mubr.msk.f32.gmra.mrb[74].mxu0 %vm333_vm0, %v10066_v33 }
 0x602   : > { %20183 = vmatprep.mubr.msk.f32.mxu0 %vm333_vm0, %v10067_v27 }
 0x605   : > { %20184 = vmatmul.mubr.msk.f32.gmra.mrb[76].mxu0 %vm333_vm0, %v10068_v46  ;;  %vm11301_vm0 = vcmask 260096  }
 0x640   : > { %v20071_v6 = vpop.f32.mrb[0].mxu0 }
 0x641   : > { %v21149_v25 = vadd.f32 %v20071_v6, %v25310_v12  ;;  %v10369_v23 = vpop.f32.mrb[1].mxu0  ;;  %v11448_v12 = vld [vmem:[%s27072_s5 + $0x8] sm:$0xff] }
 0x642   : > { %v21150_v39 = vadd.f32 %v10369_v23, %v25313_v18  ;;  %v25611_v6 = vpack.c.bf16 %v11448_v12, %v11447_v54 }
 0x643   : > { %v10844_v5 = vadd.f32 %v21149_v25, %v25595_v48 }
 0x644   : > { %v10843_v15 = vadd.f32 %v21150_v39, %v25595_v48  ;;  %v20074_v29 = vpop.f32.mrb[2].mxu0  ;;  %20956 = vmatprep.subr.bf16.mxu1 %v25611_v6 }
 0x645   : > { %v10922_v33 = vmax.f32 %v10844_v5, 0.0  ;;  %v21151_v27 = vadd.f32 %v20074_v29, %v25316_v49  ;;  %v10379_v46 = vpop.f32.mrb[3].mxu0 }
 0x646   : > { %v10921_v0 = vmax.f32 %v10843_v15, 0.0  ;;  %v21152_v52 = vadd.f32 %v10379_v46, %v25319_v36 }
 0x647   : > { %11000 = vst.msk [vmem:[#allocation4 + $0x8] sm:$0xff] %vm419_vm1, %v10922_v33  ;;  %v10846_v18 = vadd.f32 %v21151_v27, %v25595_v48 }
 0x648   : > { %10999 = vst.msk [vmem:[#allocation4] sm:$0xff] %vm419_vm1, %v10921_v0  ;;  %v10845_v49 = vadd.f32 %v21152_v52, %v25595_v48  ;;  %v20077_v25 = vpop.f32.mrb[4].mxu0 }
 0x649   : > { %v10924_v36 = vmax.f32 %v10846_v18, 0.0  ;;  %v21153_v23 = vadd.f32 %v20077_v25, %v25322_v44  ;;  %v10389_v39 = vpop.f32.mrb[5].mxu0 }
 0x64a   : > { %v10923_v5 = vmax.f32 %v10845_v49, 0.0  ;;  %v21154_v15 = vadd.f32 %v10389_v39, %v25325_v19 }
 0x64b   : > { %11002 = vst.msk [vmem:[#allocation4 + $0x18] sm:$0xff] %vm419_vm1, %v10924_v36  ;;  %v10848_v29 = vadd.f32 %v21153_v23, %v25595_v48 }
 0x64c   : > { %11001 = vst.msk [vmem:[#allocation4 + $0x10] sm:$0xff] %vm419_vm1, %v10923_v5  ;;  %v10847_v54 = vadd.f32 %v21154_v15, %v25595_v48  ;;  %v20080_v0 = vpop.f32.mrb[6].mxu0 }
 0x64d   : > { %v10926_v52 = vmax.f32 %v10848_v29, 0.0  ;;  %v21155_v33 = vadd.f32 %v20080_v0, %v25328_v30  ;;  %v10399_v27 = vpop.f32.mrb[7].mxu0 }
 0x64e   : > { %v10925_v44 = vmax.f32 %v10847_v54, 0.0  ;;  %v21156_v46 = vadd.f32 %v10399_v27, %v25331_v1 }
 0x64f   : > { %11004 = vst.msk [vmem:[#allocation4 + $0x28] sm:$0xff] %vm419_vm1, %v10926_v52  ;;  %v10850_v19 = vadd.f32 %v21155_v33, %v25595_v48 }
 0x650   : > { %11003 = vst.msk [vmem:[#allocation4 + $0x20] sm:$0xff] %vm419_vm1, %v10925_v44  ;;  %v10849_v12 = vadd.f32 %v21156_v46, %v25595_v48  ;;  %v20083_v18 = vpop.f32.mrb[8].mxu0 }
 0x651   : > { %v10928_v49 = vmax.f32 %v10850_v19, 0.0  ;;  %v21157_v25 = vadd.f32 %v20083_v18, %v25334_v17  ;;  %v10409_v36 = vpop.f32.mrb[9].mxu0  ;;  %v11077_v19 = vld [vmem:[#allocation4] ss:$2 sm:$0xff] }
 0x652   : > { %v10927_v23 = vmax.f32 %v10849_v12, 0.0  ;;  %v21158_v30 = vadd.f32 %v10409_v36, %v25337_v32  ;;  %v11155_v12 = vld [vmem:[#allocation4 + $0x1] ss:$2 sm:$0xff] }
 0x653   : > { %v11079_v39 = vld [vmem:[#allocation4 + $0x10] ss:$2 sm:$0xff]  ;;  %v11157_v5 = vld [vmem:[#allocation4 + $0x11] ss:$2 sm:$0xff]  ;;  %11006 = vst.msk [vmem:[#allocation4 + $0x38] sm:$0xff] %vm419_vm1, %v10928_v49  ;;  %v10852_v1 = vadd.f32 %v21157_v25, %v25595_v48 }
 0x654   : > { %11005 = vst.msk [vmem:[#allocation4 + $0x30] sm:$0xff] %vm419_vm1, %v10927_v23  ;;  %v10851_v15 = vadd.f32 %v21158_v30, %v25595_v48  ;;  %v20086_v29 = vpop.f32.mrb[10].mxu0  ;;  %v11233_v17 = vmax.f32 %v11079_v39, %v11157_v5 }
 0x655   : > { %v10930_v54 = vmax.f32 %v10852_v1, 0.0  ;;  %v21159_v0 = vadd.f32 %v20086_v29, %v25340_v31  ;;  %v10419_v52 = vpop.f32.mrb[11].mxu0 }
 0x656   : > { %v10929_v33 = vmax.f32 %v10851_v15, 0.0  ;;  %v21160_v27 = vadd.f32 %v10419_v52, %v25343_v10  ;;  %v11275_v5 = vrot.slane %v11233_v17, 5 }
 0x657   : > { %v11081_v32 = vld [vmem:[#allocation4 + $0x20] ss:$2 sm:$0xff]  ;;  %v11159_v44 = vld [vmem:[#allocation4 + $0x21] ss:$2 sm:$0xff]  ;;  %11008 = vst.msk [vmem:[#allocation4 + $0x48] sm:$0xff] %vm419_vm1, %v10930_v54  ;;  %v10854_v46 = vadd.f32 %v21159_v0, %v25595_v48  ;;  %v11232_v54 = vmax.f32 %v11077_v19, %v11155_v12 }
 0x658   : > { %v11234_v18 = vmax.f32 %v11081_v32, %v11159_v44  ;;  %11007 = vst.msk [vmem:[#allocation4 + $0x40] sm:$0xff] %vm419_vm1, %v10929_v33  ;;  %v10853_v49 = vadd.f32 %v21160_v27, %v25595_v48  ;;  %v20089_v25 = vpop.f32.mrb[12].mxu0 }
 0x659   : > { %v10932_v31 = vmax.f32 %v10854_v46, 0.0  ;;  %v21161_v36 = vadd.f32 %v20089_v25, %v25346_v62  ;;  %v10429_v23 = vpop.f32.mrb[13].mxu0 }
 0x65a   : > { %v11276_v30 = vrot.slane %v11234_v18, 5  ;;  %v10931_v10 = vmax.f32 %v10853_v49, 0.0  ;;  %v21162_v39 = vadd.f32 %v10429_v23, %v25349_v58 }
 0x65b   : > { %v11083_v1 = vld [vmem:[#allocation4 + $0x30] ss:$2 sm:$0xff]  ;;  %v11161_v15 = vld [vmem:[#allocation4 + $0x31] ss:$2 sm:$0xff]  ;;  %11010 = vst.msk [vmem:[#allocation4 + $0x58] sm:$0xff] %vm419_vm1, %v10932_v31  ;;  %v10856_v29 = vadd.f32 %v21161_v36, %v25595_v48 }
 0x65c   : > { %v25644_v0 = vmax.f32 %v11083_v1, %v11161_v15  ;;  %11009 = vst.msk [vmem:[#allocation4 + $0x50] sm:$0xff] %vm419_vm1, %v10931_v10  ;;  %v10855_v52 = vadd.f32 %v21162_v39, %v25595_v48  ;;  %v20092_v62 = vpop.f32.mrb[14].mxu0  ;;  %v11277_v33 = vsel %vm1737_vm6, %v11275_v5, %v11276_v30 }
 0x65d   : > { %v10934_v27 = vmax.f32 %v10856_v29, 0.0  ;;  %v21163_v58 = vadd.f32 %v20092_v62, %v25352_v63  ;;  %v10439_v32 = vpop.f32.mrb[15].mxu0  ;;  %v11282_v44 = vmax.f32 %v11232_v54, %v11277_v33 }
 0x65e   : > { %v11278_v46 = vrot.slane %v25644_v0, 5  ;;  %v10933_v18 = vmax.f32 %v10855_v52, 0.0  ;;  %v21164_v49 = vadd.f32 %v10439_v32, %v25355_v24 }
 0x65f   : > { %v11085_v19 = vld [vmem:[#allocation4 + $0x40] ss:$2 sm:$0xff]  ;;  %v11163_v12 = vld [vmem:[#allocation4 + $0x41] ss:$2 sm:$0xff]  ;;  %11012 = vst.msk [vmem:[#allocation4 + $0x68] sm:$0xff] %vm419_vm1, %v10934_v27  ;;  %v10858_v25 = vadd.f32 %v21163_v58, %v25595_v48  ;;  %11284 = vst.msk [vmem:[#allocation5] sm:$0xff] %vm419_vm1, %v11282_v44 }
 0x660   : > { %11011 = vst.msk [vmem:[#allocation4 + $0x60] sm:$0xff] %vm419_vm1, %v10933_v18  ;;  %v10857_v31 = vadd.f32 %v21164_v49, %v25595_v48  ;;  %v20095_v63 = vpop.f32.mrb[16].mxu0  ;;  %v11279_v36 = vsel %vm1737_vm6, %v11276_v30, %v11278_v46  ;;  %v11236_v5 = vmax.f32 %v11085_v19, %v11163_v12 }
 0x661   : > { %v10936_v23 = vmax.f32 %v10858_v25, 0.0  ;;  %v21165_v10 = vadd.f32 %v20095_v63, %v25358_v45  ;;  %v10449_v24 = vpop.f32.mrb[17].mxu0  ;;  %v11283_v39 = vmax.f32 %v11233_v17, %v11279_v36 }
 0x662   : > { %v10935_v1 = vmax.f32 %v10857_v31, 0.0  ;;  %v21166_v15 = vadd.f32 %v10449_v24, %v25361_v47  ;;  %v11290_v58 = vrot.slane %v11236_v5, 5 }
 0x663   : > { %v11087_v29 = vld [vmem:[#allocation4 + $0x50] ss:$2 sm:$0xff]  ;;  %v11165_v54 = vld [vmem:[#allocation4 + $0x51] ss:$2 sm:$0xff]  ;;  %11014 = vst.msk [vmem:[#allocation4 + $0x78] sm:$0xff] %vm419_vm1, %v10936_v23  ;;  %v10860_v52 = vadd.f32 %v21165_v10, %v25595_v48 }
 0x664   : > { %11286 = vst.msk [vmem:[#allocation5 + $0x8] sm:$0x1f] %vm11285_vm14, %v11283_v39  ;;  %v11237_v62 = vmax.f32 %v11087_v29, %v11165_v54  ;;  %v10859_v30 = vadd.f32 %v21166_v15, %v25595_v48  ;;  %v20098_v45 = vpop.f32.mrb[18].mxu0 }
 0x665   : > { %11013 = vst.msk [vmem:[#allocation4 + $0x70] sm:$0xff] %vm419_vm1, %v10935_v1  ;;  %v10938_v33 = vmax.f32 %v10860_v52, 0.0  ;;  %v21167_v17 = vadd.f32 %v20098_v45, %v25364_v41  ;;  %v10459_v27 = vpop.f32.mrb[19].mxu0  ;;  %v11449_v45 = vld [vmem:[%s27072_s5 + $0x10] sm:$0xff] }
 0x666   : > { %v11291_v47 = vrot.slane %v11237_v62, 5  ;;  %v10937_v32 = vmax.f32 %v10859_v30, 0.0  ;;  %v21168_v44 = vadd.f32 %v10459_v27, %v25367_v40 }
 0x667   : > { %v11089_v46 = vld [vmem:[#allocation4 + $0x60] ss:$2 sm:$0xff]  ;;  %v11167_v18 = vld [vmem:[#allocation4 + $0x61] ss:$2 sm:$0xff]  ;;  %11016 = vst.msk [vmem:[#allocation4 + $0x88] sm:$0xff] %vm419_vm1, %v10938_v33  ;;  %v10862_v49 = vadd.f32 %v21167_v17, %v25595_v48  ;;  %v11450_v33 = vld [vmem:[%s27072_s5 + $0x18] sm:$0xff] }
 0x668   : > { %v11292_v19 = vsel %vm1737_vm6, %v11290_v58, %v11291_v47  ;;  %v11238_v12 = vmax.f32 %v11089_v46, %v11167_v18  ;;  %11015 = vst.msk [vmem:[#allocation4 + $0x80] sm:$0xff] %vm419_vm1, %v10937_v32  ;;  %v10861_v25 = vadd.f32 %v21168_v44, %v25595_v48  ;;  %v20101_v41 = vpop.f32.mrb[20].mxu0  ;;  %v20959_v46 = vpack.c.bf16 %v11450_v33, %v11449_v45 }
 0x669   : > { %v10940_v31 = vmax.f32 %v10862_v49, 0.0  ;;  %v21169_v63 = vadd.f32 %v20101_v41, %v25370_v4  ;;  %v10469_v36 = vpop.f32.mrb[21].mxu0  ;;  %v11297_v40 = vmax.f32 %v25644_v0, %v11292_v19  ;;  %v11455_v41 = vld [vmem:[%s27072_s5 + $0x40] sm:$0xff] }
 0x66a   : > { %v11293_v23 = vrot.slane %v11238_v12, 5  ;;  %v10939_v10 = vmax.f32 %v10861_v25, 0.0  ;;  %v21170_v24 = vadd.f32 %v10469_v36, %v25373_v59 }
 0x66b   : > { %v11561_v39 = vld [vmem:[#allocation5 + $0x1] sm:$0xff]  ;;  %11018 = vst.msk [vmem:[#allocation4 + $0x98] sm:$0xff] %vm419_vm1, %v10940_v31  ;;  %v10864_v1 = vadd.f32 %v21169_v63, %v25595_v48  ;;  %v11456_v31 = vld [vmem:[%s27072_s5 + $0x48] sm:$0xff] }
 0x66c   : > { %20194 = vmatprep.mubr.msk.f32.mxu1 %vm419_vm1, %v11561_v39  ;;  %11300 = vst.msk [vmem:[#allocation5 + $0xc] sm:$0xfc] %vm11299_vm15, %v11297_v40  ;;  %v10863_v4 = vadd.f32 %v21170_v24, %v25595_v48  ;;  %v20104_v15 = vpop.f32.mrb[22].mxu0  ;;  %v11294_v0 = vsel %vm1737_vm6, %v11291_v47, %v11293_v23  ;;  %v11169_v40 = vld [vmem:[#allocation4 + $0x71] ss:$2 sm:$0xff] }
 0x66d   : > { %11017 = vst.msk [vmem:[#allocation4 + $0x90] sm:$0xff] %vm419_vm1, %v10939_v10  ;;  %v10942_v29 = vmax.f32 %v10864_v1, 0.0  ;;  %v21171_v59 = vadd.f32 %v20104_v15, %v25376_v16  ;;  %v10479_v54 = vpop.f32.mrb[23].mxu0  ;;  %v11298_v52 = vmax.f32 %v11236_v5, %v11294_v0  ;;  %v25710_v0 = vpack.c.bf16 %v11456_v31, %v11455_v41 }
 0x66e   : > { %v10941_v62 = vmax.f32 %v10863_v4, 0.0  ;;  %v21172_v30 = vadd.f32 %v10479_v54, %v25379_v42 }
 0x66f   : > { %v11093_v17 = vld [vmem:[#allocation4 + $0x80] ss:$2 sm:$0xff]  ;;  %v11171_v27 = vld [vmem:[#allocation4 + $0x81] ss:$2 sm:$0xff]  ;;  %11020 = vst.msk [vmem:[#allocation4 + $0xa8] sm:$0xff] %vm419_vm1, %v10942_v29  ;;  %v10866_v58 = vadd.f32 %v21171_v59, %v25595_v48 }
 0x670   : > { %11302 = vst.msk [vmem:[#allocation5 + $0x14] sm:$0x7f] %vm11301_vm0, %v11298_v52  ;;  %v11240_v16 = vmax.f32 %v11093_v17, %v11171_v27  ;;  %v10865_v42 = vadd.f32 %v21172_v30, %v25595_v48  ;;  %v20107_v5 = vpop.f32.mrb[24].mxu0 }
 0x671   : > { %11019 = vst.msk [vmem:[#allocation4 + $0xa0] sm:$0xff] %vm419_vm1, %v10941_v62  ;;  %v10944_v47 = vmax.f32 %v10866_v58, 0.0  ;;  %v21173_v32 = vadd.f32 %v20107_v5, %v25382_v56  ;;  %v10489_v44 = vpop.f32.mrb[25].mxu0 }
 0x672   : > { %v10943_v18 = vmax.f32 %v10865_v42, 0.0  ;;  %v21174_v49 = vadd.f32 %v10489_v44, %v25385_v20  ;;  %v11305_v25 = vrot.slane %v11240_v16, 5  ;;  %v11091_v20 = vld [vmem:[#allocation4 + $0x70] ss:$2 sm:$0xff] }
 0x673   : > { %v11562_v19 = vld [vmem:[#allocation5 + $0x9] sm:$0xff]  ;;  %11022 = vst.msk [vmem:[#allocation4 + $0xb8] sm:$0xff] %vm419_vm1, %v10944_v47  ;;  %v10868_v56 = vadd.f32 %v21173_v32, %v25595_v48 }
 0x674   : > { %v11095_v63 = vld [vmem:[#allocation4 + $0x90] ss:$2 sm:$0xff]  ;;  %v11173_v36 = vld [vmem:[#allocation4 + $0x91] ss:$2 sm:$0xff]  ;;  %20195 = vmatmul.mubr.msk.f32.vlgmr.msra.gmra.mrb[78].mxu1 %vm419_vm1, %v11562_v19  ;;  %11021 = vst.msk [vmem:[#allocation4 + $0xb0] sm:$0xff] %vm419_vm1, %v10943_v18  ;;  %v10867_v10 = vadd.f32 %v21174_v49, %v25595_v48  ;;  %v20110_v24 = vpop.f32.mrb[26].mxu0  ;;  %v11311_v39 = vmax.f32 %v11238_v12, %v11305_v25 }
 0x675   : > { %v11241_v23 = vmax.f32 %v11095_v63, %v11173_v36  ;;  %20958 = vmatpush3.bf16.msra.mxu1 %v25611_v6  ;;  %v10946_v1 = vmax.f32 %v10868_v56, 0.0  ;;  %v21175_v4 = vadd.f32 %v20110_v24, %v25388_v43  ;;  %v10499_v15 = vpop.f32.mrb[27].mxu0  ;;  %v11239_v6 = vmax.f32 %v11091_v20, %v11169_v40 }
 0x676   : > { %20960 = vmatprep.subr.bf16.mxu1 %v20959_v46  ;;  %v10945_v29 = vmax.f32 %v10867_v10, 0.0  ;;  %v21176_v59 = vadd.f32 %v10499_v15, %v25391_v37  ;;  %11315 = vst.msk [vmem:[#allocation5 + $0x18] sm:$0xf0] %vm11314_vm2, %v11311_v39 }
 0x677   : > { %v11563_v54 = vld [vmem:[#allocation5 + $0x11] sm:$0xff]  ;;  %v11306_v52 = vrot.slane %v11241_v23, 5  ;;  %11024 = vst.msk [vmem:[#allocation4 + $0xc8] sm:$0xff] %vm419_vm1, %v10946_v1  ;;  %v10870_v12 = vadd.f32 %v21175_v4, %v25595_v48 }
 0x678   : > { %20197 = vmatprep.mubr.msk.f32.mxu1 %vm419_vm1, %v11563_v54  ;;  %11023 = vst.msk [vmem:[#allocation4 + $0xc0] sm:$0xff] %vm419_vm1, %v10945_v29  ;;  %v10869_v43 = vadd.f32 %v21176_v59, %v25595_v48  ;;  %v20113_v62 = vpop.f32.mrb[28].mxu0  ;;  %v11097_v36 = vld [vmem:[#allocation4 + $0xa0] ss:$2 sm:$0xff]  ;;  %v11175_v56 = vld [vmem:[#allocation4 + $0xa1] ss:$2 sm:$0xff] }
 0x679   : > { %v11307_v30 = vsel %vm1737_vm6, %v11305_v25, %v11306_v52  ;;  %v11313_v37 = vmax.f32 %v11240_v16, %v11306_v52  ;;  %20962 = vmatpush3.bf16.msra.mxu1 %v20959_v46  ;;  %v10948_v45 = vmax.f32 %v10870_v12, 0.0  ;;  %v21177_v33 = vadd.f32 %v20113_v62, %v25394_v8  ;;  %v10509_v17 = vpop.f32.mrb[29].mxu0 }
 0x67a   : > { %v11312_v27 = vmax.f32 %v11239_v6, %v11307_v30  ;;  %20964 = vmatprep.subr.bf16.mxu1 %v25710_v0  ;;  %v10947_v58 = vmax.f32 %v10869_v43, 0.0  ;;  %v21178_v42 = vadd.f32 %v10509_v17, %v25397_v14  ;;  %v11242_v52 = vmax.f32 %v11097_v36, %v11175_v56 }
 0x67b   : > { %11318 = vst.msk [vmem:[#allocation5 + $0x28] sm:$0x1] %vm11317_vm3, %v11313_v37  ;;  %v11099_v5 = vld [vmem:[#allocation4 + $0xb0] ss:$2 sm:$0xff]  ;;  %v11177_v47 = vld [vmem:[#allocation4 + $0xb1] ss:$2 sm:$0xff]  ;;  %v10872_v32 = vadd.f32 %v21177_v33, %v25595_v48 }
 0x67c   : > { %11026 = vst.msk [vmem:[#allocation4 + $0xd8] sm:$0xff] %vm419_vm1, %v10948_v45  ;;  %11316 = vst.msk [vmem:[#allocation5 + $0x20] sm:$0xff] %vm419_vm1, %v11312_v27  ;;  %v11243_v16 = vmax.f32 %v11099_v5, %v11177_v47  ;;  %v10871_v8 = vadd.f32 %v21178_v42, %v25595_v48  ;;  %v20116_v44 = vpop.f32.mrb[30].mxu0 }
 0x67d   : > { %11025 = vst.msk [vmem:[#allocation4 + $0xd0] sm:$0xff] %vm419_vm1, %v10947_v58  ;;  %v10950_v46 = vmax.f32 %v10872_v32, 0.0  ;;  %v21179_v18 = vadd.f32 %v20116_v44, %v25400_v60  ;;  %v10519_v14 = vpop.f32.mrb[31].mxu0 }
 0x67e   : > { %v10949_v49 = vmax.f32 %v10871_v8, 0.0  ;;  %v21180_v19 = vadd.f32 %v10519_v14, %v25403_v51  ;;  %v11321_v25 = vrot.slane %v11243_v16, 5 }
 0x67f   : > { %v11101_v41 = vld [vmem:[#allocation4 + $0xc0] ss:$2 sm:$0xff]  ;;  %v11179_v31 = vld [vmem:[#allocation4 + $0xc1] ss:$2 sm:$0xff]  ;;  %11028 = vst.msk [vmem:[#allocation4 + $0xe8] sm:$0xff] %vm419_vm1, %v10950_v46  ;;  %v10874_v63 = vadd.f32 %v21179_v18, %v25595_v48 }
 0x680   : > { %v11244_v20 = vmax.f32 %v11101_v41, %v11179_v31  ;;  %11027 = vst.msk [vmem:[#allocation4 + $0xe0] sm:$0xff] %vm419_vm1, %v10949_v49  ;;  %v10873_v40 = vadd.f32 %v21180_v19, %v25595_v48  ;;  %v20119_v60 = vpop.f32.mrb[32].mxu0  ;;  %v11327_v10 = vmax.f32 %v11241_v23, %v11321_v25 }
 0x681   : > { %v10952_v24 = vmax.f32 %v10874_v63, 0.0  ;;  %v21181_v51 = vadd.f32 %v20119_v60, %v25406_v34  ;;  %v10529_v39 = vpop.f32.mrb[33].mxu0 }
 0x682   : > { %v11322_v1 = vrot.slane %v11244_v20, 5  ;;  %v10951_v4 = vmax.f32 %v10873_v40, 0.0  ;;  %v21182_v15 = vadd.f32 %v10529_v39, %v25409_v57  ;;  %11331 = vst.msk [vmem:[#allocation5 + $0x24] sm:$0xc0] %vm11330_vm4, %v11327_v10 }
 0x683   : > { %v11564_v29 = vld [vmem:[#allocation5 + $0x19] sm:$0xff]  ;;  %v11565_v59 = vld [vmem:[#allocation5 + $0x21] sm:$0xff]  ;;  %11030 = vst.msk [vmem:[#allocation4 + $0xf8] sm:$0xff] %vm419_vm1, %v10952_v24  ;;  %v10876_v54 = vadd.f32 %v21181_v51, %v25595_v48 }
 0x684   : > { %20198 = vmatmul.mubr.msk.f32.gmra.mrb[80].mxu1 %vm419_vm1, %v11564_v29  ;;  %11029 = vst.msk [vmem:[#allocation4 + $0xf0] sm:$0xff] %vm419_vm1, %v10951_v4  ;;  %v10875_v34 = vadd.f32 %v21182_v15, %v25595_v48  ;;  %v20122_v23 = vpop.f32.mrb[34].mxu0  ;;  %v11323_v57 = vsel %vm1737_vm6, %v11321_v25, %v11322_v1  ;;  %v11329_v12 = vmax.f32 %v11243_v16, %v11322_v1  ;;  %v11103_v18 = vld [vmem:[#allocation4 + $0xd0] ss:$2 sm:$0xff]  ;;  %v11181_v14 = vld [vmem:[#allocation4 + $0xd1] ss:$2 sm:$0xff] }
 0x685   : > { %20200 = vmatprep.mubr.msk.f32.mxu1 %vm419_vm1, %v11565_v59  ;;  %v10954_v6 = vmax.f32 %v10876_v54, 0.0  ;;  %v21183_v43 = vadd.f32 %v20122_v23, %v25412_v61  ;;  %v10539_v62 = vpop.f32.mrb[35].mxu0  ;;  %v11328_v30 = vmax.f32 %v11242_v52, %v11323_v57  ;;  %v11245_v24 = vmax.f32 %v11103_v18, %v11181_v14 }
 0x686   : > { %v10953_v37 = vmax.f32 %v10875_v34, 0.0  ;;  %v21184_v45 = vadd.f32 %v10539_v62, %v25415_v35  ;;  %11334 = vst.msk [vmem:[#allocation5 + $0x34] sm:$0x7] %vm11333_vm8, %v11329_v12 }
 0x687   : > { %v11105_v33 = vld [vmem:[#allocation4 + $0xe0] ss:$2 sm:$0xff]  ;;  %v11183_v17 = vld [vmem:[#allocation4 + $0xe1] ss:$2 sm:$0xff]  ;;  %11032 = vst.msk [vmem:[#allocation4 + $0x108] sm:$0xff] %vm419_vm1, %v10954_v6  ;;  %v10878_v27 = vadd.f32 %v21183_v43, %v25595_v48  ;;  %11332 = vst.msk [vmem:[#allocation5 + $0x2c] sm:$0xff] %vm419_vm1, %v11328_v30 }
 0x688   : > { %11031 = vst.msk [vmem:[#allocation4 + $0x100] sm:$0xff] %vm419_vm1, %v10953_v37  ;;  %v10877_v58 = vadd.f32 %v21184_v45, %v25595_v48  ;;  %v20125_v61 = vpop.f32.mrb[36].mxu0  ;;  %v11246_v35 = vmax.f32 %v11105_v33, %v11183_v17 }
 0x689   : > { %v10956_v42 = vmax.f32 %v10878_v27, 0.0  ;;  %v21185_v5 = vadd.f32 %v20125_v61, %v25418_v9  ;;  %v10549_v47 = vpop.f32.mrb[37].mxu0 }
 0x68a   : > { %v10955_v32 = vmax.f32 %v10877_v58, 0.0  ;;  %v21186_v16 = vadd.f32 %v10549_v47, %v25421_v11  ;;  %v11338_v20 = vrot.slane %v11246_v35, 5 }
 0x68b   : > { %v11107_v8 = vld [vmem:[#allocation4 + $0xf0] ss:$2 sm:$0xff]  ;;  %v11185_v44 = vld [vmem:[#allocation4 + $0xf1] ss:$2 sm:$0xff]  ;;  %11034 = vst.msk [vmem:[#allocation4 + $0x118] sm:$0xff] %vm419_vm1, %v10956_v42  ;;  %v10880_v46 = vadd.f32 %v21185_v5, %v25595_v48 }
 0x68c   : > { %v11247_v49 = vmax.f32 %v11107_v8, %v11185_v44  ;;  %11033 = vst.msk [vmem:[#allocation4 + $0x110] sm:$0xff] %vm419_vm1, %v10955_v32  ;;  %v10879_v19 = vadd.f32 %v21186_v16, %v25595_v48  ;;  %v20128_v25 = vpop.f32.mrb[38].mxu0 }
 0x68d   : > { %v10958_v9 = vmax.f32 %v10880_v46, 0.0  ;;  %v21187_v41 = vadd.f32 %v20128_v25, %v25424_v21  ;;  %v10559_v31 = vpop.f32.mrb[39].mxu0 }
 0x68e   : > { %v11339_v63 = vrot.slane %v11247_v49, 5  ;;  %v10957_v11 = vmax.f32 %v10879_v19, 0.0  ;;  %v21188_v36 = vadd.f32 %v10559_v31, %v25427_v28  ;;  %v11566_v56 = vld [vmem:[#allocation5 + $0x29] sm:$0xff] }
 0x68f   : > { %v11109_v40 = vld [vmem:[#allocation4 + $0x100] ss:$2 sm:$0xff]  ;;  %v11187_v60 = vld [vmem:[#allocation4 + $0x101] ss:$2 sm:$0xff]  ;;  %11036 = vst.msk [vmem:[#allocation4 + $0x128] sm:$0xff] %vm419_vm1, %v10958_v9  ;;  %v10882_v10 = vadd.f32 %v21187_v41, %v25595_v48  ;;  %20201 = vmatmul.mubr.msk.f32.gmra.mrb[82].mxu1 %vm419_vm1, %v11566_v56 }
 0x690   : > { %v25764_v51 = vmax.f32 %v11109_v40, %v11187_v60  ;;  %11035 = vst.msk [vmem:[#allocation4 + $0x120] sm:$0xff] %vm419_vm1, %v10957_v11  ;;  %v10881_v21 = vadd.f32 %v21188_v36, %v25595_v48  ;;  %v20131_v39 = vpop.f32.mrb[40].mxu0  ;;  %v11340_v28 = vsel %vm1737_vm6, %v11338_v20, %v11339_v63 }
 0x691   : > { %v10960_v1 = vmax.f32 %v10882_v10, 0.0  ;;  %v21189_v4 = vadd.f32 %v20131_v39, %v25430_v53  ;;  %v10569_v15 = vpop.f32.mrb[41].mxu0  ;;  %v11345_v29 = vmax.f32 %v11245_v24, %v11340_v28 }
 0x692   : > { %v11341_v59 = vrot.slane %v25764_v51, 5  ;;  %v10959_v54 = vmax.f32 %v10881_v21, 0.0  ;;  %v21190_v52 = vadd.f32 %v10569_v15, %v25433_v13 }
 0x693   : > { %v11111_v34 = vld [vmem:[#allocation4 + $0x110] ss:$2 sm:$0xff]  ;;  %v11189_v23 = vld [vmem:[#allocation4 + $0x111] ss:$2 sm:$0xff]  ;;  %11038 = vst.msk [vmem:[#allocation4 + $0x138] sm:$0xff] %vm419_vm1, %v10960_v1  ;;  %v10884_v57 = vadd.f32 %v21189_v4, %v25595_v48  ;;  %11347 = vst.msk [vmem:[#allocation5 + $0x38] sm:$0xff] %vm419_vm1, %v11345_v29 }
 0x694   : > { %11037 = vst.msk [vmem:[#allocation4 + $0x130] sm:$0xff] %vm419_vm1, %v10959_v54  ;;  %v10883_v12 = vadd.f32 %v21190_v52, %v25595_v48  ;;  %v20134_v53 = vpop.f32.mrb[42].mxu0  ;;  %v11342_v6 = vsel %vm1737_vm6, %v11339_v63, %v11341_v59  ;;  %v11249_v37 = vmax.f32 %v11111_v34, %v11189_v23  ;;  %v27427_v54 = vld [vmem:[#allocation8_spill] sm:$0xff] }
 0x695   : > { %v10962_v43 = vmax.f32 %v10884_v57, 0.0  ;;  %v21191_v62 = vadd.f32 %v20134_v53, %v25436_v26  ;;  %v10579_v30 = vpop.f32.mrb[43].mxu0  ;;  %v11346_v13 = vmax.f32 %v11246_v35, %v11342_v6 }
 0x696   : > { %v10961_v45 = vmax.f32 %v10883_v12, 0.0  ;;  %v21192_v33 = vadd.f32 %v10579_v30, %v25439_v38  ;;  %v11352_v32 = vrot.slane %v11249_v37, 5 }
 0x697   : > { %v11113_v17 = vld [vmem:[#allocation4 + $0x120] ss:$2 sm:$0xff]  ;;  %v11191_v27 = vld [vmem:[#allocation4 + $0x121] ss:$2 sm:$0xff]  ;;  %11040 = vst.msk [vmem:[#allocation4 + $0x148] sm:$0xff] %vm419_vm1, %v10962_v43  ;;  %v10886_v58 = vadd.f32 %v21191_v62, %v25595_v48 }
 0x698   : > { %11348 = vst.msk [vmem:[#allocation5 + $0x40] sm:$0x1f] %vm11285_vm14, %v11346_v13  ;;  %v11250_v61 = vmax.f32 %v11113_v17, %v11191_v27  ;;  %v10885_v42 = vadd.f32 %v21192_v33, %v25595_v48  ;;  %v20137_v26 = vpop.f32.mrb[44].mxu0 }
 0x699   : > { %11039 = vst.msk [vmem:[#allocation4 + $0x140] sm:$0xff] %vm419_vm1, %v10961_v45  ;;  %v10964_v5 = vmax.f32 %v10886_v58, 0.0  ;;  %v21193_v47 = vadd.f32 %v20137_v26, %v25442_v55  ;;  %v10589_v35 = vpop.f32.mrb[45].mxu0  ;;  %v27429_v58 = vld [vmem:[#allocation34_spill] sm:$0xff] }
 0x69a   : > { %v11353_v38 = vrot.slane %v11250_v61, 5  ;;  %v10963_v16 = vmax.f32 %v10885_v42, 0.0  ;;  %v21194_v8 = vadd.f32 %v10589_v35, %v25445_v3  ;;  %v11567_v44 = vld [vmem:[#allocation5 + $0x31] sm:$0xff] }
 0x69b   : > { %v11115_v46 = vld [vmem:[#allocation4 + $0x130] ss:$2 sm:$0xff]  ;;  %v11193_v18 = vld [vmem:[#allocation4 + $0x131] ss:$2 sm:$0xff]  ;;  %11042 = vst.msk [vmem:[#allocation4 + $0x158] sm:$0xff] %vm419_vm1, %v10964_v5  ;;  %v10888_v14 = vadd.f32 %v21193_v47, %v25595_v48  ;;  %20203 = vmatprep.mubr.msk.f32.mxu1 %vm419_vm1, %v11567_v44 }
 0x69c   : > { %v11251_v49 = vmax.f32 %v11115_v46, %v11193_v18  ;;  %11041 = vst.msk [vmem:[#allocation4 + $0x150] sm:$0xff] %vm419_vm1, %v10963_v16  ;;  %v10887_v55 = vadd.f32 %v21194_v8, %v25595_v48  ;;  %v20140_v19 = vpop.f32.mrb[46].mxu0  ;;  %v11354_v25 = vsel %vm1737_vm6, %v11352_v32, %v11353_v38  ;;  %v27430_v5 = vld [vmem:[#allocation35_spill] sm:$0xff] }
 0x69d   : > { %v10966_v9 = vmax.f32 %v10888_v14, 0.0  ;;  %v21195_v3 = vadd.f32 %v20140_v19, %v25448_v7  ;;  %v10599_v41 = vpop.f32.mrb[47].mxu0  ;;  %v11359_v31 = vmax.f32 %v25764_v51, %v11354_v25 }
 0x69e   : > { %v11355_v63 = vrot.slane %v11251_v49, 5  ;;  %v10965_v11 = vmax.f32 %v10887_v55, 0.0  ;;  %v21196_v36 = vadd.f32 %v10599_v41, %v25451_v2 }
 0x69f   : > { %v11568_v56 = vld [vmem:[#allocation5 + $0x39] sm:$0xff]  ;;  %11044 = vst.msk [vmem:[#allocation4 + $0x168] sm:$0xff] %vm419_vm1, %v10966_v9  ;;  %v10890_v20 = vadd.f32 %v21195_v3, %v25595_v48  ;;  %v27432_v3 = vld [vmem:[#allocation37_spill] sm:$0xff] }
 0x6a0   : > { %20204 = vmatmul.mubr.msk.f32.gmra.mrb[84].mxu1 %vm419_vm1, %v11568_v56  ;;  %11361 = vst.msk [vmem:[#allocation5 + $0x44] sm:$0xfc] %vm11299_vm15, %v11359_v31  ;;  %v10889_v7 = vadd.f32 %v21196_v36, %v25595_v48  ;;  %v20143_v40 = vpop.f32.mrb[48].mxu0  ;;  %v11356_v60 = vsel %vm1737_vm6, %v11353_v38, %v11355_v63  ;;  %v11117_v30 = vld [vmem:[#allocation4 + $0x140] ss:$2 sm:$0xff] }
 0x6a1   : > { %11043 = vst.msk [vmem:[#allocation4 + $0x160] sm:$0xff] %vm419_vm1, %v10965_v11  ;;  %v10968_v10 = vmax.f32 %v10890_v20, 0.0  ;;  %v21197_v24 = vadd.f32 %v20143_v40, %v25454_v22  ;;  %v10609_v2 = vpop.f32.mrb[49].mxu0  ;;  %v11360_v51 = vmax.f32 %v11249_v37, %v11356_v60  ;;  %v11195_v13 = vld [vmem:[#allocation4 + $0x141] ss:$2 sm:$0xff] }
 0x6a2   : > { %v10967_v21 = vmax.f32 %v10889_v7, 0.0  ;;  %v21198_v39 = vadd.f32 %v10609_v2, %v25457_v50  ;;  %v27428_v50 = vld [vmem:[#allocation33_spill] sm:$0xff]  ;;  %v11252_v16 = vmax.f32 %v11117_v30, %v11195_v13  ;;  %v27433_v40 = vld [vmem:[#allocation38_spill] sm:$0xff]  ;;  %v27434_v2 = vld [vmem:[#allocation39_spill] sm:$0xff] }
 0x6a3   : > { %v11119_v28 = vld [vmem:[#allocation4 + $0x150] ss:$2 sm:$0xff]  ;;  %v11197_v1 = vld [vmem:[#allocation4 + $0x151] ss:$2 sm:$0xff]  ;;  %11046 = vst.msk [vmem:[#allocation4 + $0x178] sm:$0xff] %vm419_vm1, %v10968_v10  ;;  %v10892_v4 = vadd.f32 %v21197_v24, %v25595_v48 }
 0x6a4   : > { %11362 = vst.msk [vmem:[#allocation5 + $0x4c] sm:$0x7f] %vm11301_vm0, %v11360_v51  ;;  %v11253_v15 = vmax.f32 %v11119_v28, %v11197_v1  ;;  %v10891_v29 = vadd.f32 %v21198_v39, %v25595_v48  ;;  %v20146_v59 = vpop.f32.mrb[50].mxu0 }
 0x6a5   : > { %11045 = vst.msk [vmem:[#allocation4 + $0x170] sm:$0xff] %vm419_vm1, %v10967_v21  ;;  %v10970_v22 = vmax.f32 %v10892_v4, 0.0  ;;  %v21199_v52 = vadd.f32 %v20146_v59, %v27427_v54  ;;  %v10619_v34 = vpop.f32.mrb[51].mxu0 }
 0x6a6   : > { %v10969_v23 = vmax.f32 %v10891_v29, 0.0  ;;  %v21200_v57 = vadd.f32 %v10619_v34, %v27428_v50  ;;  %v11365_v53 = vrot.slane %v11253_v15, 5  ;;  %v27435_v34 = vld [vmem:[#allocation40_spill] sm:$0xff] }
 0x6a7   : > { %v11569_v12 = vld [vmem:[#allocation5 + $0x41] sm:$0xff]  ;;  %11048 = vst.msk [vmem:[#allocation4 + $0x188] sm:$0xff] %vm419_vm1, %v10970_v22  ;;  %v10894_v62 = vadd.f32 %v21199_v52, %v25595_v48 }
 0x6a8   : > { %v11121_v6 = vld [vmem:[#allocation4 + $0x160] ss:$2 sm:$0xff]  ;;  %v11199_v43 = vld [vmem:[#allocation4 + $0x161] ss:$2 sm:$0xff]  ;;  %20206 = vmatprep.mubr.msk.f32.mxu1 %vm419_vm1, %v11569_v12  ;;  %11047 = vst.msk [vmem:[#allocation4 + $0x180] sm:$0xff] %vm419_vm1, %v10969_v23  ;;  %v10893_v45 = vadd.f32 %v21200_v57, %v25595_v48  ;;  %v20149_v33 = vpop.f32.mrb[52].mxu0  ;;  %v11371_v17 = vmax.f32 %v11251_v49, %v11365_v53 }
 0x6a9   : > { %v11254_v37 = vmax.f32 %v11121_v6, %v11199_v43  ;;  %v10972_v27 = vmax.f32 %v10894_v62, 0.0  ;;  %v21201_v61 = vadd.f32 %v20149_v33, %v27429_v58  ;;  %v10629_v42 = vpop.f32.mrb[53].mxu0  ;;  %v27431_v49 = vld [vmem:[#allocation36_spill] sm:$0xff]  ;;  %v27437_v58 = vld [vmem:[#allocation42_spill] sm:$0xff] }
 0x6aa   : > { %v10971_v26 = vmax.f32 %v10893_v45, 0.0  ;;  %v21202_v47 = vadd.f32 %v10629_v42, %v27430_v5  ;;  %11374 = vst.msk [vmem:[#allocation5 + $0x50] sm:$0xf0] %vm11314_vm2, %v11371_v17 }
 0x6ab   : > { %v11570_v35 = vld [vmem:[#allocation5 + $0x49] sm:$0xff]  ;;  %v11366_v32 = vrot.slane %v11254_v37, 5  ;;  %11050 = vst.msk [vmem:[#allocation4 + $0x198] sm:$0xff] %vm419_vm1, %v10972_v27  ;;  %v10896_v38 = vadd.f32 %v21201_v61, %v25595_v48 }
 0x6ac   : > { %20207 = vmatmul.mubr.msk.f32.gmra.mrb[86].mxu1 %vm419_vm1, %v11570_v35  ;;  %11049 = vst.msk [vmem:[#allocation4 + $0x190] sm:$0xff] %vm419_vm1, %v10971_v26  ;;  %v10895_v8 = vadd.f32 %v21202_v47, %v25595_v48  ;;  %v20152_v44 = vpop.f32.mrb[54].mxu0  ;;  %v11123_v4 = vld [vmem:[#allocation4 + $0x170] ss:$2 sm:$0xff] }
 0x6ad   : > { %v11367_v46 = vsel %vm1737_vm6, %v11365_v53, %v11366_v32  ;;  %v11373_v18 = vmax.f32 %v11253_v15, %v11366_v32  ;;  %v10974_v14 = vmax.f32 %v10896_v38, 0.0  ;;  %v21203_v55 = vadd.f32 %v20152_v44, %v27431_v49  ;;  %v10639_v19 = vpop.f32.mrb[55].mxu0  ;;  %v11201_v15 = vld [vmem:[#allocation4 + $0x171] ss:$2 sm:$0xff]  ;;  %v27438_v47 = vld [vmem:[#allocation43_spill] sm:$0xff] }
 0x6ae   : > { %v11372_v25 = vmax.f32 %v11252_v16, %v11367_v46  ;;  %v10973_v9 = vmax.f32 %v10895_v8, 0.0  ;;  %v21204_v41 = vadd.f32 %v10639_v19, %v27432_v3  ;;  %v27436_v53 = vld [vmem:[#allocation41_spill] sm:$0xff]  ;;  %v11255_v13 = vmax.f32 %v11123_v4, %v11201_v15 }
 0x6af   : > { %11376 = vst.msk [vmem:[#allocation5 + $0x60] sm:$0x1] %vm11317_vm3, %v11373_v18  ;;  %v11125_v31 = vld [vmem:[#allocation4 + $0x180] ss:$2 sm:$0xff]  ;;  %v11203_v63 = vld [vmem:[#allocation4 + $0x181] ss:$2 sm:$0xff]  ;;  %v10898_v11 = vadd.f32 %v21203_v55, %v25595_v48 }
 0x6b0   : > { %11052 = vst.msk [vmem:[#allocation4 + $0x1a8] sm:$0xff] %vm419_vm1, %v10974_v14  ;;  %11375 = vst.msk [vmem:[#allocation5 + $0x58] sm:$0xff] %vm419_vm1, %v11372_v25  ;;  %v11256_v36 = vmax.f32 %v11125_v31, %v11203_v63  ;;  %v10897_v56 = vadd.f32 %v21204_v41, %v25595_v48  ;;  %v20155_v20 = vpop.f32.mrb[56].mxu0  ;;  %v27439_v18 = vld [vmem:[#allocation44_spill] sm:$0xff]  ;;  %v27440_v25 = vld [vmem:[#allocation45_spill] sm:$0xff] }
 0x6b1   : > { %11051 = vst.msk [vmem:[#allocation4 + $0x1a0] sm:$0xff] %vm419_vm1, %v10973_v9  ;;  %v10976_v7 = vmax.f32 %v10898_v11, 0.0  ;;  %v21205_v60 = vadd.f32 %v20155_v20, %v27433_v40  ;;  %v10649_v10 = vpop.f32.mrb[57].mxu0  ;;  %v25870_v31 = vld [vmem:[%s27071_s4] ss:$0 sm:$0xff]  ;;  %v27441_v40 = vld [vmem:[#allocation46_spill] sm:$0xff] }
 0x6b2   : > { %v10975_v24 = vmax.f32 %v10897_v56, 0.0  ;;  %v21206_v51 = vadd.f32 %v10649_v10, %v27434_v2  ;;  %v11379_v21 = vrot.slane %v11256_v36, 5 }
 0x6b3   : > { %v11127_v39 = vld [vmem:[#allocation4 + $0x190] ss:$2 sm:$0xff]  ;;  %v11205_v28 = vld [vmem:[#allocation4 + $0x191] ss:$2 sm:$0xff]  ;;  %11054 = vst.msk [vmem:[#allocation4 + $0x1b8] sm:$0xff] %vm419_vm1, %v10976_v7  ;;  %v10900_v1 = vadd.f32 %v21205_v60, %v25595_v48 }
 0x6b4   : > { %v11257_v29 = vmax.f32 %v11127_v39, %v11205_v28  ;;  %11053 = vst.msk [vmem:[#allocation4 + $0x1b0] sm:$0xff] %vm419_vm1, %v10975_v24  ;;  %v10899_v59 = vadd.f32 %v21206_v51, %v25595_v48  ;;  %v20158_v22 = vpop.f32.mrb[58].mxu0  ;;  %v11385_v54 = vmax.f32 %v11254_v37, %v11379_v21  ;;  %v27442_v51 = vld [vmem:[#allocation47_spill] sm:$0xff] }
 0x6b5   : > { %v10978_v52 = vmax.f32 %v10900_v1, 0.0  ;;  %v21207_v23 = vadd.f32 %v20158_v22, %v27435_v34  ;;  %v10659_v50 = vpop.f32.mrb[59].mxu0 }
 0x6b6   : > { %v11380_v57 = vrot.slane %v11257_v29, 5  ;;  %v10977_v12 = vmax.f32 %v10899_v59, 0.0  ;;  %v21208_v6 = vadd.f32 %v10659_v50, %v27436_v53  ;;  %11388 = vst.msk [vmem:[#allocation5 + $0x5c] sm:$0xc0] %vm11330_vm4, %v11385_v54 }
 0x6b7   : > { %v25842_v43 = vld [vmem:[#allocation5 + $0x51] sm:$0xff]  ;;  %v25844_v62 = vld [vmem:[#allocation5 + $0x59] sm:$0xff]  ;;  %11056 = vst.msk [vmem:[#allocation4 + $0x1c8] sm:$0xff] %vm419_vm1, %v10978_v52  ;;  %v10902_v30 = vadd.f32 %v21207_v23, %v25595_v48  ;;  %v27443_v23 = vld [vmem:[#allocation48_spill] sm:$0xff] }
 0x6b8   : > { %20209 = vmatprep.mubr.msk.f32.mxu1 %vm419_vm1, %v25842_v43  ;;  %11055 = vst.msk [vmem:[#allocation4 + $0x1c0] sm:$0xff] %vm419_vm1, %v10977_v12  ;;  %v10901_v37 = vadd.f32 %v21208_v6, %v25595_v48  ;;  %v20161_v45 = vpop.f32.mrb[60].mxu0  ;;  %v11381_v33 = vsel %vm1737_vm6, %v11379_v21, %v11380_v57  ;;  %v11387_v17 = vmax.f32 %v11256_v36, %v11380_v57  ;;  %v11129_v63 = vld [vmem:[#allocation4 + $0x1a0] ss:$2 sm:$0xff]  ;;  %v11207_v11 = vld [vmem:[#allocation4 + $0x1a1] ss:$2 sm:$0xff] }
 0x6b9   : > { %20210 = vmatmul.mubr.msk.f32.gmra.mrb[88].mxu1 %vm419_vm1, %v25844_v62  ;;  %v10980_v27 = vmax.f32 %v10902_v30, 0.0  ;;  %v21209_v61 = vadd.f32 %v20161_v45, %v27437_v58  ;;  %v10669_v42 = vpop.f32.mrb[61].mxu0  ;;  %v11386_v26 = vmax.f32 %v11255_v13, %v11381_v33  ;;  %v11258_v29 = vmax.f32 %v11129_v63, %v11207_v11  ;;  %v27444_v30 = vld [vmem:[#allocation49_spill] sm:$0xff] }
 0x6ba   : > { %v10979_v5 = vmax.f32 %v10901_v37, 0.0  ;;  %v21210_v35 = vadd.f32 %v10669_v42, %v27438_v47  ;;  %11390 = vst.msk [vmem:[#allocation5 + $0x6c] sm:$0x7] %vm11333_vm8, %v11387_v17  ;;  %v27445_v42 = vld [vmem:[#allocation50_spill] sm:$0xff]  ;;  %v27448_v63 = vld [vmem:[#allocation53_spill] sm:$0xff] }
 0x6bb   : > { %v11131_v32 = vld [vmem:[#allocation4 + $0x1b0] ss:$2 sm:$0xff]  ;;  %v11209_v38 = vld [vmem:[#allocation4 + $0x1b1] ss:$2 sm:$0xff]  ;;  %11058 = vst.msk [vmem:[#allocation4 + $0x1d8] sm:$0xff] %vm419_vm1, %v10980_v27  ;;  %v10904_v16 = vadd.f32 %v21209_v61, %v25595_v48  ;;  %11389 = vst.msk [vmem:[#allocation5 + $0x64] sm:$0xff] %vm419_vm1, %v11386_v26 }
 0x6bc   : > { %11057 = vst.msk [vmem:[#allocation4 + $0x1d0] sm:$0xff] %vm419_vm1, %v10979_v5  ;;  %v10903_v8 = vadd.f32 %v21210_v35, %v25595_v48  ;;  %v20164_v44 = vpop.f32.mrb[62].mxu0  ;;  %v11259_v55 = vmax.f32 %v11131_v32, %v11209_v38  ;;  %v27446_v38 = vld [vmem:[#allocation51_spill] sm:$0xff] }
 0x6bd   : > { %v10982_v46 = vmax.f32 %v10904_v16, 0.0  ;;  %v21211_v14 = vadd.f32 %v20164_v44, %v27439_v18  ;;  %v10679_v49 = vpop.f32.mrb[63].mxu0 }
 0x6be   : > { %v10981_v19 = vmax.f32 %v10903_v8, 0.0  ;;  %v21212_v9 = vadd.f32 %v10679_v49, %v27440_v25  ;;  %v11394_v28 = vrot.slane %v11259_v55, 5 }
 0x6bf   : > { %v11133_v3 = vld [vmem:[#allocation4 + $0x1c0] ss:$2 sm:$0xff]  ;;  %v11211_v41 = vld [vmem:[#allocation4 + $0x1c1] ss:$2 sm:$0xff]  ;;  %11060 = vst.msk [vmem:[#allocation4 + $0x1e8] sm:$0xff] %vm419_vm1, %v10982_v46  ;;  %v10906_v48 = vadd.f32 %v25870_v31, %v21211_v14 }
 0x6c0   : > { %v11260_v36 = vmax.f32 %v11133_v3, %v11211_v41  ;;  %11059 = vst.msk [vmem:[#allocation4 + $0x1e0] sm:$0xff] %vm419_vm1, %v10981_v19  ;;  %v10905_v56 = vadd.f32 %v25870_v31, %v21212_v9  ;;  %v20167_v20 = vpop.f32.mrb[64].mxu0  ;;  %v27447_v19 = vld [vmem:[#allocation52_spill] sm:$0xff] }
 0x6c1   : > { %v10984_v7 = vmax.f32 %v10906_v48, 0.0  ;;  %v21213_v60 = vadd.f32 %v20167_v20, %v27441_v40  ;;  %v10689_v10 = vpop.f32.mrb[65].mxu0  ;;  %v11458_v20 = vld [vmem:[%s27072_s5 + $0x58] sm:$0xff] }
 0x6c2   : > { %v11395_v24 = vrot.slane %v11260_v36, 5  ;;  %v10983_v2 = vmax.f32 %v10905_v56, 0.0  ;;  %v21214_v21 = vadd.f32 %v10689_v10, %v27442_v51  ;;  %v25877_v39 = vld [vmem:[#allocation5 + $0x61] sm:$0xff]  ;;  %v11457_v56 = vld [vmem:[%s27072_s5 + $0x50] sm:$0xff] }
 0x6c3   : > { %v11135_v1 = vld [vmem:[#allocation4 + $0x1d0] ss:$2 sm:$0xff]  ;;  %v11213_v4 = vld [vmem:[#allocation4 + $0x1d1] ss:$2 sm:$0xff]  ;;  %11062 = vst.msk [vmem:[#allocation4 + $0x1f8] sm:$0xff] %vm419_vm1, %v10984_v7  ;;  %v10908_v15 = vadd.f32 %v25870_v31, %v21213_v60  ;;  %20212 = vmatprep.mubr.msk.f32.mxu1 %vm419_vm1, %v25877_v39 }
 0x6c4   : > { %v25883_v59 = vmax.f32 %v11135_v1, %v11213_v4  ;;  %11061 = vst.msk [vmem:[#allocation4 + $0x1f0] sm:$0xff] %vm419_vm1, %v10983_v2  ;;  %v10907_v22 = vadd.f32 %v25870_v31, %v21214_v21  ;;  %v20170_v54 = vpop.f32.mrb[66].mxu0  ;;  %v11396_v52 = vsel %vm1737_vm6, %v11394_v28, %v11395_v24  ;;  %v11547_v10 = vld [vmem:[#allocation5] sm:$0xff]  ;;  %v27449_v1 = vld [vmem:[#allocation54_spill] sm:$0xff] }
 0x6c5   : > { %v10986_v34 = vmax.f32 %v10908_v15, 0.0  ;;  %v21215_v50 = vadd.f32 %v20170_v54, %v27443_v23  ;;  %v10699_v57 = vpop.f32.mrb[67].mxu0  ;;  %v11401_v12 = vmax.f32 %v11258_v29, %v11396_v52  ;;  %v20967_v29 = vpack.c.bf16 %v11458_v20, %v11457_v56 }
 0x6c6   : > { %v11397_v53 = vrot.slane %v25883_v59, 5  ;;  %v10985_v6 = vmax.f32 %v10907_v22, 0.0  ;;  %v21216_v13 = vadd.f32 %v10699_v57, %v27444_v30  ;;  %v11459_v57 = vld [vmem:[%s27072_s5 + $0x60] sm:$0xff] }
 0x6c7   : > { %v11137_v37 = vld [vmem:[#allocation4 + $0x1e0] ss:$2 sm:$0xff]  ;;  %v11215_v45 = vld [vmem:[#allocation4 + $0x1e1] ss:$2 sm:$0xff]  ;;  %11064 = vst.msk [vmem:[#allocation4 + $0x208] sm:$0xff] %vm419_vm1, %v10986_v34  ;;  %v10910_v33 = vadd.f32 %v25870_v31, %v21215_v50  ;;  %11403 = vst.msk [vmem:[#allocation5 + $0x70] sm:$0xff] %vm419_vm1, %v11401_v12 }
 0x6c8   : > { %11063 = vst.msk [vmem:[#allocation4 + $0x200] sm:$0xff] %vm419_vm1, %v10985_v6  ;;  %v10909_v17 = vadd.f32 %v25870_v31, %v21216_v13  ;;  %v20173_v27 = vpop.f32.mrb[68].mxu0  ;;  %v11398_v58 = vsel %vm1737_vm6, %v11395_v24, %v11397_v53  ;;  %v25898_v35 = vmax.f32 %v11137_v37, %v11215_v45  ;;  %v27450_v34 = vld [vmem:[#allocation55_spill] sm:$0xff]  ;;  %v11548_v50 = vld [vmem:[#allocation5 + $0x8] sm:$0xff]  ;;  %v11460_v12 = vld [vmem:[%s27072_s5 + $0x68] sm:$0xff] }
 0x6c9   : > { %v10988_v61 = vmax.f32 %v10910_v33, 0.0  ;;  %v21217_v26 = vadd.f32 %v20173_v27, %v27445_v42  ;;  %v10709_v5 = vpop.f32.mrb[69].mxu0  ;;  %v11402_v47 = vmax.f32 %v11259_v55, %v11398_v58  ;;  %v27451_v45 = vld [vmem:[#allocation56_spill] sm:$0xff]  ;;  %v25950_v27 = vpack.c.bf16 %v11460_v12, %v11459_v57  ;;  %v27452_v42 = vld [vmem:[#allocation57_spill] sm:$0xff] }
 0x6ca   : > { %v10987_v32 = vmax.f32 %v10909_v17, 0.0  ;;  %v21218_v16 = vadd.f32 %v10709_v5, %v27446_v38  ;;  %v11408_v3 = vrot.slane %v25898_v35, 5  ;;  %v25954_v5 = vld [vmem:[#allocation5 + $0x18] sm:$0xff]  ;;  %v25960_v38 = vld [vmem:[#allocation5 + $0x20] sm:$0xff] }
 0x6cb   : > { %v11139_v8 = vld [vmem:[#allocation4 + $0x1f0] ss:$2 sm:$0xff]  ;;  %v11217_v44 = vld [vmem:[#allocation4 + $0x1f1] ss:$2 sm:$0xff]  ;;  %11066 = vst.msk [vmem:[#allocation4 + $0x218] sm:$0xff] %vm419_vm1, %v10988_v61  ;;  %v10912_v46 = vadd.f32 %v25870_v31, %v21217_v26 }
 0x6cc   : > { %11404 = vst.msk [vmem:[#allocation5 + $0x78] sm:$0x1f] %vm11285_vm14, %v11402_v47  ;;  %v11263_v18 = vmax.f32 %v11139_v8, %v11217_v44  ;;  %v10911_v14 = vadd.f32 %v25870_v31, %v21218_v16  ;;  %v20176_v49 = vpop.f32.mrb[70].mxu0  ;;  %v26009_v57 = vld [vmem:[#allocation5 + $0x60] sm:$0xff] }
 0x6cd   : > { %11065 = vst.msk [vmem:[#allocation4 + $0x210] sm:$0xff] %vm419_vm1, %v10987_v32  ;;  %v10990_v55 = vmax.f32 %v10912_v46, 0.0  ;;  %v21219_v25 = vadd.f32 %v20176_v49, %v27447_v19  ;;  %v10719_v9 = vpop.f32.mrb[71].mxu0  ;;  %v27453_v46 = vld [vmem:[#allocation58_spill] sm:$0xff]  ;;  %27455 = vst [vmem:[#allocation8_spill] sm:$0xff] %v26009_v57 }
 0x6ce   : > { %v11409_v41 = vrot.slane %v11263_v18, 5  ;;  %v10989_v48 = vmax.f32 %v10911_v14, 0.0  ;;  %v21220_v11 = vadd.f32 %v10719_v9, %v27448_v63  ;;  %v25909_v36 = vld [vmem:[#allocation5 + $0x69] sm:$0xff] }
 0x6cf   : > { %v11141_v7 = vld [vmem:[#allocation4 + $0x200] ss:$2 sm:$0xff]  ;;  %v11219_v40 = vld [vmem:[#allocation4 + $0x201] ss:$2 sm:$0xff]  ;;  %11068 = vst.msk [vmem:[#allocation4 + $0x228] sm:$0xff] %vm419_vm1, %v10990_v55  ;;  %v10914_v60 = vadd.f32 %v25870_v31, %v21219_v25  ;;  %20213 = vmatmul.mubr.msk.f32.gmra.mrb[90].mxu1 %vm419_vm1, %v25909_v36  ;;  %v25970_v25 = vld [vmem:[#allocation5 + $0x28] sm:$0xff] }
 0x6d0   : > { %v25921_v24 = vmax.f32 %v11141_v7, %v11219_v40  ;;  %11067 = vst.msk [vmem:[#allocation4 + $0x220] sm:$0xff] %vm419_vm1, %v10989_v48  ;;  %v10913_v2 = vadd.f32 %v25870_v31, %v21220_v11  ;;  %v20179_v51 = vpop.f32.mrb[72].mxu0  ;;  %20223 = vmatprep.mubr.msk.f32.mxu1 %vm419_vm1, %v11547_v10  ;;  %v11410_v21 = vsel %vm1737_vm6, %v11408_v3, %v11409_v41  ;;  %v27454_v55 = vld [vmem:[#allocation59_spill] sm:$0xff]  ;;  %v25976_v63 = vld [vmem:[#allocation5 + $0x30] sm:$0xff] }
 0x6d1   : > { %v10992_v28 = vmax.f32 %v10914_v60, 0.0  ;;  %v21221_v4 = vadd.f32 %v20179_v51, %v27449_v1  ;;  %v10729_v15 = vpop.f32.mrb[73].mxu0  ;;  %v11415_v22 = vmax.f32 %v25883_v59, %v11410_v21  ;;  %v25940_v59 = vld [vmem:[#allocation5 + $0x10] sm:$0xff]  ;;  %v25989_v21 = vld [vmem:[#allocation5 + $0x40] sm:$0xff] }
 0x6d2   : > { %v11411_v54 = vrot.slane %v25921_v24, 5  ;;  %v10991_v52 = vmax.f32 %v10913_v2, 0.0  ;;  %v21222_v23 = vadd.f32 %v10729_v15, %v27450_v34  ;;  %v25983_v2 = vld [vmem:[#allocation5 + $0x38] sm:$0xff] }
 0x6d3   : > { %11070 = vst.msk [vmem:[#allocation4 + $0x238] sm:$0xff] %vm419_vm1, %v10992_v28  ;;  %v10916_v53 = vadd.f32 %v25870_v31, %v21221_v4  ;;  %20224 = vmatmul.mubr.msk.f32.vlgmr.msra.gmra.mrb[78].mxu1 %vm419_vm1, %v11548_v50  ;;  %v25995_v4 = vld [vmem:[#allocation5 + $0x48] sm:$0xff] }
 0x6d4   : > { %11417 = vst.msk [vmem:[#allocation5 + $0x7c] sm:$0xfc] %vm11299_vm15, %v11415_v22  ;;  %v10915_v6 = vadd.f32 %v25870_v31, %v21222_v23  ;;  %20966 = vmatpush3.bf16.msra.mxu1 %v25710_v0  ;;  %v20182_v30 = vpop.f32.mrb[74].mxu0  ;;  %20226 = vmatprep.mubr.msk.f32.mxu1 %vm419_vm1, %v25940_v59  ;;  %v11412_v13 = vsel %vm1737_vm6, %v11409_v41, %v11411_v54  ;;  %v11143_v11 = vld [vmem:[#allocation4 + $0x210] ss:$2 sm:$0xff]  ;;  %v26000_v22 = vld [vmem:[#allocation5 + $0x50] sm:$0xff] }
 0x6d5   : > { %11069 = vst.msk [vmem:[#allocation4 + $0x230] sm:$0xff] %vm419_vm1, %v10991_v52  ;;  %v10994_v37 = vmax.f32 %v10916_v53, 0.0  ;;  %v21223_v33 = vadd.f32 %v20182_v30, %v27451_v45  ;;  %v10739_v17 = vpop.f32.mrb[75].mxu0  ;;  %20968 = vmatprep.subr.bf16.mxu1 %v20967_v29  ;;  %v11416_v58 = vmax.f32 %v25898_v35, %v11412_v13  ;;  %v11221_v56 = vld [vmem:[#allocation4 + $0x211] ss:$2 sm:$0xff]  ;;  %v26005_v52 = vld [vmem:[#allocation5 + $0x58] sm:$0xff] }
 0x6d6   : > { %v10993_v61 = vmax.f32 %v10915_v6, 0.0  ;;  %v21224_v26 = vadd.f32 %v10739_v17, %v27452_v42  ;;  %v11461_v45 = vld [vmem:[%s27072_s5 + $0x70] sm:$0xff]  ;;  %v11929_v17 = vld [vmem:[#allocation5 + $0x2] sm:$0xff] }
 0x6d7   : > { %v11145_v0 = vld [vmem:[#allocation4 + $0x220] ss:$2 sm:$0xff]  ;;  %v11223_v47 = vld [vmem:[#allocation4 + $0x221] ss:$2 sm:$0xff]  ;;  %11072 = vst.msk [vmem:[#allocation4 + $0x248] sm:$0xff] %vm419_vm1, %v10994_v37  ;;  %v10918_v32 = vadd.f32 %v25870_v31, %v21223_v33  ;;  %20227 = vmatmul.mubr.msk.f32.gmra.mrb[80].mxu1 %vm419_vm1, %v25954_v5  ;;  %v26013_v37 = vld [vmem:[#allocation5 + $0x68] sm:$0xff] }
 0x6d8   : > { %11418 = vst.msk [vmem:[#allocation5 + $0x84] sm:$0x7f] %vm11301_vm0, %v11416_v58  ;;  %v11266_v16 = vmax.f32 %v11145_v0, %v11223_v47  ;;  %v10917_v35 = vadd.f32 %v25870_v31, %v21224_v26  ;;  %v20185_v8 = vpop.f32.mrb[76].mxu0  ;;  %20229 = vmatprep.mubr.msk.f32.mxu1 %vm419_vm1, %v25960_v38  ;;  %20970 = vmatpush3.bf16.msra.mxu1 %v20967_v29  ;;  %27456 = vst [vmem:[#allocation33_spill] sm:$0xff] %v26013_v37  ;;  %v11462_v33 = vld [vmem:[%s27072_s5 + $0x78] sm:$0xff]  ;;  %v11930_v47 = vld [vmem:[#allocation5 + $0xa] sm:$0xff] }
 0x6d9   : > { %11071 = vst.msk [vmem:[#allocation4 + $0x240] sm:$0xff] %vm419_vm1, %v10993_v61  ;;  %v10996_v44 = vmax.f32 %v10918_v32, 0.0  ;;  %v21225_v18 = vadd.f32 %v20185_v8, %v27453_v46  ;;  %v10749_v14 = vpop.f32.mrb[77].mxu0  ;;  %20972 = vmatprep.subr.bf16.mxu1 %v25950_v27  ;;  %v20975_v26 = vpack.c.bf16 %v11462_v33, %v11461_v45  ;;  %v11463_v32 = vld [vmem:[%s27072_s5 + $0x80] sm:$0xff] }
 0x6da   : > { %v10995_v49 = vmax.f32 %v10917_v35, 0.0  ;;  %v21226_v19 = vadd.f32 %v10749_v14, %v27454_v55  ;;  %v11421_v9 = vrot.slane %v11266_v16, 5  ;;  %v26034_v35 = vld [vmem:[#allocation5 + $0x12] sm:$0xff]  ;;  %v26044_v46 = vld [vmem:[#allocation5 + $0x22] sm:$0xff]  ;;  %v26056_v14 = vld [vmem:[#allocation5 + $0x3a] sm:$0xff] }
 0x6db   : > { %11074 = vst.msk [vmem:[#allocation4 + $0x258] sm:$0xff] %vm419_vm1, %v10996_v44  ;;  %v10920_v48 = vadd.f32 %v25870_v31, %v21225_v18  ;;  %20230 = vmatmul.mubr.msk.f32.gmra.mrb[82].mxu1 %vm419_vm1, %v25970_v25  ;;  %v26040_v44 = vld [vmem:[#allocation5 + $0x1a] sm:$0xff]  ;;  %v26048_v18 = vld [vmem:[#allocation5 + $0x2a] sm:$0xff] }
 0x6dc   : > { %v11147_v3 = vld [vmem:[#allocation4 + $0x230] ss:$2 sm:$0xff]  ;;  %v11225_v41 = vld [vmem:[#allocation4 + $0x231] ss:$2 sm:$0xff]  ;;  %11073 = vst.msk [vmem:[#allocation4 + $0x250] sm:$0xff] %vm419_vm1, %v10995_v49  ;;  %v10919_v7 = vadd.f32 %v25870_v31, %v21226_v19  ;;  %20232 = vmatprep.mubr.msk.f32.mxu1 %vm419_vm1, %v25976_v63  ;;  %v11427_v40 = vmax.f32 %v25921_v24, %v11421_v9  ;;  %v11265_v31 = vmax.f32 %v11143_v11, %v11221_v56  ;;  %v26068_v19 = vld [vmem:[#allocation5 + $0x52] sm:$0xff] }
 0x6dd   : > { %v11267_v20 = vmax.f32 %v11147_v3, %v11225_v41  ;;  %v10998_v60 = vmax.f32 %v10920_v48, 0.0  ;;  %v26060_v49 = vld [vmem:[#allocation5 + $0x42] sm:$0xff]  ;;  %v26064_v55 = vld [vmem:[#allocation5 + $0x4a] sm:$0xff]  ;;  %v11465_v48 = vld [vmem:[%s27072_s5 + $0x90] sm:$0xff] }
 0x6de   : > { %v10997_v10 = vmax.f32 %v10919_v7, 0.0  ;;  %11430 = vst.msk [vmem:[#allocation5 + $0x88] sm:$0xf0] %vm11314_vm2, %v11427_v40  ;;  %v26076_v3 = vld [vmem:[#allocation5 + $0x62] sm:$0xff]  ;;  %v26080_v41 = vld [vmem:[#allocation5 + $0x6a] sm:$0xff] }
 0x6df   : > { %v11422_v51 = vrot.slane %v11267_v20, 5  ;;  %11076 = vst.msk [vmem:[#allocation4 + $0x268] sm:$0xff] %vm419_vm1, %v10998_v60  ;;  %20233 = vmatmul.mubr.msk.f32.gmra.mrb[84].mxu1 %vm419_vm1, %v25983_v2  ;;  %v11466_v11 = vld [vmem:[%s27072_s5 + $0x98] sm:$0xff]  ;;  %v12135_v7 = vld [vmem:[#allocation5 + $0xb] sm:$0xff] }
 0x6e0   : > { %11075 = vst.msk [vmem:[#allocation4 + $0x260] sm:$0xff] %vm419_vm1, %v10997_v10  ;;  %20235 = vmatprep.mubr.msk.f32.mxu1 %vm419_vm1, %v25989_v21  ;;  %v11149_v12 = vld [vmem:[#allocation4 + $0x240] ss:$2 sm:$0xff]  ;;  %v11227_v53 = vld [vmem:[#allocation4 + $0x241] ss:$2 sm:$0xff]  ;;  %v12134_v56 = vld [vmem:[#allocation5 + $0x3] sm:$0xff] }
 0x6e1   : > { %v11423_v24 = vsel %vm1737_vm6, %v11421_v9, %v11422_v51  ;;  %v11429_v28 = vmax.f32 %v11266_v16, %v11422_v51  ;;  %v11268_v58 = vmax.f32 %v11149_v12, %v11227_v53  ;;  %v11464_v16 = vld [vmem:[%s27072_s5 + $0x88] sm:$0xff]  ;;  %v26072_v9 = vld [vmem:[#allocation5 + $0x5a] sm:$0xff]  ;;  %v11467_v40 = vld [vmem:[%s27072_s5 + $0xa0] sm:$0xff] }
 0x6e2   : > { %v11428_v1 = vmax.f32 %v11265_v31, %v11423_v24  ;;  %v20979_v8 = vpack.c.bf16 %v11464_v16, %v11463_v32  ;;  %v11468_v60 = vld [vmem:[%s27072_s5 + $0xa8] sm:$0xff]  ;;  %v12137_v31 = vld [vmem:[#allocation5 + $0x1b] sm:$0xff]  ;;  %v12138_v24 = vld [vmem:[#allocation5 + $0x23] sm:$0xff] }
 0x6e3   : > { %11432 = vst.msk [vmem:[#allocation5 + $0x98] sm:$0x1] %vm11317_vm3, %v11429_v28  ;;  %v11151_v15 = vld [vmem:[#allocation4 + $0x250] ss:$2 sm:$0xff]  ;;  %v11229_v29 = vld [vmem:[#allocation4 + $0x251] ss:$2 sm:$0xff]  ;;  %20236 = vmatmul.mubr.msk.f32.gmra.mrb[86].mxu1 %vm419_vm1, %v25995_v4  ;;  %v20987_v51 = vpack.c.bf16 %v11468_v60, %v11467_v40 }
 0x6e4   : > { %11431 = vst.msk [vmem:[#allocation5 + $0x90] sm:$0xff] %vm419_vm1, %v11428_v1  ;;  %v11269_v54 = vmax.f32 %v11151_v15, %v11229_v29  ;;  %20238 = vmatprep.mubr.msk.f32.mxu1 %vm419_vm1, %v26000_v22  ;;  %v12136_v10 = vld [vmem:[#allocation5 + $0x13] sm:$0xff]  ;;  %v26101_v28 = vld [vmem:[#allocation5 + $0x2b] sm:$0xff]  ;;  %v26109_v15 = vld [vmem:[#allocation5 + $0x3b] sm:$0xff] }
 0x6e5   : > { %27457 = vst [vmem:[#allocation34_spill] sm:$0xff] %v26101_v28  ;;  %v26105_v1 = vld [vmem:[#allocation5 + $0x33] sm:$0xff]  ;;  %27459 = vst [vmem:[#allocation36_spill] sm:$0xff] %v26109_v15  ;;  %v26113_v29 = vld [vmem:[#allocation5 + $0x43] sm:$0xff] }
 0x6e6   : > { %v11435_v34 = vrot.slane %v11269_v54, 5  ;;  %27458 = vst [vmem:[#allocation35_spill] sm:$0xff] %v26105_v1  ;;  %27460 = vst [vmem:[#allocation37_spill] sm:$0xff] %v26113_v29  ;;  %v26133_v12 = vld [vmem:[#allocation5 + $0x6b] sm:$0xff]  ;;  %v11469_v53 = vld [vmem:[%s27072_s5 + $0xb0] sm:$0xff] }
 0x6e7   : > { %v11153_v23 = vld [vmem:[#allocation4 + $0x260] ss:$2 sm:$0xff]  ;;  %v11231_v50 = vld [vmem:[#allocation4 + $0x261] ss:$2 sm:$0xff]  ;;  %20239 = vmatmul.mubr.msk.f32.gmra.mrb[88].mxu1 %vm419_vm1, %v26005_v52  ;;  %27465 = vst [vmem:[#allocation42_spill] sm:$0xff] %v26133_v12  ;;  %v11471_v33 = vld [vmem:[%s27072_s5 + $0xc0] sm:$0xff] }
 0x6e8   : > { %v11270_v6 = vmax.f32 %v11153_v23, %v11231_v50  ;;  %20241 = vmatprep.mubr.msk.f32.mxu1 %vm419_vm1, %v26009_v57  ;;  %v11441_v30 = vmax.f32 %v11267_v20, %v11435_v34  ;;  %v20983_v20 = vpack.c.bf16 %v11466_v11, %v11465_v48  ;;  %v26125_v23 = vld [vmem:[#allocation5 + $0x5b] sm:$0xff]  ;;  %v26129_v50 = vld [vmem:[#allocation5 + $0x63] sm:$0xff]  ;;  %v12340_v45 = vld [vmem:[#allocation5 + $0xc] sm:$0xff] }
 0x6e9   : > { %27463 = vst [vmem:[#allocation40_spill] sm:$0xff] %v26125_v23  ;;  %27464 = vst [vmem:[#allocation41_spill] sm:$0xff] %v26129_v50  ;;  %v26168_v32 = vld [vmem:[#allocation5 + $0x3c] sm:$0xff]  ;;  %v26172_v16 = vld [vmem:[#allocation5 + $0x44] sm:$0xff] }
 0x6ea   : > { %v11436_v13 = vrot.slane %v11270_v6, 5  ;;  %11444 = vst.msk [vmem:[#allocation5 + $0x94] sm:$0xc0] %vm11330_vm4, %v11441_v30  ;;  %v11470_v6 = vld [vmem:[%s27072_s5 + $0xb8] sm:$0xff]  ;;  %v26180_v48 = vld [vmem:[#allocation5 + $0x54] sm:$0xff] }
 0x6eb   : > { %20242 = vmatmul.mubr.msk.f32.gmra.mrb[90].mxu1 %vm419_vm1, %v26013_v37  ;;  %v12339_v30 = vld [vmem:[#allocation5 + $0x4] sm:$0xff]  ;;  %v26184_v11 = vld [vmem:[#allocation5 + $0x5c] sm:$0xff]  ;;  %v12544_v60 = vld [vmem:[#allocation5 + $0xe] sm:$0xff] }
 0x6ec   : > { %20252 = vmatprep.mubr.msk.f32.mxu1 %vm419_vm1, %v11929_v17  ;;  %v11437_v61 = vsel %vm1737_vm6, %v11435_v34, %v11436_v13  ;;  %v11443_v42 = vmax.f32 %v11269_v54, %v11436_v13  ;;  %v26117_v54 = vld [vmem:[#allocation5 + $0x4b] sm:$0xff]  ;;  %v26121_v34 = vld [vmem:[#allocation5 + $0x53] sm:$0xff]  ;;  %v20991_v13 = vpack.c.bf16 %v11470_v6, %v11469_v53  ;;  %v11474_v40 = vld [vmem:[%s27072_s5 + $0xd8] sm:$0xff]  ;;  %vm16679_vm6 = vcmask 523264  }
 0x6ed   : > { %v11442_v0 = vmax.f32 %v11268_v58, %v11437_v61  ;;  %27461 = vst [vmem:[#allocation38_spill] sm:$0xff] %v26117_v54  ;;  %27462 = vst [vmem:[#allocation39_spill] sm:$0xff] %v26121_v34  ;;  %v11472_v17 = vld [vmem:[%s27072_s5 + $0xc8] sm:$0xff]  ;;  %v26210_v53 = vld [vmem:[#allocation5 + $0x1e] sm:$0xff] }
 0x6ee   : > { %11446 = vst.msk [vmem:[#allocation5 + $0xa4] sm:$0x7] %vm11333_vm8, %v11443_v42  ;;  %v12341_v58 = vld [vmem:[#allocation5 + $0x14] sm:$0xff]  ;;  %v20995_v61 = vpack.c.bf16 %v11472_v17, %v11471_v33  ;;  %v26152_v42 = vld [vmem:[#allocation5 + $0x1c] sm:$0xff]  ;;  %v26230_v17 = vld [vmem:[#allocation5 + $0x46] sm:$0xff] }
 0x6ef   : > { %20253 = vmatmul.mubr.msk.f32.vlgmr.msra.gmra.mrb[78].mxu1 %vm419_vm1, %v11930_v47  ;;  %11445 = vst.msk [vmem:[#allocation5 + $0x9c] sm:$0xff] %vm419_vm1, %v11442_v0  ;;  %v26160_v0 = vld [vmem:[#allocation5 + $0x2c] sm:$0xff]  ;;  %v26164_v47 = vld [vmem:[#allocation5 + $0x34] sm:$0xff]  ;;  %v26226_v33 = vld [vmem:[#allocation5 + $0x3e] sm:$0xff] }
 0x6f0   : > { %20974 = vmatpush3.bf16.msra.mxu1 %v25950_v27  ;;  %20255 = vmatprep.mubr.msk.f32.mxu1 %vm419_vm1, %v26034_v35  ;;  %v26052_v27 = vld [vmem:[#allocation5 + $0x32] sm:$0xff] }
 0x6f1   : > { %20976 = vmatprep.subr.bf16.mxu1 %v20975_v26 }
 0x6f3   : > { %20256 = vmatmul.mubr.msk.f32.gmra.mrb[80].mxu1 %vm419_vm1, %v26040_v44 }
 0x6f4   : > { %20258 = vmatprep.mubr.msk.f32.mxu1 %vm419_vm1, %v26044_v46  ;;  %20978 = vmatpush3.bf16.msra.mxu1 %v20975_v26  ;;  %v26156_v26 = vld [vmem:[#allocation5 + $0x24] sm:$0xff] }
 0x6f5   : > { %20980 = vmatprep.subr.bf16.mxu1 %v20979_v8 }
 0x6f7   : > { %20259 = vmatmul.mubr.msk.f32.gmra.mrb[82].mxu1 %vm419_vm1, %v26048_v18 }
 0x6f8   : > { %20261 = vmatprep.mubr.msk.f32.mxu1 %vm419_vm1, %v26052_v27 }
 0x6fb   : > { %20262 = vmatmul.mubr.msk.f32.gmra.mrb[84].mxu1 %vm419_vm1, %v26056_v14 }
 0x6fc   : > { %20264 = vmatprep.mubr.msk.f32.mxu1 %vm419_vm1, %v26060_v49 }
 0x6ff   : > { %20265 = vmatmul.mubr.msk.f32.gmra.mrb[86].mxu1 %vm419_vm1, %v26064_v55 }
 0x700   : > { %20267 = vmatprep.mubr.msk.f32.mxu1 %vm419_vm1, %v26068_v19 }
 0x703   : > { %20268 = vmatmul.mubr.msk.f32.gmra.mrb[88].mxu1 %vm419_vm1, %v26072_v9 }
 0x704   : > { %20270 = vmatprep.mubr.msk.f32.mxu1 %vm419_vm1, %v26076_v3 }
 0x707   : > { %20271 = vmatmul.mubr.msk.f32.gmra.mrb[90].mxu1 %vm419_vm1, %v26080_v41 }
 0x708   : > { %20281 = vmatprep.mubr.msk.f32.mxu1 %vm419_vm1, %v12134_v56  ;;  %v26188_v56 = vld [vmem:[#allocation5 + $0x64] sm:$0xff] }
 0x70b   : > { %20282 = vmatmul.mubr.msk.f32.vlgmr.msra.gmra.mrb[78].mxu1 %vm419_vm1, %v12135_v7  ;;  %v11473_v7 = vld [vmem:[%s27072_s5 + $0xd0] sm:$0xff] }
 0x70c   : > { %20982 = vmatpush3.bf16.msra.mxu1 %v20979_v8  ;;  %20284 = vmatprep.mubr.msk.f32.mxu1 %vm419_vm1, %v12136_v10  ;;  %v26176_v8 = vld [vmem:[#allocation5 + $0x4c] sm:$0xff]  ;;  %v20999_v10 = vpack.c.bf16 %v11474_v40, %v11473_v7  ;;  %v26242_v7 = vld [vmem:[#allocation5 + $0x5e] sm:$0xff] }
 0x70d   : > { %20984 = vmatprep.subr.bf16.mxu1 %v20983_v20  ;;  %v26246_v40 = vld [vmem:[#allocation5 + $0x66] sm:$0xff] }
 0x70f   : > { %20285 = vmatmul.mubr.msk.f32.gmra.mrb[80].mxu1 %vm419_vm1, %v12137_v31  ;;  %v11475_v31 = vld [vmem:[%s27072_s5 + $0xe0] sm:$0xff] }
 0x710   : > { %20287 = vmatprep.mubr.msk.f32.mxu1 %vm419_vm1, %v12138_v24  ;;  %20986 = vmatpush3.bf16.msra.mxu1 %v20983_v20  ;;  %v26192_v20 = vld [vmem:[#allocation5 + $0x6c] sm:$0xff] }
 0x711   : > { %20988 = vmatprep.subr.bf16.mxu1 %v20987_v51  ;;  %v11476_v24 = vld [vmem:[%s27072_s5 + $0xe8] sm:$0xff] }
 0x712   : > { %v21003_v6 = vpack.c.bf16 %v11476_v24, %v11475_v31  ;;  %v11478_v31 = vld [vmem:[%s27072_s5 + $0xf8] sm:$0xff]  ;;  %v12749_v24 = vld [vmem:[#allocation5 + $0xf] sm:$0xff] }
 0x713   : > { %20288 = vmatmul.mubr.msk.f32.gmra.mrb[82].mxu1 %vm419_vm1, %v26101_v28  ;;  %v26316_v28 = vld [vmem:[#allocation5 + $0x77] sm:$0xff] }
 0x714   : > { %20290 = vmatprep.mubr.msk.f32.mxu1 %vm419_vm1, %v26105_v1  ;;  %v26312_v1 = vld [vmem:[#allocation5 + $0x6f] sm:$0xff]  ;;  %27471 = vst [vmem:[#allocation48_spill] sm:$0xff] %v26316_v28 }
 0x715   : > { %27470 = vst [vmem:[#allocation47_spill] sm:$0xff] %v26312_v1 }
 0x717   : > { %20291 = vmatmul.mubr.msk.f32.gmra.mrb[84].mxu1 %vm419_vm1, %v26109_v15  ;;  %v26308_v15 = vld [vmem:[#allocation5 + $0x67] sm:$0xff] }
 0x718   : > { %20293 = vmatprep.mubr.msk.f32.mxu1 %vm419_vm1, %v26113_v29  ;;  %v26304_v29 = vld [vmem:[#allocation5 + $0x5f] sm:$0xff]  ;;  %27469 = vst [vmem:[#allocation46_spill] sm:$0xff] %v26308_v15 }
 0x719   : > { %27468 = vst [vmem:[#allocation45_spill] sm:$0xff] %v26304_v29 }
 0x71b   : > { %20294 = vmatmul.mubr.msk.f32.gmra.mrb[86].mxu1 %vm419_vm1, %v26117_v54  ;;  %v26272_v54 = vld [vmem:[#allocation5 + $0x1f] sm:$0xff] }
 0x71c   : > { %20296 = vmatprep.mubr.msk.f32.mxu1 %vm419_vm1, %v26121_v34  ;;  %v11480_v34 = vld [vmem:[%s27072_s5 + $0x108] sm:$0xff] }
 0x71f   : > { %20297 = vmatmul.mubr.msk.f32.gmra.mrb[88].mxu1 %vm419_vm1, %v26125_v23  ;;  %v11479_v23 = vld [vmem:[%s27072_s5 + $0x100] sm:$0xff] }
 0x720   : > { %20299 = vmatprep.mubr.msk.f32.mxu1 %vm419_vm1, %v26129_v50  ;;  %v12750_v50 = vld [vmem:[#allocation5 + $0x17] sm:$0xff] }
 0x723   : > { %20300 = vmatmul.mubr.msk.f32.gmra.mrb[90].mxu1 %vm419_vm1, %v26133_v12 }
 0x724   : > { %20310 = vmatprep.mubr.msk.f32.mxu1 %vm419_vm1, %v12339_v30  ;;  %v26214_v30 = vld [vmem:[#allocation5 + $0x26] sm:$0xff] }
 0x727   : > { %20311 = vmatmul.mubr.msk.f32.vlgmr.msra.gmra.mrb[78].mxu1 %vm419_vm1, %v12340_v45  ;;  %v26222_v45 = vld [vmem:[#allocation5 + $0x36] sm:$0xff] }
 0x728   : > { %20990 = vmatpush3.bf16.msra.mxu1 %v20987_v51  ;;  %20313 = vmatprep.mubr.msk.f32.mxu1 %vm419_vm1, %v12341_v58  ;;  %v12545_v51 = vld [vmem:[#allocation5 + $0x16] sm:$0xff]  ;;  %v26234_v58 = vld [vmem:[#allocation5 + $0x4e] sm:$0xff] }
 0x729   : > { %20992 = vmatprep.subr.bf16.mxu1 %v20991_v13 }
 0x72b   : > { %20314 = vmatmul.mubr.msk.f32.gmra.mrb[80].mxu1 %vm419_vm1, %v26152_v42 }
 0x72c   : > { %20316 = vmatprep.mubr.msk.f32.mxu1 %vm419_vm1, %v26156_v26  ;;  %20994 = vmatpush3.bf16.msra.mxu1 %v20991_v13  ;;  %v26218_v13 = vld [vmem:[#allocation5 + $0x2e] sm:$0xff] }
 0x72d   : > { %20996 = vmatprep.subr.bf16.mxu1 %v20995_v61 }
 0x72f   : > { %20317 = vmatmul.mubr.msk.f32.gmra.mrb[82].mxu1 %vm419_vm1, %v26160_v0 }
 0x730   : > { %20319 = vmatprep.mubr.msk.f32.mxu1 %vm419_vm1, %v26164_v47 }
 0x733   : > { %20320 = vmatmul.mubr.msk.f32.gmra.mrb[84].mxu1 %vm419_vm1, %v26168_v32 }
 0x734   : > { %20322 = vmatprep.mubr.msk.f32.mxu1 %vm419_vm1, %v26172_v16 }
 0x737   : > { %20323 = vmatmul.mubr.msk.f32.gmra.mrb[86].mxu1 %vm419_vm1, %v26176_v8 }
 0x738   : > { %20325 = vmatprep.mubr.msk.f32.mxu1 %vm419_vm1, %v26180_v48 }
 0x73b   : > { %20326 = vmatmul.mubr.msk.f32.gmra.mrb[88].mxu1 %vm419_vm1, %v26184_v11 }
 0x73c   : > { %20328 = vmatprep.mubr.msk.f32.mxu1 %vm419_vm1, %v26188_v56 }
 0x73f   : > { %20329 = vmatmul.mubr.msk.f32.gmra.mrb[90].mxu1 %vm419_vm1, %v26192_v20 }
 0x740   : > { %20339 = vmatprep.mubr.msk.f32.mxu1 %vm419_vm1, %v12544_v60  ;;  %v26250_v60 = vld [vmem:[#allocation5 + $0x6e] sm:$0xff] }
 0x743   : > { %20340 = vmatmul.mubr.msk.f32.vlgmr.msra.gmra.mrb[78].mxu1 %vm419_vm1, %v12545_v51  ;;  %v11477_v51 = vld [vmem:[%s27072_s5 + $0xf0] sm:$0xff] }
 0x744   : > { %20998 = vmatpush3.bf16.msra.mxu1 %v20995_v61  ;;  %20342 = vmatprep.mubr.msk.f32.mxu1 %vm419_vm1, %v26210_v53  ;;  %v26238_v61 = vld [vmem:[#allocation5 + $0x56] sm:$0xff]  ;;  %v21007_v12 = vpack.c.bf16 %v11478_v31, %v11477_v51  ;;  %v26276_v51 = vld [vmem:[#allocation5 + $0x27] sm:$0xff] }
 0x745   : > { %21000 = vmatprep.subr.bf16.mxu1 %v20999_v10  ;;  %v26280_v31 = vld [vmem:[#allocation5 + $0x2f] sm:$0xff] }
 0x747   : > { %20343 = vmatmul.mubr.msk.f32.gmra.mrb[80].mxu1 %vm419_vm1, %v26214_v30 }
 0x748   : > { %20345 = vmatprep.mubr.msk.f32.mxu1 %vm419_vm1, %v26218_v13  ;;  %21002 = vmatpush3.bf16.msra.mxu1 %v20999_v10  ;;  %v26254_v10 = vld [vmem:[#allocation5 + $0x76] sm:$0xff] }
 0x749   : > { %21004 = vmatprep.subr.bf16.mxu1 %v21003_v6 }
 0x74b   : > { %20346 = vmatmul.mubr.msk.f32.gmra.mrb[82].mxu1 %vm419_vm1, %v26222_v45 }
 0x74c   : > { %20348 = vmatprep.mubr.msk.f32.mxu1 %vm419_vm1, %v26226_v33 }
 0x74f   : > { %20349 = vmatmul.mubr.msk.f32.gmra.mrb[84].mxu1 %vm419_vm1, %v26230_v17 }
 0x750   : > { %20351 = vmatprep.mubr.msk.f32.mxu1 %vm419_vm1, %v26234_v58 }
 0x753   : > { %20352 = vmatmul.mubr.msk.f32.gmra.mrb[86].mxu1 %vm419_vm1, %v26238_v61 }
 0x754   : > { %20354 = vmatprep.mubr.msk.f32.mxu1 %vm419_vm1, %v26242_v7 }
 0x757   : > { %20355 = vmatmul.mubr.msk.f32.gmra.mrb[88].mxu1 %vm419_vm1, %v26246_v40 }
 0x758   : > { %20357 = vmatprep.mubr.msk.f32.mxu1 %vm419_vm1, %v26250_v60 }
 0x75b   : > { %20358 = vmatmul.mubr.msk.f32.gmra.mrb[90].mxu1 %vm419_vm1, %v26254_v10 }
 0x75c   : > { %20368 = vmatprep.mubr.msk.f32.mxu1 %vm419_vm1, %v12749_v24  ;;  %v21011_v24 = vpack.c.bf16 %v11480_v34, %v11479_v23  ;;  %v26292_v34 = vld [vmem:[#allocation5 + $0x47] sm:$0xff]  ;;  %v26296_v23 = vld [vmem:[#allocation5 + $0x4f] sm:$0xff] }
 0x75d   : > { %27466 = vst [vmem:[#allocation43_spill] sm:$0xff] %v26296_v23 }
 0x75f   : > { %20369 = vmatmul.mubr.msk.f32.vlgmr.msra.gmra.mrb[78].mxu1 %vm419_vm1, %v12750_v50  ;;  %v26284_v50 = vld [vmem:[#allocation5 + $0x37] sm:$0xff] }
 0x760   : > { %21006 = vmatpush3.bf16.msra.mxu1 %v21003_v6  ;;  %20371 = vmatprep.mubr.msk.f32.mxu1 %vm419_vm1, %v26272_v54  ;;  %v26288_v6 = vld [vmem:[#allocation5 + $0x3f] sm:$0xff] }
 0x761   : > { %21008 = vmatprep.subr.bf16.mxu1 %v21007_v12 }
 0x763   : > { %20372 = vmatmul.mubr.msk.f32.gmra.mrb[80].mxu1 %vm419_vm1, %v26276_v51 }
 0x764   : > { %20374 = vmatprep.mubr.msk.f32.mxu1 %vm419_vm1, %v26280_v31  ;;  %21010 = vmatpush3.bf16.msra.mxu1 %v21007_v12  ;;  %v26300_v12 = vld [vmem:[#allocation5 + $0x57] sm:$0xff] }
 0x765   : > { %21012 = vmatprep.subr.bf16.mxu1 %v21011_v24  ;;  %27467 = vst [vmem:[#allocation44_spill] sm:$0xff] %v26300_v12 }
 0x767   : > { %20375 = vmatmul.mubr.msk.f32.gmra.mrb[82].mxu1 %vm419_vm1, %v26284_v50 }
 0x768   : > { %20377 = vmatprep.mubr.msk.f32.mxu1 %vm419_vm1, %v26288_v6 }
 0x76b   : > { %20378 = vmatmul.mubr.msk.f32.gmra.mrb[84].mxu1 %vm419_vm1, %v26292_v34 }
 0x76c   : > { %20380 = vmatprep.mubr.msk.f32.mxu1 %vm419_vm1, %v26296_v23  ;;  %v11484_v23 = vld [vmem:[%s27072_s5 + $0x128] sm:$0xff] }
 0x76f   : > { %20381 = vmatmul.mubr.msk.f32.gmra.mrb[86].mxu1 %vm419_vm1, %v26300_v12  ;;  %v11481_v12 = vld [vmem:[%s27072_s5 + $0x110] sm:$0xff] }
 0x770   : > { %20383 = vmatprep.mubr.msk.f32.mxu1 %vm419_vm1, %v26304_v29  ;;  %v11482_v29 = vld [vmem:[%s27072_s5 + $0x118] sm:$0xff] }
 0x773   : > { %20384 = vmatmul.mubr.msk.f32.gmra.mrb[88].mxu1 %vm419_vm1, %v26308_v15  ;;  %v21015_v15 = vpack.c.bf16 %v11482_v29, %v11481_v12  ;;  %v13159_v29 = vld [vmem:[#allocation5 + $0x11] sm:$0xff]  ;;  %v11487_v12 = vld [vmem:[%s27072_s5 + $0x140] sm:$0xff] }
 0x774   : > { %20386 = vmatprep.mubr.msk.f32.mxu1 %vm419_vm1, %v26312_v1  ;;  %v11483_v1 = vld [vmem:[%s27072_s5 + $0x120] sm:$0xff] }
 0x777   : > { %20387 = vmatmul.mubr.msk.f32.gmra.mrb[90].mxu1 %vm419_vm1, %v26316_v28  ;;  %v21019_v28 = vpack.c.bf16 %v11484_v23, %v11483_v1  ;;  %v11485_v1 = vld [vmem:[%s27072_s5 + $0x130] sm:$0xff] }
 0x778   : > { %20397 = vmatprep.mubr.msk.f32.mxu1 %vm419_vm1, %v25940_v59  ;;  %v26356_v59 = vld [vmem:[#allocation5 + $0x70] sm:$0xff]  ;;  %v13160_v23 = vld [vmem:[#allocation5 + $0x19] sm:$0xff] }
 0x779   : > { %27472 = vst [vmem:[#allocation49_spill] sm:$0xff] %v26356_v59 }
 0x77b   : > { %20398 = vmatmul.mubr.msk.f32.vlgmr.msra.gmra.mrb[78].mxu1 %vm419_vm1, %v25954_v5  ;;  %v26360_v5 = vld [vmem:[#allocation5 + $0x78] sm:$0xff] }
 0x77c   : > { %21014 = vmatpush3.bf16.msra.mxu1 %v21011_v24  ;;  %20400 = vmatprep.mubr.msk.f32.mxu1 %vm419_vm1, %v25960_v38  ;;  %27473 = vst [vmem:[#allocation50_spill] sm:$0xff] %v26360_v5 }
 0x77d   : > { %21016 = vmatprep.subr.bf16.mxu1 %v21015_v15 }
 0x77f   : > { %20401 = vmatmul.mubr.msk.f32.gmra.mrb[80].mxu1 %vm419_vm1, %v25970_v25 }
 0x780   : > { %20403 = vmatprep.mubr.msk.f32.mxu1 %vm419_vm1, %v25976_v63  ;;  %21018 = vmatpush3.bf16.msra.mxu1 %v21015_v15  ;;  %v11486_v15 = vld [vmem:[%s27072_s5 + $0x138] sm:$0xff] }
 0x781   : > { %21020 = vmatprep.subr.bf16.mxu1 %v21019_v28  ;;  %v21023_v24 = vpack.c.bf16 %v11486_v15, %v11485_v1  ;;  %v13163_v1 = vld [vmem:[#allocation5 + $0x31] sm:$0xff]  ;;  %v26381_v15 = vld [vmem:[#allocation5 + $0x39] sm:$0xff] }
 0x782   : > { %27474 = vst [vmem:[#allocation51_spill] sm:$0xff] %v26381_v15 }
 0x783   : > { %20404 = vmatmul.mubr.msk.f32.gmra.mrb[82].mxu1 %vm419_vm1, %v25983_v2 }
 0x784   : > { %20406 = vmatprep.mubr.msk.f32.mxu1 %vm419_vm1, %v25989_v21 }
 0x787   : > { %20407 = vmatmul.mubr.msk.f32.gmra.mrb[84].mxu1 %vm419_vm1, %v25995_v4 }
 0x788   : > { %20409 = vmatprep.mubr.msk.f32.mxu1 %vm419_vm1, %v26000_v22 }
 0x78b   : > { %20410 = vmatmul.mubr.msk.f32.gmra.mrb[86].mxu1 %vm419_vm1, %v26005_v52 }
 0x78c   : > { %20412 = vmatprep.mubr.msk.f32.mxu1 %vm419_vm1, %v26009_v57  ;;  %v13162_v57 = vld [vmem:[#allocation5 + $0x29] sm:$0xff] }
 0x78f   : > { %20413 = vmatmul.mubr.msk.f32.gmra.mrb[88].mxu1 %vm419_vm1, %v26013_v37  ;;  %v13161_v37 = vld [vmem:[#allocation5 + $0x21] sm:$0xff] }
 0x790   : > { %20415 = vmatprep.mubr.msk.f32.mxu1 %vm419_vm1, %v26356_v59  ;;  %v11488_v59 = vld [vmem:[%s27072_s5 + $0x148] sm:$0xff] }
 0x793   : > { %20416 = vmatmul.mubr.msk.f32.gmra.mrb[90].mxu1 %vm419_vm1, %v26360_v5  ;;  %v21027_v5 = vpack.c.bf16 %v11488_v59, %v11487_v12  ;;  %v11492_v59 = vld [vmem:[%s27072_s5 + $0x168] sm:$0xff]  ;;  %v11495_v12 = vld [vmem:[%s27072_s5 + $0x180] sm:$0xff] }
 0x794   : > { %20426 = vmatprep.mubr.msk.f32.mxu1 %vm419_vm1, %v13159_v29  ;;  %v22146_v29 = vld [vmem:[#allocation5 + $0x41] sm:$0xff] }
 0x797   : > { %20427 = vmatmul.mubr.msk.f32.vlgmr.msra.gmra.mrb[78].mxu1 %vm419_vm1, %v13160_v23 }
 0x798   : > { %21022 = vmatpush3.bf16.msra.mxu1 %v21019_v28  ;;  %20429 = vmatprep.mubr.msk.f32.mxu1 %vm419_vm1, %v13161_v37  ;;  %v22147_v28 = vld [vmem:[#allocation5 + $0x49] sm:$0xff]  ;;  %v26399_v37 = vld [vmem:[#allocation5 + $0x79] sm:$0xff] }
 0x799   : > { %21024 = vmatprep.subr.bf16.mxu1 %v21023_v24  ;;  %27476 = vst [vmem:[#allocation53_spill] sm:$0xff] %v26399_v37 }
 0x79b   : > { %20430 = vmatmul.mubr.msk.f32.gmra.mrb[80].mxu1 %vm419_vm1, %v13162_v57  ;;  %v26395_v57 = vld [vmem:[#allocation5 + $0x71] sm:$0xff] }
 0x79c   : > { %20432 = vmatprep.mubr.msk.f32.mxu1 %vm419_vm1, %v13163_v1  ;;  %21026 = vmatpush3.bf16.msra.mxu1 %v21023_v24  ;;  %27475 = vst [vmem:[#allocation52_spill] sm:$0xff] %v26395_v57  ;;  %v11496_v1 = vld [vmem:[%s27072_s5 + $0x188] sm:$0xff] }
 0x79d   : > { %21028 = vmatprep.subr.bf16.mxu1 %v21027_v5 }
 0x79f   : > { %20433 = vmatmul.mubr.msk.f32.gmra.mrb[82].mxu1 %vm419_vm1, %v26381_v15  ;;  %v11502_v15 = vld [vmem:[%s27072_s5 + $0x1b8] sm:$0xff] }
 0x7a0   : > { %20435 = vmatprep.mubr.msk.f32.mxu1 %vm419_vm1, %v22146_v29  ;;  %v21043_v29 = vpack.c.bf16 %v11496_v1, %v11495_v12  ;;  %v26511_v12 = vld [vmem:[#allocation5 + $0x35] sm:$0xff]  ;;  %v26515_v1 = vld [vmem:[#allocation5 + $0x3d] sm:$0xff] }
 0x7a3   : > { %20436 = vmatmul.mubr.msk.f32.gmra.mrb[84].mxu1 %vm419_vm1, %v22147_v28  ;;  %v26489_v28 = vld [vmem:[#allocation5 + $0x84] sm:$0xff] }
 0x7a4   : > { %20438 = vmatprep.mubr.msk.f32.mxu1 %vm419_vm1, %v25842_v43  ;;  %v11489_v43 = vld [vmem:[%s27072_s5 + $0x150] sm:$0xff] }
 0x7a7   : > { %20439 = vmatmul.mubr.msk.f32.gmra.mrb[86].mxu1 %vm419_vm1, %v25844_v62  ;;  %v11490_v62 = vld [vmem:[%s27072_s5 + $0x158] sm:$0xff] }
 0x7a8   : > { %20441 = vmatprep.mubr.msk.f32.mxu1 %vm419_vm1, %v25877_v39  ;;  %v21031_v39 = vpack.c.bf16 %v11490_v62, %v11489_v43  ;;  %v11497_v43 = vld [vmem:[%s27072_s5 + $0x190] sm:$0xff]  ;;  %v11498_v62 = vld [vmem:[%s27072_s5 + $0x198] sm:$0xff] }
 0x7ab   : > { %20442 = vmatmul.mubr.msk.f32.gmra.mrb[88].mxu1 %vm419_vm1, %v25909_v36  ;;  %v11491_v36 = vld [vmem:[%s27072_s5 + $0x160] sm:$0xff] }
 0x7ac   : > { %20444 = vmatprep.mubr.msk.f32.mxu1 %vm419_vm1, %v26395_v57  ;;  %v21035_v24 = vpack.c.bf16 %v11492_v59, %v11491_v36  ;;  %v21047_v36 = vpack.c.bf16 %v11498_v62, %v11497_v43  ;;  %v13775_v59 = vld [vmem:[#allocation5 + $0x25] sm:$0xff]  ;;  %v26527_v62 = vld [vmem:[#allocation5 + $0x55] sm:$0xff] }
 0x7ad   : > { %v26519_v43 = vld [vmem:[#allocation5 + $0x45] sm:$0xff]  ;;  %v11501_v57 = vld [vmem:[%s27072_s5 + $0x1b0] sm:$0xff] }
 0x7af   : > { %20445 = vmatmul.mubr.msk.f32.gmra.mrb[90].mxu1 %vm419_vm1, %v26399_v37  ;;  %v26551_v37 = vld [vmem:[#allocation5 + $0x85] sm:$0xff] }
 0x7b0   : > { %20455 = vmatprep.mubr.msk.f32.mxu1 %vm419_vm1, %v26034_v35  ;;  %v26439_v35 = vld [vmem:[#allocation5 + $0x72] sm:$0xff]  ;;  %27480 = vst [vmem:[#allocation57_spill] sm:$0xff] %v26551_v37 }
 0x7b3   : > { %20456 = vmatmul.mubr.msk.f32.vlgmr.msra.gmra.mrb[78].mxu1 %vm419_vm1, %v26040_v44  ;;  %v26443_v44 = vld [vmem:[#allocation5 + $0x7a] sm:$0xff] }
 0x7b4   : > { %21030 = vmatpush3.bf16.msra.mxu1 %v21027_v5  ;;  %20458 = vmatprep.mubr.msk.f32.mxu1 %vm419_vm1, %v26044_v46  ;;  %v11493_v46 = vld [vmem:[%s27072_s5 + $0x170] sm:$0xff]  ;;  %v11494_v5 = vld [vmem:[%s27072_s5 + $0x178] sm:$0xff] }
 0x7b5   : > { %21032 = vmatprep.subr.bf16.mxu1 %v21031_v39  ;;  %v21039_v23 = vpack.c.bf16 %v11494_v5, %v11493_v46  ;;  %v11500_v46 = vld [vmem:[%s27072_s5 + $0x1a8] sm:$0xff] }
 0x7b6   : > { %v26507_v5 = vld [vmem:[#allocation5 + $0x2d] sm:$0xff] }
 0x7b7   : > { %20459 = vmatmul.mubr.msk.f32.gmra.mrb[80].mxu1 %vm419_vm1, %v26048_v18 }
 0x7b8   : > { %20461 = vmatprep.mubr.msk.f32.mxu1 %vm419_vm1, %v26052_v27  ;;  %21034 = vmatpush3.bf16.msra.mxu1 %v21031_v39  ;;  %v13774_v39 = vld [vmem:[#allocation5 + $0x1d] sm:$0xff] }
 0x7b9   : > { %21036 = vmatprep.subr.bf16.mxu1 %v21035_v24 }
 0x7bb   : > { %20462 = vmatmul.mubr.msk.f32.gmra.mrb[82].mxu1 %vm419_vm1, %v26056_v14 }
 0x7bc   : > { %20464 = vmatprep.mubr.msk.f32.mxu1 %vm419_vm1, %v26060_v49 }
 0x7bf   : > { %20465 = vmatmul.mubr.msk.f32.gmra.mrb[84].mxu1 %vm419_vm1, %v26064_v55 }
 0x7c0   : > { %20467 = vmatprep.mubr.msk.f32.mxu1 %vm419_vm1, %v26068_v19 }
 0x7c3   : > { %20468 = vmatmul.mubr.msk.f32.gmra.mrb[86].mxu1 %vm419_vm1, %v26072_v9 }
 0x7c4   : > { %20470 = vmatprep.mubr.msk.f32.mxu1 %vm419_vm1, %v26076_v3 }
 0x7c7   : > { %20471 = vmatmul.mubr.msk.f32.gmra.mrb[88].mxu1 %vm419_vm1, %v26080_v41 }
 0x7c8   : > { %20473 = vmatprep.mubr.msk.f32.mxu1 %vm419_vm1, %v26439_v35 }
 0x7cb   : > { %20474 = vmatmul.mubr.msk.f32.gmra.mrb[90].mxu1 %vm419_vm1, %v26443_v44 }
 0x7cc   : > { %20484 = vmatprep.mubr.msk.f32.mxu1 %vm419_vm1, %v26152_v42  ;;  %v26481_v42 = vld [vmem:[#allocation5 + $0x74] sm:$0xff] }
 0x7cf   : > { %20485 = vmatmul.mubr.msk.f32.vlgmr.msra.gmra.mrb[78].mxu1 %vm419_vm1, %v26156_v26  ;;  %v26485_v26 = vld [vmem:[#allocation5 + $0x7c] sm:$0xff] }
 0x7d0   : > { %21038 = vmatpush3.bf16.msra.mxu1 %v21035_v24  ;;  %20487 = vmatprep.mubr.msk.f32.mxu1 %vm419_vm1, %v26160_v0  ;;  %v11499_v24 = vld [vmem:[%s27072_s5 + $0x1a0] sm:$0xff] }
 0x7d1   : > { %21040 = vmatprep.subr.bf16.mxu1 %v21039_v23 }
 0x7d3   : > { %20488 = vmatmul.mubr.msk.f32.gmra.mrb[80].mxu1 %vm419_vm1, %v26164_v47 }
 0x7d4   : > { %20490 = vmatprep.mubr.msk.f32.mxu1 %vm419_vm1, %v26168_v32  ;;  %21042 = vmatpush3.bf16.msra.mxu1 %v21039_v23  ;;  %v21051_v23 = vpack.c.bf16 %v11500_v46, %v11499_v24  ;;  %v26543_v24 = vld [vmem:[#allocation5 + $0x75] sm:$0xff]  ;;  %v26547_v46 = vld [vmem:[#allocation5 + $0x7d] sm:$0xff] }
 0x7d5   : > { %21044 = vmatprep.subr.bf16.mxu1 %v21043_v29  ;;  %27478 = vst [vmem:[#allocation55_spill] sm:$0xff] %v26543_v24  ;;  %27479 = vst [vmem:[#allocation56_spill] sm:$0xff] %v26547_v46 }
 0x7d7   : > { %20491 = vmatmul.mubr.msk.f32.gmra.mrb[82].mxu1 %vm419_vm1, %v26172_v16 }
 0x7d8   : > { %20493 = vmatprep.mubr.msk.f32.mxu1 %vm419_vm1, %v26176_v8 }
 0x7db   : > { %20494 = vmatmul.mubr.msk.f32.gmra.mrb[84].mxu1 %vm419_vm1, %v26180_v48 }
 0x7dc   : > { %20496 = vmatprep.mubr.msk.f32.mxu1 %vm419_vm1, %v26184_v11 }
 0x7df   : > { %20497 = vmatmul.mubr.msk.f32.gmra.mrb[86].mxu1 %vm419_vm1, %v26188_v56 }
 0x7e0   : > { %20499 = vmatprep.mubr.msk.f32.mxu1 %vm419_vm1, %v26192_v20 }
 0x7e3   : > { %20500 = vmatmul.mubr.msk.f32.gmra.mrb[88].mxu1 %vm419_vm1, %v26481_v42 }
 0x7e4   : > { %20502 = vmatprep.mubr.msk.f32.mxu1 %vm419_vm1, %v26485_v26 }
 0x7e7   : > { %20503 = vmatmul.mubr.msk.f32.gmra.mrb[90].mxu1 %vm419_vm1, %v26489_v28 }
 0x7e8   : > { %20513 = vmatprep.mubr.msk.f32.mxu1 %vm419_vm1, %v13774_v39  ;;  %v26531_v39 = vld [vmem:[#allocation5 + $0x5d] sm:$0xff] }
 0x7eb   : > { %20514 = vmatmul.mubr.msk.f32.vlgmr.msra.gmra.mrb[78].mxu1 %vm419_vm1, %v13775_v59  ;;  %v26539_v59 = vld [vmem:[#allocation5 + $0x6d] sm:$0xff] }
 0x7ec   : > { %21046 = vmatpush3.bf16.msra.mxu1 %v21043_v29  ;;  %20516 = vmatprep.mubr.msk.f32.mxu1 %vm419_vm1, %v26507_v5  ;;  %v26523_v29 = vld [vmem:[#allocation5 + $0x4d] sm:$0xff]  ;;  %27477 = vst [vmem:[#allocation54_spill] sm:$0xff] %v26539_v59 }
 0x7ed   : > { %21048 = vmatprep.subr.bf16.mxu1 %v21047_v36 }
 0x7ef   : > { %20517 = vmatmul.mubr.msk.f32.gmra.mrb[80].mxu1 %vm419_vm1, %v26511_v12 }
 0x7f0   : > { %20519 = vmatprep.mubr.msk.f32.mxu1 %vm419_vm1, %v26515_v1  ;;  %21050 = vmatpush3.bf16.msra.mxu1 %v21047_v36  ;;  %v26535_v36 = vld [vmem:[#allocation5 + $0x65] sm:$0xff] }
 0x7f1   : > { %21052 = vmatprep.subr.bf16.mxu1 %v21051_v23 }
 0x7f3   : > { %20520 = vmatmul.mubr.msk.f32.gmra.mrb[82].mxu1 %vm419_vm1, %v26519_v43 }
 0x7f4   : > { %20522 = vmatprep.mubr.msk.f32.mxu1 %vm419_vm1, %v26523_v29 }
 0x7f7   : > { %20523 = vmatmul.mubr.msk.f32.gmra.mrb[84].mxu1 %vm419_vm1, %v26527_v62 }
 0x7f8   : > { %20525 = vmatprep.mubr.msk.f32.mxu1 %vm419_vm1, %v26531_v39 }
 0x7fb   : > { %20526 = vmatmul.mubr.msk.f32.gmra.mrb[86].mxu1 %vm419_vm1, %v26535_v36 }
 0x7fc   : > { %20528 = vmatprep.mubr.msk.f32.mxu1 %vm419_vm1, %v26539_v59  ;;  %v11504_v59 = vld [vmem:[%s27072_s5 + $0x1c8] sm:$0xff] }
 0x7ff   : > { %20529 = vmatmul.mubr.msk.f32.gmra.mrb[88].mxu1 %vm419_vm1, %v26543_v24  ;;  %v21055_v24 = vpack.c.bf16 %v11502_v15, %v11501_v57  ;;  %v11511_v57 = vld [vmem:[%s27072_s5 + $0x200] sm:$0xff] }
 0x800   : > { %20531 = vmatprep.mubr.msk.f32.mxu1 %vm419_vm1, %v26547_v46  ;;  %v11503_v46 = vld [vmem:[%s27072_s5 + $0x1c0] sm:$0xff] }
 0x803   : > { %20532 = vmatmul.mubr.msk.f32.gmra.mrb[90].mxu1 %vm419_vm1, %v26551_v37  ;;  %v21059_v37 = vpack.c.bf16 %v11504_v59, %v11503_v46  ;;  %v11516_v46 = vld [vmem:[%s27072_s5 + $0x228] sm:$0xff] }
 0x804   : > { %20542 = vmatprep.mubr.msk.f32.mxu1 %vm419_vm1, %v26210_v53  ;;  %v26591_v53 = vld [vmem:[#allocation5 + $0x7e] sm:$0xff] }
 0x807   : > { %20543 = vmatmul.mubr.msk.f32.vlgmr.msra.gmra.mrb[78].mxu1 %vm419_vm1, %v26214_v30  ;;  %v26595_v30 = vld [vmem:[#allocation5 + $0x86] sm:$0xff] }
 0x808   : > { %21054 = vmatpush3.bf16.msra.mxu1 %v21051_v23  ;;  %20545 = vmatprep.mubr.msk.f32.mxu1 %vm419_vm1, %v26218_v13  ;;  %v11505_v13 = vld [vmem:[%s27072_s5 + $0x1d0] sm:$0xff] }
 0x809   : > { %21056 = vmatprep.subr.bf16.mxu1 %v21055_v24 }
 0x80b   : > { %20546 = vmatmul.mubr.msk.f32.gmra.mrb[80].mxu1 %vm419_vm1, %v26222_v45  ;;  %v11506_v45 = vld [vmem:[%s27072_s5 + $0x1d8] sm:$0xff] }
 0x80c   : > { %20548 = vmatprep.mubr.msk.f32.mxu1 %vm419_vm1, %v26226_v33  ;;  %21058 = vmatpush3.bf16.msra.mxu1 %v21055_v24  ;;  %v21063_v33 = vpack.c.bf16 %v11506_v45, %v11505_v13  ;;  %v11515_v24 = vld [vmem:[%s27072_s5 + $0x220] sm:$0xff]  ;;  %v27492_v45 = vld [vmem:[#allocation35_spill] sm:$0xff] }
 0x80d   : > { %21060 = vmatprep.subr.bf16.mxu1 %v21059_v37  ;;  %v21083_v13 = vpack.c.bf16 %v11516_v46, %v11515_v24  ;;  %v15418_v24 = vld [vmem:[#allocation5 + $0x4e] sm:$0xff]  ;;  %v15419_v46 = vld [vmem:[#allocation5 + $0x56] sm:$0xff] }
 0x80f   : > { %20549 = vmatmul.mubr.msk.f32.gmra.mrb[82].mxu1 %vm419_vm1, %v26230_v17  ;;  %v11507_v17 = vld [vmem:[%s27072_s5 + $0x1e0] sm:$0xff] }
 0x810   : > { %20551 = vmatprep.mubr.msk.f32.mxu1 %vm419_vm1, %v26234_v58  ;;  %v11508_v58 = vld [vmem:[%s27072_s5 + $0x1e8] sm:$0xff] }
 0x813   : > { %20552 = vmatmul.mubr.msk.f32.gmra.mrb[84].mxu1 %vm419_vm1, %v26238_v61  ;;  %v21067_v61 = vpack.c.bf16 %v11508_v58, %v11507_v17  ;;  %v27494_v58 = vld [vmem:[#allocation37_spill] sm:$0xff] }
 0x814   : > { %20554 = vmatprep.mubr.msk.f32.mxu1 %vm419_vm1, %v26242_v7  ;;  %v27482_v7 = vld [vmem:[#allocation44_spill] sm:$0xff] }
 0x817   : > { %20555 = vmatmul.mubr.msk.f32.gmra.mrb[86].mxu1 %vm419_vm1, %v26246_v40  ;;  %v27483_v40 = vld [vmem:[#allocation45_spill] sm:$0xff] }
 0x818   : > { %20557 = vmatprep.mubr.msk.f32.mxu1 %vm419_vm1, %v26250_v60  ;;  %v27484_v60 = vld [vmem:[#allocation46_spill] sm:$0xff] }
 0x81b   : > { %20558 = vmatmul.mubr.msk.f32.gmra.mrb[88].mxu1 %vm419_vm1, %v26254_v10  ;;  %v27485_v10 = vld [vmem:[#allocation47_spill] sm:$0xff] }
 0x81c   : > { %20560 = vmatprep.mubr.msk.f32.mxu1 %vm419_vm1, %v26591_v53 }
 0x81f   : > { %20561 = vmatmul.mubr.msk.f32.gmra.mrb[90].mxu1 %vm419_vm1, %v26595_v30 }
 0x820   : > { %20571 = vmatprep.mubr.msk.f32.mxu1 %vm419_vm1, %v26272_v54  ;;  %v27481_v54 = vld [vmem:[#allocation43_spill] sm:$0xff] }
 0x823   : > { %20572 = vmatmul.mubr.msk.f32.vlgmr.msra.gmra.mrb[78].mxu1 %vm419_vm1, %v26276_v51  ;;  %v27486_v51 = vld [vmem:[#allocation48_spill] sm:$0xff] }
 0x824   : > { %21062 = vmatpush3.bf16.msra.mxu1 %v21059_v37  ;;  %20574 = vmatprep.mubr.msk.f32.mxu1 %vm419_vm1, %v26280_v31  ;;  %v14196_v31 = vld [vmem:[#allocation5 + $0x7f] sm:$0xff]  ;;  %v11512_v37 = vld [vmem:[%s27072_s5 + $0x208] sm:$0xff] }
 0x825   : > { %21064 = vmatprep.subr.bf16.mxu1 %v21063_v33  ;;  %v21075_v23 = vpack.c.bf16 %v11512_v37, %v11511_v57  ;;  %v11523_v37 = vld [vmem:[%s27072_s5 + $0x260] sm:$0xff] }
 0x827   : > { %20575 = vmatmul.mubr.msk.f32.gmra.mrb[80].mxu1 %vm419_vm1, %v26284_v50  ;;  %v14197_v50 = vld [vmem:[#allocation5 + $0x87] sm:$0xff] }
 0x828   : > { %20577 = vmatprep.mubr.msk.f32.mxu1 %vm419_vm1, %v26288_v6  ;;  %21066 = vmatpush3.bf16.msra.mxu1 %v21063_v33  ;;  %v11509_v6 = vld [vmem:[%s27072_s5 + $0x1f0] sm:$0xff]  ;;  %v27493_v33 = vld [vmem:[#allocation36_spill] sm:$0xff] }
 0x829   : > { %21068 = vmatprep.subr.bf16.mxu1 %v21067_v61 }
 0x82b   : > { %20578 = vmatmul.mubr.msk.f32.gmra.mrb[82].mxu1 %vm419_vm1, %v26292_v34  ;;  %v11510_v34 = vld [vmem:[%s27072_s5 + $0x1f8] sm:$0xff] }
 0x82c   : > { %20580 = vmatprep.mubr.msk.f32.mxu1 %vm419_vm1, %v27481_v54  ;;  %v21071_v15 = vpack.c.bf16 %v11510_v34, %v11509_v6  ;;  %v27496_v54 = vld [vmem:[#allocation39_spill] sm:$0xff] }
 0x82d   : > { %v26773_v6 = vld [vmem:[#allocation5 + $0x93] sm:$0xff] }
 0x82e   : > { %v11521_v34 = vld [vmem:[%s27072_s5 + $0x250] sm:$0xff] }
 0x82f   : > { %20581 = vmatmul.mubr.msk.f32.gmra.mrb[84].mxu1 %vm419_vm1, %v27482_v7  ;;  %v27497_v7 = vld [vmem:[#allocation40_spill] sm:$0xff] }
 0x830   : > { %20583 = vmatprep.mubr.msk.f32.mxu1 %vm419_vm1, %v27483_v40  ;;  %v27498_v40 = vld [vmem:[#allocation41_spill] sm:$0xff] }
 0x833   : > { %20584 = vmatmul.mubr.msk.f32.gmra.mrb[86].mxu1 %vm419_vm1, %v27484_v60  ;;  %v27499_v60 = vld [vmem:[#allocation42_spill] sm:$0xff] }
 0x834   : > { %20586 = vmatprep.mubr.msk.f32.mxu1 %vm419_vm1, %v27485_v10  ;;  %v26757_v10 = vld [vmem:[#allocation5 + $0x73] sm:$0xff] }
 0x837   : > { %20587 = vmatmul.mubr.msk.f32.gmra.mrb[88].mxu1 %vm419_vm1, %v27486_v51  ;;  %v26761_v51 = vld [vmem:[#allocation5 + $0x7b] sm:$0xff] }
 0x838   : > { %20589 = vmatprep.mubr.msk.f32.mxu1 %vm419_vm1, %v14196_v31  ;;  %v26765_v31 = vld [vmem:[#allocation5 + $0x83] sm:$0xff] }
 0x83b   : > { %20590 = vmatmul.mubr.msk.f32.gmra.mrb[90].mxu1 %vm419_vm1, %v14197_v50  ;;  %v26769_v50 = vld [vmem:[#allocation5 + $0x8b] sm:$0xff] }
 0x83c   : > { %20600 = vmatprep.mubr.msk.f32.mxu1 %vm419_vm1, %v25960_v38  ;;  %v27487_v38 = vld [vmem:[#allocation8_spill] sm:$0xff] }
 0x83f   : > { %20601 = vmatmul.mubr.msk.f32.vlgmr.msra.gmra.mrb[78].mxu1 %vm419_vm1, %v25970_v25  ;;  %v27488_v25 = vld [vmem:[#allocation33_spill] sm:$0xff] }
 0x840   : > { %21070 = vmatpush3.bf16.msra.mxu1 %v21067_v61  ;;  %20603 = vmatprep.mubr.msk.f32.mxu1 %vm419_vm1, %v25976_v63  ;;  %v27489_v63 = vld [vmem:[#allocation49_spill] sm:$0xff]  ;;  %v27495_v61 = vld [vmem:[#allocation38_spill] sm:$0xff] }
 0x841   : > { %21072 = vmatprep.subr.bf16.mxu1 %v21071_v15 }
 0x843   : > { %20604 = vmatmul.mubr.msk.f32.gmra.mrb[80].mxu1 %vm419_vm1, %v25983_v2  ;;  %v27490_v2 = vld [vmem:[#allocation50_spill] sm:$0xff] }
 0x844   : > { %20606 = vmatprep.mubr.msk.f32.mxu1 %vm419_vm1, %v25989_v21  ;;  %21074 = vmatpush3.bf16.msra.mxu1 %v21071_v15  ;;  %v26673_v21 = vld [vmem:[#allocation5 + $0x80] sm:$0xff] }
 0x845   : > { %21076 = vmatprep.subr.bf16.mxu1 %v21075_v23  ;;  %v11522_v15 = vld [vmem:[%s27072_s5 + $0x258] sm:$0xff] }
 0x846   : > { %v21095_v57 = vpack.c.bf16 %v11522_v15, %v11521_v34  ;;  %v15625_v34 = vld [vmem:[#allocation5 + $0x68] sm:$0xff]  ;;  %v15630_v15 = vld [vmem:[#allocation5 + $0x90] sm:$0xff] }
 0x847   : > { %20607 = vmatmul.mubr.msk.f32.gmra.mrb[82].mxu1 %vm419_vm1, %v25995_v4  ;;  %v26677_v4 = vld [vmem:[#allocation5 + $0x88] sm:$0xff] }
 0x848   : > { %20609 = vmatprep.mubr.msk.f32.mxu1 %vm419_vm1, %v26000_v22  ;;  %v11513_v22 = vld [vmem:[%s27072_s5 + $0x210] sm:$0xff] }
 0x84b   : > { %20610 = vmatmul.mubr.msk.f32.gmra.mrb[84].mxu1 %vm419_vm1, %v26005_v52  ;;  %v11514_v52 = vld [vmem:[%s27072_s5 + $0x218] sm:$0xff] }
 0x84c   : > { %20612 = vmatprep.mubr.msk.f32.mxu1 %vm419_vm1, %v27487_v38  ;;  %v21079_v59 = vpack.c.bf16 %v11514_v52, %v11513_v22  ;;  %v15416_v22 = vld [vmem:[#allocation5 + $0x3e] sm:$0xff] }
 0x84f   : > { %20613 = vmatmul.mubr.msk.f32.gmra.mrb[86].mxu1 %vm419_vm1, %v27488_v25  ;;  %v11532_v25 = vld [vmem:[%s27072_s5 + $0x2a8] sm:$0xff] }
 0x850   : > { %20615 = vmatprep.mubr.msk.f32.mxu1 %vm419_vm1, %v27489_v63 }
 0x853   : > { %20616 = vmatmul.mubr.msk.f32.gmra.mrb[88].mxu1 %vm419_vm1, %v27490_v2 }
 0x854   : > { %20618 = vmatprep.mubr.msk.f32.mxu1 %vm419_vm1, %v26673_v21 }
 0x857   : > { %20619 = vmatmul.mubr.msk.f32.gmra.mrb[90].mxu1 %vm419_vm1, %v26677_v4 }
 0x858   : > { %20629 = vmatprep.mubr.msk.f32.mxu1 %vm419_vm1, %v26048_v18  ;;  %v26715_v18 = vld [vmem:[#allocation5 + $0x82] sm:$0xff] }
 0x85b   : > { %20630 = vmatmul.mubr.msk.f32.vlgmr.msra.gmra.mrb[78].mxu1 %vm419_vm1, %v26052_v27  ;;  %v26719_v27 = vld [vmem:[#allocation5 + $0x8a] sm:$0xff] }
 0x85c   : > { %21078 = vmatpush3.bf16.msra.mxu1 %v21075_v23  ;;  %20632 = vmatprep.mubr.msk.f32.mxu1 %vm419_vm1, %v26056_v14  ;;  %v26723_v14 = vld [vmem:[#allocation5 + $0x92] sm:$0xff] }
 0x85d   : > { %21080 = vmatprep.subr.bf16.mxu1 %v21079_v59  ;;  %v11524_v23 = vld [vmem:[%s27072_s5 + $0x268] sm:$0xff] }
 0x85e   : > { %v21099_v38 = vpack.c.bf16 %v11524_v23, %v11523_v37  ;;  %v15632_v37 = vld [vmem:[#allocation5 + $0xa0] sm:$0xff] }
 0x85f   : > { %20633 = vmatmul.mubr.msk.f32.gmra.mrb[80].mxu1 %vm419_vm1, %v26060_v49  ;;  %v11517_v49 = vld [vmem:[%s27072_s5 + $0x230] sm:$0xff]  ;;  %v15825_v23 = vld [vmem:[#allocation5 + $0x41] sm:$0xff] }
 0x860   : > { %20635 = vmatprep.mubr.msk.f32.mxu1 %vm419_vm1, %v26064_v55  ;;  %21082 = vmatpush3.bf16.msra.mxu1 %v21079_v59  ;;  %v11518_v55 = vld [vmem:[%s27072_s5 + $0x238] sm:$0xff] }
 0x861   : > { %21084 = vmatprep.subr.bf16.mxu1 %v21083_v13  ;;  %v15417_v59 = vld [vmem:[#allocation5 + $0x46] sm:$0xff] }
 0x863   : > { %20636 = vmatmul.mubr.msk.f32.gmra.mrb[82].mxu1 %vm419_vm1, %v26068_v19  ;;  %v27491_v19 = vld [vmem:[#allocation34_spill] sm:$0xff] }
 0x864   : > { %20638 = vmatprep.mubr.msk.f32.mxu1 %vm419_vm1, %v26072_v9  ;;  %v21087_v9 = vpack.c.bf16 %v11518_v55, %v11517_v49  ;;  %v15421_v49 = vld [vmem:[#allocation5 + $0x66] sm:$0xff]  ;;  %v15422_v55 = vld [vmem:[#allocation5 + $0x6e] sm:$0xff] }
 0x867   : > { %20639 = vmatmul.mubr.msk.f32.gmra.mrb[84].mxu1 %vm419_vm1, %v26076_v3  ;;  %v11519_v3 = vld [vmem:[%s27072_s5 + $0x240] sm:$0xff] }
 0x868   : > { %20641 = vmatprep.mubr.msk.f32.mxu1 %vm419_vm1, %v26080_v41  ;;  %v11520_v41 = vld [vmem:[%s27072_s5 + $0x248] sm:$0xff] }
 0x869   : > { %v21091_v17 = vpack.c.bf16 %v11520_v41, %v11519_v3  ;;  %v15427_v3 = vld [vmem:[#allocation5 + $0x96] sm:$0xff] }
 0x86a   : > { %v11533_v41 = vld [vmem:[%s27072_s5 + $0x2b0] sm:$0xff] }
 0x86b   : > { %20642 = vmatmul.mubr.msk.f32.gmra.mrb[86].mxu1 %vm419_vm1, %v26439_v35 }
 0x86c   : > { %20644 = vmatprep.mubr.msk.f32.mxu1 %vm419_vm1, %v26443_v44 }
 0x86f   : > { %20645 = vmatmul.mubr.msk.f32.gmra.mrb[88].mxu1 %vm419_vm1, %v26715_v18 }
 0x870   : > { %20647 = vmatprep.mubr.msk.f32.mxu1 %vm419_vm1, %v26719_v27 }
 0x873   : > { %20648 = vmatmul.mubr.msk.f32.gmra.mrb[90].mxu1 %vm419_vm1, %v26723_v14 }
 0x874   : > { %20658 = vmatprep.mubr.msk.f32.mxu1 %vm419_vm1, %v27491_v19  ;;  %v15423_v19 = vld [vmem:[#allocation5 + $0x76] sm:$0xff] }
 0x877   : > { %20659 = vmatmul.mubr.msk.f32.vlgmr.msra.gmra.mrb[78].mxu1 %vm419_vm1, %v27492_v45  ;;  %v11534_v45 = vld [vmem:[%s27072_s5 + $0x2b8] sm:$0xff] }
 0x878   : > { %21086 = vmatpush3.bf16.msra.mxu1 %v21083_v13  ;;  %20661 = vmatprep.mubr.msk.f32.mxu1 %vm419_vm1, %v27493_v33  ;;  %v15420_v13 = vld [vmem:[#allocation5 + $0x5e] sm:$0xff] }
 0x879   : > { %21088 = vmatprep.subr.bf16.mxu1 %v21087_v9  ;;  %v15619_v33 = vld [vmem:[#allocation5 + $0x38] sm:$0xff] }
 0x87b   : > { %20662 = vmatmul.mubr.msk.f32.gmra.mrb[80].mxu1 %vm419_vm1, %v27494_v58  ;;  %v11536_v58 = vld [vmem:[%s27072_s5 + $0x2c8] sm:$0xff] }
 0x87c   : > { %20664 = vmatprep.mubr.msk.f32.mxu1 %vm419_vm1, %v27495_v61  ;;  %21090 = vmatpush3.bf16.msra.mxu1 %v21087_v9  ;;  %v15426_v9 = vld [vmem:[#allocation5 + $0x8e] sm:$0xff] }
 0x87d   : > { %21092 = vmatprep.subr.bf16.mxu1 %v21091_v17  ;;  %v15621_v61 = vld [vmem:[#allocation5 + $0x48] sm:$0xff] }
 0x87f   : > { %20665 = vmatmul.mubr.msk.f32.gmra.mrb[82].mxu1 %vm419_vm1, %v27496_v54 }
 0x880   : > { %20667 = vmatprep.mubr.msk.f32.mxu1 %vm419_vm1, %v27497_v7  ;;  %v15622_v7 = vld [vmem:[#allocation5 + $0x50] sm:$0xff] }
 0x883   : > { %20668 = vmatmul.mubr.msk.f32.gmra.mrb[84].mxu1 %vm419_vm1, %v27498_v40  ;;  %v15623_v40 = vld [vmem:[#allocation5 + $0x58] sm:$0xff] }
 0x884   : > { %20670 = vmatprep.mubr.msk.f32.mxu1 %vm419_vm1, %v27499_v60  ;;  %v15624_v60 = vld [vmem:[#allocation5 + $0x60] sm:$0xff] }
 0x887   : > { %20671 = vmatmul.mubr.msk.f32.gmra.mrb[86].mxu1 %vm419_vm1, %v26757_v10 }
 0x888   : > { %20673 = vmatprep.mubr.msk.f32.mxu1 %vm419_vm1, %v26761_v51 }
 0x88b   : > { %20674 = vmatmul.mubr.msk.f32.gmra.mrb[88].mxu1 %vm419_vm1, %v26765_v31 }
 0x88c   : > { %20676 = vmatprep.mubr.msk.f32.mxu1 %vm419_vm1, %v26769_v50 }
 0x88f   : > { %20677 = vmatmul.mubr.msk.f32.gmra.mrb[90].mxu1 %vm419_vm1, %v26773_v6 }
 0x890   : > { %20687 = vmatprep.mubr.msk.f32.mxu1 %vm419_vm1, %v26160_v0  ;;  %v26813_v0 = vld [vmem:[#allocation5 + $0x8c] sm:$0xff] }
 0x893   : > { %20688 = vmatmul.mubr.msk.f32.vlgmr.msra.gmra.mrb[78].mxu1 %vm419_vm1, %v26164_v47  ;;  %v26817_v47 = vld [vmem:[#allocation5 + $0x94] sm:$0xff] }
 0x894   : > { %21094 = vmatpush3.bf16.msra.mxu1 %v21091_v17  ;;  %20690 = vmatprep.mubr.msk.f32.mxu1 %vm419_vm1, %v26168_v32  ;;  %v11525_v32 = vld [vmem:[%s27072_s5 + $0x270] sm:$0xff]  ;;  %v15620_v17 = vld [vmem:[#allocation5 + $0x40] sm:$0xff] }
 0x895   : > { %21096 = vmatprep.subr.bf16.mxu1 %v21095_v57 }
 0x897   : > { %20691 = vmatmul.mubr.msk.f32.gmra.mrb[80].mxu1 %vm419_vm1, %v26172_v16  ;;  %v11526_v16 = vld [vmem:[%s27072_s5 + $0x278] sm:$0xff] }
 0x898   : > { %20693 = vmatprep.mubr.msk.f32.mxu1 %vm419_vm1, %v26176_v8  ;;  %21098 = vmatpush3.bf16.msra.mxu1 %v21095_v57  ;;  %v21103_v8 = vpack.c.bf16 %v11526_v16, %v11525_v32  ;;  %v15631_v57 = vld [vmem:[#allocation5 + $0x98] sm:$0xff]  ;;  %v11540_v32 = vld [vmem:[%s27072_s5 + $0x2e8] sm:$0xff] }
 0x899   : > { %21100 = vmatprep.subr.bf16.mxu1 %v21099_v38  ;;  %v15826_v16 = vld [vmem:[#allocation5 + $0x49] sm:$0xff] }
 0x89b   : > { %20694 = vmatmul.mubr.msk.f32.gmra.mrb[82].mxu1 %vm419_vm1, %v26180_v48  ;;  %v11527_v48 = vld [vmem:[%s27072_s5 + $0x280] sm:$0xff] }
 0x89c   : > { %20696 = vmatprep.mubr.msk.f32.mxu1 %vm419_vm1, %v26184_v11  ;;  %v11528_v11 = vld [vmem:[%s27072_s5 + $0x288] sm:$0xff] }
 0x89f   : > { %20697 = vmatmul.mubr.msk.f32.gmra.mrb[84].mxu1 %vm419_vm1, %v26188_v56  ;;  %v21107_v56 = vpack.c.bf16 %v11528_v11, %v11527_v48  ;;  %v15827_v48 = vld [vmem:[#allocation5 + $0x51] sm:$0xff]  ;;  %v15828_v11 = vld [vmem:[#allocation5 + $0x59] sm:$0xff] }
 0x8a0   : > { %20699 = vmatprep.mubr.msk.f32.mxu1 %vm419_vm1, %v26192_v20  ;;  %v27500_v20 = vld [vmem:[#allocation54_spill] sm:$0xff] }
 0x8a3   : > { %20700 = vmatmul.mubr.msk.f32.gmra.mrb[86].mxu1 %vm419_vm1, %v26481_v42  ;;  %v27501_v42 = vld [vmem:[#allocation55_spill] sm:$0xff] }
 0x8a4   : > { %20702 = vmatprep.mubr.msk.f32.mxu1 %vm419_vm1, %v26485_v26  ;;  %v27502_v26 = vld [vmem:[#allocation56_spill] sm:$0xff] }
 0x8a7   : > { %20703 = vmatmul.mubr.msk.f32.gmra.mrb[88].mxu1 %vm419_vm1, %v26489_v28  ;;  %v27503_v28 = vld [vmem:[#allocation57_spill] sm:$0xff] }
 0x8a8   : > { %20705 = vmatprep.mubr.msk.f32.mxu1 %vm419_vm1, %v26813_v0 }
 0x8ab   : > { %20706 = vmatmul.mubr.msk.f32.gmra.mrb[90].mxu1 %vm419_vm1, %v26817_v47 }
 0x8ac   : > { %20716 = vmatprep.mubr.msk.f32.mxu1 %vm419_vm1, %v26507_v5  ;;  %v15221_v5 = vld [vmem:[#allocation5 + $0x8d] sm:$0xff] }
 0x8af   : > { %20717 = vmatmul.mubr.msk.f32.vlgmr.msra.gmra.mrb[78].mxu1 %vm419_vm1, %v26511_v12  ;;  %v15222_v12 = vld [vmem:[#allocation5 + $0x95] sm:$0xff] }
 0x8b0   : > { %21102 = vmatpush3.bf16.msra.mxu1 %v21099_v38  ;;  %20719 = vmatprep.mubr.msk.f32.mxu1 %vm419_vm1, %v26515_v1  ;;  %v11529_v1 = vld [vmem:[%s27072_s5 + $0x290] sm:$0xff]  ;;  %v11539_v38 = vld [vmem:[%s27072_s5 + $0x2e0] sm:$0xff] }
 0x8b1   : > { %21104 = vmatprep.subr.bf16.mxu1 %v21103_v8 }
 0x8b3   : > { %20720 = vmatmul.mubr.msk.f32.gmra.mrb[80].mxu1 %vm419_vm1, %v26519_v43  ;;  %v11530_v43 = vld [vmem:[%s27072_s5 + $0x298] sm:$0xff] }
 0x8b4   : > { %20722 = vmatprep.mubr.msk.f32.mxu1 %vm419_vm1, %v26523_v29  ;;  %21106 = vmatpush3.bf16.msra.mxu1 %v21103_v8  ;;  %v15414_v29 = vld [vmem:[#allocation5 + $0x2e] sm:$0xff]  ;;  %v21131_v8 = vpack.c.bf16 %v11540_v32, %v11539_v38 }
 0x8b5   : > { %21108 = vmatprep.subr.bf16.mxu1 %v21107_v56 }
 0x8b7   : > { %20723 = vmatmul.mubr.msk.f32.gmra.mrb[82].mxu1 %vm419_vm1, %v26527_v62  ;;  %v21111_v62 = vpack.c.bf16 %v11530_v43, %v11529_v1  ;;  %v15836_v1 = vld [vmem:[#allocation5 + $0x99] sm:$0xff]  ;;  %v15837_v43 = vld [vmem:[#allocation5 + $0xa1] sm:$0xff] }
 0x8b8   : > { %20725 = vmatprep.mubr.msk.f32.mxu1 %vm419_vm1, %v26531_v39  ;;  %v15415_v39 = vld [vmem:[#allocation5 + $0x36] sm:$0xff] }
 0x8bb   : > { %20726 = vmatmul.mubr.msk.f32.gmra.mrb[84].mxu1 %vm419_vm1, %v26535_v36  ;;  %v11531_v36 = vld [vmem:[%s27072_s5 + $0x2a0] sm:$0xff] }
 0x8bc   : > { %20728 = vmatprep.mubr.msk.f32.mxu1 %vm419_vm1, %v27500_v20  ;;  %v21115_v52 = vpack.c.bf16 %v11532_v25, %v11531_v36  ;;  %v15830_v20 = vld [vmem:[#allocation5 + $0x69] sm:$0xff] }
 0x8bd   : > { %v16030_v25 = vld [vmem:[#allocation5 + $0x42] sm:$0xff] }
 0x8bf   : > { %20729 = vmatmul.mubr.msk.f32.gmra.mrb[86].mxu1 %vm419_vm1, %v27501_v42  ;;  %v27505_v42 = vld [vmem:[#allocation52_spill] sm:$0xff] }
 0x8c0   : > { %20731 = vmatprep.mubr.msk.f32.mxu1 %vm419_vm1, %v27502_v26  ;;  %v27506_v26 = vld [vmem:[#allocation53_spill] sm:$0xff] }
 0x8c3   : > { %20732 = vmatmul.mubr.msk.f32.gmra.mrb[88].mxu1 %vm419_vm1, %v27503_v28  ;;  %v15833_v28 = vld [vmem:[#allocation5 + $0x81] sm:$0xff] }
 0x8c4   : > { %20734 = vmatprep.mubr.msk.f32.mxu1 %vm419_vm1, %v15221_v5  ;;  %v15834_v5 = vld [vmem:[#allocation5 + $0x89] sm:$0xff] }
 0x8c7   : > { %20735 = vmatmul.mubr.msk.f32.gmra.mrb[90].mxu1 %vm419_vm1, %v15222_v12  ;;  %v15835_v12 = vld [vmem:[#allocation5 + $0x91] sm:$0xff] }
 0x8c8   : > { %20745 = vmatprep.mubr.msk.f32.mxu1 %vm419_vm1, %v15414_v29  ;;  %v11541_v29 = vld [vmem:[%s27072_s5 + $0x2f0] sm:$0xff] }
 0x8cb   : > { %20746 = vmatmul.mubr.msk.f32.vlgmr.msra.gmra.mrb[78].mxu1 %vm419_vm1, %v15415_v39  ;;  %v16029_v39 = vld [vmem:[#allocation5 + $0x3a] sm:$0xff] }
 0x8cc   : > { %21110 = vmatpush3.bf16.msra.mxu1 %v21107_v56  ;;  %20748 = vmatprep.mubr.msk.f32.mxu1 %vm419_vm1, %v15416_v22  ;;  %v15829_v56 = vld [vmem:[#allocation5 + $0x61] sm:$0xff] }
 0x8cd   : > { %21112 = vmatprep.subr.bf16.mxu1 %v21111_v62  ;;  %v11543_v22 = vld [vmem:[%s27072_s5 + $0x300] sm:$0xff] }
 0x8cf   : > { %20749 = vmatmul.mubr.msk.f32.gmra.mrb[80].mxu1 %vm419_vm1, %v15417_v59  ;;  %v16031_v59 = vld [vmem:[#allocation5 + $0x4a] sm:$0xff] }
 0x8d0   : > { %20751 = vmatprep.mubr.msk.f32.mxu1 %vm419_vm1, %v15418_v24  ;;  %21114 = vmatpush3.bf16.msra.mxu1 %v21111_v62  ;;  %v11542_v62 = vld [vmem:[%s27072_s5 + $0x2f8] sm:$0xff] }
 0x8d1   : > { %21116 = vmatprep.subr.bf16.mxu1 %v21115_v52  ;;  %v21135_v36 = vpack.c.bf16 %v11542_v62, %v11541_v29 }
 0x8d3   : > { %20752 = vmatmul.mubr.msk.f32.gmra.mrb[82].mxu1 %vm419_vm1, %v15419_v46  ;;  %v16032_v46 = vld [vmem:[#allocation5 + $0x52] sm:$0xff] }
 0x8d4   : > { %20754 = vmatprep.mubr.msk.f32.mxu1 %vm419_vm1, %v15420_v13  ;;  %v16033_v13 = vld [vmem:[#allocation5 + $0x5a] sm:$0xff] }
 0x8d7   : > { %20755 = vmatmul.mubr.msk.f32.gmra.mrb[84].mxu1 %vm419_vm1, %v15421_v49  ;;  %v16034_v49 = vld [vmem:[#allocation5 + $0x62] sm:$0xff] }
 0x8d8   : > { %20757 = vmatprep.mubr.msk.f32.mxu1 %vm419_vm1, %v15422_v55  ;;  %v16035_v55 = vld [vmem:[#allocation5 + $0x6a] sm:$0xff] }
 0x8db   : > { %20758 = vmatmul.mubr.msk.f32.gmra.mrb[86].mxu1 %vm419_vm1, %v15423_v19  ;;  %v16041_v19 = vld [vmem:[#allocation5 + $0x9a] sm:$0xff] }
 0x8dc   : > { %20760 = vmatprep.mubr.msk.f32.mxu1 %vm419_vm1, %v26591_v53  ;;  %v21119_v53 = vpack.c.bf16 %v11534_v45, %v11533_v41  ;;  %v16237_v41 = vld [vmem:[#allocation5 + $0x53] sm:$0xff]  ;;  %v16238_v45 = vld [vmem:[#allocation5 + $0x5b] sm:$0xff] }
 0x8df   : > { %20761 = vmatmul.mubr.msk.f32.gmra.mrb[88].mxu1 %vm419_vm1, %v26595_v30  ;;  %v11535_v30 = vld [vmem:[%s27072_s5 + $0x2c0] sm:$0xff] }
 0x8e0   : > { %20763 = vmatprep.mubr.msk.f32.mxu1 %vm419_vm1, %v15426_v9  ;;  %v21123_v54 = vpack.c.bf16 %v11536_v58, %v11535_v30  ;;  %v16042_v9 = vld [vmem:[#allocation5 + $0xa2] sm:$0xff] }
 0x8e1   : > { %v16247_v30 = vld [vmem:[#allocation5 + $0xa3] sm:$0xff] }
 0x8e2   : > { %v16439_v58 = vld [vmem:[#allocation5 + $0x3c] sm:$0xff] }
 0x8e3   : > { %20764 = vmatmul.mubr.msk.f32.gmra.mrb[90].mxu1 %vm419_vm1, %v15427_v3  ;;  %v16235_v3 = vld [vmem:[#allocation5 + $0x43] sm:$0xff] }
 0x8e4   : > { %20774 = vmatprep.mubr.msk.f32.mxu1 %vm419_vm1, %v15619_v33  ;;  %v16239_v33 = vld [vmem:[#allocation5 + $0x63] sm:$0xff] }
 0x8e7   : > { %20775 = vmatmul.mubr.msk.f32.vlgmr.msra.gmra.mrb[78].mxu1 %vm419_vm1, %v15620_v17  ;;  %v16246_v17 = vld [vmem:[#allocation5 + $0x9b] sm:$0xff] }
 0x8e8   : > { %21118 = vmatpush3.bf16.msra.mxu1 %v21115_v52  ;;  %20777 = vmatprep.mubr.msk.f32.mxu1 %vm419_vm1, %v15621_v61  ;;  %v11544_v52 = vld [vmem:[%s27072_s5 + $0x308] sm:$0xff] }
 0x8e9   : > { %21120 = vmatprep.subr.bf16.mxu1 %v21119_v53  ;;  %v21139_v24 = vpack.c.bf16 %v11544_v52, %v11543_v22  ;;  %v16445_v61 = vld [vmem:[#allocation5 + $0x6c] sm:$0xff] }
 0x8eb   : > { %20778 = vmatmul.mubr.msk.f32.gmra.mrb[80].mxu1 %vm419_vm1, %v15622_v7  ;;  %v16447_v7 = vld [vmem:[#allocation5 + $0x7c] sm:$0xff] }
 0x8ec   : > { %20780 = vmatprep.mubr.msk.f32.mxu1 %vm419_vm1, %v15623_v40  ;;  %21122 = vmatpush3.bf16.msra.mxu1 %v21119_v53  ;;  %v16240_v53 = vld [vmem:[#allocation5 + $0x6b] sm:$0xff] }
 0x8ed   : > { %21124 = vmatprep.subr.bf16.mxu1 %v21123_v54  ;;  %v16448_v40 = vld [vmem:[#allocation5 + $0x84] sm:$0xff] }
 0x8ef   : > { %20781 = vmatmul.mubr.msk.f32.gmra.mrb[82].mxu1 %vm419_vm1, %v15624_v60  ;;  %v16451_v60 = vld [vmem:[#allocation5 + $0x9c] sm:$0xff] }
 0x8f0   : > { %20783 = vmatprep.mubr.msk.f32.mxu1 %vm419_vm1, %v15625_v34  ;;  %v16452_v34 = vld [vmem:[#allocation5 + $0xa4] sm:$0xff] }
 0x8f3   : > { %20784 = vmatmul.mubr.msk.f32.gmra.mrb[84].mxu1 %vm419_vm1, %v27489_v63  ;;  %v11537_v63 = vld [vmem:[%s27072_s5 + $0x2d0] sm:$0xff] }
 0x8f4   : > { %20786 = vmatprep.mubr.msk.f32.mxu1 %vm419_vm1, %v27490_v2  ;;  %v11538_v2 = vld [vmem:[%s27072_s5 + $0x2d8] sm:$0xff] }
 0x8f7   : > { %20787 = vmatmul.mubr.msk.f32.gmra.mrb[86].mxu1 %vm419_vm1, %v26673_v21  ;;  %v27504_v21 = vld [vmem:[#allocation51_spill] sm:$0xff] }
 0x8f8   : > { %20789 = vmatprep.mubr.msk.f32.mxu1 %vm419_vm1, %v26677_v4  ;;  %v21127_v4 = vpack.c.bf16 %v11538_v2, %v11537_v63 }
 0x8fb   : > { %20790 = vmatmul.mubr.msk.f32.gmra.mrb[88].mxu1 %vm419_vm1, %v15630_v15  ;;  %v27021_v15 = vld [vmem:[%s27073_s6] ss:$0 sm:$0xff] }
 0x8fc   : > { %20792 = vmatprep.mubr.msk.f32.mxu1 %vm419_vm1, %v15631_v57 }
 0x8ff   : > { %20793 = vmatmul.mubr.msk.f32.gmra.mrb[90].mxu1 %vm419_vm1, %v15632_v37 }
 0x900   : > { %20803 = vmatprep.mubr.msk.f32.mxu1 %vm419_vm1, %v27504_v21 }
 0x903   : > { %20804 = vmatmul.mubr.msk.f32.vlgmr.msra.gmra.mrb[78].mxu1 %vm419_vm1, %v15825_v23 }
 0x904   : > { %21126 = vmatpush3.bf16.msra.mxu1 %v21123_v54  ;;  %20806 = vmatprep.mubr.msk.f32.mxu1 %vm419_vm1, %v15826_v16  ;;  %v16446_v54 = vld [vmem:[#allocation5 + $0x74] sm:$0xff] }
 0x905   : > { %21128 = vmatprep.subr.bf16.mxu1 %v21127_v4 }
 0x907   : > { %20807 = vmatmul.mubr.msk.f32.gmra.mrb[80].mxu1 %vm419_vm1, %v15827_v48 }
 0x908   : > { %20809 = vmatprep.mubr.msk.f32.mxu1 %vm419_vm1, %v15828_v11  ;;  %21130 = vmatpush3.bf16.msra.mxu1 %v21127_v4 }
 0x909   : > { %21132 = vmatprep.subr.bf16.mxu1 %v21131_v8 }
 0x90b   : > { %20810 = vmatmul.mubr.msk.f32.gmra.mrb[82].mxu1 %vm419_vm1, %v15829_v56 }
 0x90c   : > { %20812 = vmatprep.mubr.msk.f32.mxu1 %vm419_vm1, %v15830_v20 }
 0x90f   : > { %20813 = vmatmul.mubr.msk.f32.gmra.mrb[84].mxu1 %vm419_vm1, %v27505_v42 }
 0x910   : > { %20815 = vmatprep.mubr.msk.f32.mxu1 %vm419_vm1, %v27506_v26 }
 0x913   : > { %20816 = vmatmul.mubr.msk.f32.gmra.mrb[86].mxu1 %vm419_vm1, %v15833_v28 }
 0x914   : > { %20818 = vmatprep.mubr.msk.f32.mxu1 %vm419_vm1, %v15834_v5 }
 0x917   : > { %20819 = vmatmul.mubr.msk.f32.gmra.mrb[88].mxu1 %vm419_vm1, %v15835_v12 }
 0x918   : > { %20821 = vmatprep.mubr.msk.f32.mxu1 %vm419_vm1, %v15836_v1 }
 0x91b   : > { %20822 = vmatmul.mubr.msk.f32.gmra.mrb[90].mxu1 %vm419_vm1, %v15837_v43 }
 0x91c   : > { %20832 = vmatprep.mubr.msk.f32.mxu1 %vm419_vm1, %v16029_v39 }
 0x91f   : > { %20833 = vmatmul.mubr.msk.f32.vlgmr.msra.gmra.mrb[78].mxu1 %vm419_vm1, %v16030_v25 }
 0x920   : > { %21134 = vmatpush3.bf16.msra.mxu1 %v21131_v8  ;;  %20835 = vmatprep.mubr.msk.f32.mxu1 %vm419_vm1, %v16031_v59 }
 0x921   : > { %21136 = vmatprep.subr.bf16.mxu1 %v21135_v36 }
 0x923   : > { %20836 = vmatmul.mubr.msk.f32.gmra.mrb[80].mxu1 %vm419_vm1, %v16032_v46 }
 0x924   : > { %20838 = vmatprep.mubr.msk.f32.mxu1 %vm419_vm1, %v16033_v13  ;;  %21138 = vmatpush3.bf16.msra.mxu1 %v21135_v36 }
 0x925   : > { %21140 = vmatprep.subr.bf16.mxu1 %v21139_v24 }
 0x927   : > { %20839 = vmatmul.mubr.msk.f32.gmra.mrb[82].mxu1 %vm419_vm1, %v16034_v49 }
 0x928   : > { %20841 = vmatprep.mubr.msk.f32.mxu1 %vm419_vm1, %v16035_v55 }
 0x92b   : > { %20842 = vmatmul.mubr.msk.f32.gmra.mrb[84].mxu1 %vm419_vm1, %v26439_v35  ;;  %v11545_v35 = vld [vmem:[%s27072_s5 + $0x310] sm:$0xff] }
 0x92c   : > { %20844 = vmatprep.mubr.msk.f32.mxu1 %vm419_vm1, %v26443_v44  ;;  %v11546_v44 = vld [vmem:[%s27072_s5 + $0x318] sm:$0xff] }
 0x92f   : > { %20845 = vmatmul.mubr.msk.f32.gmra.mrb[86].mxu1 %vm419_vm1, %v26715_v18  ;;  %v16234_v18 = vld [vmem:[#allocation5 + $0x3b] sm:$0xff] }
 0x930   : > { %20847 = vmatprep.mubr.msk.f32.mxu1 %vm419_vm1, %v26719_v27  ;;  %v21143_v27 = vpack.c.bf16 %v11546_v44, %v11545_v35 }
 0x933   : > { %20848 = vmatmul.mubr.msk.f32.gmra.mrb[88].mxu1 %vm419_vm1, %v26723_v14  ;;  %v16236_v14 = vld [vmem:[#allocation5 + $0x4b] sm:$0xff] }
 0x934   : > { %20850 = vmatprep.mubr.msk.f32.mxu1 %vm419_vm1, %v16041_v19 }
 0x937   : > { %20851 = vmatmul.mubr.msk.f32.gmra.mrb[90].mxu1 %vm419_vm1, %v16042_v9 }
 0x938   : > { %20861 = vmatprep.mubr.msk.f32.mxu1 %vm419_vm1, %v16234_v18 }
 0x93b   : > { %20862 = vmatmul.mubr.msk.f32.vlgmr.msra.gmra.mrb[78].mxu1 %vm419_vm1, %v16235_v3 }
 0x93c   : > { %21142 = vmatpush3.bf16.msra.mxu1 %v21139_v24  ;;  %20864 = vmatprep.mubr.msk.f32.mxu1 %vm419_vm1, %v16236_v14 }
 0x93d   : > { %21144 = vmatprep.subr.bf16.mxu1 %v21143_v27 }
 0x93f   : > { %20865 = vmatmul.mubr.msk.f32.gmra.mrb[80].mxu1 %vm419_vm1, %v16237_v41 }
 0x940   : > { %20867 = vmatprep.mubr.msk.f32.mxu1 %vm419_vm1, %v16238_v45  ;;  %21146 = vmatpush3.bf16.msra.mxu1 %v21143_v27 }
 0x943   : > { %20868 = vmatmul.mubr.msk.f32.gmra.mrb[82].mxu1 %vm419_vm1, %v16239_v33 }
 0x944   : > { %20870 = vmatprep.mubr.msk.f32.mxu1 %vm419_vm1, %v16240_v53 }
 0x947   : > { %20871 = vmatmul.mubr.msk.f32.gmra.mrb[84].mxu1 %vm419_vm1, %v26757_v10  ;;  %v16440_v10 = vld [vmem:[#allocation5 + $0x44] sm:$0xff] }
 0x948   : > { %20873 = vmatprep.mubr.msk.f32.mxu1 %vm419_vm1, %v26761_v51  ;;  %v16441_v51 = vld [vmem:[#allocation5 + $0x4c] sm:$0xff] }
 0x94b   : > { %20874 = vmatmul.mubr.msk.f32.gmra.mrb[86].mxu1 %vm419_vm1, %v26765_v31  ;;  %v16442_v31 = vld [vmem:[#allocation5 + $0x54] sm:$0xff] }
 0x94c   : > { %20876 = vmatprep.mubr.msk.f32.mxu1 %vm419_vm1, %v26769_v50  ;;  %v16443_v50 = vld [vmem:[#allocation5 + $0x5c] sm:$0xff] }
 0x94f   : > { %20877 = vmatmul.mubr.msk.f32.gmra.mrb[88].mxu1 %vm419_vm1, %v26773_v6  ;;  %v16444_v6 = vld [vmem:[#allocation5 + $0x64] sm:$0xff] }
 0x950   : > { %20879 = vmatprep.mubr.msk.f32.mxu1 %vm419_vm1, %v16246_v17 }
 0x953   : > { %20880 = vmatmul.mubr.msk.f32.gmra.mrb[90].mxu1 %vm419_vm1, %v16247_v30  ;;  %v16728_v30 = vld [vmem:[%s27074_s7] sm:$0xff] }
 0x954   : > { %20890 = vmatprep.mubr.msk.f32.mxu1 %vm419_vm1, %v16439_v58 }
 0x957   : > { %20891 = vmatmul.mubr.msk.f32.vlgmr.msra.gmra.mrb[78].mxu1 %vm419_vm1, %v16440_v10 }
 0x958   : > { %20893 = vmatprep.mubr.msk.f32.mxu1 %vm419_vm1, %v16441_v51 }
 0x95b   : > { %20894 = vmatmul.mubr.msk.f32.gmra.mrb[80].mxu1 %vm419_vm1, %v16442_v31 }
 0x95c   : > { %20896 = vmatprep.mubr.msk.f32.mxu1 %vm419_vm1, %v16443_v50 }
 0x95f   : > { %20897 = vmatmul.mubr.msk.f32.gmra.mrb[82].mxu1 %vm419_vm1, %v16444_v6 }
 0x960   : > { %20899 = vmatprep.mubr.msk.f32.mxu1 %vm419_vm1, %v16445_v61 }
 0x963   : > { %20900 = vmatmul.mubr.msk.f32.gmra.mrb[84].mxu1 %vm419_vm1, %v16446_v54  ;;  %v16750_v54 = vrot.slane %v16728_v30, 6 }
 0x964   : > { %20902 = vmatprep.mubr.msk.f32.mxu1 %vm419_vm1, %v16447_v7 }
 0x967   : > { %20903 = vmatmul.mubr.msk.f32.gmra.mrb[86].mxu1 %vm419_vm1, %v16448_v40 }
 0x968   : > { %20905 = vmatprep.mubr.msk.f32.mxu1 %vm419_vm1, %v26813_v0 }
 0x96b   : > { %20906 = vmatmul.mubr.msk.f32.gmra.mrb[88].mxu1 %vm419_vm1, %v26817_v47 }
 0x96c   : > { %20908 = vmatprep.mubr.msk.f32.mxu1 %vm419_vm1, %v16451_v60 }
 0x96f   : > { %20909 = vmatmul.mubr.msk.f32.gmra.mrb[90].mxu1 %vm419_vm1, %v16452_v34  ;;  %vm16732_vm1 = vcmask 1040384  }
 0xa2a   : > { %v20892_v57 = vpop.f32.mrb[78].mxu1 }
 0xa2b   : > { %v16652_v37 = vadd.f32 %v20892_v57, %v27021_v15  ;;  %v16561_v63 = vpop.f32.mrb[79].mxu1 }
 0xa2c   : > { %v16651_v0 = vadd.f32 %v27021_v15, %v16561_v63 }
 0xa2d   : > { %v16666_v2 = vmax.f32 %v16652_v37, 0.0 }
 0xa2e   : > { %v16665_v47 = vmax.f32 %v16651_v0, 0.0  ;;  %v20895_v21 = vpop.f32.mrb[80].mxu1 }
 0xa2f   : > { %16681 = vst.msk [vmem:[#allocation6 + $0x8] sm:$0xff] %vm16679_vm6, %v16666_v2  ;;  %v16654_v4 = vadd.f32 %v20895_v21, %v27021_v15  ;;  %v16571_v23 = vpop.f32.mrb[81].mxu1 }
 0xa30   : > { %16680 = vst.msk [vmem:[#allocation6] sm:$0xff] %vm16679_vm6, %v16665_v47  ;;  %v16653_v38 = vadd.f32 %v27021_v15, %v16571_v23 }
 0xa31   : > { %v16668_v32 = vmax.f32 %v16654_v4, 0.0 }
 0xa32   : > { %v16667_v16 = vmax.f32 %v16653_v38, 0.0  ;;  %v20898_v8 = vpop.f32.mrb[82].mxu1 }
 0xa33   : > { %16683 = vst.msk [vmem:[#allocation6 + $0x18] sm:$0xff] %vm16679_vm6, %v16668_v32  ;;  %v16656_v48 = vadd.f32 %v20898_v8, %v27021_v15  ;;  %v16581_v11 = vpop.f32.mrb[83].mxu1 }
 0xa34   : > { %16682 = vst.msk [vmem:[#allocation6 + $0x10] sm:$0xff] %vm16679_vm6, %v16667_v16  ;;  %v16655_v56 = vadd.f32 %v27021_v15, %v16581_v11 }
 0xa35   : > { %v16670_v20 = vmax.f32 %v16656_v48, 0.0 }
 0xa36   : > { %v16669_v42 = vmax.f32 %v16655_v56, 0.0  ;;  %v20901_v26 = vpop.f32.mrb[84].mxu1 }
 0xa37   : > { %16685 = vst.msk [vmem:[#allocation6 + $0x28] sm:$0xff] %vm16679_vm6, %v16670_v20  ;;  %v16658_v28 = vadd.f32 %v20901_v26, %v27021_v15  ;;  %v16591_v5 = vpop.f32.mrb[85].mxu1  ;;  %v16694_v44 = vld [vmem:[#allocation6] ss:$2 sm:$0xff]  ;;  %v16708_v3 = vld [vmem:[#allocation6 + $0x1] ss:$2 sm:$0xff] }
 0xa38   : > { %16684 = vst.msk [vmem:[#allocation6 + $0x20] sm:$0xff] %vm16679_vm6, %v16669_v42  ;;  %v16657_v12 = vadd.f32 %v27021_v15, %v16591_v5  ;;  %v16721_v31 = vmax.f32 %v16694_v44, %v16708_v3 }
 0xa39   : > { %v16672_v1 = vmax.f32 %v16658_v28, 0.0 }
 0xa3a   : > { %v16671_v43 = vmax.f32 %v16657_v12, 0.0  ;;  %v20904_v29 = vpop.f32.mrb[86].mxu1  ;;  %v16733_v37 = vrot.slane %v16721_v31, 7 }
 0xa3b   : > { %16687 = vst.msk [vmem:[#allocation6 + $0x38] sm:$0xff] %vm16679_vm6, %v16672_v1  ;;  %v16660_v62 = vadd.f32 %v20904_v29, %v27021_v15  ;;  %v16601_v39 = vpop.f32.mrb[87].mxu1  ;;  %v16696_v55 = vld [vmem:[#allocation6 + $0x10] ss:$2 sm:$0xff]  ;;  %v16710_v19 = vld [vmem:[#allocation6 + $0x11] ss:$2 sm:$0xff] }
 0xa3c   : > { %16686 = vst.msk [vmem:[#allocation6 + $0x30] sm:$0xff] %vm16679_vm6, %v16671_v43  ;;  %v16659_v36 = vadd.f32 %v27021_v15, %v16601_v39  ;;  %v16722_v17 = vmax.f32 %v16696_v55, %v16710_v19 }
 0xa3d   : > { %v16674_v25 = vmax.f32 %v16660_v62, 0.0 }
 0xa3e   : > { %v16673_v22 = vmax.f32 %v16659_v36, 0.0  ;;  %v20907_v52 = vpop.f32.mrb[88].mxu1  ;;  %v16734_v60 = vrot.slane %v16722_v17, 7 }
 0xa3f   : > { %16689 = vst.msk [vmem:[#allocation6 + $0x48] sm:$0xff] %vm16679_vm6, %v16674_v25  ;;  %v16662_v59 = vadd.f32 %v20907_v52, %v27021_v15  ;;  %v16611_v24 = vpop.f32.mrb[89].mxu1  ;;  %v16698_v46 = vld [vmem:[#allocation6 + $0x20] ss:$2 sm:$0xff]  ;;  %v16712_v13 = vld [vmem:[#allocation6 + $0x21] ss:$2 sm:$0xff] }
 0xa40   : > { %16688 = vst.msk [vmem:[#allocation6 + $0x40] sm:$0xff] %vm16679_vm6, %v16673_v22  ;;  %v16661_v49 = vadd.f32 %v27021_v15, %v16611_v24  ;;  %v16723_v9 = vmax.f32 %v16698_v46, %v16712_v13  ;;  %v16735_v47 = vsel %vm16732_vm1, %v16733_v37, %v16734_v60 }
 0xa41   : > { %v16676_v35 = vmax.f32 %v16662_v59, 0.0  ;;  %v16737_v16 = vmax.f32 %v16721_v31, %v16735_v47 }
 0xa42   : > { %v16675_v18 = vmax.f32 %v16661_v49, 0.0  ;;  %v20910_v27 = vpop.f32.mrb[90].mxu1  ;;  %v16742_v14 = vrot.slane %v16723_v9, 7 }
 0xa43   : > { %16691 = vst.msk [vmem:[#allocation6 + $0x58] sm:$0xff] %vm16679_vm6, %v16676_v35  ;;  %v16664_v41 = vadd.f32 %v20910_v27, %v27021_v15  ;;  %v16621_v45 = vpop.f32.mrb[91].mxu1  ;;  %v16700_v33 = vld [vmem:[#allocation6 + $0x30] ss:$2 sm:$0xff]  ;;  %v16714_v53 = vld [vmem:[#allocation6 + $0x31] ss:$2 sm:$0xff]  ;;  %v16738_v5 = vmul.f32 %v16737_v16, %v16728_v30 }
 0xa44   : > { %16690 = vst.msk [vmem:[#allocation6 + $0x50] sm:$0xff] %vm16679_vm6, %v16675_v18  ;;  %v16663_v58 = vadd.f32 %v27021_v15, %v16621_v45  ;;  %v16724_v10 = vmax.f32 %v16700_v33, %v16714_v53  ;;  %v16747_v61 = vmax.f32 %v16722_v17, %v16742_v14  ;;  %v16729_v15 = vld [vmem:[%s27074_s7 + $0x8] sm:$0xff] }
 0xa45   : > { %v16678_v51 = vmax.f32 %v16664_v41, 0.0  ;;  %v16767_v23 = vrot.slane %v16729_v15, 4  ;;  %v16778_v1 = vrot.slane %v16729_v15, 2 }
 0xa46   : > { %v16677_v50 = vmax.f32 %v16663_v58, 0.0  ;;  %v16743_v6 = vrot.slane %v16724_v10, 7  ;;  %v16752_v0 = vmul.f32 %v16750_v54, %v16747_v61 }
 0xa47   : > { %16693 = vst.msk [vmem:[#allocation6 + $0x68] sm:$0xff] %vm16679_vm6, %v16678_v51  ;;  %v16702_v7 = vld [vmem:[#allocation6 + $0x40] ss:$2 sm:$0xff]  ;;  %v16716_v40 = vld [vmem:[#allocation6 + $0x41] ss:$2 sm:$0xff] }
 0xa48   : > { %16692 = vst.msk [vmem:[#allocation6 + $0x60] sm:$0xff] %vm16679_vm6, %v16677_v50  ;;  %v16725_v34 = vmax.f32 %v16702_v7, %v16716_v40  ;;  %v16744_v57 = vsel %vm16732_vm1, %v16742_v14, %v16743_v6  ;;  %v16757_v8 = vrot.slane %v16752_v0, 6 }
 0xa49   : > { %v16748_v63 = vmax.f32 %v16723_v9, %v16744_v57  ;;  %v16785_v9 = vld [vmem:[#allocation7] sm:$0x1] }
 0xa4a   : > { %v16763_v2 = vrot.slane %v16725_v34, 7 }
 0xa4b   : > { %v16753_v21 = vmul.f32 %v16750_v54, %v16748_v63  ;;  %v16704_v32 = vld [vmem:[#allocation6 + $0x50] ss:$2 sm:$0xff]  ;;  %v16718_v11 = vld [vmem:[#allocation6 + $0x51] ss:$2 sm:$0xff] }
 0xa4c   : > { %v16765_v4 = vmax.f32 %v16724_v10, %v16763_v2  ;;  %v16726_v28 = vmax.f32 %v16704_v32, %v16718_v11 }
 0xa4d   : > { %v16758_v38 = vrot.slane %v16753_v21, 6 }
 0xa4e   : > { %v16769_v42 = vmul.f32 %v16767_v23, %v16765_v4 }
 0xa4f   : > { %v16706_v48 = vld [vmem:[#allocation6 + $0x60] ss:$2 sm:$0xff]  ;;  %v16720_v56 = vld [vmem:[#allocation6 + $0x61] ss:$2 sm:$0xff]  ;;  %v16759_v26 = vsel %vm1895_vm7, %v16757_v8, %v16758_v38  ;;  %vm16805_vm7 = vcmask 0  }
 0xa50   : > { %v16727_v20 = vmax.f32 %v16706_v48, %v16720_v56  ;;  %v16761_v43 = vadd.f32 %v16759_v26, %v16738_v5  ;;  %v16771_v29 = vrot.slane %v16769_v42, 4 }
 0xa52   : > { %v16775_v12 = vrot.slane %v16727_v20, 7  ;;  %v16773_v36 = vadd.f32 %v16771_v29, %v16761_v43 }
 0xa54   : > { %v16777_v62 = vmax.f32 %v16726_v28, %v16775_v12 }
 0xa56   : > { %v16780_v39 = vmul.f32 %v16778_v1, %v16777_v62 }
 0xa58   : > { %v16782_v25 = vrot.slane %v16780_v39, 2 }
 0xa5a   : > { %v16784_v22 = vadd.f32 %v16782_v25, %v16773_v36 }
 0xa5c   : > { %v16787_v52 = vsel %vm16786_vm9, %v16784_v22, 0.0 }
 0xa5d   : > { %16788 = vadd.xlane.f32.xlu0 %v16787_v52 }
 0xaea   : > { %v16789_v59 = vpop.xlane.xlu0 %16788 }
 0xaeb   : > { %v16791_v24 = vsel %vm1392_vm5, %v16789_v59, 0.0 }
 0xaec   : > { %v16792_v46 = vrot.slane %v16791_v24, 4 }
 0xaee   : > { %v16793_v13 = vadd.f32 %v16792_v46, %v16791_v24 }
 0xaf0   : > { %v16794_v49 = vrot.slane %v16793_v13, 2 }
 0xaf2   : > { %v16795_v55 = vadd.f32 %v16794_v49, %v16793_v13 }
 0xaf4   : > { %v16796_v19 = vrot.slane %v16795_v55, 1 }
 0xaf6   : > { %v16797_v35 = vadd.f32 %v16796_v19, %v16795_v55 }
 0xaf8   : > { %v16798_v44 = vadd.f32 %v16797_v35, %v16785_v9 }
 0xafa   : > { %v16799_v18 = vsub.f32 0.0, %v16798_v44 }
 0xafc   : > { %v16800_v27 = vmul.f32 1.442695, %v16799_v18 }
 0xafe   : > { %22129 = vpow2.f32 %v16800_v27 }
 0xb08   : > { %v22130_v3 = vpop.eup %22129 }
 0xb09   : > { %v16802_v14 = vadd.f32 1.0, %v22130_v3 }
 0xb0b   : > { %22131 = vrcp.f32 %v16802_v14 }
 0xb15   : > { %v22132_v41 = vpop.eup %22131 }
 0xb16   : > { %16806 = vst.msk [vmem:[%s332_s22] sm:$0x1] %vm16805_vm7, %v22132_v41 }
 0xb17 PF: > { %s21_s11 = sadd.s32 1, %s22158_s11  }
 0xb18   : > { %p18_p6 = scmp.ge.s32.totalorder %s21_s11, 4  }
 0xb1a   :  { %20 = sbr.rel (!%p18_p6) target bundleno = 3 (0x3), region = 495 }

</bundles_post_ra>
